<compile_context>
chip_gen: v6e
topology: v6e:2x2x1
jax: 0.10.0
libtpu: 0.0.40
codegen_flags: <defaults>
</compile_context>

<pallas_src>
import math
import functools

import jax
import jax.numpy as jnp
from jax.experimental import pallas as pl
from jax.experimental.pallas import tpu as pltpu


_ENC_KEYS = ("wqkv", "bqkv", "wo", "bo", "n1w", "n1b",
             "w1", "b1", "w2", "b2", "n2w", "n2b", "norm_w", "norm_b")
_DEC_KEYS = ("sw", "sb", "swo", "sbo", "n1w", "n1b",
             "cw", "cb", "cwo", "cbo", "n2w", "n2b",
             "w1", "b1", "w2", "b2", "n3w", "n3b", "norm_w", "norm_b")


# ----------------------------- in-kernel helpers -----------------------------

def _mm_t(x, w):
    # y = x @ w.T with w in PyTorch (out, in) layout; dot_general contracts axis 1 of both
    # operands so no transpose is materialized.  bf16 MXU inputs, f32 accumulation.
    return jax.lax.dot_general(
        x.astype(jnp.bfloat16), w.astype(jnp.bfloat16),
        dimension_numbers=(((1,), (1,)), ((), ())),
        preferred_element_type=jnp.float32)


def _layer_norm(y, g, b, eps):
    mean = jnp.mean(y, axis=-1, keepdims=True)
    var = jnp.mean(jnp.square(y - mean), axis=-1, keepdims=True)
    return (y - mean) * jax.lax.rsqrt(var + eps) * g + b


def _ffn(x, w1, b1, w2, b2):
    h = jnp.maximum(_mm_t(x, w1) + b1, 0.0)
    return _mm_t(h, w2) + b2


def _mha(x, kv, w_qkv, b_qkv, w_o, b_o, *, nhead, batch, self_attn, head_scratch):
    """PyTorch nn.MultiheadAttention semantics (batch_first, no mask, eval mode).

    x:  (batch*Sq, D) f32  query-side rows (batch merged into the matmul M dimension).
    kv: (batch*Sk, D) f32  key/value-side rows.
    head_scratch: (>= batch*Sq, D) f32 VMEM scratch used to assemble per-head outputs so the
    out-projection is a single K=D matmul (no per-head w_o slices / accumulation adds).
    """
    BSq, D = x.shape
    Sq = BSq // batch
    hd = D // nhead
    scale = 1.0 / math.sqrt(hd)

    if self_attn:
        qkv = _mm_t(x, w_qkv) + b_qkv                       # fused QKV matmul, M = batch*Sq
        q, k, v = qkv[:, :D], qkv[:, D:2 * D], qkv[:, 2 * D:]
        BSk = BSq
    else:
        q = _mm_t(x, w_qkv[:D]) + b_qkv[:, :D]              # (batch*Sq, D)
        kvp = _mm_t(kv, w_qkv[D:]) + b_qkv[:, D:]           # fused K/V matmul, (batch*Sk, 2D)
        k, v = kvp[:, :D], kvp[:, D:]
        BSk = kv.shape[0]
    Sk = BSk // batch

    # Scores / softmax / PV must stay per-sequence -> static (batch, head) unroll.
    # TODO(synk): at real sequence lengths use a flash-style online-softmax loop over Sk
    #             instead of materializing the full (Sq, Sk) score matrix per head.
    for b in range(batch):
        rq = slice(b * Sq, (b + 1) * Sq)
        rk = slice(b * Sk, (b + 1) * Sk)
        for h in range(nhead):
            c = slice(h * hd, (h + 1) * hd)
            s = jax.lax.dot_general(
                q[rq, c].astype(jnp.bfloat16), k[rk, c].astype(jnp.bfloat16),
                dimension_numbers=(((1,), (1,)), ((), ())),
                preferred_element_type=jnp.float32) * scale          # (Sq, Sk)
            m = jnp.max(s, axis=-1, keepdims=True)
            p = jnp.exp(s - m)
            p = p * pl.reciprocal(jnp.sum(p, axis=-1, keepdims=True), approx=True)
            head_scratch[rq, c] = jnp.dot(p.astype(jnp.bfloat16),
                                          v[rk, c].astype(jnp.bfloat16),
                                          preferred_element_type=jnp.float32)

    attn = head_scratch[0:BSq, :]                           # (batch*Sq, D) concatenated heads
    return _mm_t(attn, w_o) + b_o                           # ONE out-projection matmul, K = D


# ----------------------------- fused whole-model kernel -----------------------------

def _transformer_kernel(*refs, batch, nhead, num_layers, eps):
    it = iter(refs)
    src_ref = next(it)        # (B*S, D) f32
    tgt_ref = next(it)        # (B*T, D) f32
    pe_src_ref = next(it)     # (B*S, D) f32 (PE tiled over batch)
    pe_tgt_ref = next(it)     # (B*T, D) f32
    enc = {key: next(it) for key in _ENC_KEYS}
    dec = {key: next(it) for key in _DEC_KEYS}
    o_ref = next(it)          # (B*T, D)
    head_scratch = next(it)   # (max(B*S, B*T), D) f32 VMEM scratch

    # -------- encoder stack (PE add + layers + final encoder LayerNorm, all fused) --------
    x = src_ref[...].astype(jnp.float32) + pe_src_ref[...]
    for l in range(num_layers):                              # static unroll over layers
        attn = _mha(x, x, enc["wqkv"][l], enc["bqkv"][l], enc["wo"][l], enc["bo"][l],
                    nhead=nhead, batch=batch, self_attn=True, head_scratch=head_scratch)
        x = _layer_norm(x + attn, enc["n1w"][l], enc["n1b"][l], eps)
        ff = _ffn(x, enc["w1"][l], enc["b1"][l], enc["w2"][l], enc["b2"][l])
        x = _layer_norm(x + ff, enc["n2w"][l], enc["n2b"][l], eps)
    mem = _layer_norm(x, enc["norm_w"][...], enc["norm_b"][...], eps)

    # -------- decoder stack (PE add + layers + final decoder LayerNorm, all fused) --------
    y = tgt_ref[...].astype(jnp.float32) + pe_tgt_ref[...]
    for l in range(num_layers):
        sa = _mha(y, y, dec["sw"][l], dec["sb"][l], dec["swo"][l], dec["sbo"][l],
                  nhead=nhead, batch=batch, self_attn=True, head_scratch=head_scratch)
        y = _layer_norm(y + sa, dec["n1w"][l], dec["n1b"][l], eps)
        ca = _mha(y, mem, dec["cw"][l], dec["cb"][l], dec["cwo"][l], dec["cbo"][l],
                  nhead=nhead, batch=batch, self_attn=False, head_scratch=head_scratch)
        y = _layer_norm(y + ca, dec["n2w"][l], dec["n2b"][l], eps)
        ff = _ffn(y, dec["w1"][l], dec["b1"][l], dec["w2"][l], dec["b2"][l])
        y = _layer_norm(y + ff, dec["n3w"][l], dec["n3b"][l], eps)
    y = _layer_norm(y, dec["norm_w"][...], dec["norm_b"][...], eps)

    o_ref[...] = y.astype(o_ref.dtype)


# ----------------------------- pallas_call wrapper -----------------------------

def transformer_forward(src, tgt, params, nhead):
    """src: (B, S, D), tgt: (B, T, D) -> (B, T, D).  Eval-mode nn.Transformer forward."""
    B, S, D = src.shape
    T = tgt.shape[1]
    enc, dec = params["enc"], params["dec"]
    num_layers = enc["wqkv"].shape[0]

    # Fold batch into the row (matmul-M) dimension outside the kernel (free layout ops),
    # so the kernel only ever sees lane-last 2-D tiles.  PE is tiled to match (added in-kernel).
    src2 = src.reshape(B * S, D)
    tgt2 = tgt.reshape(B * T, D)
    pe_s = jnp.broadcast_to(params["pe"][:, :S, :], (B, S, D)).reshape(B * S, D)
    pe_t = jnp.broadcast_to(params["pe"][:, :T, :], (B, T, D)).reshape(B * T, D)

    inputs = [src2, tgt2, pe_s, pe_t]
    inputs += [enc[k] for k in _ENC_KEYS]
    inputs += [dec[k] for k in _DEC_KEYS]

    def full_spec(a):
        nd = a.ndim
        return pl.BlockSpec(a.shape, lambda i, _nd=nd: (0,) * _nd)

    out2 = pl.pallas_call(
        functools.partial(_transformer_kernel, batch=B, nhead=nhead,
                          num_layers=num_layers, eps=1e-5),
        grid=(1,),                       # single fused invocation: whole batch, all layers
        in_specs=[full_spec(a) for a in inputs],
        out_specs=pl.BlockSpec((B * T, D), lambda i: (0, 0)),
        out_shape=jax.ShapeDtypeStruct((B * T, D), src.dtype),
        scratch_shapes=[pltpu.VMEM((max(B * S, B * T), D), jnp.float32)],
        compiler_params=pltpu.CompilerParams(
            dimension_semantics=("arbitrary",),
            vmem_limit_bytes=32 * 1024 * 1024),
    )(*inputs)
    return out2.reshape(B, T, D)


# ----------------------------- parameter setup -----------------------------

def positional_encoding_table(max_len, d_model):
    position = jnp.arange(max_len, dtype=jnp.float32)[:, None]
    div_term = jnp.exp(jnp.arange(0, d_model, 2, dtype=jnp.float32)
                       * -(math.log(10000.0) / d_model))
    pe = jnp.zeros((max_len, d_model), dtype=jnp.float32)
    pe = pe.at[:, 0::2].set(jnp.sin(position * div_term))
    pe = pe.at[:, 1::2].set(jnp.cos(position * div_term))
    return pe[None]  # (1, max_len, d_model)


def _xavier(key, shape):
    fan_out, fan_in = shape[-2], shape[-1]
    a = math.sqrt(6.0 / (fan_in + fan_out))
    return jax.random.uniform(key, shape, jnp.float32, -a, a)


def init_transformer_params(key, d_model, num_layers, dim_ff, max_len):
    D, F, L = d_model, dim_ff, num_layers
    keys = iter(jax.random.split(key, 10))

    def w(shape):   # stacked-over-layers matmul weight, bf16 for the MXU
        return _xavier(next(keys), shape).astype(jnp.bfloat16)

    def zeros(shape):
        return jnp.zeros(shape, jnp.float32)

    def ones(shape):
        return jnp.ones(shape, jnp.float32)

    enc = {
        "wqkv": w((L, 3 * D, D)), "bqkv": zeros((L, 1, 3 * D)),
        "wo": w((L, D, D)), "bo": zeros((L, 1, D)),
        "n1w": ones((L, 1, D)), "n1b": zeros((L, 1, D)),
        "w1": w((L, F, D)), "b1": zeros((L, 1, F)),
        "w2": w((L, D, F)), "b2": zeros((L, 1, D)),
        "n2w": ones((L, 1, D)), "n2b": zeros((L, 1, D)),
        "norm_w": ones((1, D)), "norm_b": zeros((1, D)),
    }
    dec = {
        "sw": w((L, 3 * D, D)), "sb": zeros((L, 1, 3 * D)),
        "swo": w((L, D, D)), "sbo": zeros((L, 1, D)),
        "n1w": ones((L, 1, D)), "n1b": zeros((L, 1, D)),
        "cw": w((L, 3 * D, D)), "cb": zeros((L, 1, 3 * D)),
        "cwo": w((L, D, D)), "cbo": zeros((L, 1, D)),
        "n2w": ones((L, 1, D)), "n2b": zeros((L, 1, D)),
        "w1": w((L, F, D)), "b1": zeros((L, 1, F)),
        "w2": w((L, D, F)), "b2": zeros((L, 1, D)),
        "n3w": ones((L, 1, D)), "n3b": zeros((L, 1, D)),
        "norm_w": ones((1, D)), "norm_b": zeros((1, D)),
    }
    return {"pe": positional_encoding_table(max_len, d_model), "enc": enc, "dec": dec}


# ----------------------------- main -----------------------------

if __name__ == "__main__":
    d_model, nhead, num_layers, dim_ff, max_len = 32, 4, 2, 64, 64
    B, S, T = 2, 8, 8

    root = jax.random.PRNGKey(0)
    k_p, k_src, k_tgt = jax.random.split(root, 3)

    params = init_transformer_params(k_p, d_model, num_layers, dim_ff, max_len)
    src = jax.random.normal(k_src, (B, S, d_model), jnp.float32)
    tgt = jax.random.normal(k_tgt, (B, T, d_model), jnp.float32)

    fwd = jax.jit(functools.partial(transformer_forward, nhead=nhead))
    out = fwd(src, tgt, params)
    jax.block_until_ready(out)
    assert out.shape == (B, T, d_model)
    assert bool(jnp.all(jnp.isfinite(out)))
    print("KERNEL_OK")
</pallas_src>

<mosaic_0001>
module attributes {stable_mosaic.version = 11 : i64} {
  func.func @_transformer_kernel(%arg0: i32, %arg1: memref<16x32xf32, #tpu.memory_space<vmem>>, %arg2: memref<16x32xf32, #tpu.memory_space<vmem>>, %arg3: memref<16x32xf32, #tpu.memory_space<vmem>>, %arg4: memref<16x32xf32, #tpu.memory_space<vmem>>, %arg5: memref<2x96x32xbf16, #tpu.memory_space<vmem>>, %arg6: memref<2x1x96xf32, #tpu.memory_space<vmem>>, %arg7: memref<2x32x32xbf16, #tpu.memory_space<vmem>>, %arg8: memref<2x1x32xf32, #tpu.memory_space<vmem>>, %arg9: memref<2x1x32xf32, #tpu.memory_space<vmem>>, %arg10: memref<2x1x32xf32, #tpu.memory_space<vmem>>, %arg11: memref<2x64x32xbf16, #tpu.memory_space<vmem>>, %arg12: memref<2x1x64xf32, #tpu.memory_space<vmem>>, %arg13: memref<2x32x64xbf16, #tpu.memory_space<vmem>>, %arg14: memref<2x1x32xf32, #tpu.memory_space<vmem>>, %arg15: memref<2x1x32xf32, #tpu.memory_space<vmem>>, %arg16: memref<2x1x32xf32, #tpu.memory_space<vmem>>, %arg17: memref<1x32xf32, #tpu.memory_space<vmem>>, %arg18: memref<1x32xf32, #tpu.memory_space<vmem>>, %arg19: memref<2x96x32xbf16, #tpu.memory_space<vmem>>, %arg20: memref<2x1x96xf32, #tpu.memory_space<vmem>>, %arg21: memref<2x32x32xbf16, #tpu.memory_space<vmem>>, %arg22: memref<2x1x32xf32, #tpu.memory_space<vmem>>, %arg23: memref<2x1x32xf32, #tpu.memory_space<vmem>>, %arg24: memref<2x1x32xf32, #tpu.memory_space<vmem>>, %arg25: memref<2x96x32xbf16, #tpu.memory_space<vmem>>, %arg26: memref<2x1x96xf32, #tpu.memory_space<vmem>>, %arg27: memref<2x32x32xbf16, #tpu.memory_space<vmem>>, %arg28: memref<2x1x32xf32, #tpu.memory_space<vmem>>, %arg29: memref<2x1x32xf32, #tpu.memory_space<vmem>>, %arg30: memref<2x1x32xf32, #tpu.memory_space<vmem>>, %arg31: memref<2x64x32xbf16, #tpu.memory_space<vmem>>, %arg32: memref<2x1x64xf32, #tpu.memory_space<vmem>>, %arg33: memref<2x32x64xbf16, #tpu.memory_space<vmem>>, %arg34: memref<2x1x32xf32, #tpu.memory_space<vmem>>, %arg35: memref<2x1x32xf32, #tpu.memory_space<vmem>>, %arg36: memref<2x1x32xf32, #tpu.memory_space<vmem>>, %arg37: memref<1x32xf32, #tpu.memory_space<vmem>>, %arg38: memref<1x32xf32, #tpu.memory_space<vmem>>, %arg39: memref<16x32xf32, #tpu.memory_space<vmem>>, %arg40: memref<16x32xf32, #tpu.memory_space<vmem>>) attributes {dimension_semantics = [#tpu.dimension_semantics<arbitrary>], iteration_bounds = array<i64: 1>, scalar_prefetch = 0 : i64, scratch_operands = 1 : i64, tpu.core_type = #tpu.core_type<tc>, window_params = [{pipeline_mode = #tpu.pipeline_mode<synchronous>, transform_indices = @transform_0, window_bounds = array<i64: 16, 32>}, {pipeline_mode = #tpu.pipeline_mode<synchronous>, transform_indices = @transform_1, window_bounds = array<i64: 16, 32>}, {pipeline_mode = #tpu.pipeline_mode<synchronous>, transform_indices = @transform_2, window_bounds = array<i64: 16, 32>}, {pipeline_mode = #tpu.pipeline_mode<synchronous>, transform_indices = @transform_3, window_bounds = array<i64: 16, 32>}, {pipeline_mode = #tpu.pipeline_mode<synchronous>, transform_indices = @transform_4, window_bounds = array<i64: 2, 96, 32>}, {pipeline_mode = #tpu.pipeline_mode<synchronous>, transform_indices = @transform_5, window_bounds = array<i64: 2, 1, 96>}, {pipeline_mode = #tpu.pipeline_mode<synchronous>, transform_indices = @transform_6, window_bounds = array<i64: 2, 32, 32>}, {pipeline_mode = #tpu.pipeline_mode<synchronous>, transform_indices = @transform_7, window_bounds = array<i64: 2, 1, 32>}, {pipeline_mode = #tpu.pipeline_mode<synchronous>, transform_indices = @transform_8, window_bounds = array<i64: 2, 1, 32>}, {pipeline_mode = #tpu.pipeline_mode<synchronous>, transform_indices = @transform_9, window_bounds = array<i64: 2, 1, 32>}, {pipeline_mode = #tpu.pipeline_mode<synchronous>, transform_indices = @transform_10, window_bounds = array<i64: 2, 64, 32>}, {pipeline_mode = #tpu.pipeline_mode<synchronous>, transform_indices = @transform_11, window_bounds = array<i64: 2, 1, 64>}, {pipeline_mode = #tpu.pipeline_mode<synchronous>, transform_indices = @transform_12, window_bounds = array<i64: 2, 32, 64>}, {pipeline_mode = #tpu.pipeline_mode<synchronous>, transform_indices = @transform_13, window_bounds = array<i64: 2, 1, 32>}, {pipeline_mode = #tpu.pipeline_mode<synchronous>, transform_indices = @transform_14, window_bounds = array<i64: 2, 1, 32>}, {pipeline_mode = #tpu.pipeline_mode<synchronous>, transform_indices = @transform_15, window_bounds = array<i64: 2, 1, 32>}, {pipeline_mode = #tpu.pipeline_mode<synchronous>, transform_indices = @transform_16, window_bounds = array<i64: 1, 32>}, {pipeline_mode = #tpu.pipeline_mode<synchronous>, transform_indices = @transform_17, window_bounds = array<i64: 1, 32>}, {pipeline_mode = #tpu.pipeline_mode<synchronous>, transform_indices = @transform_18, window_bounds = array<i64: 2, 96, 32>}, {pipeline_mode = #tpu.pipeline_mode<synchronous>, transform_indices = @transform_19, window_bounds = array<i64: 2, 1, 96>}, {pipeline_mode = #tpu.pipeline_mode<synchronous>, transform_indices = @transform_20, window_bounds = array<i64: 2, 32, 32>}, {pipeline_mode = #tpu.pipeline_mode<synchronous>, transform_indices = @transform_21, window_bounds = array<i64: 2, 1, 32>}, {pipeline_mode = #tpu.pipeline_mode<synchronous>, transform_indices = @transform_22, window_bounds = array<i64: 2, 1, 32>}, {pipeline_mode = #tpu.pipeline_mode<synchronous>, transform_indices = @transform_23, window_bounds = array<i64: 2, 1, 32>}, {pipeline_mode = #tpu.pipeline_mode<synchronous>, transform_indices = @transform_24, window_bounds = array<i64: 2, 96, 32>}, {pipeline_mode = #tpu.pipeline_mode<synchronous>, transform_indices = @transform_25, window_bounds = array<i64: 2, 1, 96>}, {pipeline_mode = #tpu.pipeline_mode<synchronous>, transform_indices = @transform_26, window_bounds = array<i64: 2, 32, 32>}, {pipeline_mode = #tpu.pipeline_mode<synchronous>, transform_indices = @transform_27, window_bounds = array<i64: 2, 1, 32>}, {pipeline_mode = #tpu.pipeline_mode<synchronous>, transform_indices = @transform_28, window_bounds = array<i64: 2, 1, 32>}, {pipeline_mode = #tpu.pipeline_mode<synchronous>, transform_indices = @transform_29, window_bounds = array<i64: 2, 1, 32>}, {pipeline_mode = #tpu.pipeline_mode<synchronous>, transform_indices = @transform_30, window_bounds = array<i64: 2, 64, 32>}, {pipeline_mode = #tpu.pipeline_mode<synchronous>, transform_indices = @transform_31, window_bounds = array<i64: 2, 1, 64>}, {pipeline_mode = #tpu.pipeline_mode<synchronous>, transform_indices = @transform_32, window_bounds = array<i64: 2, 32, 64>}, {pipeline_mode = #tpu.pipeline_mode<synchronous>, transform_indices = @transform_33, window_bounds = array<i64: 2, 1, 32>}, {pipeline_mode = #tpu.pipeline_mode<synchronous>, transform_indices = @transform_34, window_bounds = array<i64: 2, 1, 32>}, {pipeline_mode = #tpu.pipeline_mode<synchronous>, transform_indices = @transform_35, window_bounds = array<i64: 2, 1, 32>}, {pipeline_mode = #tpu.pipeline_mode<synchronous>, transform_indices = @transform_36, window_bounds = array<i64: 1, 32>}, {pipeline_mode = #tpu.pipeline_mode<synchronous>, transform_indices = @transform_37, window_bounds = array<i64: 1, 32>}, {pipeline_mode = #tpu.pipeline_mode<synchronous>, transform_indices = @transform_38, window_bounds = array<i64: 16, 32>}]} {
    %c0 = arith.constant 0 : index
    %c0_0 = arith.constant 0 : index
    %0 = vector.load %arg1[%c0, %c0_0] : memref<16x32xf32, #tpu.memory_space<vmem>>, vector<16x32xf32>
    %c0_1 = arith.constant 0 : index
    %c0_2 = arith.constant 0 : index
    %1 = vector.load %arg3[%c0_1, %c0_2] : memref<16x32xf32, #tpu.memory_space<vmem>>, vector<16x32xf32>
    %2 = arith.addf %0, %1 : vector<16x32xf32>
    %c0_3 = arith.constant 0 : index
    %c0_4 = arith.constant 0 : index
    %c0_5 = arith.constant 0 : index
    %3 = vector.load %arg5[%c0_3, %c0_4, %c0_5] : memref<2x96x32xbf16, #tpu.memory_space<vmem>>, vector<1x96x32xbf16>
    %4 = vector.shape_cast %3 : vector<1x96x32xbf16> to vector<96x32xbf16>
    %c0_6 = arith.constant 0 : index
    %c0_7 = arith.constant 0 : index
    %c0_8 = arith.constant 0 : index
    %5 = vector.load %arg6[%c0_6, %c0_7, %c0_8] : memref<2x1x96xf32, #tpu.memory_space<vmem>>, vector<1x1x96xf32>
    %6 = vector.shape_cast %5 : vector<1x1x96xf32> to vector<1x96xf32>
    %c0_9 = arith.constant 0 : index
    %c0_10 = arith.constant 0 : index
    %c0_11 = arith.constant 0 : index
    %7 = vector.load %arg7[%c0_9, %c0_10, %c0_11] : memref<2x32x32xbf16, #tpu.memory_space<vmem>>, vector<1x32x32xbf16>
    %8 = vector.shape_cast %7 : vector<1x32x32xbf16> to vector<32x32xbf16>
    %c0_12 = arith.constant 0 : index
    %c0_13 = arith.constant 0 : index
    %c0_14 = arith.constant 0 : index
    %9 = vector.load %arg8[%c0_12, %c0_13, %c0_14] : memref<2x1x32xf32, #tpu.memory_space<vmem>>, vector<1x1x32xf32>
    %10 = vector.shape_cast %9 : vector<1x1x32xf32> to vector<1x32xf32>
    %11 = arith.truncf %2 : vector<16x32xf32> to vector<16x32xbf16>
    %cst = arith.constant dense<0.000000e+00> : vector<16x96xf32>
    %12 = tpu.matmul %11, %4, %cst {dimension_numbers = #tpu.dot_dimension_numbers<[1], [1], [0], [0], [0, 0, 1, 0], [], []>} : vector<16x32xbf16>, vector<96x32xbf16>, vector<16x96xf32> -> vector<16x96xf32>
    %13 = vector.broadcast %6 : vector<1x96xf32> to vector<16x96xf32>
    %14 = arith.addf %12, %13 : vector<16x96xf32>
    %15 = vector.extract_strided_slice %14 {offsets = [0, 0], sizes = [16, 32], strides = [1, 1]} : vector<16x96xf32> to vector<16x32xf32>
    %16 = vector.extract_strided_slice %14 {offsets = [0, 32], sizes = [16, 32], strides = [1, 1]} : vector<16x96xf32> to vector<16x32xf32>
    %17 = vector.extract_strided_slice %14 {offsets = [0, 64], sizes = [16, 32], strides = [1, 1]} : vector<16x96xf32> to vector<16x32xf32>
    %18 = vector.extract_strided_slice %15 {offsets = [0, 0], sizes = [8, 8], strides = [1, 1]} : vector<16x32xf32> to vector<8x8xf32>
    %19 = arith.truncf %18 : vector<8x8xf32> to vector<8x8xbf16>
    %20 = vector.extract_strided_slice %16 {offsets = [0, 0], sizes = [8, 8], strides = [1, 1]} : vector<16x32xf32> to vector<8x8xf32>
    %21 = arith.truncf %20 : vector<8x8xf32> to vector<8x8xbf16>
    %cst_15 = arith.constant dense<0.000000e+00> : vector<8x8xf32>
    %22 = tpu.matmul %19, %21, %cst_15 {dimension_numbers = #tpu.dot_dimension_numbers<[1], [1], [0], [0], [0, 0, 1, 0], [], []>} : vector<8x8xbf16>, vector<8x8xbf16>, vector<8x8xf32> -> vector<8x8xf32>
    %cst_16 = arith.constant 0.353553385 : f32
    %23 = vector.broadcast %cst_16 : f32 to vector<8x8xf32>
    %24 = arith.mulf %22, %23 : vector<8x8xf32>
    %cst_17 = arith.constant dense<0xFF800000> : vector<8xf32>
    %25 = vector.multi_reduction <maximumf>, %24, %cst_17 [1] : vector<8x8xf32> to vector<8xf32>
    %26 = vector.shape_cast %25 : vector<8xf32> to vector<8x1xf32>
    %27 = vector.broadcast %26 : vector<8x1xf32> to vector<8x8xf32>
    %28 = arith.subf %24, %27 : vector<8x8xf32>
    %29 = math.exp %28 : vector<8x8xf32>
    %cst_18 = arith.constant dense<0.000000e+00> : vector<8xf32>
    %30 = vector.multi_reduction <add>, %29, %cst_18 [1] : vector<8x8xf32> to vector<8xf32>
    %31 = vector.shape_cast %30 : vector<8xf32> to vector<8x1xf32>
    %32 = tpu.reciprocal %31 {approx = true} : vector<8x1xf32> -> vector<8x1xf32>
    %33 = vector.broadcast %32 : vector<8x1xf32> to vector<8x8xf32>
    %34 = arith.mulf %29, %33 : vector<8x8xf32>
    %35 = arith.truncf %34 : vector<8x8xf32> to vector<8x8xbf16>
    %36 = vector.extract_strided_slice %17 {offsets = [0, 0], sizes = [8, 8], strides = [1, 1]} : vector<16x32xf32> to vector<8x8xf32>
    %37 = arith.truncf %36 : vector<8x8xf32> to vector<8x8xbf16>
    %cst_19 = arith.constant dense<0.000000e+00> : vector<8x8xf32>
    %38 = tpu.matmul %35, %37, %cst_19 {dimension_numbers = #tpu.dot_dimension_numbers<[1], [0], [0], [1], [0, 0, 1, 1], [], []>} : vector<8x8xbf16>, vector<8x8xbf16>, vector<8x8xf32> -> vector<8x8xf32>
    %c0_20 = arith.constant 0 : index
    %c0_21 = arith.constant 0 : index
    %39 = vector.load %arg40[%c0_20, %c0_21] : memref<16x32xf32, #tpu.memory_space<vmem>>, vector<8x8xf32>
    tpu.vector_store %arg40[%c0_20, %c0_21], %38 {strides = array<i32>} : memref<16x32xf32, #tpu.memory_space<vmem>>, vector<8x8xf32>,
    %40 = vector.extract_strided_slice %15 {offsets = [0, 8], sizes = [8, 8], strides = [1, 1]} : vector<16x32xf32> to vector<8x8xf32>
    %41 = arith.truncf %40 : vector<8x8xf32> to vector<8x8xbf16>
    %42 = vector.extract_strided_slice %16 {offsets = [0, 8], sizes = [8, 8], strides = [1, 1]} : vector<16x32xf32> to vector<8x8xf32>
    %43 = arith.truncf %42 : vector<8x8xf32> to vector<8x8xbf16>
    %cst_22 = arith.constant dense<0.000000e+00> : vector<8x8xf32>
    %44 = tpu.matmul %41, %43, %cst_22 {dimension_numbers = #tpu.dot_dimension_numbers<[1], [1], [0], [0], [0, 0, 1, 0], [], []>} : vector<8x8xbf16>, vector<8x8xbf16>, vector<8x8xf32> -> vector<8x8xf32>
    %cst_23 = arith.constant 0.353553385 : f32
    %45 = vector.broadcast %cst_23 : f32 to vector<8x8xf32>
    %46 = arith.mulf %44, %45 : vector<8x8xf32>
    %cst_24 = arith.constant dense<0xFF800000> : vector<8xf32>
    %47 = vector.multi_reduction <maximumf>, %46, %cst_24 [1] : vector<8x8xf32> to vector<8xf32>
    %48 = vector.shape_cast %47 : vector<8xf32> to vector<8x1xf32>
    %49 = vector.broadcast %48 : vector<8x1xf32> to vector<8x8xf32>
    %50 = arith.subf %46, %49 : vector<8x8xf32>
    %51 = math.exp %50 : vector<8x8xf32>
    %cst_25 = arith.constant dense<0.000000e+00> : vector<8xf32>
    %52 = vector.multi_reduction <add>, %51, %cst_25 [1] : vector<8x8xf32> to vector<8xf32>
    %53 = vector.shape_cast %52 : vector<8xf32> to vector<8x1xf32>
    %54 = tpu.reciprocal %53 {approx = true} : vector<8x1xf32> -> vector<8x1xf32>
    %55 = vector.broadcast %54 : vector<8x1xf32> to vector<8x8xf32>
    %56 = arith.mulf %51, %55 : vector<8x8xf32>
    %57 = arith.truncf %56 : vector<8x8xf32> to vector<8x8xbf16>
    %58 = vector.extract_strided_slice %17 {offsets = [0, 8], sizes = [8, 8], strides = [1, 1]} : vector<16x32xf32> to vector<8x8xf32>
    %59 = arith.truncf %58 : vector<8x8xf32> to vector<8x8xbf16>
    %cst_26 = arith.constant dense<0.000000e+00> : vector<8x8xf32>
    %60 = tpu.matmul %57, %59, %cst_26 {dimension_numbers = #tpu.dot_dimension_numbers<[1], [0], [0], [1], [0, 0, 1, 1], [], []>} : vector<8x8xbf16>, vector<8x8xbf16>, vector<8x8xf32> -> vector<8x8xf32>
    %c0_27 = arith.constant 0 : index
    %c8 = arith.constant 8 : index
    %61 = vector.load %arg40[%c0_27, %c8] : memref<16x32xf32, #tpu.memory_space<vmem>>, vector<8x8xf32>
    tpu.vector_store %arg40[%c0_27, %c8], %60 {strides = array<i32>} : memref<16x32xf32, #tpu.memory_space<vmem>>, vector<8x8xf32>,
    %62 = vector.extract_strided_slice %15 {offsets = [0, 16], sizes = [8, 8], strides = [1, 1]} : vector<16x32xf32> to vector<8x8xf32>
    %63 = arith.truncf %62 : vector<8x8xf32> to vector<8x8xbf16>
    %64 = vector.extract_strided_slice %16 {offsets = [0, 16], sizes = [8, 8], strides = [1, 1]} : vector<16x32xf32> to vector<8x8xf32>
    %65 = arith.truncf %64 : vector<8x8xf32> to vector<8x8xbf16>
    %cst_28 = arith.constant dense<0.000000e+00> : vector<8x8xf32>
    %66 = tpu.matmul %63, %65, %cst_28 {dimension_numbers = #tpu.dot_dimension_numbers<[1], [1], [0], [0], [0, 0, 1, 0], [], []>} : vector<8x8xbf16>, vector<8x8xbf16>, vector<8x8xf32> -> vector<8x8xf32>
    %cst_29 = arith.constant 0.353553385 : f32
    %67 = vector.broadcast %cst_29 : f32 to vector<8x8xf32>
    %68 = arith.mulf %66, %67 : vector<8x8xf32>
    %cst_30 = arith.constant dense<0xFF800000> : vector<8xf32>
    %69 = vector.multi_reduction <maximumf>, %68, %cst_30 [1] : vector<8x8xf32> to vector<8xf32>
    %70 = vector.shape_cast %69 : vector<8xf32> to vector<8x1xf32>
    %71 = vector.broadcast %70 : vector<8x1xf32> to vector<8x8xf32>
    %72 = arith.subf %68, %71 : vector<8x8xf32>
    %73 = math.exp %72 : vector<8x8xf32>
    %cst_31 = arith.constant dense<0.000000e+00> : vector<8xf32>
    %74 = vector.multi_reduction <add>, %73, %cst_31 [1] : vector<8x8xf32> to vector<8xf32>
    %75 = vector.shape_cast %74 : vector<8xf32> to vector<8x1xf32>
    %76 = tpu.reciprocal %75 {approx = true} : vector<8x1xf32> -> vector<8x1xf32>
    %77 = vector.broadcast %76 : vector<8x1xf32> to vector<8x8xf32>
    %78 = arith.mulf %73, %77 : vector<8x8xf32>
    %79 = arith.truncf %78 : vector<8x8xf32> to vector<8x8xbf16>
    %80 = vector.extract_strided_slice %17 {offsets = [0, 16], sizes = [8, 8], strides = [1, 1]} : vector<16x32xf32> to vector<8x8xf32>
    %81 = arith.truncf %80 : vector<8x8xf32> to vector<8x8xbf16>
    %cst_32 = arith.constant dense<0.000000e+00> : vector<8x8xf32>
    %82 = tpu.matmul %79, %81, %cst_32 {dimension_numbers = #tpu.dot_dimension_numbers<[1], [0], [0], [1], [0, 0, 1, 1], [], []>} : vector<8x8xbf16>, vector<8x8xbf16>, vector<8x8xf32> -> vector<8x8xf32>
    %c0_33 = arith.constant 0 : index
    %c16 = arith.constant 16 : index
    %83 = vector.load %arg40[%c0_33, %c16] : memref<16x32xf32, #tpu.memory_space<vmem>>, vector<8x8xf32>
    tpu.vector_store %arg40[%c0_33, %c16], %82 {strides = array<i32>} : memref<16x32xf32, #tpu.memory_space<vmem>>, vector<8x8xf32>,
    %84 = vector.extract_strided_slice %15 {offsets = [0, 24], sizes = [8, 8], strides = [1, 1]} : vector<16x32xf32> to vector<8x8xf32>
    %85 = arith.truncf %84 : vector<8x8xf32> to vector<8x8xbf16>
    %86 = vector.extract_strided_slice %16 {offsets = [0, 24], sizes = [8, 8], strides = [1, 1]} : vector<16x32xf32> to vector<8x8xf32>
    %87 = arith.truncf %86 : vector<8x8xf32> to vector<8x8xbf16>
    %cst_34 = arith.constant dense<0.000000e+00> : vector<8x8xf32>
    %88 = tpu.matmul %85, %87, %cst_34 {dimension_numbers = #tpu.dot_dimension_numbers<[1], [1], [0], [0], [0, 0, 1, 0], [], []>} : vector<8x8xbf16>, vector<8x8xbf16>, vector<8x8xf32> -> vector<8x8xf32>
    %cst_35 = arith.constant 0.353553385 : f32
    %89 = vector.broadcast %cst_35 : f32 to vector<8x8xf32>
    %90 = arith.mulf %88, %89 : vector<8x8xf32>
    %cst_36 = arith.constant dense<0xFF800000> : vector<8xf32>
    %91 = vector.multi_reduction <maximumf>, %90, %cst_36 [1] : vector<8x8xf32> to vector<8xf32>
    %92 = vector.shape_cast %91 : vector<8xf32> to vector<8x1xf32>
    %93 = vector.broadcast %92 : vector<8x1xf32> to vector<8x8xf32>
    %94 = arith.subf %90, %93 : vector<8x8xf32>
    %95 = math.exp %94 : vector<8x8xf32>
    %cst_37 = arith.constant dense<0.000000e+00> : vector<8xf32>
    %96 = vector.multi_reduction <add>, %95, %cst_37 [1] : vector<8x8xf32> to vector<8xf32>
    %97 = vector.shape_cast %96 : vector<8xf32> to vector<8x1xf32>
    %98 = tpu.reciprocal %97 {approx = true} : vector<8x1xf32> -> vector<8x1xf32>
    %99 = vector.broadcast %98 : vector<8x1xf32> to vector<8x8xf32>
    %100 = arith.mulf %95, %99 : vector<8x8xf32>
    %101 = arith.truncf %100 : vector<8x8xf32> to vector<8x8xbf16>
    %102 = vector.extract_strided_slice %17 {offsets = [0, 24], sizes = [8, 8], strides = [1, 1]} : vector<16x32xf32> to vector<8x8xf32>
    %103 = arith.truncf %102 : vector<8x8xf32> to vector<8x8xbf16>
    %cst_38 = arith.constant dense<0.000000e+00> : vector<8x8xf32>
    %104 = tpu.matmul %101, %103, %cst_38 {dimension_numbers = #tpu.dot_dimension_numbers<[1], [0], [0], [1], [0, 0, 1, 1], [], []>} : vector<8x8xbf16>, vector<8x8xbf16>, vector<8x8xf32> -> vector<8x8xf32>
    %c0_39 = arith.constant 0 : index
    %c24 = arith.constant 24 : index
    %105 = vector.load %arg40[%c0_39, %c24] : memref<16x32xf32, #tpu.memory_space<vmem>>, vector<8x8xf32>
    tpu.vector_store %arg40[%c0_39, %c24], %104 {strides = array<i32>} : memref<16x32xf32, #tpu.memory_space<vmem>>, vector<8x8xf32>,
    %106 = vector.extract_strided_slice %15 {offsets = [8, 0], sizes = [8, 8], strides = [1, 1]} : vector<16x32xf32> to vector<8x8xf32>
    %107 = arith.truncf %106 : vector<8x8xf32> to vector<8x8xbf16>
    %108 = vector.extract_strided_slice %16 {offsets = [8, 0], sizes = [8, 8], strides = [1, 1]} : vector<16x32xf32> to vector<8x8xf32>
    %109 = arith.truncf %108 : vector<8x8xf32> to vector<8x8xbf16>
    %cst_40 = arith.constant dense<0.000000e+00> : vector<8x8xf32>
    %110 = tpu.matmul %107, %109, %cst_40 {dimension_numbers = #tpu.dot_dimension_numbers<[1], [1], [0], [0], [0, 0, 1, 0], [], []>} : vector<8x8xbf16>, vector<8x8xbf16>, vector<8x8xf32> -> vector<8x8xf32>
    %cst_41 = arith.constant 0.353553385 : f32
    %111 = vector.broadcast %cst_41 : f32 to vector<8x8xf32>
    %112 = arith.mulf %110, %111 : vector<8x8xf32>
    %cst_42 = arith.constant dense<0xFF800000> : vector<8xf32>
    %113 = vector.multi_reduction <maximumf>, %112, %cst_42 [1] : vector<8x8xf32> to vector<8xf32>
    %114 = vector.shape_cast %113 : vector<8xf32> to vector<8x1xf32>
    %115 = vector.broadcast %114 : vector<8x1xf32> to vector<8x8xf32>
    %116 = arith.subf %112, %115 : vector<8x8xf32>
    %117 = math.exp %116 : vector<8x8xf32>
    %cst_43 = arith.constant dense<0.000000e+00> : vector<8xf32>
    %118 = vector.multi_reduction <add>, %117, %cst_43 [1] : vector<8x8xf32> to vector<8xf32>
    %119 = vector.shape_cast %118 : vector<8xf32> to vector<8x1xf32>
    %120 = tpu.reciprocal %119 {approx = true} : vector<8x1xf32> -> vector<8x1xf32>
    %121 = vector.broadcast %120 : vector<8x1xf32> to vector<8x8xf32>
    %122 = arith.mulf %117, %121 : vector<8x8xf32>
    %123 = arith.truncf %122 : vector<8x8xf32> to vector<8x8xbf16>
    %124 = vector.extract_strided_slice %17 {offsets = [8, 0], sizes = [8, 8], strides = [1, 1]} : vector<16x32xf32> to vector<8x8xf32>
    %125 = arith.truncf %124 : vector<8x8xf32> to vector<8x8xbf16>
    %cst_44 = arith.constant dense<0.000000e+00> : vector<8x8xf32>
    %126 = tpu.matmul %123, %125, %cst_44 {dimension_numbers = #tpu.dot_dimension_numbers<[1], [0], [0], [1], [0, 0, 1, 1], [], []>} : vector<8x8xbf16>, vector<8x8xbf16>, vector<8x8xf32> -> vector<8x8xf32>
    %c8_45 = arith.constant 8 : index
    %c0_46 = arith.constant 0 : index
    %127 = vector.load %arg40[%c8_45, %c0_46] : memref<16x32xf32, #tpu.memory_space<vmem>>, vector<8x8xf32>
    tpu.vector_store %arg40[%c8_45, %c0_46], %126 {strides = array<i32>} : memref<16x32xf32, #tpu.memory_space<vmem>>, vector<8x8xf32>,
    %128 = vector.extract_strided_slice %15 {offsets = [8, 8], sizes = [8, 8], strides = [1, 1]} : vector<16x32xf32> to vector<8x8xf32>
    %129 = arith.truncf %128 : vector<8x8xf32> to vector<8x8xbf16>
    %130 = vector.extract_strided_slice %16 {offsets = [8, 8], sizes = [8, 8], strides = [1, 1]} : vector<16x32xf32> to vector<8x8xf32>
    %131 = arith.truncf %130 : vector<8x8xf32> to vector<8x8xbf16>
    %cst_47 = arith.constant dense<0.000000e+00> : vector<8x8xf32>
    %132 = tpu.matmul %129, %131, %cst_47 {dimension_numbers = #tpu.dot_dimension_numbers<[1], [1], [0], [0], [0, 0, 1, 0], [], []>} : vector<8x8xbf16>, vector<8x8xbf16>, vector<8x8xf32> -> vector<8x8xf32>
    %cst_48 = arith.constant 0.353553385 : f32
    %133 = vector.broadcast %cst_48 : f32 to vector<8x8xf32>
    %134 = arith.mulf %132, %133 : vector<8x8xf32>
    %cst_49 = arith.constant dense<0xFF800000> : vector<8xf32>
    %135 = vector.multi_reduction <maximumf>, %134, %cst_49 [1] : vector<8x8xf32> to vector<8xf32>
    %136 = vector.shape_cast %135 : vector<8xf32> to vector<8x1xf32>
    %137 = vector.broadcast %136 : vector<8x1xf32> to vector<8x8xf32>
    %138 = arith.subf %134, %137 : vector<8x8xf32>
    %139 = math.exp %138 : vector<8x8xf32>
    %cst_50 = arith.constant dense<0.000000e+00> : vector<8xf32>
    %140 = vector.multi_reduction <add>, %139, %cst_50 [1] : vector<8x8xf32> to vector<8xf32>
    %141 = vector.shape_cast %140 : vector<8xf32> to vector<8x1xf32>
    %142 = tpu.reciprocal %141 {approx = true} : vector<8x1xf32> -> vector<8x1xf32>
    %143 = vector.broadcast %142 : vector<8x1xf32> to vector<8x8xf32>
    %144 = arith.mulf %139, %143 : vector<8x8xf32>
    %145 = arith.truncf %144 : vector<8x8xf32> to vector<8x8xbf16>
    %146 = vector.extract_strided_slice %17 {offsets = [8, 8], sizes = [8, 8], strides = [1, 1]} : vector<16x32xf32> to vector<8x8xf32>
    %147 = arith.truncf %146 : vector<8x8xf32> to vector<8x8xbf16>
    %cst_51 = arith.constant dense<0.000000e+00> : vector<8x8xf32>
    %148 = tpu.matmul %145, %147, %cst_51 {dimension_numbers = #tpu.dot_dimension_numbers<[1], [0], [0], [1], [0, 0, 1, 1], [], []>} : vector<8x8xbf16>, vector<8x8xbf16>, vector<8x8xf32> -> vector<8x8xf32>
    %c8_52 = arith.constant 8 : index
    %c8_53 = arith.constant 8 : index
    %149 = vector.load %arg40[%c8_52, %c8_53] : memref<16x32xf32, #tpu.memory_space<vmem>>, vector<8x8xf32>
    tpu.vector_store %arg40[%c8_52, %c8_53], %148 {strides = array<i32>} : memref<16x32xf32, #tpu.memory_space<vmem>>, vector<8x8xf32>,
    %150 = vector.extract_strided_slice %15 {offsets = [8, 16], sizes = [8, 8], strides = [1, 1]} : vector<16x32xf32> to vector<8x8xf32>
    %151 = arith.truncf %150 : vector<8x8xf32> to vector<8x8xbf16>
    %152 = vector.extract_strided_slice %16 {offsets = [8, 16], sizes = [8, 8], strides = [1, 1]} : vector<16x32xf32> to vector<8x8xf32>
    %153 = arith.truncf %152 : vector<8x8xf32> to vector<8x8xbf16>
    %cst_54 = arith.constant dense<0.000000e+00> : vector<8x8xf32>
    %154 = tpu.matmul %151, %153, %cst_54 {dimension_numbers = #tpu.dot_dimension_numbers<[1], [1], [0], [0], [0, 0, 1, 0], [], []>} : vector<8x8xbf16>, vector<8x8xbf16>, vector<8x8xf32> -> vector<8x8xf32>
    %cst_55 = arith.constant 0.353553385 : f32
    %155 = vector.broadcast %cst_55 : f32 to vector<8x8xf32>
    %156 = arith.mulf %154, %155 : vector<8x8xf32>
    %cst_56 = arith.constant dense<0xFF800000> : vector<8xf32>
    %157 = vector.multi_reduction <maximumf>, %156, %cst_56 [1] : vector<8x8xf32> to vector<8xf32>
    %158 = vector.shape_cast %157 : vector<8xf32> to vector<8x1xf32>
    %159 = vector.broadcast %158 : vector<8x1xf32> to vector<8x8xf32>
    %160 = arith.subf %156, %159 : vector<8x8xf32>
    %161 = math.exp %160 : vector<8x8xf32>
    %cst_57 = arith.constant dense<0.000000e+00> : vector<8xf32>
    %162 = vector.multi_reduction <add>, %161, %cst_57 [1] : vector<8x8xf32> to vector<8xf32>
    %163 = vector.shape_cast %162 : vector<8xf32> to vector<8x1xf32>
    %164 = tpu.reciprocal %163 {approx = true} : vector<8x1xf32> -> vector<8x1xf32>
    %165 = vector.broadcast %164 : vector<8x1xf32> to vector<8x8xf32>
    %166 = arith.mulf %161, %165 : vector<8x8xf32>
    %167 = arith.truncf %166 : vector<8x8xf32> to vector<8x8xbf16>
    %168 = vector.extract_strided_slice %17 {offsets = [8, 16], sizes = [8, 8], strides = [1, 1]} : vector<16x32xf32> to vector<8x8xf32>
    %169 = arith.truncf %168 : vector<8x8xf32> to vector<8x8xbf16>
    %cst_58 = arith.constant dense<0.000000e+00> : vector<8x8xf32>
    %170 = tpu.matmul %167, %169, %cst_58 {dimension_numbers = #tpu.dot_dimension_numbers<[1], [0], [0], [1], [0, 0, 1, 1], [], []>} : vector<8x8xbf16>, vector<8x8xbf16>, vector<8x8xf32> -> vector<8x8xf32>
    %c8_59 = arith.constant 8 : index
    %c16_60 = arith.constant 16 : index
    %171 = vector.load %arg40[%c8_59, %c16_60] : memref<16x32xf32, #tpu.memory_space<vmem>>, vector<8x8xf32>
    tpu.vector_store %arg40[%c8_59, %c16_60], %170 {strides = array<i32>} : memref<16x32xf32, #tpu.memory_space<vmem>>, vector<8x8xf32>,
    %172 = vector.extract_strided_slice %15 {offsets = [8, 24], sizes = [8, 8], strides = [1, 1]} : vector<16x32xf32> to vector<8x8xf32>
    %173 = arith.truncf %172 : vector<8x8xf32> to vector<8x8xbf16>
    %174 = vector.extract_strided_slice %16 {offsets = [8, 24], sizes = [8, 8], strides = [1, 1]} : vector<16x32xf32> to vector<8x8xf32>
    %175 = arith.truncf %174 : vector<8x8xf32> to vector<8x8xbf16>
    %cst_61 = arith.constant dense<0.000000e+00> : vector<8x8xf32>
    %176 = tpu.matmul %173, %175, %cst_61 {dimension_numbers = #tpu.dot_dimension_numbers<[1], [1], [0], [0], [0, 0, 1, 0], [], []>} : vector<8x8xbf16>, vector<8x8xbf16>, vector<8x8xf32> -> vector<8x8xf32>
    %cst_62 = arith.constant 0.353553385 : f32
    %177 = vector.broadcast %cst_62 : f32 to vector<8x8xf32>
    %178 = arith.mulf %176, %177 : vector<8x8xf32>
    %cst_63 = arith.constant dense<0xFF800000> : vector<8xf32>
    %179 = vector.multi_reduction <maximumf>, %178, %cst_63 [1] : vector<8x8xf32> to vector<8xf32>
    %180 = vector.shape_cast %179 : vector<8xf32> to vector<8x1xf32>
    %181 = vector.broadcast %180 : vector<8x1xf32> to vector<8x8xf32>
    %182 = arith.subf %178, %181 : vector<8x8xf32>
    %183 = math.exp %182 : vector<8x8xf32>
    %cst_64 = arith.constant dense<0.000000e+00> : vector<8xf32>
    %184 = vector.multi_reduction <add>, %183, %cst_64 [1] : vector<8x8xf32> to vector<8xf32>
    %185 = vector.shape_cast %184 : vector<8xf32> to vector<8x1xf32>
    %186 = tpu.reciprocal %185 {approx = true} : vector<8x1xf32> -> vector<8x1xf32>
    %187 = vector.broadcast %186 : vector<8x1xf32> to vector<8x8xf32>
    %188 = arith.mulf %183, %187 : vector<8x8xf32>
    %189 = arith.truncf %188 : vector<8x8xf32> to vector<8x8xbf16>
    %190 = vector.extract_strided_slice %17 {offsets = [8, 24], sizes = [8, 8], strides = [1, 1]} : vector<16x32xf32> to vector<8x8xf32>
    %191 = arith.truncf %190 : vector<8x8xf32> to vector<8x8xbf16>
    %cst_65 = arith.constant dense<0.000000e+00> : vector<8x8xf32>
    %192 = tpu.matmul %189, %191, %cst_65 {dimension_numbers = #tpu.dot_dimension_numbers<[1], [0], [0], [1], [0, 0, 1, 1], [], []>} : vector<8x8xbf16>, vector<8x8xbf16>, vector<8x8xf32> -> vector<8x8xf32>
    %c8_66 = arith.constant 8 : index
    %c24_67 = arith.constant 24 : index
    %193 = vector.load %arg40[%c8_66, %c24_67] : memref<16x32xf32, #tpu.memory_space<vmem>>, vector<8x8xf32>
    tpu.vector_store %arg40[%c8_66, %c24_67], %192 {strides = array<i32>} : memref<16x32xf32, #tpu.memory_space<vmem>>, vector<8x8xf32>,
    %c0_68 = arith.constant 0 : index
    %c0_69 = arith.constant 0 : index
    %194 = vector.load %arg40[%c0_68, %c0_69] : memref<16x32xf32, #tpu.memory_space<vmem>>, vector<16x32xf32>
    %195 = arith.truncf %194 : vector<16x32xf32> to vector<16x32xbf16>
    %cst_70 = arith.constant dense<0.000000e+00> : vector<16x32xf32>
    %196 = tpu.matmul %195, %8, %cst_70 {dimension_numbers = #tpu.dot_dimension_numbers<[1], [1], [0], [0], [0, 0, 1, 0], [], []>} : vector<16x32xbf16>, vector<32x32xbf16>, vector<16x32xf32> -> vector<16x32xf32>
    %197 = vector.broadcast %10 : vector<1x32xf32> to vector<16x32xf32>
    %198 = arith.addf %196, %197 : vector<16x32xf32>
    %199 = arith.addf %2, %198 : vector<16x32xf32>
    %c0_71 = arith.constant 0 : index
    %c0_72 = arith.constant 0 : index
    %c0_73 = arith.constant 0 : index
    %200 = vector.load %arg9[%c0_71, %c0_72, %c0_73] : memref<2x1x32xf32, #tpu.memory_space<vmem>>, vector<1x1x32xf32>
    %201 = vector.shape_cast %200 : vector<1x1x32xf32> to vector<1x32xf32>
    %c0_74 = arith.constant 0 : index
    %c0_75 = arith.constant 0 : index
    %c0_76 = arith.constant 0 : index
    %202 = vector.load %arg10[%c0_74, %c0_75, %c0_76] : memref<2x1x32xf32, #tpu.memory_space<vmem>>, vector<1x1x32xf32>
    %203 = vector.shape_cast %202 : vector<1x1x32xf32> to vector<1x32xf32>
    %cst_77 = arith.constant dense<0.000000e+00> : vector<16xf32>
    %204 = vector.multi_reduction <add>, %199, %cst_77 [1] : vector<16x32xf32> to vector<16xf32>
    %205 = vector.shape_cast %204 : vector<16xf32> to vector<16x1xf32>
    %cst_78 = arith.constant 3.200000e+01 : f32
    %206 = vector.broadcast %cst_78 : f32 to vector<16x1xf32>
    %207 = arith.divf %205, %206 : vector<16x1xf32>
    %208 = vector.broadcast %207 : vector<16x1xf32> to vector<16x32xf32>
    %209 = arith.subf %199, %208 : vector<16x32xf32>
    %210 = arith.mulf %209, %209 : vector<16x32xf32>
    %cst_79 = arith.constant dense<0.000000e+00> : vector<16xf32>
    %211 = vector.multi_reduction <add>, %210, %cst_79 [1] : vector<16x32xf32> to vector<16xf32>
    %212 = vector.shape_cast %211 : vector<16xf32> to vector<16x1xf32>
    %cst_80 = arith.constant 3.200000e+01 : f32
    %213 = vector.broadcast %cst_80 : f32 to vector<16x1xf32>
    %214 = arith.divf %212, %213 : vector<16x1xf32>
    %215 = vector.broadcast %207 : vector<16x1xf32> to vector<16x32xf32>
    %216 = arith.subf %199, %215 : vector<16x32xf32>
    %cst_81 = arith.constant 9.99999974E-6 : f32
    %217 = vector.broadcast %cst_81 : f32 to vector<16x1xf32>
    %218 = arith.addf %214, %217 : vector<16x1xf32>
    %219 = math.rsqrt %218 : vector<16x1xf32>
    %220 = vector.broadcast %219 : vector<16x1xf32> to vector<16x32xf32>
    %221 = arith.mulf %216, %220 : vector<16x32xf32>
    %222 = vector.broadcast %201 : vector<1x32xf32> to vector<16x32xf32>
    %223 = arith.mulf %221, %222 : vector<16x32xf32>
    %224 = vector.broadcast %203 : vector<1x32xf32> to vector<16x32xf32>
    %225 = arith.addf %223, %224 : vector<16x32xf32>
    %c0_82 = arith.constant 0 : index
    %c0_83 = arith.constant 0 : index
    %c0_84 = arith.constant 0 : index
    %226 = vector.load %arg11[%c0_82, %c0_83, %c0_84] : memref<2x64x32xbf16, #tpu.memory_space<vmem>>, vector<1x64x32xbf16>
    %227 = vector.shape_cast %226 : vector<1x64x32xbf16> to vector<64x32xbf16>
    %c0_85 = arith.constant 0 : index
    %c0_86 = arith.constant 0 : index
    %c0_87 = arith.constant 0 : index
    %228 = vector.load %arg12[%c0_85, %c0_86, %c0_87] : memref<2x1x64xf32, #tpu.memory_space<vmem>>, vector<1x1x64xf32>
    %229 = vector.shape_cast %228 : vector<1x1x64xf32> to vector<1x64xf32>
    %c0_88 = arith.constant 0 : index
    %c0_89 = arith.constant 0 : index
    %c0_90 = arith.constant 0 : index
    %230 = vector.load %arg13[%c0_88, %c0_89, %c0_90] : memref<2x32x64xbf16, #tpu.memory_space<vmem>>, vector<1x32x64xbf16>
    %231 = vector.shape_cast %230 : vector<1x32x64xbf16> to vector<32x64xbf16>
    %c0_91 = arith.constant 0 : index
    %c0_92 = arith.constant 0 : index
    %c0_93 = arith.constant 0 : index
    %232 = vector.load %arg14[%c0_91, %c0_92, %c0_93] : memref<2x1x32xf32, #tpu.memory_space<vmem>>, vector<1x1x32xf32>
    %233 = vector.shape_cast %232 : vector<1x1x32xf32> to vector<1x32xf32>
    %234 = arith.truncf %225 : vector<16x32xf32> to vector<16x32xbf16>
    %cst_94 = arith.constant dense<0.000000e+00> : vector<16x64xf32>
    %235 = tpu.matmul %234, %227, %cst_94 {dimension_numbers = #tpu.dot_dimension_numbers<[1], [1], [0], [0], [0, 0, 1, 0], [], []>} : vector<16x32xbf16>, vector<64x32xbf16>, vector<16x64xf32> -> vector<16x64xf32>
    %236 = vector.broadcast %229 : vector<1x64xf32> to vector<16x64xf32>
    %237 = arith.addf %235, %236 : vector<16x64xf32>
    %cst_95 = arith.constant 0.000000e+00 : f32
    %238 = vector.broadcast %cst_95 : f32 to vector<16x64xf32>
    %239 = arith.maximumf %237, %238 : vector<16x64xf32>
    %240 = arith.truncf %239 : vector<16x64xf32> to vector<16x64xbf16>
    %cst_96 = arith.constant dense<0.000000e+00> : vector<16x32xf32>
    %241 = tpu.matmul %240, %231, %cst_96 {dimension_numbers = #tpu.dot_dimension_numbers<[1], [1], [0], [0], [0, 0, 1, 0], [], []>} : vector<16x64xbf16>, vector<32x64xbf16>, vector<16x32xf32> -> vector<16x32xf32>
    %242 = vector.broadcast %233 : vector<1x32xf32> to vector<16x32xf32>
    %243 = arith.addf %241, %242 : vector<16x32xf32>
    %244 = arith.addf %225, %243 : vector<16x32xf32>
    %c0_97 = arith.constant 0 : index
    %c0_98 = arith.constant 0 : index
    %c0_99 = arith.constant 0 : index
    %245 = vector.load %arg15[%c0_97, %c0_98, %c0_99] : memref<2x1x32xf32, #tpu.memory_space<vmem>>, vector<1x1x32xf32>
    %246 = vector.shape_cast %245 : vector<1x1x32xf32> to vector<1x32xf32>
    %c0_100 = arith.constant 0 : index
    %c0_101 = arith.constant 0 : index
    %c0_102 = arith.constant 0 : index
    %247 = vector.load %arg16[%c0_100, %c0_101, %c0_102] : memref<2x1x32xf32, #tpu.memory_space<vmem>>, vector<1x1x32xf32>
    %248 = vector.shape_cast %247 : vector<1x1x32xf32> to vector<1x32xf32>
    %cst_103 = arith.constant dense<0.000000e+00> : vector<16xf32>
    %249 = vector.multi_reduction <add>, %244, %cst_103 [1] : vector<16x32xf32> to vector<16xf32>
    %250 = vector.shape_cast %249 : vector<16xf32> to vector<16x1xf32>
    %cst_104 = arith.constant 3.200000e+01 : f32
    %251 = vector.broadcast %cst_104 : f32 to vector<16x1xf32>
    %252 = arith.divf %250, %251 : vector<16x1xf32>
    %253 = vector.broadcast %252 : vector<16x1xf32> to vector<16x32xf32>
    %254 = arith.subf %244, %253 : vector<16x32xf32>
    %255 = arith.mulf %254, %254 : vector<16x32xf32>
    %cst_105 = arith.constant dense<0.000000e+00> : vector<16xf32>
    %256 = vector.multi_reduction <add>, %255, %cst_105 [1] : vector<16x32xf32> to vector<16xf32>
    %257 = vector.shape_cast %256 : vector<16xf32> to vector<16x1xf32>
    %cst_106 = arith.constant 3.200000e+01 : f32
    %258 = vector.broadcast %cst_106 : f32 to vector<16x1xf32>
    %259 = arith.divf %257, %258 : vector<16x1xf32>
    %260 = vector.broadcast %252 : vector<16x1xf32> to vector<16x32xf32>
    %261 = arith.subf %244, %260 : vector<16x32xf32>
    %cst_107 = arith.constant 9.99999974E-6 : f32
    %262 = vector.broadcast %cst_107 : f32 to vector<16x1xf32>
    %263 = arith.addf %259, %262 : vector<16x1xf32>
    %264 = math.rsqrt %263 : vector<16x1xf32>
    %265 = vector.broadcast %264 : vector<16x1xf32> to vector<16x32xf32>
    %266 = arith.mulf %261, %265 : vector<16x32xf32>
    %267 = vector.broadcast %246 : vector<1x32xf32> to vector<16x32xf32>
    %268 = arith.mulf %266, %267 : vector<16x32xf32>
    %269 = vector.broadcast %248 : vector<1x32xf32> to vector<16x32xf32>
    %270 = arith.addf %268, %269 : vector<16x32xf32>
    %c1 = arith.constant 1 : index
    %c0_108 = arith.constant 0 : index
    %c0_109 = arith.constant 0 : index
    %271 = vector.load %arg5[%c1, %c0_108, %c0_109] : memref<2x96x32xbf16, #tpu.memory_space<vmem>>, vector<1x96x32xbf16>
    %272 = vector.shape_cast %271 : vector<1x96x32xbf16> to vector<96x32xbf16>
    %c1_110 = arith.constant 1 : index
    %c0_111 = arith.constant 0 : index
    %c0_112 = arith.constant 0 : index
    %273 = vector.load %arg6[%c1_110, %c0_111, %c0_112] : memref<2x1x96xf32, #tpu.memory_space<vmem>>, vector<1x1x96xf32>
    %274 = vector.shape_cast %273 : vector<1x1x96xf32> to vector<1x96xf32>
    %c1_113 = arith.constant 1 : index
    %c0_114 = arith.constant 0 : index
    %c0_115 = arith.constant 0 : index
    %275 = vector.load %arg7[%c1_113, %c0_114, %c0_115] : memref<2x32x32xbf16, #tpu.memory_space<vmem>>, vector<1x32x32xbf16>
    %276 = vector.shape_cast %275 : vector<1x32x32xbf16> to vector<32x32xbf16>
    %c1_116 = arith.constant 1 : index
    %c0_117 = arith.constant 0 : index
    %c0_118 = arith.constant 0 : index
    %277 = vector.load %arg8[%c1_116, %c0_117, %c0_118] : memref<2x1x32xf32, #tpu.memory_space<vmem>>, vector<1x1x32xf32>
    %278 = vector.shape_cast %277 : vector<1x1x32xf32> to vector<1x32xf32>
    %279 = arith.truncf %270 : vector<16x32xf32> to vector<16x32xbf16>
    %cst_119 = arith.constant dense<0.000000e+00> : vector<16x96xf32>
    %280 = tpu.matmul %279, %272, %cst_119 {dimension_numbers = #tpu.dot_dimension_numbers<[1], [1], [0], [0], [0, 0, 1, 0], [], []>} : vector<16x32xbf16>, vector<96x32xbf16>, vector<16x96xf32> -> vector<16x96xf32>
    %281 = vector.broadcast %274 : vector<1x96xf32> to vector<16x96xf32>
    %282 = arith.addf %280, %281 : vector<16x96xf32>
    %283 = vector.extract_strided_slice %282 {offsets = [0, 0], sizes = [16, 32], strides = [1, 1]} : vector<16x96xf32> to vector<16x32xf32>
    %284 = vector.extract_strided_slice %282 {offsets = [0, 32], sizes = [16, 32], strides = [1, 1]} : vector<16x96xf32> to vector<16x32xf32>
    %285 = vector.extract_strided_slice %282 {offsets = [0, 64], sizes = [16, 32], strides = [1, 1]} : vector<16x96xf32> to vector<16x32xf32>
    %286 = vector.extract_strided_slice %283 {offsets = [0, 0], sizes = [8, 8], strides = [1, 1]} : vector<16x32xf32> to vector<8x8xf32>
    %287 = arith.truncf %286 : vector<8x8xf32> to vector<8x8xbf16>
    %288 = vector.extract_strided_slice %284 {offsets = [0, 0], sizes = [8, 8], strides = [1, 1]} : vector<16x32xf32> to vector<8x8xf32>
    %289 = arith.truncf %288 : vector<8x8xf32> to vector<8x8xbf16>
    %cst_120 = arith.constant dense<0.000000e+00> : vector<8x8xf32>
    %290 = tpu.matmul %287, %289, %cst_120 {dimension_numbers = #tpu.dot_dimension_numbers<[1], [1], [0], [0], [0, 0, 1, 0], [], []>} : vector<8x8xbf16>, vector<8x8xbf16>, vector<8x8xf32> -> vector<8x8xf32>
    %cst_121 = arith.constant 0.353553385 : f32
    %291 = vector.broadcast %cst_121 : f32 to vector<8x8xf32>
    %292 = arith.mulf %290, %291 : vector<8x8xf32>
    %cst_122 = arith.constant dense<0xFF800000> : vector<8xf32>
    %293 = vector.multi_reduction <maximumf>, %292, %cst_122 [1] : vector<8x8xf32> to vector<8xf32>
    %294 = vector.shape_cast %293 : vector<8xf32> to vector<8x1xf32>
    %295 = vector.broadcast %294 : vector<8x1xf32> to vector<8x8xf32>
    %296 = arith.subf %292, %295 : vector<8x8xf32>
    %297 = math.exp %296 : vector<8x8xf32>
    %cst_123 = arith.constant dense<0.000000e+00> : vector<8xf32>
    %298 = vector.multi_reduction <add>, %297, %cst_123 [1] : vector<8x8xf32> to vector<8xf32>
    %299 = vector.shape_cast %298 : vector<8xf32> to vector<8x1xf32>
    %300 = tpu.reciprocal %299 {approx = true} : vector<8x1xf32> -> vector<8x1xf32>
    %301 = vector.broadcast %300 : vector<8x1xf32> to vector<8x8xf32>
    %302 = arith.mulf %297, %301 : vector<8x8xf32>
    %303 = arith.truncf %302 : vector<8x8xf32> to vector<8x8xbf16>
    %304 = vector.extract_strided_slice %285 {offsets = [0, 0], sizes = [8, 8], strides = [1, 1]} : vector<16x32xf32> to vector<8x8xf32>
    %305 = arith.truncf %304 : vector<8x8xf32> to vector<8x8xbf16>
    %cst_124 = arith.constant dense<0.000000e+00> : vector<8x8xf32>
    %306 = tpu.matmul %303, %305, %cst_124 {dimension_numbers = #tpu.dot_dimension_numbers<[1], [0], [0], [1], [0, 0, 1, 1], [], []>} : vector<8x8xbf16>, vector<8x8xbf16>, vector<8x8xf32> -> vector<8x8xf32>
    %c0_125 = arith.constant 0 : index
    %c0_126 = arith.constant 0 : index
    %307 = vector.load %arg40[%c0_125, %c0_126] : memref<16x32xf32, #tpu.memory_space<vmem>>, vector<8x8xf32>
    tpu.vector_store %arg40[%c0_125, %c0_126], %306 {strides = array<i32>} : memref<16x32xf32, #tpu.memory_space<vmem>>, vector<8x8xf32>,
    %308 = vector.extract_strided_slice %283 {offsets = [0, 8], sizes = [8, 8], strides = [1, 1]} : vector<16x32xf32> to vector<8x8xf32>
    %309 = arith.truncf %308 : vector<8x8xf32> to vector<8x8xbf16>
    %310 = vector.extract_strided_slice %284 {offsets = [0, 8], sizes = [8, 8], strides = [1, 1]} : vector<16x32xf32> to vector<8x8xf32>
    %311 = arith.truncf %310 : vector<8x8xf32> to vector<8x8xbf16>
    %cst_127 = arith.constant dense<0.000000e+00> : vector<8x8xf32>
    %312 = tpu.matmul %309, %311, %cst_127 {dimension_numbers = #tpu.dot_dimension_numbers<[1], [1], [0], [0], [0, 0, 1, 0], [], []>} : vector<8x8xbf16>, vector<8x8xbf16>, vector<8x8xf32> -> vector<8x8xf32>
    %cst_128 = arith.constant 0.353553385 : f32
    %313 = vector.broadcast %cst_128 : f32 to vector<8x8xf32>
    %314 = arith.mulf %312, %313 : vector<8x8xf32>
    %cst_129 = arith.constant dense<0xFF800000> : vector<8xf32>
    %315 = vector.multi_reduction <maximumf>, %314, %cst_129 [1] : vector<8x8xf32> to vector<8xf32>
    %316 = vector.shape_cast %315 : vector<8xf32> to vector<8x1xf32>
    %317 = vector.broadcast %316 : vector<8x1xf32> to vector<8x8xf32>
    %318 = arith.subf %314, %317 : vector<8x8xf32>
    %319 = math.exp %318 : vector<8x8xf32>
    %cst_130 = arith.constant dense<0.000000e+00> : vector<8xf32>
    %320 = vector.multi_reduction <add>, %319, %cst_130 [1] : vector<8x8xf32> to vector<8xf32>
    %321 = vector.shape_cast %320 : vector<8xf32> to vector<8x1xf32>
    %322 = tpu.reciprocal %321 {approx = true} : vector<8x1xf32> -> vector<8x1xf32>
    %323 = vector.broadcast %322 : vector<8x1xf32> to vector<8x8xf32>
    %324 = arith.mulf %319, %323 : vector<8x8xf32>
    %325 = arith.truncf %324 : vector<8x8xf32> to vector<8x8xbf16>
    %326 = vector.extract_strided_slice %285 {offsets = [0, 8], sizes = [8, 8], strides = [1, 1]} : vector<16x32xf32> to vector<8x8xf32>
    %327 = arith.truncf %326 : vector<8x8xf32> to vector<8x8xbf16>
    %cst_131 = arith.constant dense<0.000000e+00> : vector<8x8xf32>
    %328 = tpu.matmul %325, %327, %cst_131 {dimension_numbers = #tpu.dot_dimension_numbers<[1], [0], [0], [1], [0, 0, 1, 1], [], []>} : vector<8x8xbf16>, vector<8x8xbf16>, vector<8x8xf32> -> vector<8x8xf32>
    %c0_132 = arith.constant 0 : index
    %c8_133 = arith.constant 8 : index
    %329 = vector.load %arg40[%c0_132, %c8_133] : memref<16x32xf32, #tpu.memory_space<vmem>>, vector<8x8xf32>
    tpu.vector_store %arg40[%c0_132, %c8_133], %328 {strides = array<i32>} : memref<16x32xf32, #tpu.memory_space<vmem>>, vector<8x8xf32>,
    %330 = vector.extract_strided_slice %283 {offsets = [0, 16], sizes = [8, 8], strides = [1, 1]} : vector<16x32xf32> to vector<8x8xf32>
    %331 = arith.truncf %330 : vector<8x8xf32> to vector<8x8xbf16>
    %332 = vector.extract_strided_slice %284 {offsets = [0, 16], sizes = [8, 8], strides = [1, 1]} : vector<16x32xf32> to vector<8x8xf32>
    %333 = arith.truncf %332 : vector<8x8xf32> to vector<8x8xbf16>
    %cst_134 = arith.constant dense<0.000000e+00> : vector<8x8xf32>
    %334 = tpu.matmul %331, %333, %cst_134 {dimension_numbers = #tpu.dot_dimension_numbers<[1], [1], [0], [0], [0, 0, 1, 0], [], []>} : vector<8x8xbf16>, vector<8x8xbf16>, vector<8x8xf32> -> vector<8x8xf32>
    %cst_135 = arith.constant 0.353553385 : f32
    %335 = vector.broadcast %cst_135 : f32 to vector<8x8xf32>
    %336 = arith.mulf %334, %335 : vector<8x8xf32>
    %cst_136 = arith.constant dense<0xFF800000> : vector<8xf32>
    %337 = vector.multi_reduction <maximumf>, %336, %cst_136 [1] : vector<8x8xf32> to vector<8xf32>
    %338 = vector.shape_cast %337 : vector<8xf32> to vector<8x1xf32>
    %339 = vector.broadcast %338 : vector<8x1xf32> to vector<8x8xf32>
    %340 = arith.subf %336, %339 : vector<8x8xf32>
    %341 = math.exp %340 : vector<8x8xf32>
    %cst_137 = arith.constant dense<0.000000e+00> : vector<8xf32>
    %342 = vector.multi_reduction <add>, %341, %cst_137 [1] : vector<8x8xf32> to vector<8xf32>
    %343 = vector.shape_cast %342 : vector<8xf32> to vector<8x1xf32>
    %344 = tpu.reciprocal %343 {approx = true} : vector<8x1xf32> -> vector<8x1xf32>
    %345 = vector.broadcast %344 : vector<8x1xf32> to vector<8x8xf32>
    %346 = arith.mulf %341, %345 : vector<8x8xf32>
    %347 = arith.truncf %346 : vector<8x8xf32> to vector<8x8xbf16>
    %348 = vector.extract_strided_slice %285 {offsets = [0, 16], sizes = [8, 8], strides = [1, 1]} : vector<16x32xf32> to vector<8x8xf32>
    %349 = arith.truncf %348 : vector<8x8xf32> to vector<8x8xbf16>
    %cst_138 = arith.constant dense<0.000000e+00> : vector<8x8xf32>
    %350 = tpu.matmul %347, %349, %cst_138 {dimension_numbers = #tpu.dot_dimension_numbers<[1], [0], [0], [1], [0, 0, 1, 1], [], []>} : vector<8x8xbf16>, vector<8x8xbf16>, vector<8x8xf32> -> vector<8x8xf32>
    %c0_139 = arith.constant 0 : index
    %c16_140 = arith.constant 16 : index
    %351 = vector.load %arg40[%c0_139, %c16_140] : memref<16x32xf32, #tpu.memory_space<vmem>>, vector<8x8xf32>
    tpu.vector_store %arg40[%c0_139, %c16_140], %350 {strides = array<i32>} : memref<16x32xf32, #tpu.memory_space<vmem>>, vector<8x8xf32>,
    %352 = vector.extract_strided_slice %283 {offsets = [0, 24], sizes = [8, 8], strides = [1, 1]} : vector<16x32xf32> to vector<8x8xf32>
    %353 = arith.truncf %352 : vector<8x8xf32> to vector<8x8xbf16>
    %354 = vector.extract_strided_slice %284 {offsets = [0, 24], sizes = [8, 8], strides = [1, 1]} : vector<16x32xf32> to vector<8x8xf32>
    %355 = arith.truncf %354 : vector<8x8xf32> to vector<8x8xbf16>
    %cst_141 = arith.constant dense<0.000000e+00> : vector<8x8xf32>
    %356 = tpu.matmul %353, %355, %cst_141 {dimension_numbers = #tpu.dot_dimension_numbers<[1], [1], [0], [0], [0, 0, 1, 0], [], []>} : vector<8x8xbf16>, vector<8x8xbf16>, vector<8x8xf32> -> vector<8x8xf32>
    %cst_142 = arith.constant 0.353553385 : f32
    %357 = vector.broadcast %cst_142 : f32 to vector<8x8xf32>
    %358 = arith.mulf %356, %357 : vector<8x8xf32>
    %cst_143 = arith.constant dense<0xFF800000> : vector<8xf32>
    %359 = vector.multi_reduction <maximumf>, %358, %cst_143 [1] : vector<8x8xf32> to vector<8xf32>
    %360 = vector.shape_cast %359 : vector<8xf32> to vector<8x1xf32>
    %361 = vector.broadcast %360 : vector<8x1xf32> to vector<8x8xf32>
    %362 = arith.subf %358, %361 : vector<8x8xf32>
    %363 = math.exp %362 : vector<8x8xf32>
    %cst_144 = arith.constant dense<0.000000e+00> : vector<8xf32>
    %364 = vector.multi_reduction <add>, %363, %cst_144 [1] : vector<8x8xf32> to vector<8xf32>
    %365 = vector.shape_cast %364 : vector<8xf32> to vector<8x1xf32>
    %366 = tpu.reciprocal %365 {approx = true} : vector<8x1xf32> -> vector<8x1xf32>
    %367 = vector.broadcast %366 : vector<8x1xf32> to vector<8x8xf32>
    %368 = arith.mulf %363, %367 : vector<8x8xf32>
    %369 = arith.truncf %368 : vector<8x8xf32> to vector<8x8xbf16>
    %370 = vector.extract_strided_slice %285 {offsets = [0, 24], sizes = [8, 8], strides = [1, 1]} : vector<16x32xf32> to vector<8x8xf32>
    %371 = arith.truncf %370 : vector<8x8xf32> to vector<8x8xbf16>
    %cst_145 = arith.constant dense<0.000000e+00> : vector<8x8xf32>
    %372 = tpu.matmul %369, %371, %cst_145 {dimension_numbers = #tpu.dot_dimension_numbers<[1], [0], [0], [1], [0, 0, 1, 1], [], []>} : vector<8x8xbf16>, vector<8x8xbf16>, vector<8x8xf32> -> vector<8x8xf32>
    %c0_146 = arith.constant 0 : index
    %c24_147 = arith.constant 24 : index
    %373 = vector.load %arg40[%c0_146, %c24_147] : memref<16x32xf32, #tpu.memory_space<vmem>>, vector<8x8xf32>
    tpu.vector_store %arg40[%c0_146, %c24_147], %372 {strides = array<i32>} : memref<16x32xf32, #tpu.memory_space<vmem>>, vector<8x8xf32>,
    %374 = vector.extract_strided_slice %283 {offsets = [8, 0], sizes = [8, 8], strides = [1, 1]} : vector<16x32xf32> to vector<8x8xf32>
    %375 = arith.truncf %374 : vector<8x8xf32> to vector<8x8xbf16>
    %376 = vector.extract_strided_slice %284 {offsets = [8, 0], sizes = [8, 8], strides = [1, 1]} : vector<16x32xf32> to vector<8x8xf32>
    %377 = arith.truncf %376 : vector<8x8xf32> to vector<8x8xbf16>
    %cst_148 = arith.constant dense<0.000000e+00> : vector<8x8xf32>
    %378 = tpu.matmul %375, %377, %cst_148 {dimension_numbers = #tpu.dot_dimension_numbers<[1], [1], [0], [0], [0, 0, 1, 0], [], []>} : vector<8x8xbf16>, vector<8x8xbf16>, vector<8x8xf32> -> vector<8x8xf32>
    %cst_149 = arith.constant 0.353553385 : f32
    %379 = vector.broadcast %cst_149 : f32 to vector<8x8xf32>
    %380 = arith.mulf %378, %379 : vector<8x8xf32>
    %cst_150 = arith.constant dense<0xFF800000> : vector<8xf32>
    %381 = vector.multi_reduction <maximumf>, %380, %cst_150 [1] : vector<8x8xf32> to vector<8xf32>
    %382 = vector.shape_cast %381 : vector<8xf32> to vector<8x1xf32>
    %383 = vector.broadcast %382 : vector<8x1xf32> to vector<8x8xf32>
    %384 = arith.subf %380, %383 : vector<8x8xf32>
    %385 = math.exp %384 : vector<8x8xf32>
    %cst_151 = arith.constant dense<0.000000e+00> : vector<8xf32>
    %386 = vector.multi_reduction <add>, %385, %cst_151 [1] : vector<8x8xf32> to vector<8xf32>
    %387 = vector.shape_cast %386 : vector<8xf32> to vector<8x1xf32>
    %388 = tpu.reciprocal %387 {approx = true} : vector<8x1xf32> -> vector<8x1xf32>
    %389 = vector.broadcast %388 : vector<8x1xf32> to vector<8x8xf32>
    %390 = arith.mulf %385, %389 : vector<8x8xf32>
    %391 = arith.truncf %390 : vector<8x8xf32> to vector<8x8xbf16>
    %392 = vector.extract_strided_slice %285 {offsets = [8, 0], sizes = [8, 8], strides = [1, 1]} : vector<16x32xf32> to vector<8x8xf32>
    %393 = arith.truncf %392 : vector<8x8xf32> to vector<8x8xbf16>
    %cst_152 = arith.constant dense<0.000000e+00> : vector<8x8xf32>
    %394 = tpu.matmul %391, %393, %cst_152 {dimension_numbers = #tpu.dot_dimension_numbers<[1], [0], [0], [1], [0, 0, 1, 1], [], []>} : vector<8x8xbf16>, vector<8x8xbf16>, vector<8x8xf32> -> vector<8x8xf32>
    %c8_153 = arith.constant 8 : index
    %c0_154 = arith.constant 0 : index
    %395 = vector.load %arg40[%c8_153, %c0_154] : memref<16x32xf32, #tpu.memory_space<vmem>>, vector<8x8xf32>
    tpu.vector_store %arg40[%c8_153, %c0_154], %394 {strides = array<i32>} : memref<16x32xf32, #tpu.memory_space<vmem>>, vector<8x8xf32>,
    %396 = vector.extract_strided_slice %283 {offsets = [8, 8], sizes = [8, 8], strides = [1, 1]} : vector<16x32xf32> to vector<8x8xf32>
    %397 = arith.truncf %396 : vector<8x8xf32> to vector<8x8xbf16>
    %398 = vector.extract_strided_slice %284 {offsets = [8, 8], sizes = [8, 8], strides = [1, 1]} : vector<16x32xf32> to vector<8x8xf32>
    %399 = arith.truncf %398 : vector<8x8xf32> to vector<8x8xbf16>
    %cst_155 = arith.constant dense<0.000000e+00> : vector<8x8xf32>
    %400 = tpu.matmul %397, %399, %cst_155 {dimension_numbers = #tpu.dot_dimension_numbers<[1], [1], [0], [0], [0, 0, 1, 0], [], []>} : vector<8x8xbf16>, vector<8x8xbf16>, vector<8x8xf32> -> vector<8x8xf32>
    %cst_156 = arith.constant 0.353553385 : f32
    %401 = vector.broadcast %cst_156 : f32 to vector<8x8xf32>
    %402 = arith.mulf %400, %401 : vector<8x8xf32>
    %cst_157 = arith.constant dense<0xFF800000> : vector<8xf32>
    %403 = vector.multi_reduction <maximumf>, %402, %cst_157 [1] : vector<8x8xf32> to vector<8xf32>
    %404 = vector.shape_cast %403 : vector<8xf32> to vector<8x1xf32>
    %405 = vector.broadcast %404 : vector<8x1xf32> to vector<8x8xf32>
    %406 = arith.subf %402, %405 : vector<8x8xf32>
    %407 = math.exp %406 : vector<8x8xf32>
    %cst_158 = arith.constant dense<0.000000e+00> : vector<8xf32>
    %408 = vector.multi_reduction <add>, %407, %cst_158 [1] : vector<8x8xf32> to vector<8xf32>
    %409 = vector.shape_cast %408 : vector<8xf32> to vector<8x1xf32>
    %410 = tpu.reciprocal %409 {approx = true} : vector<8x1xf32> -> vector<8x1xf32>
    %411 = vector.broadcast %410 : vector<8x1xf32> to vector<8x8xf32>
    %412 = arith.mulf %407, %411 : vector<8x8xf32>
    %413 = arith.truncf %412 : vector<8x8xf32> to vector<8x8xbf16>
    %414 = vector.extract_strided_slice %285 {offsets = [8, 8], sizes = [8, 8], strides = [1, 1]} : vector<16x32xf32> to vector<8x8xf32>
    %415 = arith.truncf %414 : vector<8x8xf32> to vector<8x8xbf16>
    %cst_159 = arith.constant dense<0.000000e+00> : vector<8x8xf32>
    %416 = tpu.matmul %413, %415, %cst_159 {dimension_numbers = #tpu.dot_dimension_numbers<[1], [0], [0], [1], [0, 0, 1, 1], [], []>} : vector<8x8xbf16>, vector<8x8xbf16>, vector<8x8xf32> -> vector<8x8xf32>
    %c8_160 = arith.constant 8 : index
    %c8_161 = arith.constant 8 : index
    %417 = vector.load %arg40[%c8_160, %c8_161] : memref<16x32xf32, #tpu.memory_space<vmem>>, vector<8x8xf32>
    tpu.vector_store %arg40[%c8_160, %c8_161], %416 {strides = array<i32>} : memref<16x32xf32, #tpu.memory_space<vmem>>, vector<8x8xf32>,
    %418 = vector.extract_strided_slice %283 {offsets = [8, 16], sizes = [8, 8], strides = [1, 1]} : vector<16x32xf32> to vector<8x8xf32>
    %419 = arith.truncf %418 : vector<8x8xf32> to vector<8x8xbf16>
    %420 = vector.extract_strided_slice %284 {offsets = [8, 16], sizes = [8, 8], strides = [1, 1]} : vector<16x32xf32> to vector<8x8xf32>
    %421 = arith.truncf %420 : vector<8x8xf32> to vector<8x8xbf16>
    %cst_162 = arith.constant dense<0.000000e+00> : vector<8x8xf32>
    %422 = tpu.matmul %419, %421, %cst_162 {dimension_numbers = #tpu.dot_dimension_numbers<[1], [1], [0], [0], [0, 0, 1, 0], [], []>} : vector<8x8xbf16>, vector<8x8xbf16>, vector<8x8xf32> -> vector<8x8xf32>
    %cst_163 = arith.constant 0.353553385 : f32
    %423 = vector.broadcast %cst_163 : f32 to vector<8x8xf32>
    %424 = arith.mulf %422, %423 : vector<8x8xf32>
    %cst_164 = arith.constant dense<0xFF800000> : vector<8xf32>
    %425 = vector.multi_reduction <maximumf>, %424, %cst_164 [1] : vector<8x8xf32> to vector<8xf32>
    %426 = vector.shape_cast %425 : vector<8xf32> to vector<8x1xf32>
    %427 = vector.broadcast %426 : vector<8x1xf32> to vector<8x8xf32>
    %428 = arith.subf %424, %427 : vector<8x8xf32>
    %429 = math.exp %428 : vector<8x8xf32>
    %cst_165 = arith.constant dense<0.000000e+00> : vector<8xf32>
    %430 = vector.multi_reduction <add>, %429, %cst_165 [1] : vector<8x8xf32> to vector<8xf32>
    %431 = vector.shape_cast %430 : vector<8xf32> to vector<8x1xf32>
    %432 = tpu.reciprocal %431 {approx = true} : vector<8x1xf32> -> vector<8x1xf32>
    %433 = vector.broadcast %432 : vector<8x1xf32> to vector<8x8xf32>
    %434 = arith.mulf %429, %433 : vector<8x8xf32>
    %435 = arith.truncf %434 : vector<8x8xf32> to vector<8x8xbf16>
    %436 = vector.extract_strided_slice %285 {offsets = [8, 16], sizes = [8, 8], strides = [1, 1]} : vector<16x32xf32> to vector<8x8xf32>
    %437 = arith.truncf %436 : vector<8x8xf32> to vector<8x8xbf16>
    %cst_166 = arith.constant dense<0.000000e+00> : vector<8x8xf32>
    %438 = tpu.matmul %435, %437, %cst_166 {dimension_numbers = #tpu.dot_dimension_numbers<[1], [0], [0], [1], [0, 0, 1, 1], [], []>} : vector<8x8xbf16>, vector<8x8xbf16>, vector<8x8xf32> -> vector<8x8xf32>
    %c8_167 = arith.constant 8 : index
    %c16_168 = arith.constant 16 : index
    %439 = vector.load %arg40[%c8_167, %c16_168] : memref<16x32xf32, #tpu.memory_space<vmem>>, vector<8x8xf32>
    tpu.vector_store %arg40[%c8_167, %c16_168], %438 {strides = array<i32>} : memref<16x32xf32, #tpu.memory_space<vmem>>, vector<8x8xf32>,
    %440 = vector.extract_strided_slice %283 {offsets = [8, 24], sizes = [8, 8], strides = [1, 1]} : vector<16x32xf32> to vector<8x8xf32>
    %441 = arith.truncf %440 : vector<8x8xf32> to vector<8x8xbf16>
    %442 = vector.extract_strided_slice %284 {offsets = [8, 24], sizes = [8, 8], strides = [1, 1]} : vector<16x32xf32> to vector<8x8xf32>
    %443 = arith.truncf %442 : vector<8x8xf32> to vector<8x8xbf16>
    %cst_169 = arith.constant dense<0.000000e+00> : vector<8x8xf32>
    %444 = tpu.matmul %441, %443, %cst_169 {dimension_numbers = #tpu.dot_dimension_numbers<[1], [1], [0], [0], [0, 0, 1, 0], [], []>} : vector<8x8xbf16>, vector<8x8xbf16>, vector<8x8xf32> -> vector<8x8xf32>
    %cst_170 = arith.constant 0.353553385 : f32
    %445 = vector.broadcast %cst_170 : f32 to vector<8x8xf32>
    %446 = arith.mulf %444, %445 : vector<8x8xf32>
    %cst_171 = arith.constant dense<0xFF800000> : vector<8xf32>
    %447 = vector.multi_reduction <maximumf>, %446, %cst_171 [1] : vector<8x8xf32> to vector<8xf32>
    %448 = vector.shape_cast %447 : vector<8xf32> to vector<8x1xf32>
    %449 = vector.broadcast %448 : vector<8x1xf32> to vector<8x8xf32>
    %450 = arith.subf %446, %449 : vector<8x8xf32>
    %451 = math.exp %450 : vector<8x8xf32>
    %cst_172 = arith.constant dense<0.000000e+00> : vector<8xf32>
    %452 = vector.multi_reduction <add>, %451, %cst_172 [1] : vector<8x8xf32> to vector<8xf32>
    %453 = vector.shape_cast %452 : vector<8xf32> to vector<8x1xf32>
    %454 = tpu.reciprocal %453 {approx = true} : vector<8x1xf32> -> vector<8x1xf32>
    %455 = vector.broadcast %454 : vector<8x1xf32> to vector<8x8xf32>
    %456 = arith.mulf %451, %455 : vector<8x8xf32>
    %457 = arith.truncf %456 : vector<8x8xf32> to vector<8x8xbf16>
    %458 = vector.extract_strided_slice %285 {offsets = [8, 24], sizes = [8, 8], strides = [1, 1]} : vector<16x32xf32> to vector<8x8xf32>
    %459 = arith.truncf %458 : vector<8x8xf32> to vector<8x8xbf16>
    %cst_173 = arith.constant dense<0.000000e+00> : vector<8x8xf32>
    %460 = tpu.matmul %457, %459, %cst_173 {dimension_numbers = #tpu.dot_dimension_numbers<[1], [0], [0], [1], [0, 0, 1, 1], [], []>} : vector<8x8xbf16>, vector<8x8xbf16>, vector<8x8xf32> -> vector<8x8xf32>
    %c8_174 = arith.constant 8 : index
    %c24_175 = arith.constant 24 : index
    %461 = vector.load %arg40[%c8_174, %c24_175] : memref<16x32xf32, #tpu.memory_space<vmem>>, vector<8x8xf32>
    tpu.vector_store %arg40[%c8_174, %c24_175], %460 {strides = array<i32>} : memref<16x32xf32, #tpu.memory_space<vmem>>, vector<8x8xf32>,
    %c0_176 = arith.constant 0 : index
    %c0_177 = arith.constant 0 : index
    %462 = vector.load %arg40[%c0_176, %c0_177] : memref<16x32xf32, #tpu.memory_space<vmem>>, vector<16x32xf32>
    %463 = arith.truncf %462 : vector<16x32xf32> to vector<16x32xbf16>
    %cst_178 = arith.constant dense<0.000000e+00> : vector<16x32xf32>
    %464 = tpu.matmul %463, %276, %cst_178 {dimension_numbers = #tpu.dot_dimension_numbers<[1], [1], [0], [0], [0, 0, 1, 0], [], []>} : vector<16x32xbf16>, vector<32x32xbf16>, vector<16x32xf32> -> vector<16x32xf32>
    %465 = vector.broadcast %278 : vector<1x32xf32> to vector<16x32xf32>
    %466 = arith.addf %464, %465 : vector<16x32xf32>
    %467 = arith.addf %270, %466 : vector<16x32xf32>
    %c1_179 = arith.constant 1 : index
    %c0_180 = arith.constant 0 : index
    %c0_181 = arith.constant 0 : index
    %468 = vector.load %arg9[%c1_179, %c0_180, %c0_181] : memref<2x1x32xf32, #tpu.memory_space<vmem>>, vector<1x1x32xf32>
    %469 = vector.shape_cast %468 : vector<1x1x32xf32> to vector<1x32xf32>
    %c1_182 = arith.constant 1 : index
    %c0_183 = arith.constant 0 : index
    %c0_184 = arith.constant 0 : index
    %470 = vector.load %arg10[%c1_182, %c0_183, %c0_184] : memref<2x1x32xf32, #tpu.memory_space<vmem>>, vector<1x1x32xf32>
    %471 = vector.shape_cast %470 : vector<1x1x32xf32> to vector<1x32xf32>
    %cst_185 = arith.constant dense<0.000000e+00> : vector<16xf32>
    %472 = vector.multi_reduction <add>, %467, %cst_185 [1] : vector<16x32xf32> to vector<16xf32>
    %473 = vector.shape_cast %472 : vector<16xf32> to vector<16x1xf32>
    %cst_186 = arith.constant 3.200000e+01 : f32
    %474 = vector.broadcast %cst_186 : f32 to vector<16x1xf32>
    %475 = arith.divf %473, %474 : vector<16x1xf32>
    %476 = vector.broadcast %475 : vector<16x1xf32> to vector<16x32xf32>
    %477 = arith.subf %467, %476 : vector<16x32xf32>
    %478 = arith.mulf %477, %477 : vector<16x32xf32>
    %cst_187 = arith.constant dense<0.000000e+00> : vector<16xf32>
    %479 = vector.multi_reduction <add>, %478, %cst_187 [1] : vector<16x32xf32> to vector<16xf32>
    %480 = vector.shape_cast %479 : vector<16xf32> to vector<16x1xf32>
    %cst_188 = arith.constant 3.200000e+01 : f32
    %481 = vector.broadcast %cst_188 : f32 to vector<16x1xf32>
    %482 = arith.divf %480, %481 : vector<16x1xf32>
    %483 = vector.broadcast %475 : vector<16x1xf32> to vector<16x32xf32>
    %484 = arith.subf %467, %483 : vector<16x32xf32>
    %cst_189 = arith.constant 9.99999974E-6 : f32
    %485 = vector.broadcast %cst_189 : f32 to vector<16x1xf32>
    %486 = arith.addf %482, %485 : vector<16x1xf32>
    %487 = math.rsqrt %486 : vector<16x1xf32>
    %488 = vector.broadcast %487 : vector<16x1xf32> to vector<16x32xf32>
    %489 = arith.mulf %484, %488 : vector<16x32xf32>
    %490 = vector.broadcast %469 : vector<1x32xf32> to vector<16x32xf32>
    %491 = arith.mulf %489, %490 : vector<16x32xf32>
    %492 = vector.broadcast %471 : vector<1x32xf32> to vector<16x32xf32>
    %493 = arith.addf %491, %492 : vector<16x32xf32>
    %c1_190 = arith.constant 1 : index
    %c0_191 = arith.constant 0 : index
    %c0_192 = arith.constant 0 : index
    %494 = vector.load %arg11[%c1_190, %c0_191, %c0_192] : memref<2x64x32xbf16, #tpu.memory_space<vmem>>, vector<1x64x32xbf16>
    %495 = vector.shape_cast %494 : vector<1x64x32xbf16> to vector<64x32xbf16>
    %c1_193 = arith.constant 1 : index
    %c0_194 = arith.constant 0 : index
    %c0_195 = arith.constant 0 : index
    %496 = vector.load %arg12[%c1_193, %c0_194, %c0_195] : memref<2x1x64xf32, #tpu.memory_space<vmem>>, vector<1x1x64xf32>
    %497 = vector.shape_cast %496 : vector<1x1x64xf32> to vector<1x64xf32>
    %c1_196 = arith.constant 1 : index
    %c0_197 = arith.constant 0 : index
    %c0_198 = arith.constant 0 : index
    %498 = vector.load %arg13[%c1_196, %c0_197, %c0_198] : memref<2x32x64xbf16, #tpu.memory_space<vmem>>, vector<1x32x64xbf16>
    %499 = vector.shape_cast %498 : vector<1x32x64xbf16> to vector<32x64xbf16>
    %c1_199 = arith.constant 1 : index
    %c0_200 = arith.constant 0 : index
    %c0_201 = arith.constant 0 : index
    %500 = vector.load %arg14[%c1_199, %c0_200, %c0_201] : memref<2x1x32xf32, #tpu.memory_space<vmem>>, vector<1x1x32xf32>
    %501 = vector.shape_cast %500 : vector<1x1x32xf32> to vector<1x32xf32>
    %502 = arith.truncf %493 : vector<16x32xf32> to vector<16x32xbf16>
    %cst_202 = arith.constant dense<0.000000e+00> : vector<16x64xf32>
    %503 = tpu.matmul %502, %495, %cst_202 {dimension_numbers = #tpu.dot_dimension_numbers<[1], [1], [0], [0], [0, 0, 1, 0], [], []>} : vector<16x32xbf16>, vector<64x32xbf16>, vector<16x64xf32> -> vector<16x64xf32>
    %504 = vector.broadcast %497 : vector<1x64xf32> to vector<16x64xf32>
    %505 = arith.addf %503, %504 : vector<16x64xf32>
    %cst_203 = arith.constant 0.000000e+00 : f32
    %506 = vector.broadcast %cst_203 : f32 to vector<16x64xf32>
    %507 = arith.maximumf %505, %506 : vector<16x64xf32>
    %508 = arith.truncf %507 : vector<16x64xf32> to vector<16x64xbf16>
    %cst_204 = arith.constant dense<0.000000e+00> : vector<16x32xf32>
    %509 = tpu.matmul %508, %499, %cst_204 {dimension_numbers = #tpu.dot_dimension_numbers<[1], [1], [0], [0], [0, 0, 1, 0], [], []>} : vector<16x64xbf16>, vector<32x64xbf16>, vector<16x32xf32> -> vector<16x32xf32>
    %510 = vector.broadcast %501 : vector<1x32xf32> to vector<16x32xf32>
    %511 = arith.addf %509, %510 : vector<16x32xf32>
    %512 = arith.addf %493, %511 : vector<16x32xf32>
    %c1_205 = arith.constant 1 : index
    %c0_206 = arith.constant 0 : index
    %c0_207 = arith.constant 0 : index
    %513 = vector.load %arg15[%c1_205, %c0_206, %c0_207] : memref<2x1x32xf32, #tpu.memory_space<vmem>>, vector<1x1x32xf32>
    %514 = vector.shape_cast %513 : vector<1x1x32xf32> to vector<1x32xf32>
    %c1_208 = arith.constant 1 : index
    %c0_209 = arith.constant 0 : index
    %c0_210 = arith.constant 0 : index
    %515 = vector.load %arg16[%c1_208, %c0_209, %c0_210] : memref<2x1x32xf32, #tpu.memory_space<vmem>>, vector<1x1x32xf32>
    %516 = vector.shape_cast %515 : vector<1x1x32xf32> to vector<1x32xf32>
    %cst_211 = arith.constant dense<0.000000e+00> : vector<16xf32>
    %517 = vector.multi_reduction <add>, %512, %cst_211 [1] : vector<16x32xf32> to vector<16xf32>
    %518 = vector.shape_cast %517 : vector<16xf32> to vector<16x1xf32>
    %cst_212 = arith.constant 3.200000e+01 : f32
    %519 = vector.broadcast %cst_212 : f32 to vector<16x1xf32>
    %520 = arith.divf %518, %519 : vector<16x1xf32>
    %521 = vector.broadcast %520 : vector<16x1xf32> to vector<16x32xf32>
    %522 = arith.subf %512, %521 : vector<16x32xf32>
    %523 = arith.mulf %522, %522 : vector<16x32xf32>
    %cst_213 = arith.constant dense<0.000000e+00> : vector<16xf32>
    %524 = vector.multi_reduction <add>, %523, %cst_213 [1] : vector<16x32xf32> to vector<16xf32>
    %525 = vector.shape_cast %524 : vector<16xf32> to vector<16x1xf32>
    %cst_214 = arith.constant 3.200000e+01 : f32
    %526 = vector.broadcast %cst_214 : f32 to vector<16x1xf32>
    %527 = arith.divf %525, %526 : vector<16x1xf32>
    %528 = vector.broadcast %520 : vector<16x1xf32> to vector<16x32xf32>
    %529 = arith.subf %512, %528 : vector<16x32xf32>
    %cst_215 = arith.constant 9.99999974E-6 : f32
    %530 = vector.broadcast %cst_215 : f32 to vector<16x1xf32>
    %531 = arith.addf %527, %530 : vector<16x1xf32>
    %532 = math.rsqrt %531 : vector<16x1xf32>
    %533 = vector.broadcast %532 : vector<16x1xf32> to vector<16x32xf32>
    %534 = arith.mulf %529, %533 : vector<16x32xf32>
    %535 = vector.broadcast %514 : vector<1x32xf32> to vector<16x32xf32>
    %536 = arith.mulf %534, %535 : vector<16x32xf32>
    %537 = vector.broadcast %516 : vector<1x32xf32> to vector<16x32xf32>
    %538 = arith.addf %536, %537 : vector<16x32xf32>
    %c0_216 = arith.constant 0 : index
    %c0_217 = arith.constant 0 : index
    %539 = vector.load %arg17[%c0_216, %c0_217] : memref<1x32xf32, #tpu.memory_space<vmem>>, vector<1x32xf32>
    %c0_218 = arith.constant 0 : index
    %c0_219 = arith.constant 0 : index
    %540 = vector.load %arg18[%c0_218, %c0_219] : memref<1x32xf32, #tpu.memory_space<vmem>>, vector<1x32xf32>
    %cst_220 = arith.constant dense<0.000000e+00> : vector<16xf32>
    %541 = vector.multi_reduction <add>, %538, %cst_220 [1] : vector<16x32xf32> to vector<16xf32>
    %542 = vector.shape_cast %541 : vector<16xf32> to vector<16x1xf32>
    %cst_221 = arith.constant 3.200000e+01 : f32
    %543 = vector.broadcast %cst_221 : f32 to vector<16x1xf32>
    %544 = arith.divf %542, %543 : vector<16x1xf32>
    %545 = vector.broadcast %544 : vector<16x1xf32> to vector<16x32xf32>
    %546 = arith.subf %538, %545 : vector<16x32xf32>
    %547 = arith.mulf %546, %546 : vector<16x32xf32>
    %cst_222 = arith.constant dense<0.000000e+00> : vector<16xf32>
    %548 = vector.multi_reduction <add>, %547, %cst_222 [1] : vector<16x32xf32> to vector<16xf32>
    %549 = vector.shape_cast %548 : vector<16xf32> to vector<16x1xf32>
    %cst_223 = arith.constant 3.200000e+01 : f32
    %550 = vector.broadcast %cst_223 : f32 to vector<16x1xf32>
    %551 = arith.divf %549, %550 : vector<16x1xf32>
    %552 = vector.broadcast %544 : vector<16x1xf32> to vector<16x32xf32>
    %553 = arith.subf %538, %552 : vector<16x32xf32>
    %cst_224 = arith.constant 9.99999974E-6 : f32
    %554 = vector.broadcast %cst_224 : f32 to vector<16x1xf32>
    %555 = arith.addf %551, %554 : vector<16x1xf32>
    %556 = math.rsqrt %555 : vector<16x1xf32>
    %557 = vector.broadcast %556 : vector<16x1xf32> to vector<16x32xf32>
    %558 = arith.mulf %553, %557 : vector<16x32xf32>
    %559 = vector.broadcast %539 : vector<1x32xf32> to vector<16x32xf32>
    %560 = arith.mulf %558, %559 : vector<16x32xf32>
    %561 = vector.broadcast %540 : vector<1x32xf32> to vector<16x32xf32>
    %562 = arith.addf %560, %561 : vector<16x32xf32>
    %c0_225 = arith.constant 0 : index
    %c0_226 = arith.constant 0 : index
    %563 = vector.load %arg2[%c0_225, %c0_226] : memref<16x32xf32, #tpu.memory_space<vmem>>, vector<16x32xf32>
    %c0_227 = arith.constant 0 : index
    %c0_228 = arith.constant 0 : index
    %564 = vector.load %arg4[%c0_227, %c0_228] : memref<16x32xf32, #tpu.memory_space<vmem>>, vector<16x32xf32>
    %565 = arith.addf %563, %564 : vector<16x32xf32>
    %c0_229 = arith.constant 0 : index
    %c0_230 = arith.constant 0 : index
    %c0_231 = arith.constant 0 : index
    %566 = vector.load %arg19[%c0_229, %c0_230, %c0_231] : memref<2x96x32xbf16, #tpu.memory_space<vmem>>, vector<1x96x32xbf16>
    %567 = vector.shape_cast %566 : vector<1x96x32xbf16> to vector<96x32xbf16>
    %c0_232 = arith.constant 0 : index
    %c0_233 = arith.constant 0 : index
    %c0_234 = arith.constant 0 : index
    %568 = vector.load %arg20[%c0_232, %c0_233, %c0_234] : memref<2x1x96xf32, #tpu.memory_space<vmem>>, vector<1x1x96xf32>
    %569 = vector.shape_cast %568 : vector<1x1x96xf32> to vector<1x96xf32>
    %c0_235 = arith.constant 0 : index
    %c0_236 = arith.constant 0 : index
    %c0_237 = arith.constant 0 : index
    %570 = vector.load %arg21[%c0_235, %c0_236, %c0_237] : memref<2x32x32xbf16, #tpu.memory_space<vmem>>, vector<1x32x32xbf16>
    %571 = vector.shape_cast %570 : vector<1x32x32xbf16> to vector<32x32xbf16>
    %c0_238 = arith.constant 0 : index
    %c0_239 = arith.constant 0 : index
    %c0_240 = arith.constant 0 : index
    %572 = vector.load %arg22[%c0_238, %c0_239, %c0_240] : memref<2x1x32xf32, #tpu.memory_space<vmem>>, vector<1x1x32xf32>
    %573 = vector.shape_cast %572 : vector<1x1x32xf32> to vector<1x32xf32>
    %574 = arith.truncf %565 : vector<16x32xf32> to vector<16x32xbf16>
    %cst_241 = arith.constant dense<0.000000e+00> : vector<16x96xf32>
    %575 = tpu.matmul %574, %567, %cst_241 {dimension_numbers = #tpu.dot_dimension_numbers<[1], [1], [0], [0], [0, 0, 1, 0], [], []>} : vector<16x32xbf16>, vector<96x32xbf16>, vector<16x96xf32> -> vector<16x96xf32>
    %576 = vector.broadcast %569 : vector<1x96xf32> to vector<16x96xf32>
    %577 = arith.addf %575, %576 : vector<16x96xf32>
    %578 = vector.extract_strided_slice %577 {offsets = [0, 0], sizes = [16, 32], strides = [1, 1]} : vector<16x96xf32> to vector<16x32xf32>
    %579 = vector.extract_strided_slice %577 {offsets = [0, 32], sizes = [16, 32], strides = [1, 1]} : vector<16x96xf32> to vector<16x32xf32>
    %580 = vector.extract_strided_slice %577 {offsets = [0, 64], sizes = [16, 32], strides = [1, 1]} : vector<16x96xf32> to vector<16x32xf32>
    %581 = vector.extract_strided_slice %578 {offsets = [0, 0], sizes = [8, 8], strides = [1, 1]} : vector<16x32xf32> to vector<8x8xf32>
    %582 = arith.truncf %581 : vector<8x8xf32> to vector<8x8xbf16>
    %583 = vector.extract_strided_slice %579 {offsets = [0, 0], sizes = [8, 8], strides = [1, 1]} : vector<16x32xf32> to vector<8x8xf32>
    %584 = arith.truncf %583 : vector<8x8xf32> to vector<8x8xbf16>
    %cst_242 = arith.constant dense<0.000000e+00> : vector<8x8xf32>
    %585 = tpu.matmul %582, %584, %cst_242 {dimension_numbers = #tpu.dot_dimension_numbers<[1], [1], [0], [0], [0, 0, 1, 0], [], []>} : vector<8x8xbf16>, vector<8x8xbf16>, vector<8x8xf32> -> vector<8x8xf32>
    %cst_243 = arith.constant 0.353553385 : f32
    %586 = vector.broadcast %cst_243 : f32 to vector<8x8xf32>
    %587 = arith.mulf %585, %586 : vector<8x8xf32>
    %cst_244 = arith.constant dense<0xFF800000> : vector<8xf32>
    %588 = vector.multi_reduction <maximumf>, %587, %cst_244 [1] : vector<8x8xf32> to vector<8xf32>
    %589 = vector.shape_cast %588 : vector<8xf32> to vector<8x1xf32>
    %590 = vector.broadcast %589 : vector<8x1xf32> to vector<8x8xf32>
    %591 = arith.subf %587, %590 : vector<8x8xf32>
    %592 = math.exp %591 : vector<8x8xf32>
    %cst_245 = arith.constant dense<0.000000e+00> : vector<8xf32>
    %593 = vector.multi_reduction <add>, %592, %cst_245 [1] : vector<8x8xf32> to vector<8xf32>
    %594 = vector.shape_cast %593 : vector<8xf32> to vector<8x1xf32>
    %595 = tpu.reciprocal %594 {approx = true} : vector<8x1xf32> -> vector<8x1xf32>
    %596 = vector.broadcast %595 : vector<8x1xf32> to vector<8x8xf32>
    %597 = arith.mulf %592, %596 : vector<8x8xf32>
    %598 = arith.truncf %597 : vector<8x8xf32> to vector<8x8xbf16>
    %599 = vector.extract_strided_slice %580 {offsets = [0, 0], sizes = [8, 8], strides = [1, 1]} : vector<16x32xf32> to vector<8x8xf32>
    %600 = arith.truncf %599 : vector<8x8xf32> to vector<8x8xbf16>
    %cst_246 = arith.constant dense<0.000000e+00> : vector<8x8xf32>
    %601 = tpu.matmul %598, %600, %cst_246 {dimension_numbers = #tpu.dot_dimension_numbers<[1], [0], [0], [1], [0, 0, 1, 1], [], []>} : vector<8x8xbf16>, vector<8x8xbf16>, vector<8x8xf32> -> vector<8x8xf32>
    %c0_247 = arith.constant 0 : index
    %c0_248 = arith.constant 0 : index
    %602 = vector.load %arg40[%c0_247, %c0_248] : memref<16x32xf32, #tpu.memory_space<vmem>>, vector<8x8xf32>
    tpu.vector_store %arg40[%c0_247, %c0_248], %601 {strides = array<i32>} : memref<16x32xf32, #tpu.memory_space<vmem>>, vector<8x8xf32>,
    %603 = vector.extract_strided_slice %578 {offsets = [0, 8], sizes = [8, 8], strides = [1, 1]} : vector<16x32xf32> to vector<8x8xf32>
    %604 = arith.truncf %603 : vector<8x8xf32> to vector<8x8xbf16>
    %605 = vector.extract_strided_slice %579 {offsets = [0, 8], sizes = [8, 8], strides = [1, 1]} : vector<16x32xf32> to vector<8x8xf32>
    %606 = arith.truncf %605 : vector<8x8xf32> to vector<8x8xbf16>
    %cst_249 = arith.constant dense<0.000000e+00> : vector<8x8xf32>
    %607 = tpu.matmul %604, %606, %cst_249 {dimension_numbers = #tpu.dot_dimension_numbers<[1], [1], [0], [0], [0, 0, 1, 0], [], []>} : vector<8x8xbf16>, vector<8x8xbf16>, vector<8x8xf32> -> vector<8x8xf32>
    %cst_250 = arith.constant 0.353553385 : f32
    %608 = vector.broadcast %cst_250 : f32 to vector<8x8xf32>
    %609 = arith.mulf %607, %608 : vector<8x8xf32>
    %cst_251 = arith.constant dense<0xFF800000> : vector<8xf32>
    %610 = vector.multi_reduction <maximumf>, %609, %cst_251 [1] : vector<8x8xf32> to vector<8xf32>
    %611 = vector.shape_cast %610 : vector<8xf32> to vector<8x1xf32>
    %612 = vector.broadcast %611 : vector<8x1xf32> to vector<8x8xf32>
    %613 = arith.subf %609, %612 : vector<8x8xf32>
    %614 = math.exp %613 : vector<8x8xf32>
    %cst_252 = arith.constant dense<0.000000e+00> : vector<8xf32>
    %615 = vector.multi_reduction <add>, %614, %cst_252 [1] : vector<8x8xf32> to vector<8xf32>
    %616 = vector.shape_cast %615 : vector<8xf32> to vector<8x1xf32>
    %617 = tpu.reciprocal %616 {approx = true} : vector<8x1xf32> -> vector<8x1xf32>
    %618 = vector.broadcast %617 : vector<8x1xf32> to vector<8x8xf32>
    %619 = arith.mulf %614, %618 : vector<8x8xf32>
    %620 = arith.truncf %619 : vector<8x8xf32> to vector<8x8xbf16>
    %621 = vector.extract_strided_slice %580 {offsets = [0, 8], sizes = [8, 8], strides = [1, 1]} : vector<16x32xf32> to vector<8x8xf32>
    %622 = arith.truncf %621 : vector<8x8xf32> to vector<8x8xbf16>
    %cst_253 = arith.constant dense<0.000000e+00> : vector<8x8xf32>
    %623 = tpu.matmul %620, %622, %cst_253 {dimension_numbers = #tpu.dot_dimension_numbers<[1], [0], [0], [1], [0, 0, 1, 1], [], []>} : vector<8x8xbf16>, vector<8x8xbf16>, vector<8x8xf32> -> vector<8x8xf32>
    %c0_254 = arith.constant 0 : index
    %c8_255 = arith.constant 8 : index
    %624 = vector.load %arg40[%c0_254, %c8_255] : memref<16x32xf32, #tpu.memory_space<vmem>>, vector<8x8xf32>
    tpu.vector_store %arg40[%c0_254, %c8_255], %623 {strides = array<i32>} : memref<16x32xf32, #tpu.memory_space<vmem>>, vector<8x8xf32>,
    %625 = vector.extract_strided_slice %578 {offsets = [0, 16], sizes = [8, 8], strides = [1, 1]} : vector<16x32xf32> to vector<8x8xf32>
    %626 = arith.truncf %625 : vector<8x8xf32> to vector<8x8xbf16>
    %627 = vector.extract_strided_slice %579 {offsets = [0, 16], sizes = [8, 8], strides = [1, 1]} : vector<16x32xf32> to vector<8x8xf32>
    %628 = arith.truncf %627 : vector<8x8xf32> to vector<8x8xbf16>
    %cst_256 = arith.constant dense<0.000000e+00> : vector<8x8xf32>
    %629 = tpu.matmul %626, %628, %cst_256 {dimension_numbers = #tpu.dot_dimension_numbers<[1], [1], [0], [0], [0, 0, 1, 0], [], []>} : vector<8x8xbf16>, vector<8x8xbf16>, vector<8x8xf32> -> vector<8x8xf32>
    %cst_257 = arith.constant 0.353553385 : f32
    %630 = vector.broadcast %cst_257 : f32 to vector<8x8xf32>
    %631 = arith.mulf %629, %630 : vector<8x8xf32>
    %cst_258 = arith.constant dense<0xFF800000> : vector<8xf32>
    %632 = vector.multi_reduction <maximumf>, %631, %cst_258 [1] : vector<8x8xf32> to vector<8xf32>
    %633 = vector.shape_cast %632 : vector<8xf32> to vector<8x1xf32>
    %634 = vector.broadcast %633 : vector<8x1xf32> to vector<8x8xf32>
    %635 = arith.subf %631, %634 : vector<8x8xf32>
    %636 = math.exp %635 : vector<8x8xf32>
    %cst_259 = arith.constant dense<0.000000e+00> : vector<8xf32>
    %637 = vector.multi_reduction <add>, %636, %cst_259 [1] : vector<8x8xf32> to vector<8xf32>
    %638 = vector.shape_cast %637 : vector<8xf32> to vector<8x1xf32>
    %639 = tpu.reciprocal %638 {approx = true} : vector<8x1xf32> -> vector<8x1xf32>
    %640 = vector.broadcast %639 : vector<8x1xf32> to vector<8x8xf32>
    %641 = arith.mulf %636, %640 : vector<8x8xf32>
    %642 = arith.truncf %641 : vector<8x8xf32> to vector<8x8xbf16>
    %643 = vector.extract_strided_slice %580 {offsets = [0, 16], sizes = [8, 8], strides = [1, 1]} : vector<16x32xf32> to vector<8x8xf32>
    %644 = arith.truncf %643 : vector<8x8xf32> to vector<8x8xbf16>
    %cst_260 = arith.constant dense<0.000000e+00> : vector<8x8xf32>
    %645 = tpu.matmul %642, %644, %cst_260 {dimension_numbers = #tpu.dot_dimension_numbers<[1], [0], [0], [1], [0, 0, 1, 1], [], []>} : vector<8x8xbf16>, vector<8x8xbf16>, vector<8x8xf32> -> vector<8x8xf32>
    %c0_261 = arith.constant 0 : index
    %c16_262 = arith.constant 16 : index
    %646 = vector.load %arg40[%c0_261, %c16_262] : memref<16x32xf32, #tpu.memory_space<vmem>>, vector<8x8xf32>
    tpu.vector_store %arg40[%c0_261, %c16_262], %645 {strides = array<i32>} : memref<16x32xf32, #tpu.memory_space<vmem>>, vector<8x8xf32>,
    %647 = vector.extract_strided_slice %578 {offsets = [0, 24], sizes = [8, 8], strides = [1, 1]} : vector<16x32xf32> to vector<8x8xf32>
    %648 = arith.truncf %647 : vector<8x8xf32> to vector<8x8xbf16>
    %649 = vector.extract_strided_slice %579 {offsets = [0, 24], sizes = [8, 8], strides = [1, 1]} : vector<16x32xf32> to vector<8x8xf32>
    %650 = arith.truncf %649 : vector<8x8xf32> to vector<8x8xbf16>
    %cst_263 = arith.constant dense<0.000000e+00> : vector<8x8xf32>
    %651 = tpu.matmul %648, %650, %cst_263 {dimension_numbers = #tpu.dot_dimension_numbers<[1], [1], [0], [0], [0, 0, 1, 0], [], []>} : vector<8x8xbf16>, vector<8x8xbf16>, vector<8x8xf32> -> vector<8x8xf32>
    %cst_264 = arith.constant 0.353553385 : f32
    %652 = vector.broadcast %cst_264 : f32 to vector<8x8xf32>
    %653 = arith.mulf %651, %652 : vector<8x8xf32>
    %cst_265 = arith.constant dense<0xFF800000> : vector<8xf32>
    %654 = vector.multi_reduction <maximumf>, %653, %cst_265 [1] : vector<8x8xf32> to vector<8xf32>
    %655 = vector.shape_cast %654 : vector<8xf32> to vector<8x1xf32>
    %656 = vector.broadcast %655 : vector<8x1xf32> to vector<8x8xf32>
    %657 = arith.subf %653, %656 : vector<8x8xf32>
    %658 = math.exp %657 : vector<8x8xf32>
    %cst_266 = arith.constant dense<0.000000e+00> : vector<8xf32>
    %659 = vector.multi_reduction <add>, %658, %cst_266 [1] : vector<8x8xf32> to vector<8xf32>
    %660 = vector.shape_cast %659 : vector<8xf32> to vector<8x1xf32>
    %661 = tpu.reciprocal %660 {approx = true} : vector<8x1xf32> -> vector<8x1xf32>
    %662 = vector.broadcast %661 : vector<8x1xf32> to vector<8x8xf32>
    %663 = arith.mulf %658, %662 : vector<8x8xf32>
    %664 = arith.truncf %663 : vector<8x8xf32> to vector<8x8xbf16>
    %665 = vector.extract_strided_slice %580 {offsets = [0, 24], sizes = [8, 8], strides = [1, 1]} : vector<16x32xf32> to vector<8x8xf32>
    %666 = arith.truncf %665 : vector<8x8xf32> to vector<8x8xbf16>
    %cst_267 = arith.constant dense<0.000000e+00> : vector<8x8xf32>
    %667 = tpu.matmul %664, %666, %cst_267 {dimension_numbers = #tpu.dot_dimension_numbers<[1], [0], [0], [1], [0, 0, 1, 1], [], []>} : vector<8x8xbf16>, vector<8x8xbf16>, vector<8x8xf32> -> vector<8x8xf32>
    %c0_268 = arith.constant 0 : index
    %c24_269 = arith.constant 24 : index
    %668 = vector.load %arg40[%c0_268, %c24_269] : memref<16x32xf32, #tpu.memory_space<vmem>>, vector<8x8xf32>
    tpu.vector_store %arg40[%c0_268, %c24_269], %667 {strides = array<i32>} : memref<16x32xf32, #tpu.memory_space<vmem>>, vector<8x8xf32>,
    %669 = vector.extract_strided_slice %578 {offsets = [8, 0], sizes = [8, 8], strides = [1, 1]} : vector<16x32xf32> to vector<8x8xf32>
    %670 = arith.truncf %669 : vector<8x8xf32> to vector<8x8xbf16>
    %671 = vector.extract_strided_slice %579 {offsets = [8, 0], sizes = [8, 8], strides = [1, 1]} : vector<16x32xf32> to vector<8x8xf32>
    %672 = arith.truncf %671 : vector<8x8xf32> to vector<8x8xbf16>
    %cst_270 = arith.constant dense<0.000000e+00> : vector<8x8xf32>
    %673 = tpu.matmul %670, %672, %cst_270 {dimension_numbers = #tpu.dot_dimension_numbers<[1], [1], [0], [0], [0, 0, 1, 0], [], []>} : vector<8x8xbf16>, vector<8x8xbf16>, vector<8x8xf32> -> vector<8x8xf32>
    %cst_271 = arith.constant 0.353553385 : f32
    %674 = vector.broadcast %cst_271 : f32 to vector<8x8xf32>
    %675 = arith.mulf %673, %674 : vector<8x8xf32>
    %cst_272 = arith.constant dense<0xFF800000> : vector<8xf32>
    %676 = vector.multi_reduction <maximumf>, %675, %cst_272 [1] : vector<8x8xf32> to vector<8xf32>
    %677 = vector.shape_cast %676 : vector<8xf32> to vector<8x1xf32>
    %678 = vector.broadcast %677 : vector<8x1xf32> to vector<8x8xf32>
    %679 = arith.subf %675, %678 : vector<8x8xf32>
    %680 = math.exp %679 : vector<8x8xf32>
    %cst_273 = arith.constant dense<0.000000e+00> : vector<8xf32>
    %681 = vector.multi_reduction <add>, %680, %cst_273 [1] : vector<8x8xf32> to vector<8xf32>
    %682 = vector.shape_cast %681 : vector<8xf32> to vector<8x1xf32>
    %683 = tpu.reciprocal %682 {approx = true} : vector<8x1xf32> -> vector<8x1xf32>
    %684 = vector.broadcast %683 : vector<8x1xf32> to vector<8x8xf32>
    %685 = arith.mulf %680, %684 : vector<8x8xf32>
    %686 = arith.truncf %685 : vector<8x8xf32> to vector<8x8xbf16>
    %687 = vector.extract_strided_slice %580 {offsets = [8, 0], sizes = [8, 8], strides = [1, 1]} : vector<16x32xf32> to vector<8x8xf32>
    %688 = arith.truncf %687 : vector<8x8xf32> to vector<8x8xbf16>
    %cst_274 = arith.constant dense<0.000000e+00> : vector<8x8xf32>
    %689 = tpu.matmul %686, %688, %cst_274 {dimension_numbers = #tpu.dot_dimension_numbers<[1], [0], [0], [1], [0, 0, 1, 1], [], []>} : vector<8x8xbf16>, vector<8x8xbf16>, vector<8x8xf32> -> vector<8x8xf32>
    %c8_275 = arith.constant 8 : index
    %c0_276 = arith.constant 0 : index
    %690 = vector.load %arg40[%c8_275, %c0_276] : memref<16x32xf32, #tpu.memory_space<vmem>>, vector<8x8xf32>
    tpu.vector_store %arg40[%c8_275, %c0_276], %689 {strides = array<i32>} : memref<16x32xf32, #tpu.memory_space<vmem>>, vector<8x8xf32>,
    %691 = vector.extract_strided_slice %578 {offsets = [8, 8], sizes = [8, 8], strides = [1, 1]} : vector<16x32xf32> to vector<8x8xf32>
    %692 = arith.truncf %691 : vector<8x8xf32> to vector<8x8xbf16>
    %693 = vector.extract_strided_slice %579 {offsets = [8, 8], sizes = [8, 8], strides = [1, 1]} : vector<16x32xf32> to vector<8x8xf32>
    %694 = arith.truncf %693 : vector<8x8xf32> to vector<8x8xbf16>
    %cst_277 = arith.constant dense<0.000000e+00> : vector<8x8xf32>
    %695 = tpu.matmul %692, %694, %cst_277 {dimension_numbers = #tpu.dot_dimension_numbers<[1], [1], [0], [0], [0, 0, 1, 0], [], []>} : vector<8x8xbf16>, vector<8x8xbf16>, vector<8x8xf32> -> vector<8x8xf32>
    %cst_278 = arith.constant 0.353553385 : f32
    %696 = vector.broadcast %cst_278 : f32 to vector<8x8xf32>
    %697 = arith.mulf %695, %696 : vector<8x8xf32>
    %cst_279 = arith.constant dense<0xFF800000> : vector<8xf32>
    %698 = vector.multi_reduction <maximumf>, %697, %cst_279 [1] : vector<8x8xf32> to vector<8xf32>
    %699 = vector.shape_cast %698 : vector<8xf32> to vector<8x1xf32>
    %700 = vector.broadcast %699 : vector<8x1xf32> to vector<8x8xf32>
    %701 = arith.subf %697, %700 : vector<8x8xf32>
    %702 = math.exp %701 : vector<8x8xf32>
    %cst_280 = arith.constant dense<0.000000e+00> : vector<8xf32>
    %703 = vector.multi_reduction <add>, %702, %cst_280 [1] : vector<8x8xf32> to vector<8xf32>
    %704 = vector.shape_cast %703 : vector<8xf32> to vector<8x1xf32>
    %705 = tpu.reciprocal %704 {approx = true} : vector<8x1xf32> -> vector<8x1xf32>
    %706 = vector.broadcast %705 : vector<8x1xf32> to vector<8x8xf32>
    %707 = arith.mulf %702, %706 : vector<8x8xf32>
    %708 = arith.truncf %707 : vector<8x8xf32> to vector<8x8xbf16>
    %709 = vector.extract_strided_slice %580 {offsets = [8, 8], sizes = [8, 8], strides = [1, 1]} : vector<16x32xf32> to vector<8x8xf32>
    %710 = arith.truncf %709 : vector<8x8xf32> to vector<8x8xbf16>
    %cst_281 = arith.constant dense<0.000000e+00> : vector<8x8xf32>
    %711 = tpu.matmul %708, %710, %cst_281 {dimension_numbers = #tpu.dot_dimension_numbers<[1], [0], [0], [1], [0, 0, 1, 1], [], []>} : vector<8x8xbf16>, vector<8x8xbf16>, vector<8x8xf32> -> vector<8x8xf32>
    %c8_282 = arith.constant 8 : index
    %c8_283 = arith.constant 8 : index
    %712 = vector.load %arg40[%c8_282, %c8_283] : memref<16x32xf32, #tpu.memory_space<vmem>>, vector<8x8xf32>
    tpu.vector_store %arg40[%c8_282, %c8_283], %711 {strides = array<i32>} : memref<16x32xf32, #tpu.memory_space<vmem>>, vector<8x8xf32>,
    %713 = vector.extract_strided_slice %578 {offsets = [8, 16], sizes = [8, 8], strides = [1, 1]} : vector<16x32xf32> to vector<8x8xf32>
    %714 = arith.truncf %713 : vector<8x8xf32> to vector<8x8xbf16>
    %715 = vector.extract_strided_slice %579 {offsets = [8, 16], sizes = [8, 8], strides = [1, 1]} : vector<16x32xf32> to vector<8x8xf32>
    %716 = arith.truncf %715 : vector<8x8xf32> to vector<8x8xbf16>
    %cst_284 = arith.constant dense<0.000000e+00> : vector<8x8xf32>
    %717 = tpu.matmul %714, %716, %cst_284 {dimension_numbers = #tpu.dot_dimension_numbers<[1], [1], [0], [0], [0, 0, 1, 0], [], []>} : vector<8x8xbf16>, vector<8x8xbf16>, vector<8x8xf32> -> vector<8x8xf32>
    %cst_285 = arith.constant 0.353553385 : f32
    %718 = vector.broadcast %cst_285 : f32 to vector<8x8xf32>
    %719 = arith.mulf %717, %718 : vector<8x8xf32>
    %cst_286 = arith.constant dense<0xFF800000> : vector<8xf32>
    %720 = vector.multi_reduction <maximumf>, %719, %cst_286 [1] : vector<8x8xf32> to vector<8xf32>
    %721 = vector.shape_cast %720 : vector<8xf32> to vector<8x1xf32>
    %722 = vector.broadcast %721 : vector<8x1xf32> to vector<8x8xf32>
    %723 = arith.subf %719, %722 : vector<8x8xf32>
    %724 = math.exp %723 : vector<8x8xf32>
    %cst_287 = arith.constant dense<0.000000e+00> : vector<8xf32>
    %725 = vector.multi_reduction <add>, %724, %cst_287 [1] : vector<8x8xf32> to vector<8xf32>
    %726 = vector.shape_cast %725 : vector<8xf32> to vector<8x1xf32>
    %727 = tpu.reciprocal %726 {approx = true} : vector<8x1xf32> -> vector<8x1xf32>
    %728 = vector.broadcast %727 : vector<8x1xf32> to vector<8x8xf32>
    %729 = arith.mulf %724, %728 : vector<8x8xf32>
    %730 = arith.truncf %729 : vector<8x8xf32> to vector<8x8xbf16>
    %731 = vector.extract_strided_slice %580 {offsets = [8, 16], sizes = [8, 8], strides = [1, 1]} : vector<16x32xf32> to vector<8x8xf32>
    %732 = arith.truncf %731 : vector<8x8xf32> to vector<8x8xbf16>
    %cst_288 = arith.constant dense<0.000000e+00> : vector<8x8xf32>
    %733 = tpu.matmul %730, %732, %cst_288 {dimension_numbers = #tpu.dot_dimension_numbers<[1], [0], [0], [1], [0, 0, 1, 1], [], []>} : vector<8x8xbf16>, vector<8x8xbf16>, vector<8x8xf32> -> vector<8x8xf32>
    %c8_289 = arith.constant 8 : index
    %c16_290 = arith.constant 16 : index
    %734 = vector.load %arg40[%c8_289, %c16_290] : memref<16x32xf32, #tpu.memory_space<vmem>>, vector<8x8xf32>
    tpu.vector_store %arg40[%c8_289, %c16_290], %733 {strides = array<i32>} : memref<16x32xf32, #tpu.memory_space<vmem>>, vector<8x8xf32>,
    %735 = vector.extract_strided_slice %578 {offsets = [8, 24], sizes = [8, 8], strides = [1, 1]} : vector<16x32xf32> to vector<8x8xf32>
    %736 = arith.truncf %735 : vector<8x8xf32> to vector<8x8xbf16>
    %737 = vector.extract_strided_slice %579 {offsets = [8, 24], sizes = [8, 8], strides = [1, 1]} : vector<16x32xf32> to vector<8x8xf32>
    %738 = arith.truncf %737 : vector<8x8xf32> to vector<8x8xbf16>
    %cst_291 = arith.constant dense<0.000000e+00> : vector<8x8xf32>
    %739 = tpu.matmul %736, %738, %cst_291 {dimension_numbers = #tpu.dot_dimension_numbers<[1], [1], [0], [0], [0, 0, 1, 0], [], []>} : vector<8x8xbf16>, vector<8x8xbf16>, vector<8x8xf32> -> vector<8x8xf32>
    %cst_292 = arith.constant 0.353553385 : f32
    %740 = vector.broadcast %cst_292 : f32 to vector<8x8xf32>
    %741 = arith.mulf %739, %740 : vector<8x8xf32>
    %cst_293 = arith.constant dense<0xFF800000> : vector<8xf32>
    %742 = vector.multi_reduction <maximumf>, %741, %cst_293 [1] : vector<8x8xf32> to vector<8xf32>
    %743 = vector.shape_cast %742 : vector<8xf32> to vector<8x1xf32>
    %744 = vector.broadcast %743 : vector<8x1xf32> to vector<8x8xf32>
    %745 = arith.subf %741, %744 : vector<8x8xf32>
    %746 = math.exp %745 : vector<8x8xf32>
    %cst_294 = arith.constant dense<0.000000e+00> : vector<8xf32>
    %747 = vector.multi_reduction <add>, %746, %cst_294 [1] : vector<8x8xf32> to vector<8xf32>
    %748 = vector.shape_cast %747 : vector<8xf32> to vector<8x1xf32>
    %749 = tpu.reciprocal %748 {approx = true} : vector<8x1xf32> -> vector<8x1xf32>
    %750 = vector.broadcast %749 : vector<8x1xf32> to vector<8x8xf32>
    %751 = arith.mulf %746, %750 : vector<8x8xf32>
    %752 = arith.truncf %751 : vector<8x8xf32> to vector<8x8xbf16>
    %753 = vector.extract_strided_slice %580 {offsets = [8, 24], sizes = [8, 8], strides = [1, 1]} : vector<16x32xf32> to vector<8x8xf32>
    %754 = arith.truncf %753 : vector<8x8xf32> to vector<8x8xbf16>
    %cst_295 = arith.constant dense<0.000000e+00> : vector<8x8xf32>
    %755 = tpu.matmul %752, %754, %cst_295 {dimension_numbers = #tpu.dot_dimension_numbers<[1], [0], [0], [1], [0, 0, 1, 1], [], []>} : vector<8x8xbf16>, vector<8x8xbf16>, vector<8x8xf32> -> vector<8x8xf32>
    %c8_296 = arith.constant 8 : index
    %c24_297 = arith.constant 24 : index
    %756 = vector.load %arg40[%c8_296, %c24_297] : memref<16x32xf32, #tpu.memory_space<vmem>>, vector<8x8xf32>
    tpu.vector_store %arg40[%c8_296, %c24_297], %755 {strides = array<i32>} : memref<16x32xf32, #tpu.memory_space<vmem>>, vector<8x8xf32>,
    %c0_298 = arith.constant 0 : index
    %c0_299 = arith.constant 0 : index
    %757 = vector.load %arg40[%c0_298, %c0_299] : memref<16x32xf32, #tpu.memory_space<vmem>>, vector<16x32xf32>
    %758 = arith.truncf %757 : vector<16x32xf32> to vector<16x32xbf16>
    %cst_300 = arith.constant dense<0.000000e+00> : vector<16x32xf32>
    %759 = tpu.matmul %758, %571, %cst_300 {dimension_numbers = #tpu.dot_dimension_numbers<[1], [1], [0], [0], [0, 0, 1, 0], [], []>} : vector<16x32xbf16>, vector<32x32xbf16>, vector<16x32xf32> -> vector<16x32xf32>
    %760 = vector.broadcast %573 : vector<1x32xf32> to vector<16x32xf32>
    %761 = arith.addf %759, %760 : vector<16x32xf32>
    %762 = arith.addf %565, %761 : vector<16x32xf32>
    %c0_301 = arith.constant 0 : index
    %c0_302 = arith.constant 0 : index
    %c0_303 = arith.constant 0 : index
    %763 = vector.load %arg23[%c0_301, %c0_302, %c0_303] : memref<2x1x32xf32, #tpu.memory_space<vmem>>, vector<1x1x32xf32>
    %764 = vector.shape_cast %763 : vector<1x1x32xf32> to vector<1x32xf32>
    %c0_304 = arith.constant 0 : index
    %c0_305 = arith.constant 0 : index
    %c0_306 = arith.constant 0 : index
    %765 = vector.load %arg24[%c0_304, %c0_305, %c0_306] : memref<2x1x32xf32, #tpu.memory_space<vmem>>, vector<1x1x32xf32>
    %766 = vector.shape_cast %765 : vector<1x1x32xf32> to vector<1x32xf32>
    %cst_307 = arith.constant dense<0.000000e+00> : vector<16xf32>
    %767 = vector.multi_reduction <add>, %762, %cst_307 [1] : vector<16x32xf32> to vector<16xf32>
    %768 = vector.shape_cast %767 : vector<16xf32> to vector<16x1xf32>
    %cst_308 = arith.constant 3.200000e+01 : f32
    %769 = vector.broadcast %cst_308 : f32 to vector<16x1xf32>
    %770 = arith.divf %768, %769 : vector<16x1xf32>
    %771 = vector.broadcast %770 : vector<16x1xf32> to vector<16x32xf32>
    %772 = arith.subf %762, %771 : vector<16x32xf32>
    %773 = arith.mulf %772, %772 : vector<16x32xf32>
    %cst_309 = arith.constant dense<0.000000e+00> : vector<16xf32>
    %774 = vector.multi_reduction <add>, %773, %cst_309 [1] : vector<16x32xf32> to vector<16xf32>
    %775 = vector.shape_cast %774 : vector<16xf32> to vector<16x1xf32>
    %cst_310 = arith.constant 3.200000e+01 : f32
    %776 = vector.broadcast %cst_310 : f32 to vector<16x1xf32>
    %777 = arith.divf %775, %776 : vector<16x1xf32>
    %778 = vector.broadcast %770 : vector<16x1xf32> to vector<16x32xf32>
    %779 = arith.subf %762, %778 : vector<16x32xf32>
    %cst_311 = arith.constant 9.99999974E-6 : f32
    %780 = vector.broadcast %cst_311 : f32 to vector<16x1xf32>
    %781 = arith.addf %777, %780 : vector<16x1xf32>
    %782 = math.rsqrt %781 : vector<16x1xf32>
    %783 = vector.broadcast %782 : vector<16x1xf32> to vector<16x32xf32>
    %784 = arith.mulf %779, %783 : vector<16x32xf32>
    %785 = vector.broadcast %764 : vector<1x32xf32> to vector<16x32xf32>
    %786 = arith.mulf %784, %785 : vector<16x32xf32>
    %787 = vector.broadcast %766 : vector<1x32xf32> to vector<16x32xf32>
    %788 = arith.addf %786, %787 : vector<16x32xf32>
    %c0_312 = arith.constant 0 : index
    %c0_313 = arith.constant 0 : index
    %c0_314 = arith.constant 0 : index
    %789 = vector.load %arg25[%c0_312, %c0_313, %c0_314] : memref<2x96x32xbf16, #tpu.memory_space<vmem>>, vector<1x96x32xbf16>
    %790 = vector.shape_cast %789 : vector<1x96x32xbf16> to vector<96x32xbf16>
    %c0_315 = arith.constant 0 : index
    %c0_316 = arith.constant 0 : index
    %c0_317 = arith.constant 0 : index
    %791 = vector.load %arg26[%c0_315, %c0_316, %c0_317] : memref<2x1x96xf32, #tpu.memory_space<vmem>>, vector<1x1x96xf32>
    %792 = vector.shape_cast %791 : vector<1x1x96xf32> to vector<1x96xf32>
    %c0_318 = arith.constant 0 : index
    %c0_319 = arith.constant 0 : index
    %c0_320 = arith.constant 0 : index
    %793 = vector.load %arg27[%c0_318, %c0_319, %c0_320] : memref<2x32x32xbf16, #tpu.memory_space<vmem>>, vector<1x32x32xbf16>
    %794 = vector.shape_cast %793 : vector<1x32x32xbf16> to vector<32x32xbf16>
    %c0_321 = arith.constant 0 : index
    %c0_322 = arith.constant 0 : index
    %c0_323 = arith.constant 0 : index
    %795 = vector.load %arg28[%c0_321, %c0_322, %c0_323] : memref<2x1x32xf32, #tpu.memory_space<vmem>>, vector<1x1x32xf32>
    %796 = vector.shape_cast %795 : vector<1x1x32xf32> to vector<1x32xf32>
    %797 = vector.extract_strided_slice %790 {offsets = [0, 0], sizes = [32, 32], strides = [1, 1]} : vector<96x32xbf16> to vector<32x32xbf16>
    %798 = arith.truncf %788 : vector<16x32xf32> to vector<16x32xbf16>
    %cst_324 = arith.constant dense<0.000000e+00> : vector<16x32xf32>
    %799 = tpu.matmul %798, %797, %cst_324 {dimension_numbers = #tpu.dot_dimension_numbers<[1], [1], [0], [0], [0, 0, 1, 0], [], []>} : vector<16x32xbf16>, vector<32x32xbf16>, vector<16x32xf32> -> vector<16x32xf32>
    %800 = vector.extract_strided_slice %792 {offsets = [0, 0], sizes = [1, 32], strides = [1, 1]} : vector<1x96xf32> to vector<1x32xf32>
    %801 = vector.broadcast %800 : vector<1x32xf32> to vector<16x32xf32>
    %802 = arith.addf %799, %801 : vector<16x32xf32>
    %803 = vector.extract_strided_slice %790 {offsets = [32, 0], sizes = [64, 32], strides = [1, 1]} : vector<96x32xbf16> to vector<64x32xbf16>
    %804 = arith.truncf %562 : vector<16x32xf32> to vector<16x32xbf16>
    %cst_325 = arith.constant dense<0.000000e+00> : vector<16x64xf32>
    %805 = tpu.matmul %804, %803, %cst_325 {dimension_numbers = #tpu.dot_dimension_numbers<[1], [1], [0], [0], [0, 0, 1, 0], [], []>} : vector<16x32xbf16>, vector<64x32xbf16>, vector<16x64xf32> -> vector<16x64xf32>
    %806 = vector.extract_strided_slice %792 {offsets = [0, 32], sizes = [1, 64], strides = [1, 1]} : vector<1x96xf32> to vector<1x64xf32>
    %807 = vector.broadcast %806 : vector<1x64xf32> to vector<16x64xf32>
    %808 = arith.addf %805, %807 : vector<16x64xf32>
    %809 = vector.extract_strided_slice %808 {offsets = [0, 0], sizes = [16, 32], strides = [1, 1]} : vector<16x64xf32> to vector<16x32xf32>
    %810 = vector.extract_strided_slice %808 {offsets = [0, 32], sizes = [16, 32], strides = [1, 1]} : vector<16x64xf32> to vector<16x32xf32>
    %811 = vector.extract_strided_slice %802 {offsets = [0, 0], sizes = [8, 8], strides = [1, 1]} : vector<16x32xf32> to vector<8x8xf32>
    %812 = arith.truncf %811 : vector<8x8xf32> to vector<8x8xbf16>
    %813 = vector.extract_strided_slice %809 {offsets = [0, 0], sizes = [8, 8], strides = [1, 1]} : vector<16x32xf32> to vector<8x8xf32>
    %814 = arith.truncf %813 : vector<8x8xf32> to vector<8x8xbf16>
    %cst_326 = arith.constant dense<0.000000e+00> : vector<8x8xf32>
    %815 = tpu.matmul %812, %814, %cst_326 {dimension_numbers = #tpu.dot_dimension_numbers<[1], [1], [0], [0], [0, 0, 1, 0], [], []>} : vector<8x8xbf16>, vector<8x8xbf16>, vector<8x8xf32> -> vector<8x8xf32>
    %cst_327 = arith.constant 0.353553385 : f32
    %816 = vector.broadcast %cst_327 : f32 to vector<8x8xf32>
    %817 = arith.mulf %815, %816 : vector<8x8xf32>
    %cst_328 = arith.constant dense<0xFF800000> : vector<8xf32>
    %818 = vector.multi_reduction <maximumf>, %817, %cst_328 [1] : vector<8x8xf32> to vector<8xf32>
    %819 = vector.shape_cast %818 : vector<8xf32> to vector<8x1xf32>
    %820 = vector.broadcast %819 : vector<8x1xf32> to vector<8x8xf32>
    %821 = arith.subf %817, %820 : vector<8x8xf32>
    %822 = math.exp %821 : vector<8x8xf32>
    %cst_329 = arith.constant dense<0.000000e+00> : vector<8xf32>
    %823 = vector.multi_reduction <add>, %822, %cst_329 [1] : vector<8x8xf32> to vector<8xf32>
    %824 = vector.shape_cast %823 : vector<8xf32> to vector<8x1xf32>
    %825 = tpu.reciprocal %824 {approx = true} : vector<8x1xf32> -> vector<8x1xf32>
    %826 = vector.broadcast %825 : vector<8x1xf32> to vector<8x8xf32>
    %827 = arith.mulf %822, %826 : vector<8x8xf32>
    %828 = arith.truncf %827 : vector<8x8xf32> to vector<8x8xbf16>
    %829 = vector.extract_strided_slice %810 {offsets = [0, 0], sizes = [8, 8], strides = [1, 1]} : vector<16x32xf32> to vector<8x8xf32>
    %830 = arith.truncf %829 : vector<8x8xf32> to vector<8x8xbf16>
    %cst_330 = arith.constant dense<0.000000e+00> : vector<8x8xf32>
    %831 = tpu.matmul %828, %830, %cst_330 {dimension_numbers = #tpu.dot_dimension_numbers<[1], [0], [0], [1], [0, 0, 1, 1], [], []>} : vector<8x8xbf16>, vector<8x8xbf16>, vector<8x8xf32> -> vector<8x8xf32>
    %c0_331 = arith.constant 0 : index
    %c0_332 = arith.constant 0 : index
    %832 = vector.load %arg40[%c0_331, %c0_332] : memref<16x32xf32, #tpu.memory_space<vmem>>, vector<8x8xf32>
    tpu.vector_store %arg40[%c0_331, %c0_332], %831 {strides = array<i32>} : memref<16x32xf32, #tpu.memory_space<vmem>>, vector<8x8xf32>,
    %833 = vector.extract_strided_slice %802 {offsets = [0, 8], sizes = [8, 8], strides = [1, 1]} : vector<16x32xf32> to vector<8x8xf32>
    %834 = arith.truncf %833 : vector<8x8xf32> to vector<8x8xbf16>
    %835 = vector.extract_strided_slice %809 {offsets = [0, 8], sizes = [8, 8], strides = [1, 1]} : vector<16x32xf32> to vector<8x8xf32>
    %836 = arith.truncf %835 : vector<8x8xf32> to vector<8x8xbf16>
    %cst_333 = arith.constant dense<0.000000e+00> : vector<8x8xf32>
    %837 = tpu.matmul %834, %836, %cst_333 {dimension_numbers = #tpu.dot_dimension_numbers<[1], [1], [0], [0], [0, 0, 1, 0], [], []>} : vector<8x8xbf16>, vector<8x8xbf16>, vector<8x8xf32> -> vector<8x8xf32>
    %cst_334 = arith.constant 0.353553385 : f32
    %838 = vector.broadcast %cst_334 : f32 to vector<8x8xf32>
    %839 = arith.mulf %837, %838 : vector<8x8xf32>
    %cst_335 = arith.constant dense<0xFF800000> : vector<8xf32>
    %840 = vector.multi_reduction <maximumf>, %839, %cst_335 [1] : vector<8x8xf32> to vector<8xf32>
    %841 = vector.shape_cast %840 : vector<8xf32> to vector<8x1xf32>
    %842 = vector.broadcast %841 : vector<8x1xf32> to vector<8x8xf32>
    %843 = arith.subf %839, %842 : vector<8x8xf32>
    %844 = math.exp %843 : vector<8x8xf32>
    %cst_336 = arith.constant dense<0.000000e+00> : vector<8xf32>
    %845 = vector.multi_reduction <add>, %844, %cst_336 [1] : vector<8x8xf32> to vector<8xf32>
    %846 = vector.shape_cast %845 : vector<8xf32> to vector<8x1xf32>
    %847 = tpu.reciprocal %846 {approx = true} : vector<8x1xf32> -> vector<8x1xf32>
    %848 = vector.broadcast %847 : vector<8x1xf32> to vector<8x8xf32>
    %849 = arith.mulf %844, %848 : vector<8x8xf32>
    %850 = arith.truncf %849 : vector<8x8xf32> to vector<8x8xbf16>
    %851 = vector.extract_strided_slice %810 {offsets = [0, 8], sizes = [8, 8], strides = [1, 1]} : vector<16x32xf32> to vector<8x8xf32>
    %852 = arith.truncf %851 : vector<8x8xf32> to vector<8x8xbf16>
    %cst_337 = arith.constant dense<0.000000e+00> : vector<8x8xf32>
    %853 = tpu.matmul %850, %852, %cst_337 {dimension_numbers = #tpu.dot_dimension_numbers<[1], [0], [0], [1], [0, 0, 1, 1], [], []>} : vector<8x8xbf16>, vector<8x8xbf16>, vector<8x8xf32> -> vector<8x8xf32>
    %c0_338 = arith.constant 0 : index
    %c8_339 = arith.constant 8 : index
    %854 = vector.load %arg40[%c0_338, %c8_339] : memref<16x32xf32, #tpu.memory_space<vmem>>, vector<8x8xf32>
    tpu.vector_store %arg40[%c0_338, %c8_339], %853 {strides = array<i32>} : memref<16x32xf32, #tpu.memory_space<vmem>>, vector<8x8xf32>,
    %855 = vector.extract_strided_slice %802 {offsets = [0, 16], sizes = [8, 8], strides = [1, 1]} : vector<16x32xf32> to vector<8x8xf32>
    %856 = arith.truncf %855 : vector<8x8xf32> to vector<8x8xbf16>
    %857 = vector.extract_strided_slice %809 {offsets = [0, 16], sizes = [8, 8], strides = [1, 1]} : vector<16x32xf32> to vector<8x8xf32>
    %858 = arith.truncf %857 : vector<8x8xf32> to vector<8x8xbf16>
    %cst_340 = arith.constant dense<0.000000e+00> : vector<8x8xf32>
    %859 = tpu.matmul %856, %858, %cst_340 {dimension_numbers = #tpu.dot_dimension_numbers<[1], [1], [0], [0], [0, 0, 1, 0], [], []>} : vector<8x8xbf16>, vector<8x8xbf16>, vector<8x8xf32> -> vector<8x8xf32>
    %cst_341 = arith.constant 0.353553385 : f32
    %860 = vector.broadcast %cst_341 : f32 to vector<8x8xf32>
    %861 = arith.mulf %859, %860 : vector<8x8xf32>
    %cst_342 = arith.constant dense<0xFF800000> : vector<8xf32>
    %862 = vector.multi_reduction <maximumf>, %861, %cst_342 [1] : vector<8x8xf32> to vector<8xf32>
    %863 = vector.shape_cast %862 : vector<8xf32> to vector<8x1xf32>
    %864 = vector.broadcast %863 : vector<8x1xf32> to vector<8x8xf32>
    %865 = arith.subf %861, %864 : vector<8x8xf32>
    %866 = math.exp %865 : vector<8x8xf32>
    %cst_343 = arith.constant dense<0.000000e+00> : vector<8xf32>
    %867 = vector.multi_reduction <add>, %866, %cst_343 [1] : vector<8x8xf32> to vector<8xf32>
    %868 = vector.shape_cast %867 : vector<8xf32> to vector<8x1xf32>
    %869 = tpu.reciprocal %868 {approx = true} : vector<8x1xf32> -> vector<8x1xf32>
    %870 = vector.broadcast %869 : vector<8x1xf32> to vector<8x8xf32>
    %871 = arith.mulf %866, %870 : vector<8x8xf32>
    %872 = arith.truncf %871 : vector<8x8xf32> to vector<8x8xbf16>
    %873 = vector.extract_strided_slice %810 {offsets = [0, 16], sizes = [8, 8], strides = [1, 1]} : vector<16x32xf32> to vector<8x8xf32>
    %874 = arith.truncf %873 : vector<8x8xf32> to vector<8x8xbf16>
    %cst_344 = arith.constant dense<0.000000e+00> : vector<8x8xf32>
    %875 = tpu.matmul %872, %874, %cst_344 {dimension_numbers = #tpu.dot_dimension_numbers<[1], [0], [0], [1], [0, 0, 1, 1], [], []>} : vector<8x8xbf16>, vector<8x8xbf16>, vector<8x8xf32> -> vector<8x8xf32>
    %c0_345 = arith.constant 0 : index
    %c16_346 = arith.constant 16 : index
    %876 = vector.load %arg40[%c0_345, %c16_346] : memref<16x32xf32, #tpu.memory_space<vmem>>, vector<8x8xf32>
    tpu.vector_store %arg40[%c0_345, %c16_346], %875 {strides = array<i32>} : memref<16x32xf32, #tpu.memory_space<vmem>>, vector<8x8xf32>,
    %877 = vector.extract_strided_slice %802 {offsets = [0, 24], sizes = [8, 8], strides = [1, 1]} : vector<16x32xf32> to vector<8x8xf32>
    %878 = arith.truncf %877 : vector<8x8xf32> to vector<8x8xbf16>
    %879 = vector.extract_strided_slice %809 {offsets = [0, 24], sizes = [8, 8], strides = [1, 1]} : vector<16x32xf32> to vector<8x8xf32>
    %880 = arith.truncf %879 : vector<8x8xf32> to vector<8x8xbf16>
    %cst_347 = arith.constant dense<0.000000e+00> : vector<8x8xf32>
    %881 = tpu.matmul %878, %880, %cst_347 {dimension_numbers = #tpu.dot_dimension_numbers<[1], [1], [0], [0], [0, 0, 1, 0], [], []>} : vector<8x8xbf16>, vector<8x8xbf16>, vector<8x8xf32> -> vector<8x8xf32>
    %cst_348 = arith.constant 0.353553385 : f32
    %882 = vector.broadcast %cst_348 : f32 to vector<8x8xf32>
    %883 = arith.mulf %881, %882 : vector<8x8xf32>
    %cst_349 = arith.constant dense<0xFF800000> : vector<8xf32>
    %884 = vector.multi_reduction <maximumf>, %883, %cst_349 [1] : vector<8x8xf32> to vector<8xf32>
    %885 = vector.shape_cast %884 : vector<8xf32> to vector<8x1xf32>
    %886 = vector.broadcast %885 : vector<8x1xf32> to vector<8x8xf32>
    %887 = arith.subf %883, %886 : vector<8x8xf32>
    %888 = math.exp %887 : vector<8x8xf32>
    %cst_350 = arith.constant dense<0.000000e+00> : vector<8xf32>
    %889 = vector.multi_reduction <add>, %888, %cst_350 [1] : vector<8x8xf32> to vector<8xf32>
    %890 = vector.shape_cast %889 : vector<8xf32> to vector<8x1xf32>
    %891 = tpu.reciprocal %890 {approx = true} : vector<8x1xf32> -> vector<8x1xf32>
    %892 = vector.broadcast %891 : vector<8x1xf32> to vector<8x8xf32>
    %893 = arith.mulf %888, %892 : vector<8x8xf32>
    %894 = arith.truncf %893 : vector<8x8xf32> to vector<8x8xbf16>
    %895 = vector.extract_strided_slice %810 {offsets = [0, 24], sizes = [8, 8], strides = [1, 1]} : vector<16x32xf32> to vector<8x8xf32>
    %896 = arith.truncf %895 : vector<8x8xf32> to vector<8x8xbf16>
    %cst_351 = arith.constant dense<0.000000e+00> : vector<8x8xf32>
    %897 = tpu.matmul %894, %896, %cst_351 {dimension_numbers = #tpu.dot_dimension_numbers<[1], [0], [0], [1], [0, 0, 1, 1], [], []>} : vector<8x8xbf16>, vector<8x8xbf16>, vector<8x8xf32> -> vector<8x8xf32>
    %c0_352 = arith.constant 0 : index
    %c24_353 = arith.constant 24 : index
    %898 = vector.load %arg40[%c0_352, %c24_353] : memref<16x32xf32, #tpu.memory_space<vmem>>, vector<8x8xf32>
    tpu.vector_store %arg40[%c0_352, %c24_353], %897 {strides = array<i32>} : memref<16x32xf32, #tpu.memory_space<vmem>>, vector<8x8xf32>,
    %899 = vector.extract_strided_slice %802 {offsets = [8, 0], sizes = [8, 8], strides = [1, 1]} : vector<16x32xf32> to vector<8x8xf32>
    %900 = arith.truncf %899 : vector<8x8xf32> to vector<8x8xbf16>
    %901 = vector.extract_strided_slice %809 {offsets = [8, 0], sizes = [8, 8], strides = [1, 1]} : vector<16x32xf32> to vector<8x8xf32>
    %902 = arith.truncf %901 : vector<8x8xf32> to vector<8x8xbf16>
    %cst_354 = arith.constant dense<0.000000e+00> : vector<8x8xf32>
    %903 = tpu.matmul %900, %902, %cst_354 {dimension_numbers = #tpu.dot_dimension_numbers<[1], [1], [0], [0], [0, 0, 1, 0], [], []>} : vector<8x8xbf16>, vector<8x8xbf16>, vector<8x8xf32> -> vector<8x8xf32>
    %cst_355 = arith.constant 0.353553385 : f32
    %904 = vector.broadcast %cst_355 : f32 to vector<8x8xf32>
    %905 = arith.mulf %903, %904 : vector<8x8xf32>
    %cst_356 = arith.constant dense<0xFF800000> : vector<8xf32>
    %906 = vector.multi_reduction <maximumf>, %905, %cst_356 [1] : vector<8x8xf32> to vector<8xf32>
    %907 = vector.shape_cast %906 : vector<8xf32> to vector<8x1xf32>
    %908 = vector.broadcast %907 : vector<8x1xf32> to vector<8x8xf32>
    %909 = arith.subf %905, %908 : vector<8x8xf32>
    %910 = math.exp %909 : vector<8x8xf32>
    %cst_357 = arith.constant dense<0.000000e+00> : vector<8xf32>
    %911 = vector.multi_reduction <add>, %910, %cst_357 [1] : vector<8x8xf32> to vector<8xf32>
    %912 = vector.shape_cast %911 : vector<8xf32> to vector<8x1xf32>
    %913 = tpu.reciprocal %912 {approx = true} : vector<8x1xf32> -> vector<8x1xf32>
    %914 = vector.broadcast %913 : vector<8x1xf32> to vector<8x8xf32>
    %915 = arith.mulf %910, %914 : vector<8x8xf32>
    %916 = arith.truncf %915 : vector<8x8xf32> to vector<8x8xbf16>
    %917 = vector.extract_strided_slice %810 {offsets = [8, 0], sizes = [8, 8], strides = [1, 1]} : vector<16x32xf32> to vector<8x8xf32>
    %918 = arith.truncf %917 : vector<8x8xf32> to vector<8x8xbf16>
    %cst_358 = arith.constant dense<0.000000e+00> : vector<8x8xf32>
    %919 = tpu.matmul %916, %918, %cst_358 {dimension_numbers = #tpu.dot_dimension_numbers<[1], [0], [0], [1], [0, 0, 1, 1], [], []>} : vector<8x8xbf16>, vector<8x8xbf16>, vector<8x8xf32> -> vector<8x8xf32>
    %c8_359 = arith.constant 8 : index
    %c0_360 = arith.constant 0 : index
    %920 = vector.load %arg40[%c8_359, %c0_360] : memref<16x32xf32, #tpu.memory_space<vmem>>, vector<8x8xf32>
    tpu.vector_store %arg40[%c8_359, %c0_360], %919 {strides = array<i32>} : memref<16x32xf32, #tpu.memory_space<vmem>>, vector<8x8xf32>,
    %921 = vector.extract_strided_slice %802 {offsets = [8, 8], sizes = [8, 8], strides = [1, 1]} : vector<16x32xf32> to vector<8x8xf32>
    %922 = arith.truncf %921 : vector<8x8xf32> to vector<8x8xbf16>
    %923 = vector.extract_strided_slice %809 {offsets = [8, 8], sizes = [8, 8], strides = [1, 1]} : vector<16x32xf32> to vector<8x8xf32>
    %924 = arith.truncf %923 : vector<8x8xf32> to vector<8x8xbf16>
    %cst_361 = arith.constant dense<0.000000e+00> : vector<8x8xf32>
    %925 = tpu.matmul %922, %924, %cst_361 {dimension_numbers = #tpu.dot_dimension_numbers<[1], [1], [0], [0], [0, 0, 1, 0], [], []>} : vector<8x8xbf16>, vector<8x8xbf16>, vector<8x8xf32> -> vector<8x8xf32>
    %cst_362 = arith.constant 0.353553385 : f32
    %926 = vector.broadcast %cst_362 : f32 to vector<8x8xf32>
    %927 = arith.mulf %925, %926 : vector<8x8xf32>
    %cst_363 = arith.constant dense<0xFF800000> : vector<8xf32>
    %928 = vector.multi_reduction <maximumf>, %927, %cst_363 [1] : vector<8x8xf32> to vector<8xf32>
    %929 = vector.shape_cast %928 : vector<8xf32> to vector<8x1xf32>
    %930 = vector.broadcast %929 : vector<8x1xf32> to vector<8x8xf32>
    %931 = arith.subf %927, %930 : vector<8x8xf32>
    %932 = math.exp %931 : vector<8x8xf32>
    %cst_364 = arith.constant dense<0.000000e+00> : vector<8xf32>
    %933 = vector.multi_reduction <add>, %932, %cst_364 [1] : vector<8x8xf32> to vector<8xf32>
    %934 = vector.shape_cast %933 : vector<8xf32> to vector<8x1xf32>
    %935 = tpu.reciprocal %934 {approx = true} : vector<8x1xf32> -> vector<8x1xf32>
    %936 = vector.broadcast %935 : vector<8x1xf32> to vector<8x8xf32>
    %937 = arith.mulf %932, %936 : vector<8x8xf32>
    %938 = arith.truncf %937 : vector<8x8xf32> to vector<8x8xbf16>
    %939 = vector.extract_strided_slice %810 {offsets = [8, 8], sizes = [8, 8], strides = [1, 1]} : vector<16x32xf32> to vector<8x8xf32>
    %940 = arith.truncf %939 : vector<8x8xf32> to vector<8x8xbf16>
    %cst_365 = arith.constant dense<0.000000e+00> : vector<8x8xf32>
    %941 = tpu.matmul %938, %940, %cst_365 {dimension_numbers = #tpu.dot_dimension_numbers<[1], [0], [0], [1], [0, 0, 1, 1], [], []>} : vector<8x8xbf16>, vector<8x8xbf16>, vector<8x8xf32> -> vector<8x8xf32>
    %c8_366 = arith.constant 8 : index
    %c8_367 = arith.constant 8 : index
    %942 = vector.load %arg40[%c8_366, %c8_367] : memref<16x32xf32, #tpu.memory_space<vmem>>, vector<8x8xf32>
    tpu.vector_store %arg40[%c8_366, %c8_367], %941 {strides = array<i32>} : memref<16x32xf32, #tpu.memory_space<vmem>>, vector<8x8xf32>,
    %943 = vector.extract_strided_slice %802 {offsets = [8, 16], sizes = [8, 8], strides = [1, 1]} : vector<16x32xf32> to vector<8x8xf32>
    %944 = arith.truncf %943 : vector<8x8xf32> to vector<8x8xbf16>
    %945 = vector.extract_strided_slice %809 {offsets = [8, 16], sizes = [8, 8], strides = [1, 1]} : vector<16x32xf32> to vector<8x8xf32>
    %946 = arith.truncf %945 : vector<8x8xf32> to vector<8x8xbf16>
    %cst_368 = arith.constant dense<0.000000e+00> : vector<8x8xf32>
    %947 = tpu.matmul %944, %946, %cst_368 {dimension_numbers = #tpu.dot_dimension_numbers<[1], [1], [0], [0], [0, 0, 1, 0], [], []>} : vector<8x8xbf16>, vector<8x8xbf16>, vector<8x8xf32> -> vector<8x8xf32>
    %cst_369 = arith.constant 0.353553385 : f32
    %948 = vector.broadcast %cst_369 : f32 to vector<8x8xf32>
    %949 = arith.mulf %947, %948 : vector<8x8xf32>
    %cst_370 = arith.constant dense<0xFF800000> : vector<8xf32>
    %950 = vector.multi_reduction <maximumf>, %949, %cst_370 [1] : vector<8x8xf32> to vector<8xf32>
    %951 = vector.shape_cast %950 : vector<8xf32> to vector<8x1xf32>
    %952 = vector.broadcast %951 : vector<8x1xf32> to vector<8x8xf32>
    %953 = arith.subf %949, %952 : vector<8x8xf32>
    %954 = math.exp %953 : vector<8x8xf32>
    %cst_371 = arith.constant dense<0.000000e+00> : vector<8xf32>
    %955 = vector.multi_reduction <add>, %954, %cst_371 [1] : vector<8x8xf32> to vector<8xf32>
    %956 = vector.shape_cast %955 : vector<8xf32> to vector<8x1xf32>
    %957 = tpu.reciprocal %956 {approx = true} : vector<8x1xf32> -> vector<8x1xf32>
    %958 = vector.broadcast %957 : vector<8x1xf32> to vector<8x8xf32>
    %959 = arith.mulf %954, %958 : vector<8x8xf32>
    %960 = arith.truncf %959 : vector<8x8xf32> to vector<8x8xbf16>
    %961 = vector.extract_strided_slice %810 {offsets = [8, 16], sizes = [8, 8], strides = [1, 1]} : vector<16x32xf32> to vector<8x8xf32>
    %962 = arith.truncf %961 : vector<8x8xf32> to vector<8x8xbf16>
    %cst_372 = arith.constant dense<0.000000e+00> : vector<8x8xf32>
    %963 = tpu.matmul %960, %962, %cst_372 {dimension_numbers = #tpu.dot_dimension_numbers<[1], [0], [0], [1], [0, 0, 1, 1], [], []>} : vector<8x8xbf16>, vector<8x8xbf16>, vector<8x8xf32> -> vector<8x8xf32>
    %c8_373 = arith.constant 8 : index
    %c16_374 = arith.constant 16 : index
    %964 = vector.load %arg40[%c8_373, %c16_374] : memref<16x32xf32, #tpu.memory_space<vmem>>, vector<8x8xf32>
    tpu.vector_store %arg40[%c8_373, %c16_374], %963 {strides = array<i32>} : memref<16x32xf32, #tpu.memory_space<vmem>>, vector<8x8xf32>,
    %965 = vector.extract_strided_slice %802 {offsets = [8, 24], sizes = [8, 8], strides = [1, 1]} : vector<16x32xf32> to vector<8x8xf32>
    %966 = arith.truncf %965 : vector<8x8xf32> to vector<8x8xbf16>
    %967 = vector.extract_strided_slice %809 {offsets = [8, 24], sizes = [8, 8], strides = [1, 1]} : vector<16x32xf32> to vector<8x8xf32>
    %968 = arith.truncf %967 : vector<8x8xf32> to vector<8x8xbf16>
    %cst_375 = arith.constant dense<0.000000e+00> : vector<8x8xf32>
    %969 = tpu.matmul %966, %968, %cst_375 {dimension_numbers = #tpu.dot_dimension_numbers<[1], [1], [0], [0], [0, 0, 1, 0], [], []>} : vector<8x8xbf16>, vector<8x8xbf16>, vector<8x8xf32> -> vector<8x8xf32>
    %cst_376 = arith.constant 0.353553385 : f32
    %970 = vector.broadcast %cst_376 : f32 to vector<8x8xf32>
    %971 = arith.mulf %969, %970 : vector<8x8xf32>
    %cst_377 = arith.constant dense<0xFF800000> : vector<8xf32>
    %972 = vector.multi_reduction <maximumf>, %971, %cst_377 [1] : vector<8x8xf32> to vector<8xf32>
    %973 = vector.shape_cast %972 : vector<8xf32> to vector<8x1xf32>
    %974 = vector.broadcast %973 : vector<8x1xf32> to vector<8x8xf32>
    %975 = arith.subf %971, %974 : vector<8x8xf32>
    %976 = math.exp %975 : vector<8x8xf32>
    %cst_378 = arith.constant dense<0.000000e+00> : vector<8xf32>
    %977 = vector.multi_reduction <add>, %976, %cst_378 [1] : vector<8x8xf32> to vector<8xf32>
    %978 = vector.shape_cast %977 : vector<8xf32> to vector<8x1xf32>
    %979 = tpu.reciprocal %978 {approx = true} : vector<8x1xf32> -> vector<8x1xf32>
    %980 = vector.broadcast %979 : vector<8x1xf32> to vector<8x8xf32>
    %981 = arith.mulf %976, %980 : vector<8x8xf32>
    %982 = arith.truncf %981 : vector<8x8xf32> to vector<8x8xbf16>
    %983 = vector.extract_strided_slice %810 {offsets = [8, 24], sizes = [8, 8], strides = [1, 1]} : vector<16x32xf32> to vector<8x8xf32>
    %984 = arith.truncf %983 : vector<8x8xf32> to vector<8x8xbf16>
    %cst_379 = arith.constant dense<0.000000e+00> : vector<8x8xf32>
    %985 = tpu.matmul %982, %984, %cst_379 {dimension_numbers = #tpu.dot_dimension_numbers<[1], [0], [0], [1], [0, 0, 1, 1], [], []>} : vector<8x8xbf16>, vector<8x8xbf16>, vector<8x8xf32> -> vector<8x8xf32>
    %c8_380 = arith.constant 8 : index
    %c24_381 = arith.constant 24 : index
    %986 = vector.load %arg40[%c8_380, %c24_381] : memref<16x32xf32, #tpu.memory_space<vmem>>, vector<8x8xf32>
    tpu.vector_store %arg40[%c8_380, %c24_381], %985 {strides = array<i32>} : memref<16x32xf32, #tpu.memory_space<vmem>>, vector<8x8xf32>,
    %c0_382 = arith.constant 0 : index
    %c0_383 = arith.constant 0 : index
    %987 = vector.load %arg40[%c0_382, %c0_383] : memref<16x32xf32, #tpu.memory_space<vmem>>, vector<16x32xf32>
    %988 = arith.truncf %987 : vector<16x32xf32> to vector<16x32xbf16>
    %cst_384 = arith.constant dense<0.000000e+00> : vector<16x32xf32>
    %989 = tpu.matmul %988, %794, %cst_384 {dimension_numbers = #tpu.dot_dimension_numbers<[1], [1], [0], [0], [0, 0, 1, 0], [], []>} : vector<16x32xbf16>, vector<32x32xbf16>, vector<16x32xf32> -> vector<16x32xf32>
    %990 = vector.broadcast %796 : vector<1x32xf32> to vector<16x32xf32>
    %991 = arith.addf %989, %990 : vector<16x32xf32>
    %992 = arith.addf %788, %991 : vector<16x32xf32>
    %c0_385 = arith.constant 0 : index
    %c0_386 = arith.constant 0 : index
    %c0_387 = arith.constant 0 : index
    %993 = vector.load %arg29[%c0_385, %c0_386, %c0_387] : memref<2x1x32xf32, #tpu.memory_space<vmem>>, vector<1x1x32xf32>
    %994 = vector.shape_cast %993 : vector<1x1x32xf32> to vector<1x32xf32>
    %c0_388 = arith.constant 0 : index
    %c0_389 = arith.constant 0 : index
    %c0_390 = arith.constant 0 : index
    %995 = vector.load %arg30[%c0_388, %c0_389, %c0_390] : memref<2x1x32xf32, #tpu.memory_space<vmem>>, vector<1x1x32xf32>
    %996 = vector.shape_cast %995 : vector<1x1x32xf32> to vector<1x32xf32>
    %cst_391 = arith.constant dense<0.000000e+00> : vector<16xf32>
    %997 = vector.multi_reduction <add>, %992, %cst_391 [1] : vector<16x32xf32> to vector<16xf32>
    %998 = vector.shape_cast %997 : vector<16xf32> to vector<16x1xf32>
    %cst_392 = arith.constant 3.200000e+01 : f32
    %999 = vector.broadcast %cst_392 : f32 to vector<16x1xf32>
    %1000 = arith.divf %998, %999 : vector<16x1xf32>
    %1001 = vector.broadcast %1000 : vector<16x1xf32> to vector<16x32xf32>
    %1002 = arith.subf %992, %1001 : vector<16x32xf32>
    %1003 = arith.mulf %1002, %1002 : vector<16x32xf32>
    %cst_393 = arith.constant dense<0.000000e+00> : vector<16xf32>
    %1004 = vector.multi_reduction <add>, %1003, %cst_393 [1] : vector<16x32xf32> to vector<16xf32>
    %1005 = vector.shape_cast %1004 : vector<16xf32> to vector<16x1xf32>
    %cst_394 = arith.constant 3.200000e+01 : f32
    %1006 = vector.broadcast %cst_394 : f32 to vector<16x1xf32>
    %1007 = arith.divf %1005, %1006 : vector<16x1xf32>
    %1008 = vector.broadcast %1000 : vector<16x1xf32> to vector<16x32xf32>
    %1009 = arith.subf %992, %1008 : vector<16x32xf32>
    %cst_395 = arith.constant 9.99999974E-6 : f32
    %1010 = vector.broadcast %cst_395 : f32 to vector<16x1xf32>
    %1011 = arith.addf %1007, %1010 : vector<16x1xf32>
    %1012 = math.rsqrt %1011 : vector<16x1xf32>
    %1013 = vector.broadcast %1012 : vector<16x1xf32> to vector<16x32xf32>
    %1014 = arith.mulf %1009, %1013 : vector<16x32xf32>
    %1015 = vector.broadcast %994 : vector<1x32xf32> to vector<16x32xf32>
    %1016 = arith.mulf %1014, %1015 : vector<16x32xf32>
    %1017 = vector.broadcast %996 : vector<1x32xf32> to vector<16x32xf32>
    %1018 = arith.addf %1016, %1017 : vector<16x32xf32>
    %c0_396 = arith.constant 0 : index
    %c0_397 = arith.constant 0 : index
    %c0_398 = arith.constant 0 : index
    %1019 = vector.load %arg31[%c0_396, %c0_397, %c0_398] : memref<2x64x32xbf16, #tpu.memory_space<vmem>>, vector<1x64x32xbf16>
    %1020 = vector.shape_cast %1019 : vector<1x64x32xbf16> to vector<64x32xbf16>
    %c0_399 = arith.constant 0 : index
    %c0_400 = arith.constant 0 : index
    %c0_401 = arith.constant 0 : index
    %1021 = vector.load %arg32[%c0_399, %c0_400, %c0_401] : memref<2x1x64xf32, #tpu.memory_space<vmem>>, vector<1x1x64xf32>
    %1022 = vector.shape_cast %1021 : vector<1x1x64xf32> to vector<1x64xf32>
    %c0_402 = arith.constant 0 : index
    %c0_403 = arith.constant 0 : index
    %c0_404 = arith.constant 0 : index
    %1023 = vector.load %arg33[%c0_402, %c0_403, %c0_404] : memref<2x32x64xbf16, #tpu.memory_space<vmem>>, vector<1x32x64xbf16>
    %1024 = vector.shape_cast %1023 : vector<1x32x64xbf16> to vector<32x64xbf16>
    %c0_405 = arith.constant 0 : index
    %c0_406 = arith.constant 0 : index
    %c0_407 = arith.constant 0 : index
    %1025 = vector.load %arg34[%c0_405, %c0_406, %c0_407] : memref<2x1x32xf32, #tpu.memory_space<vmem>>, vector<1x1x32xf32>
    %1026 = vector.shape_cast %1025 : vector<1x1x32xf32> to vector<1x32xf32>
    %1027 = arith.truncf %1018 : vector<16x32xf32> to vector<16x32xbf16>
    %cst_408 = arith.constant dense<0.000000e+00> : vector<16x64xf32>
    %1028 = tpu.matmul %1027, %1020, %cst_408 {dimension_numbers = #tpu.dot_dimension_numbers<[1], [1], [0], [0], [0, 0, 1, 0], [], []>} : vector<16x32xbf16>, vector<64x32xbf16>, vector<16x64xf32> -> vector<16x64xf32>
    %1029 = vector.broadcast %1022 : vector<1x64xf32> to vector<16x64xf32>
    %1030 = arith.addf %1028, %1029 : vector<16x64xf32>
    %cst_409 = arith.constant 0.000000e+00 : f32
    %1031 = vector.broadcast %cst_409 : f32 to vector<16x64xf32>
    %1032 = arith.maximumf %1030, %1031 : vector<16x64xf32>
    %1033 = arith.truncf %1032 : vector<16x64xf32> to vector<16x64xbf16>
    %cst_410 = arith.constant dense<0.000000e+00> : vector<16x32xf32>
    %1034 = tpu.matmul %1033, %1024, %cst_410 {dimension_numbers = #tpu.dot_dimension_numbers<[1], [1], [0], [0], [0, 0, 1, 0], [], []>} : vector<16x64xbf16>, vector<32x64xbf16>, vector<16x32xf32> -> vector<16x32xf32>
    %1035 = vector.broadcast %1026 : vector<1x32xf32> to vector<16x32xf32>
    %1036 = arith.addf %1034, %1035 : vector<16x32xf32>
    %1037 = arith.addf %1018, %1036 : vector<16x32xf32>
    %c0_411 = arith.constant 0 : index
    %c0_412 = arith.constant 0 : index
    %c0_413 = arith.constant 0 : index
    %1038 = vector.load %arg35[%c0_411, %c0_412, %c0_413] : memref<2x1x32xf32, #tpu.memory_space<vmem>>, vector<1x1x32xf32>
    %1039 = vector.shape_cast %1038 : vector<1x1x32xf32> to vector<1x32xf32>
    %c0_414 = arith.constant 0 : index
    %c0_415 = arith.constant 0 : index
    %c0_416 = arith.constant 0 : index
    %1040 = vector.load %arg36[%c0_414, %c0_415, %c0_416] : memref<2x1x32xf32, #tpu.memory_space<vmem>>, vector<1x1x32xf32>
    %1041 = vector.shape_cast %1040 : vector<1x1x32xf32> to vector<1x32xf32>
    %cst_417 = arith.constant dense<0.000000e+00> : vector<16xf32>
    %1042 = vector.multi_reduction <add>, %1037, %cst_417 [1] : vector<16x32xf32> to vector<16xf32>
    %1043 = vector.shape_cast %1042 : vector<16xf32> to vector<16x1xf32>
    %cst_418 = arith.constant 3.200000e+01 : f32
    %1044 = vector.broadcast %cst_418 : f32 to vector<16x1xf32>
    %1045 = arith.divf %1043, %1044 : vector<16x1xf32>
    %1046 = vector.broadcast %1045 : vector<16x1xf32> to vector<16x32xf32>
    %1047 = arith.subf %1037, %1046 : vector<16x32xf32>
    %1048 = arith.mulf %1047, %1047 : vector<16x32xf32>
    %cst_419 = arith.constant dense<0.000000e+00> : vector<16xf32>
    %1049 = vector.multi_reduction <add>, %1048, %cst_419 [1] : vector<16x32xf32> to vector<16xf32>
    %1050 = vector.shape_cast %1049 : vector<16xf32> to vector<16x1xf32>
    %cst_420 = arith.constant 3.200000e+01 : f32
    %1051 = vector.broadcast %cst_420 : f32 to vector<16x1xf32>
    %1052 = arith.divf %1050, %1051 : vector<16x1xf32>
    %1053 = vector.broadcast %1045 : vector<16x1xf32> to vector<16x32xf32>
    %1054 = arith.subf %1037, %1053 : vector<16x32xf32>
    %cst_421 = arith.constant 9.99999974E-6 : f32
    %1055 = vector.broadcast %cst_421 : f32 to vector<16x1xf32>
    %1056 = arith.addf %1052, %1055 : vector<16x1xf32>
    %1057 = math.rsqrt %1056 : vector<16x1xf32>
    %1058 = vector.broadcast %1057 : vector<16x1xf32> to vector<16x32xf32>
    %1059 = arith.mulf %1054, %1058 : vector<16x32xf32>
    %1060 = vector.broadcast %1039 : vector<1x32xf32> to vector<16x32xf32>
    %1061 = arith.mulf %1059, %1060 : vector<16x32xf32>
    %1062 = vector.broadcast %1041 : vector<1x32xf32> to vector<16x32xf32>
    %1063 = arith.addf %1061, %1062 : vector<16x32xf32>
    %c1_422 = arith.constant 1 : index
    %c0_423 = arith.constant 0 : index
    %c0_424 = arith.constant 0 : index
    %1064 = vector.load %arg19[%c1_422, %c0_423, %c0_424] : memref<2x96x32xbf16, #tpu.memory_space<vmem>>, vector<1x96x32xbf16>
    %1065 = vector.shape_cast %1064 : vector<1x96x32xbf16> to vector<96x32xbf16>
    %c1_425 = arith.constant 1 : index
    %c0_426 = arith.constant 0 : index
    %c0_427 = arith.constant 0 : index
    %1066 = vector.load %arg20[%c1_425, %c0_426, %c0_427] : memref<2x1x96xf32, #tpu.memory_space<vmem>>, vector<1x1x96xf32>
    %1067 = vector.shape_cast %1066 : vector<1x1x96xf32> to vector<1x96xf32>
    %c1_428 = arith.constant 1 : index
    %c0_429 = arith.constant 0 : index
    %c0_430 = arith.constant 0 : index
    %1068 = vector.load %arg21[%c1_428, %c0_429, %c0_430] : memref<2x32x32xbf16, #tpu.memory_space<vmem>>, vector<1x32x32xbf16>
    %1069 = vector.shape_cast %1068 : vector<1x32x32xbf16> to vector<32x32xbf16>
    %c1_431 = arith.constant 1 : index
    %c0_432 = arith.constant 0 : index
    %c0_433 = arith.constant 0 : index
    %1070 = vector.load %arg22[%c1_431, %c0_432, %c0_433] : memref<2x1x32xf32, #tpu.memory_space<vmem>>, vector<1x1x32xf32>
    %1071 = vector.shape_cast %1070 : vector<1x1x32xf32> to vector<1x32xf32>
    %1072 = arith.truncf %1063 : vector<16x32xf32> to vector<16x32xbf16>
    %cst_434 = arith.constant dense<0.000000e+00> : vector<16x96xf32>
    %1073 = tpu.matmul %1072, %1065, %cst_434 {dimension_numbers = #tpu.dot_dimension_numbers<[1], [1], [0], [0], [0, 0, 1, 0], [], []>} : vector<16x32xbf16>, vector<96x32xbf16>, vector<16x96xf32> -> vector<16x96xf32>
    %1074 = vector.broadcast %1067 : vector<1x96xf32> to vector<16x96xf32>
    %1075 = arith.addf %1073, %1074 : vector<16x96xf32>
    %1076 = vector.extract_strided_slice %1075 {offsets = [0, 0], sizes = [16, 32], strides = [1, 1]} : vector<16x96xf32> to vector<16x32xf32>
    %1077 = vector.extract_strided_slice %1075 {offsets = [0, 32], sizes = [16, 32], strides = [1, 1]} : vector<16x96xf32> to vector<16x32xf32>
    %1078 = vector.extract_strided_slice %1075 {offsets = [0, 64], sizes = [16, 32], strides = [1, 1]} : vector<16x96xf32> to vector<16x32xf32>
    %1079 = vector.extract_strided_slice %1076 {offsets = [0, 0], sizes = [8, 8], strides = [1, 1]} : vector<16x32xf32> to vector<8x8xf32>
    %1080 = arith.truncf %1079 : vector<8x8xf32> to vector<8x8xbf16>
    %1081 = vector.extract_strided_slice %1077 {offsets = [0, 0], sizes = [8, 8], strides = [1, 1]} : vector<16x32xf32> to vector<8x8xf32>
    %1082 = arith.truncf %1081 : vector<8x8xf32> to vector<8x8xbf16>
    %cst_435 = arith.constant dense<0.000000e+00> : vector<8x8xf32>
    %1083 = tpu.matmul %1080, %1082, %cst_435 {dimension_numbers = #tpu.dot_dimension_numbers<[1], [1], [0], [0], [0, 0, 1, 0], [], []>} : vector<8x8xbf16>, vector<8x8xbf16>, vector<8x8xf32> -> vector<8x8xf32>
    %cst_436 = arith.constant 0.353553385 : f32
    %1084 = vector.broadcast %cst_436 : f32 to vector<8x8xf32>
    %1085 = arith.mulf %1083, %1084 : vector<8x8xf32>
    %cst_437 = arith.constant dense<0xFF800000> : vector<8xf32>
    %1086 = vector.multi_reduction <maximumf>, %1085, %cst_437 [1] : vector<8x8xf32> to vector<8xf32>
    %1087 = vector.shape_cast %1086 : vector<8xf32> to vector<8x1xf32>
    %1088 = vector.broadcast %1087 : vector<8x1xf32> to vector<8x8xf32>
    %1089 = arith.subf %1085, %1088 : vector<8x8xf32>
    %1090 = math.exp %1089 : vector<8x8xf32>
    %cst_438 = arith.constant dense<0.000000e+00> : vector<8xf32>
    %1091 = vector.multi_reduction <add>, %1090, %cst_438 [1] : vector<8x8xf32> to vector<8xf32>
    %1092 = vector.shape_cast %1091 : vector<8xf32> to vector<8x1xf32>
    %1093 = tpu.reciprocal %1092 {approx = true} : vector<8x1xf32> -> vector<8x1xf32>
    %1094 = vector.broadcast %1093 : vector<8x1xf32> to vector<8x8xf32>
    %1095 = arith.mulf %1090, %1094 : vector<8x8xf32>
    %1096 = arith.truncf %1095 : vector<8x8xf32> to vector<8x8xbf16>
    %1097 = vector.extract_strided_slice %1078 {offsets = [0, 0], sizes = [8, 8], strides = [1, 1]} : vector<16x32xf32> to vector<8x8xf32>
    %1098 = arith.truncf %1097 : vector<8x8xf32> to vector<8x8xbf16>
    %cst_439 = arith.constant dense<0.000000e+00> : vector<8x8xf32>
    %1099 = tpu.matmul %1096, %1098, %cst_439 {dimension_numbers = #tpu.dot_dimension_numbers<[1], [0], [0], [1], [0, 0, 1, 1], [], []>} : vector<8x8xbf16>, vector<8x8xbf16>, vector<8x8xf32> -> vector<8x8xf32>
    %c0_440 = arith.constant 0 : index
    %c0_441 = arith.constant 0 : index
    %1100 = vector.load %arg40[%c0_440, %c0_441] : memref<16x32xf32, #tpu.memory_space<vmem>>, vector<8x8xf32>
    tpu.vector_store %arg40[%c0_440, %c0_441], %1099 {strides = array<i32>} : memref<16x32xf32, #tpu.memory_space<vmem>>, vector<8x8xf32>,
    %1101 = vector.extract_strided_slice %1076 {offsets = [0, 8], sizes = [8, 8], strides = [1, 1]} : vector<16x32xf32> to vector<8x8xf32>
    %1102 = arith.truncf %1101 : vector<8x8xf32> to vector<8x8xbf16>
    %1103 = vector.extract_strided_slice %1077 {offsets = [0, 8], sizes = [8, 8], strides = [1, 1]} : vector<16x32xf32> to vector<8x8xf32>
    %1104 = arith.truncf %1103 : vector<8x8xf32> to vector<8x8xbf16>
    %cst_442 = arith.constant dense<0.000000e+00> : vector<8x8xf32>
    %1105 = tpu.matmul %1102, %1104, %cst_442 {dimension_numbers = #tpu.dot_dimension_numbers<[1], [1], [0], [0], [0, 0, 1, 0], [], []>} : vector<8x8xbf16>, vector<8x8xbf16>, vector<8x8xf32> -> vector<8x8xf32>
    %cst_443 = arith.constant 0.353553385 : f32
    %1106 = vector.broadcast %cst_443 : f32 to vector<8x8xf32>
    %1107 = arith.mulf %1105, %1106 : vector<8x8xf32>
    %cst_444 = arith.constant dense<0xFF800000> : vector<8xf32>
    %1108 = vector.multi_reduction <maximumf>, %1107, %cst_444 [1] : vector<8x8xf32> to vector<8xf32>
    %1109 = vector.shape_cast %1108 : vector<8xf32> to vector<8x1xf32>
    %1110 = vector.broadcast %1109 : vector<8x1xf32> to vector<8x8xf32>
    %1111 = arith.subf %1107, %1110 : vector<8x8xf32>
    %1112 = math.exp %1111 : vector<8x8xf32>
    %cst_445 = arith.constant dense<0.000000e+00> : vector<8xf32>
    %1113 = vector.multi_reduction <add>, %1112, %cst_445 [1] : vector<8x8xf32> to vector<8xf32>
    %1114 = vector.shape_cast %1113 : vector<8xf32> to vector<8x1xf32>
    %1115 = tpu.reciprocal %1114 {approx = true} : vector<8x1xf32> -> vector<8x1xf32>
    %1116 = vector.broadcast %1115 : vector<8x1xf32> to vector<8x8xf32>
    %1117 = arith.mulf %1112, %1116 : vector<8x8xf32>
    %1118 = arith.truncf %1117 : vector<8x8xf32> to vector<8x8xbf16>
    %1119 = vector.extract_strided_slice %1078 {offsets = [0, 8], sizes = [8, 8], strides = [1, 1]} : vector<16x32xf32> to vector<8x8xf32>
    %1120 = arith.truncf %1119 : vector<8x8xf32> to vector<8x8xbf16>
    %cst_446 = arith.constant dense<0.000000e+00> : vector<8x8xf32>
    %1121 = tpu.matmul %1118, %1120, %cst_446 {dimension_numbers = #tpu.dot_dimension_numbers<[1], [0], [0], [1], [0, 0, 1, 1], [], []>} : vector<8x8xbf16>, vector<8x8xbf16>, vector<8x8xf32> -> vector<8x8xf32>
    %c0_447 = arith.constant 0 : index
    %c8_448 = arith.constant 8 : index
    %1122 = vector.load %arg40[%c0_447, %c8_448] : memref<16x32xf32, #tpu.memory_space<vmem>>, vector<8x8xf32>
    tpu.vector_store %arg40[%c0_447, %c8_448], %1121 {strides = array<i32>} : memref<16x32xf32, #tpu.memory_space<vmem>>, vector<8x8xf32>,
    %1123 = vector.extract_strided_slice %1076 {offsets = [0, 16], sizes = [8, 8], strides = [1, 1]} : vector<16x32xf32> to vector<8x8xf32>
    %1124 = arith.truncf %1123 : vector<8x8xf32> to vector<8x8xbf16>
    %1125 = vector.extract_strided_slice %1077 {offsets = [0, 16], sizes = [8, 8], strides = [1, 1]} : vector<16x32xf32> to vector<8x8xf32>
    %1126 = arith.truncf %1125 : vector<8x8xf32> to vector<8x8xbf16>
    %cst_449 = arith.constant dense<0.000000e+00> : vector<8x8xf32>
    %1127 = tpu.matmul %1124, %1126, %cst_449 {dimension_numbers = #tpu.dot_dimension_numbers<[1], [1], [0], [0], [0, 0, 1, 0], [], []>} : vector<8x8xbf16>, vector<8x8xbf16>, vector<8x8xf32> -> vector<8x8xf32>
    %cst_450 = arith.constant 0.353553385 : f32
    %1128 = vector.broadcast %cst_450 : f32 to vector<8x8xf32>
    %1129 = arith.mulf %1127, %1128 : vector<8x8xf32>
    %cst_451 = arith.constant dense<0xFF800000> : vector<8xf32>
    %1130 = vector.multi_reduction <maximumf>, %1129, %cst_451 [1] : vector<8x8xf32> to vector<8xf32>
    %1131 = vector.shape_cast %1130 : vector<8xf32> to vector<8x1xf32>
    %1132 = vector.broadcast %1131 : vector<8x1xf32> to vector<8x8xf32>
    %1133 = arith.subf %1129, %1132 : vector<8x8xf32>
    %1134 = math.exp %1133 : vector<8x8xf32>
    %cst_452 = arith.constant dense<0.000000e+00> : vector<8xf32>
    %1135 = vector.multi_reduction <add>, %1134, %cst_452 [1] : vector<8x8xf32> to vector<8xf32>
    %1136 = vector.shape_cast %1135 : vector<8xf32> to vector<8x1xf32>
    %1137 = tpu.reciprocal %1136 {approx = true} : vector<8x1xf32> -> vector<8x1xf32>
    %1138 = vector.broadcast %1137 : vector<8x1xf32> to vector<8x8xf32>
    %1139 = arith.mulf %1134, %1138 : vector<8x8xf32>
    %1140 = arith.truncf %1139 : vector<8x8xf32> to vector<8x8xbf16>
    %1141 = vector.extract_strided_slice %1078 {offsets = [0, 16], sizes = [8, 8], strides = [1, 1]} : vector<16x32xf32> to vector<8x8xf32>
    %1142 = arith.truncf %1141 : vector<8x8xf32> to vector<8x8xbf16>
    %cst_453 = arith.constant dense<0.000000e+00> : vector<8x8xf32>
    %1143 = tpu.matmul %1140, %1142, %cst_453 {dimension_numbers = #tpu.dot_dimension_numbers<[1], [0], [0], [1], [0, 0, 1, 1], [], []>} : vector<8x8xbf16>, vector<8x8xbf16>, vector<8x8xf32> -> vector<8x8xf32>
    %c0_454 = arith.constant 0 : index
    %c16_455 = arith.constant 16 : index
    %1144 = vector.load %arg40[%c0_454, %c16_455] : memref<16x32xf32, #tpu.memory_space<vmem>>, vector<8x8xf32>
    tpu.vector_store %arg40[%c0_454, %c16_455], %1143 {strides = array<i32>} : memref<16x32xf32, #tpu.memory_space<vmem>>, vector<8x8xf32>,
    %1145 = vector.extract_strided_slice %1076 {offsets = [0, 24], sizes = [8, 8], strides = [1, 1]} : vector<16x32xf32> to vector<8x8xf32>
    %1146 = arith.truncf %1145 : vector<8x8xf32> to vector<8x8xbf16>
    %1147 = vector.extract_strided_slice %1077 {offsets = [0, 24], sizes = [8, 8], strides = [1, 1]} : vector<16x32xf32> to vector<8x8xf32>
    %1148 = arith.truncf %1147 : vector<8x8xf32> to vector<8x8xbf16>
    %cst_456 = arith.constant dense<0.000000e+00> : vector<8x8xf32>
    %1149 = tpu.matmul %1146, %1148, %cst_456 {dimension_numbers = #tpu.dot_dimension_numbers<[1], [1], [0], [0], [0, 0, 1, 0], [], []>} : vector<8x8xbf16>, vector<8x8xbf16>, vector<8x8xf32> -> vector<8x8xf32>
    %cst_457 = arith.constant 0.353553385 : f32
    %1150 = vector.broadcast %cst_457 : f32 to vector<8x8xf32>
    %1151 = arith.mulf %1149, %1150 : vector<8x8xf32>
    %cst_458 = arith.constant dense<0xFF800000> : vector<8xf32>
    %1152 = vector.multi_reduction <maximumf>, %1151, %cst_458 [1] : vector<8x8xf32> to vector<8xf32>
    %1153 = vector.shape_cast %1152 : vector<8xf32> to vector<8x1xf32>
    %1154 = vector.broadcast %1153 : vector<8x1xf32> to vector<8x8xf32>
    %1155 = arith.subf %1151, %1154 : vector<8x8xf32>
    %1156 = math.exp %1155 : vector<8x8xf32>
    %cst_459 = arith.constant dense<0.000000e+00> : vector<8xf32>
    %1157 = vector.multi_reduction <add>, %1156, %cst_459 [1] : vector<8x8xf32> to vector<8xf32>
    %1158 = vector.shape_cast %1157 : vector<8xf32> to vector<8x1xf32>
    %1159 = tpu.reciprocal %1158 {approx = true} : vector<8x1xf32> -> vector<8x1xf32>
    %1160 = vector.broadcast %1159 : vector<8x1xf32> to vector<8x8xf32>
    %1161 = arith.mulf %1156, %1160 : vector<8x8xf32>
    %1162 = arith.truncf %1161 : vector<8x8xf32> to vector<8x8xbf16>
    %1163 = vector.extract_strided_slice %1078 {offsets = [0, 24], sizes = [8, 8], strides = [1, 1]} : vector<16x32xf32> to vector<8x8xf32>
    %1164 = arith.truncf %1163 : vector<8x8xf32> to vector<8x8xbf16>
    %cst_460 = arith.constant dense<0.000000e+00> : vector<8x8xf32>
    %1165 = tpu.matmul %1162, %1164, %cst_460 {dimension_numbers = #tpu.dot_dimension_numbers<[1], [0], [0], [1], [0, 0, 1, 1], [], []>} : vector<8x8xbf16>, vector<8x8xbf16>, vector<8x8xf32> -> vector<8x8xf32>
    %c0_461 = arith.constant 0 : index
    %c24_462 = arith.constant 24 : index
    %1166 = vector.load %arg40[%c0_461, %c24_462] : memref<16x32xf32, #tpu.memory_space<vmem>>, vector<8x8xf32>
    tpu.vector_store %arg40[%c0_461, %c24_462], %1165 {strides = array<i32>} : memref<16x32xf32, #tpu.memory_space<vmem>>, vector<8x8xf32>,
    %1167 = vector.extract_strided_slice %1076 {offsets = [8, 0], sizes = [8, 8], strides = [1, 1]} : vector<16x32xf32> to vector<8x8xf32>
    %1168 = arith.truncf %1167 : vector<8x8xf32> to vector<8x8xbf16>
    %1169 = vector.extract_strided_slice %1077 {offsets = [8, 0], sizes = [8, 8], strides = [1, 1]} : vector<16x32xf32> to vector<8x8xf32>
    %1170 = arith.truncf %1169 : vector<8x8xf32> to vector<8x8xbf16>
    %cst_463 = arith.constant dense<0.000000e+00> : vector<8x8xf32>
    %1171 = tpu.matmul %1168, %1170, %cst_463 {dimension_numbers = #tpu.dot_dimension_numbers<[1], [1], [0], [0], [0, 0, 1, 0], [], []>} : vector<8x8xbf16>, vector<8x8xbf16>, vector<8x8xf32> -> vector<8x8xf32>
    %cst_464 = arith.constant 0.353553385 : f32
    %1172 = vector.broadcast %cst_464 : f32 to vector<8x8xf32>
    %1173 = arith.mulf %1171, %1172 : vector<8x8xf32>
    %cst_465 = arith.constant dense<0xFF800000> : vector<8xf32>
    %1174 = vector.multi_reduction <maximumf>, %1173, %cst_465 [1] : vector<8x8xf32> to vector<8xf32>
    %1175 = vector.shape_cast %1174 : vector<8xf32> to vector<8x1xf32>
    %1176 = vector.broadcast %1175 : vector<8x1xf32> to vector<8x8xf32>
    %1177 = arith.subf %1173, %1176 : vector<8x8xf32>
    %1178 = math.exp %1177 : vector<8x8xf32>
    %cst_466 = arith.constant dense<0.000000e+00> : vector<8xf32>
    %1179 = vector.multi_reduction <add>, %1178, %cst_466 [1] : vector<8x8xf32> to vector<8xf32>
    %1180 = vector.shape_cast %1179 : vector<8xf32> to vector<8x1xf32>
    %1181 = tpu.reciprocal %1180 {approx = true} : vector<8x1xf32> -> vector<8x1xf32>
    %1182 = vector.broadcast %1181 : vector<8x1xf32> to vector<8x8xf32>
    %1183 = arith.mulf %1178, %1182 : vector<8x8xf32>
    %1184 = arith.truncf %1183 : vector<8x8xf32> to vector<8x8xbf16>
    %1185 = vector.extract_strided_slice %1078 {offsets = [8, 0], sizes = [8, 8], strides = [1, 1]} : vector<16x32xf32> to vector<8x8xf32>
    %1186 = arith.truncf %1185 : vector<8x8xf32> to vector<8x8xbf16>
    %cst_467 = arith.constant dense<0.000000e+00> : vector<8x8xf32>
    %1187 = tpu.matmul %1184, %1186, %cst_467 {dimension_numbers = #tpu.dot_dimension_numbers<[1], [0], [0], [1], [0, 0, 1, 1], [], []>} : vector<8x8xbf16>, vector<8x8xbf16>, vector<8x8xf32> -> vector<8x8xf32>
    %c8_468 = arith.constant 8 : index
    %c0_469 = arith.constant 0 : index
    %1188 = vector.load %arg40[%c8_468, %c0_469] : memref<16x32xf32, #tpu.memory_space<vmem>>, vector<8x8xf32>
    tpu.vector_store %arg40[%c8_468, %c0_469], %1187 {strides = array<i32>} : memref<16x32xf32, #tpu.memory_space<vmem>>, vector<8x8xf32>,
    %1189 = vector.extract_strided_slice %1076 {offsets = [8, 8], sizes = [8, 8], strides = [1, 1]} : vector<16x32xf32> to vector<8x8xf32>
    %1190 = arith.truncf %1189 : vector<8x8xf32> to vector<8x8xbf16>
    %1191 = vector.extract_strided_slice %1077 {offsets = [8, 8], sizes = [8, 8], strides = [1, 1]} : vector<16x32xf32> to vector<8x8xf32>
    %1192 = arith.truncf %1191 : vector<8x8xf32> to vector<8x8xbf16>
    %cst_470 = arith.constant dense<0.000000e+00> : vector<8x8xf32>
    %1193 = tpu.matmul %1190, %1192, %cst_470 {dimension_numbers = #tpu.dot_dimension_numbers<[1], [1], [0], [0], [0, 0, 1, 0], [], []>} : vector<8x8xbf16>, vector<8x8xbf16>, vector<8x8xf32> -> vector<8x8xf32>
    %cst_471 = arith.constant 0.353553385 : f32
    %1194 = vector.broadcast %cst_471 : f32 to vector<8x8xf32>
    %1195 = arith.mulf %1193, %1194 : vector<8x8xf32>
    %cst_472 = arith.constant dense<0xFF800000> : vector<8xf32>
    %1196 = vector.multi_reduction <maximumf>, %1195, %cst_472 [1] : vector<8x8xf32> to vector<8xf32>
    %1197 = vector.shape_cast %1196 : vector<8xf32> to vector<8x1xf32>
    %1198 = vector.broadcast %1197 : vector<8x1xf32> to vector<8x8xf32>
    %1199 = arith.subf %1195, %1198 : vector<8x8xf32>
    %1200 = math.exp %1199 : vector<8x8xf32>
    %cst_473 = arith.constant dense<0.000000e+00> : vector<8xf32>
    %1201 = vector.multi_reduction <add>, %1200, %cst_473 [1] : vector<8x8xf32> to vector<8xf32>
    %1202 = vector.shape_cast %1201 : vector<8xf32> to vector<8x1xf32>
    %1203 = tpu.reciprocal %1202 {approx = true} : vector<8x1xf32> -> vector<8x1xf32>
    %1204 = vector.broadcast %1203 : vector<8x1xf32> to vector<8x8xf32>
    %1205 = arith.mulf %1200, %1204 : vector<8x8xf32>
    %1206 = arith.truncf %1205 : vector<8x8xf32> to vector<8x8xbf16>
    %1207 = vector.extract_strided_slice %1078 {offsets = [8, 8], sizes = [8, 8], strides = [1, 1]} : vector<16x32xf32> to vector<8x8xf32>
    %1208 = arith.truncf %1207 : vector<8x8xf32> to vector<8x8xbf16>
    %cst_474 = arith.constant dense<0.000000e+00> : vector<8x8xf32>
    %1209 = tpu.matmul %1206, %1208, %cst_474 {dimension_numbers = #tpu.dot_dimension_numbers<[1], [0], [0], [1], [0, 0, 1, 1], [], []>} : vector<8x8xbf16>, vector<8x8xbf16>, vector<8x8xf32> -> vector<8x8xf32>
    %c8_475 = arith.constant 8 : index
    %c8_476 = arith.constant 8 : index
    %1210 = vector.load %arg40[%c8_475, %c8_476] : memref<16x32xf32, #tpu.memory_space<vmem>>, vector<8x8xf32>
    tpu.vector_store %arg40[%c8_475, %c8_476], %1209 {strides = array<i32>} : memref<16x32xf32, #tpu.memory_space<vmem>>, vector<8x8xf32>,
    %1211 = vector.extract_strided_slice %1076 {offsets = [8, 16], sizes = [8, 8], strides = [1, 1]} : vector<16x32xf32> to vector<8x8xf32>
    %1212 = arith.truncf %1211 : vector<8x8xf32> to vector<8x8xbf16>
    %1213 = vector.extract_strided_slice %1077 {offsets = [8, 16], sizes = [8, 8], strides = [1, 1]} : vector<16x32xf32> to vector<8x8xf32>
    %1214 = arith.truncf %1213 : vector<8x8xf32> to vector<8x8xbf16>
    %cst_477 = arith.constant dense<0.000000e+00> : vector<8x8xf32>
    %1215 = tpu.matmul %1212, %1214, %cst_477 {dimension_numbers = #tpu.dot_dimension_numbers<[1], [1], [0], [0], [0, 0, 1, 0], [], []>} : vector<8x8xbf16>, vector<8x8xbf16>, vector<8x8xf32> -> vector<8x8xf32>
    %cst_478 = arith.constant 0.353553385 : f32
    %1216 = vector.broadcast %cst_478 : f32 to vector<8x8xf32>
    %1217 = arith.mulf %1215, %1216 : vector<8x8xf32>
    %cst_479 = arith.constant dense<0xFF800000> : vector<8xf32>
    %1218 = vector.multi_reduction <maximumf>, %1217, %cst_479 [1] : vector<8x8xf32> to vector<8xf32>
    %1219 = vector.shape_cast %1218 : vector<8xf32> to vector<8x1xf32>
    %1220 = vector.broadcast %1219 : vector<8x1xf32> to vector<8x8xf32>
    %1221 = arith.subf %1217, %1220 : vector<8x8xf32>
    %1222 = math.exp %1221 : vector<8x8xf32>
    %cst_480 = arith.constant dense<0.000000e+00> : vector<8xf32>
    %1223 = vector.multi_reduction <add>, %1222, %cst_480 [1] : vector<8x8xf32> to vector<8xf32>
    %1224 = vector.shape_cast %1223 : vector<8xf32> to vector<8x1xf32>
    %1225 = tpu.reciprocal %1224 {approx = true} : vector<8x1xf32> -> vector<8x1xf32>
    %1226 = vector.broadcast %1225 : vector<8x1xf32> to vector<8x8xf32>
    %1227 = arith.mulf %1222, %1226 : vector<8x8xf32>
    %1228 = arith.truncf %1227 : vector<8x8xf32> to vector<8x8xbf16>
    %1229 = vector.extract_strided_slice %1078 {offsets = [8, 16], sizes = [8, 8], strides = [1, 1]} : vector<16x32xf32> to vector<8x8xf32>
    %1230 = arith.truncf %1229 : vector<8x8xf32> to vector<8x8xbf16>
    %cst_481 = arith.constant dense<0.000000e+00> : vector<8x8xf32>
    %1231 = tpu.matmul %1228, %1230, %cst_481 {dimension_numbers = #tpu.dot_dimension_numbers<[1], [0], [0], [1], [0, 0, 1, 1], [], []>} : vector<8x8xbf16>, vector<8x8xbf16>, vector<8x8xf32> -> vector<8x8xf32>
    %c8_482 = arith.constant 8 : index
    %c16_483 = arith.constant 16 : index
    %1232 = vector.load %arg40[%c8_482, %c16_483] : memref<16x32xf32, #tpu.memory_space<vmem>>, vector<8x8xf32>
    tpu.vector_store %arg40[%c8_482, %c16_483], %1231 {strides = array<i32>} : memref<16x32xf32, #tpu.memory_space<vmem>>, vector<8x8xf32>,
    %1233 = vector.extract_strided_slice %1076 {offsets = [8, 24], sizes = [8, 8], strides = [1, 1]} : vector<16x32xf32> to vector<8x8xf32>
    %1234 = arith.truncf %1233 : vector<8x8xf32> to vector<8x8xbf16>
    %1235 = vector.extract_strided_slice %1077 {offsets = [8, 24], sizes = [8, 8], strides = [1, 1]} : vector<16x32xf32> to vector<8x8xf32>
    %1236 = arith.truncf %1235 : vector<8x8xf32> to vector<8x8xbf16>
    %cst_484 = arith.constant dense<0.000000e+00> : vector<8x8xf32>
    %1237 = tpu.matmul %1234, %1236, %cst_484 {dimension_numbers = #tpu.dot_dimension_numbers<[1], [1], [0], [0], [0, 0, 1, 0], [], []>} : vector<8x8xbf16>, vector<8x8xbf16>, vector<8x8xf32> -> vector<8x8xf32>
    %cst_485 = arith.constant 0.353553385 : f32
    %1238 = vector.broadcast %cst_485 : f32 to vector<8x8xf32>
    %1239 = arith.mulf %1237, %1238 : vector<8x8xf32>
    %cst_486 = arith.constant dense<0xFF800000> : vector<8xf32>
    %1240 = vector.multi_reduction <maximumf>, %1239, %cst_486 [1] : vector<8x8xf32> to vector<8xf32>
    %1241 = vector.shape_cast %1240 : vector<8xf32> to vector<8x1xf32>
    %1242 = vector.broadcast %1241 : vector<8x1xf32> to vector<8x8xf32>
    %1243 = arith.subf %1239, %1242 : vector<8x8xf32>
    %1244 = math.exp %1243 : vector<8x8xf32>
    %cst_487 = arith.constant dense<0.000000e+00> : vector<8xf32>
    %1245 = vector.multi_reduction <add>, %1244, %cst_487 [1] : vector<8x8xf32> to vector<8xf32>
    %1246 = vector.shape_cast %1245 : vector<8xf32> to vector<8x1xf32>
    %1247 = tpu.reciprocal %1246 {approx = true} : vector<8x1xf32> -> vector<8x1xf32>
    %1248 = vector.broadcast %1247 : vector<8x1xf32> to vector<8x8xf32>
    %1249 = arith.mulf %1244, %1248 : vector<8x8xf32>
    %1250 = arith.truncf %1249 : vector<8x8xf32> to vector<8x8xbf16>
    %1251 = vector.extract_strided_slice %1078 {offsets = [8, 24], sizes = [8, 8], strides = [1, 1]} : vector<16x32xf32> to vector<8x8xf32>
    %1252 = arith.truncf %1251 : vector<8x8xf32> to vector<8x8xbf16>
    %cst_488 = arith.constant dense<0.000000e+00> : vector<8x8xf32>
    %1253 = tpu.matmul %1250, %1252, %cst_488 {dimension_numbers = #tpu.dot_dimension_numbers<[1], [0], [0], [1], [0, 0, 1, 1], [], []>} : vector<8x8xbf16>, vector<8x8xbf16>, vector<8x8xf32> -> vector<8x8xf32>
    %c8_489 = arith.constant 8 : index
    %c24_490 = arith.constant 24 : index
    %1254 = vector.load %arg40[%c8_489, %c24_490] : memref<16x32xf32, #tpu.memory_space<vmem>>, vector<8x8xf32>
    tpu.vector_store %arg40[%c8_489, %c24_490], %1253 {strides = array<i32>} : memref<16x32xf32, #tpu.memory_space<vmem>>, vector<8x8xf32>,
    %c0_491 = arith.constant 0 : index
    %c0_492 = arith.constant 0 : index
    %1255 = vector.load %arg40[%c0_491, %c0_492] : memref<16x32xf32, #tpu.memory_space<vmem>>, vector<16x32xf32>
    %1256 = arith.truncf %1255 : vector<16x32xf32> to vector<16x32xbf16>
    %cst_493 = arith.constant dense<0.000000e+00> : vector<16x32xf32>
    %1257 = tpu.matmul %1256, %1069, %cst_493 {dimension_numbers = #tpu.dot_dimension_numbers<[1], [1], [0], [0], [0, 0, 1, 0], [], []>} : vector<16x32xbf16>, vector<32x32xbf16>, vector<16x32xf32> -> vector<16x32xf32>
    %1258 = vector.broadcast %1071 : vector<1x32xf32> to vector<16x32xf32>
    %1259 = arith.addf %1257, %1258 : vector<16x32xf32>
    %1260 = arith.addf %1063, %1259 : vector<16x32xf32>
    %c1_494 = arith.constant 1 : index
    %c0_495 = arith.constant 0 : index
    %c0_496 = arith.constant 0 : index
    %1261 = vector.load %arg23[%c1_494, %c0_495, %c0_496] : memref<2x1x32xf32, #tpu.memory_space<vmem>>, vector<1x1x32xf32>
    %1262 = vector.shape_cast %1261 : vector<1x1x32xf32> to vector<1x32xf32>
    %c1_497 = arith.constant 1 : index
    %c0_498 = arith.constant 0 : index
    %c0_499 = arith.constant 0 : index
    %1263 = vector.load %arg24[%c1_497, %c0_498, %c0_499] : memref<2x1x32xf32, #tpu.memory_space<vmem>>, vector<1x1x32xf32>
    %1264 = vector.shape_cast %1263 : vector<1x1x32xf32> to vector<1x32xf32>
    %cst_500 = arith.constant dense<0.000000e+00> : vector<16xf32>
    %1265 = vector.multi_reduction <add>, %1260, %cst_500 [1] : vector<16x32xf32> to vector<16xf32>
    %1266 = vector.shape_cast %1265 : vector<16xf32> to vector<16x1xf32>
    %cst_501 = arith.constant 3.200000e+01 : f32
    %1267 = vector.broadcast %cst_501 : f32 to vector<16x1xf32>
    %1268 = arith.divf %1266, %1267 : vector<16x1xf32>
    %1269 = vector.broadcast %1268 : vector<16x1xf32> to vector<16x32xf32>
    %1270 = arith.subf %1260, %1269 : vector<16x32xf32>
    %1271 = arith.mulf %1270, %1270 : vector<16x32xf32>
    %cst_502 = arith.constant dense<0.000000e+00> : vector<16xf32>
    %1272 = vector.multi_reduction <add>, %1271, %cst_502 [1] : vector<16x32xf32> to vector<16xf32>
    %1273 = vector.shape_cast %1272 : vector<16xf32> to vector<16x1xf32>
    %cst_503 = arith.constant 3.200000e+01 : f32
    %1274 = vector.broadcast %cst_503 : f32 to vector<16x1xf32>
    %1275 = arith.divf %1273, %1274 : vector<16x1xf32>
    %1276 = vector.broadcast %1268 : vector<16x1xf32> to vector<16x32xf32>
    %1277 = arith.subf %1260, %1276 : vector<16x32xf32>
    %cst_504 = arith.constant 9.99999974E-6 : f32
    %1278 = vector.broadcast %cst_504 : f32 to vector<16x1xf32>
    %1279 = arith.addf %1275, %1278 : vector<16x1xf32>
    %1280 = math.rsqrt %1279 : vector<16x1xf32>
    %1281 = vector.broadcast %1280 : vector<16x1xf32> to vector<16x32xf32>
    %1282 = arith.mulf %1277, %1281 : vector<16x32xf32>
    %1283 = vector.broadcast %1262 : vector<1x32xf32> to vector<16x32xf32>
    %1284 = arith.mulf %1282, %1283 : vector<16x32xf32>
    %1285 = vector.broadcast %1264 : vector<1x32xf32> to vector<16x32xf32>
    %1286 = arith.addf %1284, %1285 : vector<16x32xf32>
    %c1_505 = arith.constant 1 : index
    %c0_506 = arith.constant 0 : index
    %c0_507 = arith.constant 0 : index
    %1287 = vector.load %arg25[%c1_505, %c0_506, %c0_507] : memref<2x96x32xbf16, #tpu.memory_space<vmem>>, vector<1x96x32xbf16>
    %1288 = vector.shape_cast %1287 : vector<1x96x32xbf16> to vector<96x32xbf16>
    %c1_508 = arith.constant 1 : index
    %c0_509 = arith.constant 0 : index
    %c0_510 = arith.constant 0 : index
    %1289 = vector.load %arg26[%c1_508, %c0_509, %c0_510] : memref<2x1x96xf32, #tpu.memory_space<vmem>>, vector<1x1x96xf32>
    %1290 = vector.shape_cast %1289 : vector<1x1x96xf32> to vector<1x96xf32>
    %c1_511 = arith.constant 1 : index
    %c0_512 = arith.constant 0 : index
    %c0_513 = arith.constant 0 : index
    %1291 = vector.load %arg27[%c1_511, %c0_512, %c0_513] : memref<2x32x32xbf16, #tpu.memory_space<vmem>>, vector<1x32x32xbf16>
    %1292 = vector.shape_cast %1291 : vector<1x32x32xbf16> to vector<32x32xbf16>
    %c1_514 = arith.constant 1 : index
    %c0_515 = arith.constant 0 : index
    %c0_516 = arith.constant 0 : index
    %1293 = vector.load %arg28[%c1_514, %c0_515, %c0_516] : memref<2x1x32xf32, #tpu.memory_space<vmem>>, vector<1x1x32xf32>
    %1294 = vector.shape_cast %1293 : vector<1x1x32xf32> to vector<1x32xf32>
    %1295 = vector.extract_strided_slice %1288 {offsets = [0, 0], sizes = [32, 32], strides = [1, 1]} : vector<96x32xbf16> to vector<32x32xbf16>
    %1296 = arith.truncf %1286 : vector<16x32xf32> to vector<16x32xbf16>
    %cst_517 = arith.constant dense<0.000000e+00> : vector<16x32xf32>
    %1297 = tpu.matmul %1296, %1295, %cst_517 {dimension_numbers = #tpu.dot_dimension_numbers<[1], [1], [0], [0], [0, 0, 1, 0], [], []>} : vector<16x32xbf16>, vector<32x32xbf16>, vector<16x32xf32> -> vector<16x32xf32>
    %1298 = vector.extract_strided_slice %1290 {offsets = [0, 0], sizes = [1, 32], strides = [1, 1]} : vector<1x96xf32> to vector<1x32xf32>
    %1299 = vector.broadcast %1298 : vector<1x32xf32> to vector<16x32xf32>
    %1300 = arith.addf %1297, %1299 : vector<16x32xf32>
    %1301 = vector.extract_strided_slice %1288 {offsets = [32, 0], sizes = [64, 32], strides = [1, 1]} : vector<96x32xbf16> to vector<64x32xbf16>
    %1302 = arith.truncf %562 : vector<16x32xf32> to vector<16x32xbf16>
    %cst_518 = arith.constant dense<0.000000e+00> : vector<16x64xf32>
    %1303 = tpu.matmul %1302, %1301, %cst_518 {dimension_numbers = #tpu.dot_dimension_numbers<[1], [1], [0], [0], [0, 0, 1, 0], [], []>} : vector<16x32xbf16>, vector<64x32xbf16>, vector<16x64xf32> -> vector<16x64xf32>
    %1304 = vector.extract_strided_slice %1290 {offsets = [0, 32], sizes = [1, 64], strides = [1, 1]} : vector<1x96xf32> to vector<1x64xf32>
    %1305 = vector.broadcast %1304 : vector<1x64xf32> to vector<16x64xf32>
    %1306 = arith.addf %1303, %1305 : vector<16x64xf32>
    %1307 = vector.extract_strided_slice %1306 {offsets = [0, 0], sizes = [16, 32], strides = [1, 1]} : vector<16x64xf32> to vector<16x32xf32>
    %1308 = vector.extract_strided_slice %1306 {offsets = [0, 32], sizes = [16, 32], strides = [1, 1]} : vector<16x64xf32> to vector<16x32xf32>
    %1309 = vector.extract_strided_slice %1300 {offsets = [0, 0], sizes = [8, 8], strides = [1, 1]} : vector<16x32xf32> to vector<8x8xf32>
    %1310 = arith.truncf %1309 : vector<8x8xf32> to vector<8x8xbf16>
    %1311 = vector.extract_strided_slice %1307 {offsets = [0, 0], sizes = [8, 8], strides = [1, 1]} : vector<16x32xf32> to vector<8x8xf32>
    %1312 = arith.truncf %1311 : vector<8x8xf32> to vector<8x8xbf16>
    %cst_519 = arith.constant dense<0.000000e+00> : vector<8x8xf32>
    %1313 = tpu.matmul %1310, %1312, %cst_519 {dimension_numbers = #tpu.dot_dimension_numbers<[1], [1], [0], [0], [0, 0, 1, 0], [], []>} : vector<8x8xbf16>, vector<8x8xbf16>, vector<8x8xf32> -> vector<8x8xf32>
    %cst_520 = arith.constant 0.353553385 : f32
    %1314 = vector.broadcast %cst_520 : f32 to vector<8x8xf32>
    %1315 = arith.mulf %1313, %1314 : vector<8x8xf32>
    %cst_521 = arith.constant dense<0xFF800000> : vector<8xf32>
    %1316 = vector.multi_reduction <maximumf>, %1315, %cst_521 [1] : vector<8x8xf32> to vector<8xf32>
    %1317 = vector.shape_cast %1316 : vector<8xf32> to vector<8x1xf32>
    %1318 = vector.broadcast %1317 : vector<8x1xf32> to vector<8x8xf32>
    %1319 = arith.subf %1315, %1318 : vector<8x8xf32>
    %1320 = math.exp %1319 : vector<8x8xf32>
    %cst_522 = arith.constant dense<0.000000e+00> : vector<8xf32>
    %1321 = vector.multi_reduction <add>, %1320, %cst_522 [1] : vector<8x8xf32> to vector<8xf32>
    %1322 = vector.shape_cast %1321 : vector<8xf32> to vector<8x1xf32>
    %1323 = tpu.reciprocal %1322 {approx = true} : vector<8x1xf32> -> vector<8x1xf32>
    %1324 = vector.broadcast %1323 : vector<8x1xf32> to vector<8x8xf32>
    %1325 = arith.mulf %1320, %1324 : vector<8x8xf32>
    %1326 = arith.truncf %1325 : vector<8x8xf32> to vector<8x8xbf16>
    %1327 = vector.extract_strided_slice %1308 {offsets = [0, 0], sizes = [8, 8], strides = [1, 1]} : vector<16x32xf32> to vector<8x8xf32>
    %1328 = arith.truncf %1327 : vector<8x8xf32> to vector<8x8xbf16>
    %cst_523 = arith.constant dense<0.000000e+00> : vector<8x8xf32>
    %1329 = tpu.matmul %1326, %1328, %cst_523 {dimension_numbers = #tpu.dot_dimension_numbers<[1], [0], [0], [1], [0, 0, 1, 1], [], []>} : vector<8x8xbf16>, vector<8x8xbf16>, vector<8x8xf32> -> vector<8x8xf32>
    %c0_524 = arith.constant 0 : index
    %c0_525 = arith.constant 0 : index
    %1330 = vector.load %arg40[%c0_524, %c0_525] : memref<16x32xf32, #tpu.memory_space<vmem>>, vector<8x8xf32>
    tpu.vector_store %arg40[%c0_524, %c0_525], %1329 {strides = array<i32>} : memref<16x32xf32, #tpu.memory_space<vmem>>, vector<8x8xf32>,
    %1331 = vector.extract_strided_slice %1300 {offsets = [0, 8], sizes = [8, 8], strides = [1, 1]} : vector<16x32xf32> to vector<8x8xf32>
    %1332 = arith.truncf %1331 : vector<8x8xf32> to vector<8x8xbf16>
    %1333 = vector.extract_strided_slice %1307 {offsets = [0, 8], sizes = [8, 8], strides = [1, 1]} : vector<16x32xf32> to vector<8x8xf32>
    %1334 = arith.truncf %1333 : vector<8x8xf32> to vector<8x8xbf16>
    %cst_526 = arith.constant dense<0.000000e+00> : vector<8x8xf32>
    %1335 = tpu.matmul %1332, %1334, %cst_526 {dimension_numbers = #tpu.dot_dimension_numbers<[1], [1], [0], [0], [0, 0, 1, 0], [], []>} : vector<8x8xbf16>, vector<8x8xbf16>, vector<8x8xf32> -> vector<8x8xf32>
    %cst_527 = arith.constant 0.353553385 : f32
    %1336 = vector.broadcast %cst_527 : f32 to vector<8x8xf32>
    %1337 = arith.mulf %1335, %1336 : vector<8x8xf32>
    %cst_528 = arith.constant dense<0xFF800000> : vector<8xf32>
    %1338 = vector.multi_reduction <maximumf>, %1337, %cst_528 [1] : vector<8x8xf32> to vector<8xf32>
    %1339 = vector.shape_cast %1338 : vector<8xf32> to vector<8x1xf32>
    %1340 = vector.broadcast %1339 : vector<8x1xf32> to vector<8x8xf32>
    %1341 = arith.subf %1337, %1340 : vector<8x8xf32>
    %1342 = math.exp %1341 : vector<8x8xf32>
    %cst_529 = arith.constant dense<0.000000e+00> : vector<8xf32>
    %1343 = vector.multi_reduction <add>, %1342, %cst_529 [1] : vector<8x8xf32> to vector<8xf32>
    %1344 = vector.shape_cast %1343 : vector<8xf32> to vector<8x1xf32>
    %1345 = tpu.reciprocal %1344 {approx = true} : vector<8x1xf32> -> vector<8x1xf32>
    %1346 = vector.broadcast %1345 : vector<8x1xf32> to vector<8x8xf32>
    %1347 = arith.mulf %1342, %1346 : vector<8x8xf32>
    %1348 = arith.truncf %1347 : vector<8x8xf32> to vector<8x8xbf16>
    %1349 = vector.extract_strided_slice %1308 {offsets = [0, 8], sizes = [8, 8], strides = [1, 1]} : vector<16x32xf32> to vector<8x8xf32>
    %1350 = arith.truncf %1349 : vector<8x8xf32> to vector<8x8xbf16>
    %cst_530 = arith.constant dense<0.000000e+00> : vector<8x8xf32>
    %1351 = tpu.matmul %1348, %1350, %cst_530 {dimension_numbers = #tpu.dot_dimension_numbers<[1], [0], [0], [1], [0, 0, 1, 1], [], []>} : vector<8x8xbf16>, vector<8x8xbf16>, vector<8x8xf32> -> vector<8x8xf32>
    %c0_531 = arith.constant 0 : index
    %c8_532 = arith.constant 8 : index
    %1352 = vector.load %arg40[%c0_531, %c8_532] : memref<16x32xf32, #tpu.memory_space<vmem>>, vector<8x8xf32>
    tpu.vector_store %arg40[%c0_531, %c8_532], %1351 {strides = array<i32>} : memref<16x32xf32, #tpu.memory_space<vmem>>, vector<8x8xf32>,
    %1353 = vector.extract_strided_slice %1300 {offsets = [0, 16], sizes = [8, 8], strides = [1, 1]} : vector<16x32xf32> to vector<8x8xf32>
    %1354 = arith.truncf %1353 : vector<8x8xf32> to vector<8x8xbf16>
    %1355 = vector.extract_strided_slice %1307 {offsets = [0, 16], sizes = [8, 8], strides = [1, 1]} : vector<16x32xf32> to vector<8x8xf32>
    %1356 = arith.truncf %1355 : vector<8x8xf32> to vector<8x8xbf16>
    %cst_533 = arith.constant dense<0.000000e+00> : vector<8x8xf32>
    %1357 = tpu.matmul %1354, %1356, %cst_533 {dimension_numbers = #tpu.dot_dimension_numbers<[1], [1], [0], [0], [0, 0, 1, 0], [], []>} : vector<8x8xbf16>, vector<8x8xbf16>, vector<8x8xf32> -> vector<8x8xf32>
    %cst_534 = arith.constant 0.353553385 : f32
    %1358 = vector.broadcast %cst_534 : f32 to vector<8x8xf32>
    %1359 = arith.mulf %1357, %1358 : vector<8x8xf32>
    %cst_535 = arith.constant dense<0xFF800000> : vector<8xf32>
    %1360 = vector.multi_reduction <maximumf>, %1359, %cst_535 [1] : vector<8x8xf32> to vector<8xf32>
    %1361 = vector.shape_cast %1360 : vector<8xf32> to vector<8x1xf32>
    %1362 = vector.broadcast %1361 : vector<8x1xf32> to vector<8x8xf32>
    %1363 = arith.subf %1359, %1362 : vector<8x8xf32>
    %1364 = math.exp %1363 : vector<8x8xf32>
    %cst_536 = arith.constant dense<0.000000e+00> : vector<8xf32>
    %1365 = vector.multi_reduction <add>, %1364, %cst_536 [1] : vector<8x8xf32> to vector<8xf32>
    %1366 = vector.shape_cast %1365 : vector<8xf32> to vector<8x1xf32>
    %1367 = tpu.reciprocal %1366 {approx = true} : vector<8x1xf32> -> vector<8x1xf32>
    %1368 = vector.broadcast %1367 : vector<8x1xf32> to vector<8x8xf32>
    %1369 = arith.mulf %1364, %1368 : vector<8x8xf32>
    %1370 = arith.truncf %1369 : vector<8x8xf32> to vector<8x8xbf16>
    %1371 = vector.extract_strided_slice %1308 {offsets = [0, 16], sizes = [8, 8], strides = [1, 1]} : vector<16x32xf32> to vector<8x8xf32>
    %1372 = arith.truncf %1371 : vector<8x8xf32> to vector<8x8xbf16>
    %cst_537 = arith.constant dense<0.000000e+00> : vector<8x8xf32>
    %1373 = tpu.matmul %1370, %1372, %cst_537 {dimension_numbers = #tpu.dot_dimension_numbers<[1], [0], [0], [1], [0, 0, 1, 1], [], []>} : vector<8x8xbf16>, vector<8x8xbf16>, vector<8x8xf32> -> vector<8x8xf32>
    %c0_538 = arith.constant 0 : index
    %c16_539 = arith.constant 16 : index
    %1374 = vector.load %arg40[%c0_538, %c16_539] : memref<16x32xf32, #tpu.memory_space<vmem>>, vector<8x8xf32>
    tpu.vector_store %arg40[%c0_538, %c16_539], %1373 {strides = array<i32>} : memref<16x32xf32, #tpu.memory_space<vmem>>, vector<8x8xf32>,
    %1375 = vector.extract_strided_slice %1300 {offsets = [0, 24], sizes = [8, 8], strides = [1, 1]} : vector<16x32xf32> to vector<8x8xf32>
    %1376 = arith.truncf %1375 : vector<8x8xf32> to vector<8x8xbf16>
    %1377 = vector.extract_strided_slice %1307 {offsets = [0, 24], sizes = [8, 8], strides = [1, 1]} : vector<16x32xf32> to vector<8x8xf32>
    %1378 = arith.truncf %1377 : vector<8x8xf32> to vector<8x8xbf16>
    %cst_540 = arith.constant dense<0.000000e+00> : vector<8x8xf32>
    %1379 = tpu.matmul %1376, %1378, %cst_540 {dimension_numbers = #tpu.dot_dimension_numbers<[1], [1], [0], [0], [0, 0, 1, 0], [], []>} : vector<8x8xbf16>, vector<8x8xbf16>, vector<8x8xf32> -> vector<8x8xf32>
    %cst_541 = arith.constant 0.353553385 : f32
    %1380 = vector.broadcast %cst_541 : f32 to vector<8x8xf32>
    %1381 = arith.mulf %1379, %1380 : vector<8x8xf32>
    %cst_542 = arith.constant dense<0xFF800000> : vector<8xf32>
    %1382 = vector.multi_reduction <maximumf>, %1381, %cst_542 [1] : vector<8x8xf32> to vector<8xf32>
    %1383 = vector.shape_cast %1382 : vector<8xf32> to vector<8x1xf32>
    %1384 = vector.broadcast %1383 : vector<8x1xf32> to vector<8x8xf32>
    %1385 = arith.subf %1381, %1384 : vector<8x8xf32>
    %1386 = math.exp %1385 : vector<8x8xf32>
    %cst_543 = arith.constant dense<0.000000e+00> : vector<8xf32>
    %1387 = vector.multi_reduction <add>, %1386, %cst_543 [1] : vector<8x8xf32> to vector<8xf32>
    %1388 = vector.shape_cast %1387 : vector<8xf32> to vector<8x1xf32>
    %1389 = tpu.reciprocal %1388 {approx = true} : vector<8x1xf32> -> vector<8x1xf32>
    %1390 = vector.broadcast %1389 : vector<8x1xf32> to vector<8x8xf32>
    %1391 = arith.mulf %1386, %1390 : vector<8x8xf32>
    %1392 = arith.truncf %1391 : vector<8x8xf32> to vector<8x8xbf16>
    %1393 = vector.extract_strided_slice %1308 {offsets = [0, 24], sizes = [8, 8], strides = [1, 1]} : vector<16x32xf32> to vector<8x8xf32>
    %1394 = arith.truncf %1393 : vector<8x8xf32> to vector<8x8xbf16>
    %cst_544 = arith.constant dense<0.000000e+00> : vector<8x8xf32>
    %1395 = tpu.matmul %1392, %1394, %cst_544 {dimension_numbers = #tpu.dot_dimension_numbers<[1], [0], [0], [1], [0, 0, 1, 1], [], []>} : vector<8x8xbf16>, vector<8x8xbf16>, vector<8x8xf32> -> vector<8x8xf32>
    %c0_545 = arith.constant 0 : index
    %c24_546 = arith.constant 24 : index
    %1396 = vector.load %arg40[%c0_545, %c24_546] : memref<16x32xf32, #tpu.memory_space<vmem>>, vector<8x8xf32>
    tpu.vector_store %arg40[%c0_545, %c24_546], %1395 {strides = array<i32>} : memref<16x32xf32, #tpu.memory_space<vmem>>, vector<8x8xf32>,
    %1397 = vector.extract_strided_slice %1300 {offsets = [8, 0], sizes = [8, 8], strides = [1, 1]} : vector<16x32xf32> to vector<8x8xf32>
    %1398 = arith.truncf %1397 : vector<8x8xf32> to vector<8x8xbf16>
    %1399 = vector.extract_strided_slice %1307 {offsets = [8, 0], sizes = [8, 8], strides = [1, 1]} : vector<16x32xf32> to vector<8x8xf32>
    %1400 = arith.truncf %1399 : vector<8x8xf32> to vector<8x8xbf16>
    %cst_547 = arith.constant dense<0.000000e+00> : vector<8x8xf32>
    %1401 = tpu.matmul %1398, %1400, %cst_547 {dimension_numbers = #tpu.dot_dimension_numbers<[1], [1], [0], [0], [0, 0, 1, 0], [], []>} : vector<8x8xbf16>, vector<8x8xbf16>, vector<8x8xf32> -> vector<8x8xf32>
    %cst_548 = arith.constant 0.353553385 : f32
    %1402 = vector.broadcast %cst_548 : f32 to vector<8x8xf32>
    %1403 = arith.mulf %1401, %1402 : vector<8x8xf32>
    %cst_549 = arith.constant dense<0xFF800000> : vector<8xf32>
    %1404 = vector.multi_reduction <maximumf>, %1403, %cst_549 [1] : vector<8x8xf32> to vector<8xf32>
    %1405 = vector.shape_cast %1404 : vector<8xf32> to vector<8x1xf32>
    %1406 = vector.broadcast %1405 : vector<8x1xf32> to vector<8x8xf32>
    %1407 = arith.subf %1403, %1406 : vector<8x8xf32>
    %1408 = math.exp %1407 : vector<8x8xf32>
    %cst_550 = arith.constant dense<0.000000e+00> : vector<8xf32>
    %1409 = vector.multi_reduction <add>, %1408, %cst_550 [1] : vector<8x8xf32> to vector<8xf32>
    %1410 = vector.shape_cast %1409 : vector<8xf32> to vector<8x1xf32>
    %1411 = tpu.reciprocal %1410 {approx = true} : vector<8x1xf32> -> vector<8x1xf32>
    %1412 = vector.broadcast %1411 : vector<8x1xf32> to vector<8x8xf32>
    %1413 = arith.mulf %1408, %1412 : vector<8x8xf32>
    %1414 = arith.truncf %1413 : vector<8x8xf32> to vector<8x8xbf16>
    %1415 = vector.extract_strided_slice %1308 {offsets = [8, 0], sizes = [8, 8], strides = [1, 1]} : vector<16x32xf32> to vector<8x8xf32>
    %1416 = arith.truncf %1415 : vector<8x8xf32> to vector<8x8xbf16>
    %cst_551 = arith.constant dense<0.000000e+00> : vector<8x8xf32>
    %1417 = tpu.matmul %1414, %1416, %cst_551 {dimension_numbers = #tpu.dot_dimension_numbers<[1], [0], [0], [1], [0, 0, 1, 1], [], []>} : vector<8x8xbf16>, vector<8x8xbf16>, vector<8x8xf32> -> vector<8x8xf32>
    %c8_552 = arith.constant 8 : index
    %c0_553 = arith.constant 0 : index
    %1418 = vector.load %arg40[%c8_552, %c0_553] : memref<16x32xf32, #tpu.memory_space<vmem>>, vector<8x8xf32>
    tpu.vector_store %arg40[%c8_552, %c0_553], %1417 {strides = array<i32>} : memref<16x32xf32, #tpu.memory_space<vmem>>, vector<8x8xf32>,
    %1419 = vector.extract_strided_slice %1300 {offsets = [8, 8], sizes = [8, 8], strides = [1, 1]} : vector<16x32xf32> to vector<8x8xf32>
    %1420 = arith.truncf %1419 : vector<8x8xf32> to vector<8x8xbf16>
    %1421 = vector.extract_strided_slice %1307 {offsets = [8, 8], sizes = [8, 8], strides = [1, 1]} : vector<16x32xf32> to vector<8x8xf32>
    %1422 = arith.truncf %1421 : vector<8x8xf32> to vector<8x8xbf16>
    %cst_554 = arith.constant dense<0.000000e+00> : vector<8x8xf32>
    %1423 = tpu.matmul %1420, %1422, %cst_554 {dimension_numbers = #tpu.dot_dimension_numbers<[1], [1], [0], [0], [0, 0, 1, 0], [], []>} : vector<8x8xbf16>, vector<8x8xbf16>, vector<8x8xf32> -> vector<8x8xf32>
    %cst_555 = arith.constant 0.353553385 : f32
    %1424 = vector.broadcast %cst_555 : f32 to vector<8x8xf32>
    %1425 = arith.mulf %1423, %1424 : vector<8x8xf32>
    %cst_556 = arith.constant dense<0xFF800000> : vector<8xf32>
    %1426 = vector.multi_reduction <maximumf>, %1425, %cst_556 [1] : vector<8x8xf32> to vector<8xf32>
    %1427 = vector.shape_cast %1426 : vector<8xf32> to vector<8x1xf32>
    %1428 = vector.broadcast %1427 : vector<8x1xf32> to vector<8x8xf32>
    %1429 = arith.subf %1425, %1428 : vector<8x8xf32>
    %1430 = math.exp %1429 : vector<8x8xf32>
    %cst_557 = arith.constant dense<0.000000e+00> : vector<8xf32>
    %1431 = vector.multi_reduction <add>, %1430, %cst_557 [1] : vector<8x8xf32> to vector<8xf32>
    %1432 = vector.shape_cast %1431 : vector<8xf32> to vector<8x1xf32>
    %1433 = tpu.reciprocal %1432 {approx = true} : vector<8x1xf32> -> vector<8x1xf32>
    %1434 = vector.broadcast %1433 : vector<8x1xf32> to vector<8x8xf32>
    %1435 = arith.mulf %1430, %1434 : vector<8x8xf32>
    %1436 = arith.truncf %1435 : vector<8x8xf32> to vector<8x8xbf16>
    %1437 = vector.extract_strided_slice %1308 {offsets = [8, 8], sizes = [8, 8], strides = [1, 1]} : vector<16x32xf32> to vector<8x8xf32>
    %1438 = arith.truncf %1437 : vector<8x8xf32> to vector<8x8xbf16>
    %cst_558 = arith.constant dense<0.000000e+00> : vector<8x8xf32>
    %1439 = tpu.matmul %1436, %1438, %cst_558 {dimension_numbers = #tpu.dot_dimension_numbers<[1], [0], [0], [1], [0, 0, 1, 1], [], []>} : vector<8x8xbf16>, vector<8x8xbf16>, vector<8x8xf32> -> vector<8x8xf32>
    %c8_559 = arith.constant 8 : index
    %c8_560 = arith.constant 8 : index
    %1440 = vector.load %arg40[%c8_559, %c8_560] : memref<16x32xf32, #tpu.memory_space<vmem>>, vector<8x8xf32>
    tpu.vector_store %arg40[%c8_559, %c8_560], %1439 {strides = array<i32>} : memref<16x32xf32, #tpu.memory_space<vmem>>, vector<8x8xf32>,
    %1441 = vector.extract_strided_slice %1300 {offsets = [8, 16], sizes = [8, 8], strides = [1, 1]} : vector<16x32xf32> to vector<8x8xf32>
    %1442 = arith.truncf %1441 : vector<8x8xf32> to vector<8x8xbf16>
    %1443 = vector.extract_strided_slice %1307 {offsets = [8, 16], sizes = [8, 8], strides = [1, 1]} : vector<16x32xf32> to vector<8x8xf32>
    %1444 = arith.truncf %1443 : vector<8x8xf32> to vector<8x8xbf16>
    %cst_561 = arith.constant dense<0.000000e+00> : vector<8x8xf32>
    %1445 = tpu.matmul %1442, %1444, %cst_561 {dimension_numbers = #tpu.dot_dimension_numbers<[1], [1], [0], [0], [0, 0, 1, 0], [], []>} : vector<8x8xbf16>, vector<8x8xbf16>, vector<8x8xf32> -> vector<8x8xf32>
    %cst_562 = arith.constant 0.353553385 : f32
    %1446 = vector.broadcast %cst_562 : f32 to vector<8x8xf32>
    %1447 = arith.mulf %1445, %1446 : vector<8x8xf32>
    %cst_563 = arith.constant dense<0xFF800000> : vector<8xf32>
    %1448 = vector.multi_reduction <maximumf>, %1447, %cst_563 [1] : vector<8x8xf32> to vector<8xf32>
    %1449 = vector.shape_cast %1448 : vector<8xf32> to vector<8x1xf32>
    %1450 = vector.broadcast %1449 : vector<8x1xf32> to vector<8x8xf32>
    %1451 = arith.subf %1447, %1450 : vector<8x8xf32>
    %1452 = math.exp %1451 : vector<8x8xf32>
    %cst_564 = arith.constant dense<0.000000e+00> : vector<8xf32>
    %1453 = vector.multi_reduction <add>, %1452, %cst_564 [1] : vector<8x8xf32> to vector<8xf32>
    %1454 = vector.shape_cast %1453 : vector<8xf32> to vector<8x1xf32>
    %1455 = tpu.reciprocal %1454 {approx = true} : vector<8x1xf32> -> vector<8x1xf32>
    %1456 = vector.broadcast %1455 : vector<8x1xf32> to vector<8x8xf32>
    %1457 = arith.mulf %1452, %1456 : vector<8x8xf32>
    %1458 = arith.truncf %1457 : vector<8x8xf32> to vector<8x8xbf16>
    %1459 = vector.extract_strided_slice %1308 {offsets = [8, 16], sizes = [8, 8], strides = [1, 1]} : vector<16x32xf32> to vector<8x8xf32>
    %1460 = arith.truncf %1459 : vector<8x8xf32> to vector<8x8xbf16>
    %cst_565 = arith.constant dense<0.000000e+00> : vector<8x8xf32>
    %1461 = tpu.matmul %1458, %1460, %cst_565 {dimension_numbers = #tpu.dot_dimension_numbers<[1], [0], [0], [1], [0, 0, 1, 1], [], []>} : vector<8x8xbf16>, vector<8x8xbf16>, vector<8x8xf32> -> vector<8x8xf32>
    %c8_566 = arith.constant 8 : index
    %c16_567 = arith.constant 16 : index
    %1462 = vector.load %arg40[%c8_566, %c16_567] : memref<16x32xf32, #tpu.memory_space<vmem>>, vector<8x8xf32>
    tpu.vector_store %arg40[%c8_566, %c16_567], %1461 {strides = array<i32>} : memref<16x32xf32, #tpu.memory_space<vmem>>, vector<8x8xf32>,
    %1463 = vector.extract_strided_slice %1300 {offsets = [8, 24], sizes = [8, 8], strides = [1, 1]} : vector<16x32xf32> to vector<8x8xf32>
    %1464 = arith.truncf %1463 : vector<8x8xf32> to vector<8x8xbf16>
    %1465 = vector.extract_strided_slice %1307 {offsets = [8, 24], sizes = [8, 8], strides = [1, 1]} : vector<16x32xf32> to vector<8x8xf32>
    %1466 = arith.truncf %1465 : vector<8x8xf32> to vector<8x8xbf16>
    %cst_568 = arith.constant dense<0.000000e+00> : vector<8x8xf32>
    %1467 = tpu.matmul %1464, %1466, %cst_568 {dimension_numbers = #tpu.dot_dimension_numbers<[1], [1], [0], [0], [0, 0, 1, 0], [], []>} : vector<8x8xbf16>, vector<8x8xbf16>, vector<8x8xf32> -> vector<8x8xf32>
    %cst_569 = arith.constant 0.353553385 : f32
    %1468 = vector.broadcast %cst_569 : f32 to vector<8x8xf32>
    %1469 = arith.mulf %1467, %1468 : vector<8x8xf32>
    %cst_570 = arith.constant dense<0xFF800000> : vector<8xf32>
    %1470 = vector.multi_reduction <maximumf>, %1469, %cst_570 [1] : vector<8x8xf32> to vector<8xf32>
    %1471 = vector.shape_cast %1470 : vector<8xf32> to vector<8x1xf32>
    %1472 = vector.broadcast %1471 : vector<8x1xf32> to vector<8x8xf32>
    %1473 = arith.subf %1469, %1472 : vector<8x8xf32>
    %1474 = math.exp %1473 : vector<8x8xf32>
    %cst_571 = arith.constant dense<0.000000e+00> : vector<8xf32>
    %1475 = vector.multi_reduction <add>, %1474, %cst_571 [1] : vector<8x8xf32> to vector<8xf32>
    %1476 = vector.shape_cast %1475 : vector<8xf32> to vector<8x1xf32>
    %1477 = tpu.reciprocal %1476 {approx = true} : vector<8x1xf32> -> vector<8x1xf32>
    %1478 = vector.broadcast %1477 : vector<8x1xf32> to vector<8x8xf32>
    %1479 = arith.mulf %1474, %1478 : vector<8x8xf32>
    %1480 = arith.truncf %1479 : vector<8x8xf32> to vector<8x8xbf16>
    %1481 = vector.extract_strided_slice %1308 {offsets = [8, 24], sizes = [8, 8], strides = [1, 1]} : vector<16x32xf32> to vector<8x8xf32>
    %1482 = arith.truncf %1481 : vector<8x8xf32> to vector<8x8xbf16>
    %cst_572 = arith.constant dense<0.000000e+00> : vector<8x8xf32>
    %1483 = tpu.matmul %1480, %1482, %cst_572 {dimension_numbers = #tpu.dot_dimension_numbers<[1], [0], [0], [1], [0, 0, 1, 1], [], []>} : vector<8x8xbf16>, vector<8x8xbf16>, vector<8x8xf32> -> vector<8x8xf32>
    %c8_573 = arith.constant 8 : index
    %c24_574 = arith.constant 24 : index
    %1484 = vector.load %arg40[%c8_573, %c24_574] : memref<16x32xf32, #tpu.memory_space<vmem>>, vector<8x8xf32>
    tpu.vector_store %arg40[%c8_573, %c24_574], %1483 {strides = array<i32>} : memref<16x32xf32, #tpu.memory_space<vmem>>, vector<8x8xf32>,
    %c0_575 = arith.constant 0 : index
    %c0_576 = arith.constant 0 : index
    %1485 = vector.load %arg40[%c0_575, %c0_576] : memref<16x32xf32, #tpu.memory_space<vmem>>, vector<16x32xf32>
    %1486 = arith.truncf %1485 : vector<16x32xf32> to vector<16x32xbf16>
    %cst_577 = arith.constant dense<0.000000e+00> : vector<16x32xf32>
    %1487 = tpu.matmul %1486, %1292, %cst_577 {dimension_numbers = #tpu.dot_dimension_numbers<[1], [1], [0], [0], [0, 0, 1, 0], [], []>} : vector<16x32xbf16>, vector<32x32xbf16>, vector<16x32xf32> -> vector<16x32xf32>
    %1488 = vector.broadcast %1294 : vector<1x32xf32> to vector<16x32xf32>
    %1489 = arith.addf %1487, %1488 : vector<16x32xf32>
    %1490 = arith.addf %1286, %1489 : vector<16x32xf32>
    %c1_578 = arith.constant 1 : index
    %c0_579 = arith.constant 0 : index
    %c0_580 = arith.constant 0 : index
    %1491 = vector.load %arg29[%c1_578, %c0_579, %c0_580] : memref<2x1x32xf32, #tpu.memory_space<vmem>>, vector<1x1x32xf32>
    %1492 = vector.shape_cast %1491 : vector<1x1x32xf32> to vector<1x32xf32>
    %c1_581 = arith.constant 1 : index
    %c0_582 = arith.constant 0 : index
    %c0_583 = arith.constant 0 : index
    %1493 = vector.load %arg30[%c1_581, %c0_582, %c0_583] : memref<2x1x32xf32, #tpu.memory_space<vmem>>, vector<1x1x32xf32>
    %1494 = vector.shape_cast %1493 : vector<1x1x32xf32> to vector<1x32xf32>
    %cst_584 = arith.constant dense<0.000000e+00> : vector<16xf32>
    %1495 = vector.multi_reduction <add>, %1490, %cst_584 [1] : vector<16x32xf32> to vector<16xf32>
    %1496 = vector.shape_cast %1495 : vector<16xf32> to vector<16x1xf32>
    %cst_585 = arith.constant 3.200000e+01 : f32
    %1497 = vector.broadcast %cst_585 : f32 to vector<16x1xf32>
    %1498 = arith.divf %1496, %1497 : vector<16x1xf32>
    %1499 = vector.broadcast %1498 : vector<16x1xf32> to vector<16x32xf32>
    %1500 = arith.subf %1490, %1499 : vector<16x32xf32>
    %1501 = arith.mulf %1500, %1500 : vector<16x32xf32>
    %cst_586 = arith.constant dense<0.000000e+00> : vector<16xf32>
    %1502 = vector.multi_reduction <add>, %1501, %cst_586 [1] : vector<16x32xf32> to vector<16xf32>
    %1503 = vector.shape_cast %1502 : vector<16xf32> to vector<16x1xf32>
    %cst_587 = arith.constant 3.200000e+01 : f32
    %1504 = vector.broadcast %cst_587 : f32 to vector<16x1xf32>
    %1505 = arith.divf %1503, %1504 : vector<16x1xf32>
    %1506 = vector.broadcast %1498 : vector<16x1xf32> to vector<16x32xf32>
    %1507 = arith.subf %1490, %1506 : vector<16x32xf32>
    %cst_588 = arith.constant 9.99999974E-6 : f32
    %1508 = vector.broadcast %cst_588 : f32 to vector<16x1xf32>
    %1509 = arith.addf %1505, %1508 : vector<16x1xf32>
    %1510 = math.rsqrt %1509 : vector<16x1xf32>
    %1511 = vector.broadcast %1510 : vector<16x1xf32> to vector<16x32xf32>
    %1512 = arith.mulf %1507, %1511 : vector<16x32xf32>
    %1513 = vector.broadcast %1492 : vector<1x32xf32> to vector<16x32xf32>
    %1514 = arith.mulf %1512, %1513 : vector<16x32xf32>
    %1515 = vector.broadcast %1494 : vector<1x32xf32> to vector<16x32xf32>
    %1516 = arith.addf %1514, %1515 : vector<16x32xf32>
    %c1_589 = arith.constant 1 : index
    %c0_590 = arith.constant 0 : index
    %c0_591 = arith.constant 0 : index
    %1517 = vector.load %arg31[%c1_589, %c0_590, %c0_591] : memref<2x64x32xbf16, #tpu.memory_space<vmem>>, vector<1x64x32xbf16>
    %1518 = vector.shape_cast %1517 : vector<1x64x32xbf16> to vector<64x32xbf16>
    %c1_592 = arith.constant 1 : index
    %c0_593 = arith.constant 0 : index
    %c0_594 = arith.constant 0 : index
    %1519 = vector.load %arg32[%c1_592, %c0_593, %c0_594] : memref<2x1x64xf32, #tpu.memory_space<vmem>>, vector<1x1x64xf32>
    %1520 = vector.shape_cast %1519 : vector<1x1x64xf32> to vector<1x64xf32>
    %c1_595 = arith.constant 1 : index
    %c0_596 = arith.constant 0 : index
    %c0_597 = arith.constant 0 : index
    %1521 = vector.load %arg33[%c1_595, %c0_596, %c0_597] : memref<2x32x64xbf16, #tpu.memory_space<vmem>>, vector<1x32x64xbf16>
    %1522 = vector.shape_cast %1521 : vector<1x32x64xbf16> to vector<32x64xbf16>
    %c1_598 = arith.constant 1 : index
    %c0_599 = arith.constant 0 : index
    %c0_600 = arith.constant 0 : index
    %1523 = vector.load %arg34[%c1_598, %c0_599, %c0_600] : memref<2x1x32xf32, #tpu.memory_space<vmem>>, vector<1x1x32xf32>
    %1524 = vector.shape_cast %1523 : vector<1x1x32xf32> to vector<1x32xf32>
    %1525 = arith.truncf %1516 : vector<16x32xf32> to vector<16x32xbf16>
    %cst_601 = arith.constant dense<0.000000e+00> : vector<16x64xf32>
    %1526 = tpu.matmul %1525, %1518, %cst_601 {dimension_numbers = #tpu.dot_dimension_numbers<[1], [1], [0], [0], [0, 0, 1, 0], [], []>} : vector<16x32xbf16>, vector<64x32xbf16>, vector<16x64xf32> -> vector<16x64xf32>
    %1527 = vector.broadcast %1520 : vector<1x64xf32> to vector<16x64xf32>
    %1528 = arith.addf %1526, %1527 : vector<16x64xf32>
    %cst_602 = arith.constant 0.000000e+00 : f32
    %1529 = vector.broadcast %cst_602 : f32 to vector<16x64xf32>
    %1530 = arith.maximumf %1528, %1529 : vector<16x64xf32>
    %1531 = arith.truncf %1530 : vector<16x64xf32> to vector<16x64xbf16>
    %cst_603 = arith.constant dense<0.000000e+00> : vector<16x32xf32>
    %1532 = tpu.matmul %1531, %1522, %cst_603 {dimension_numbers = #tpu.dot_dimension_numbers<[1], [1], [0], [0], [0, 0, 1, 0], [], []>} : vector<16x64xbf16>, vector<32x64xbf16>, vector<16x32xf32> -> vector<16x32xf32>
    %1533 = vector.broadcast %1524 : vector<1x32xf32> to vector<16x32xf32>
    %1534 = arith.addf %1532, %1533 : vector<16x32xf32>
    %1535 = arith.addf %1516, %1534 : vector<16x32xf32>
    %c1_604 = arith.constant 1 : index
    %c0_605 = arith.constant 0 : index
    %c0_606 = arith.constant 0 : index
    %1536 = vector.load %arg35[%c1_604, %c0_605, %c0_606] : memref<2x1x32xf32, #tpu.memory_space<vmem>>, vector<1x1x32xf32>
    %1537 = vector.shape_cast %1536 : vector<1x1x32xf32> to vector<1x32xf32>
    %c1_607 = arith.constant 1 : index
    %c0_608 = arith.constant 0 : index
    %c0_609 = arith.constant 0 : index
    %1538 = vector.load %arg36[%c1_607, %c0_608, %c0_609] : memref<2x1x32xf32, #tpu.memory_space<vmem>>, vector<1x1x32xf32>
    %1539 = vector.shape_cast %1538 : vector<1x1x32xf32> to vector<1x32xf32>
    %cst_610 = arith.constant dense<0.000000e+00> : vector<16xf32>
    %1540 = vector.multi_reduction <add>, %1535, %cst_610 [1] : vector<16x32xf32> to vector<16xf32>
    %1541 = vector.shape_cast %1540 : vector<16xf32> to vector<16x1xf32>
    %cst_611 = arith.constant 3.200000e+01 : f32
    %1542 = vector.broadcast %cst_611 : f32 to vector<16x1xf32>
    %1543 = arith.divf %1541, %1542 : vector<16x1xf32>
    %1544 = vector.broadcast %1543 : vector<16x1xf32> to vector<16x32xf32>
    %1545 = arith.subf %1535, %1544 : vector<16x32xf32>
    %1546 = arith.mulf %1545, %1545 : vector<16x32xf32>
    %cst_612 = arith.constant dense<0.000000e+00> : vector<16xf32>
    %1547 = vector.multi_reduction <add>, %1546, %cst_612 [1] : vector<16x32xf32> to vector<16xf32>
    %1548 = vector.shape_cast %1547 : vector<16xf32> to vector<16x1xf32>
    %cst_613 = arith.constant 3.200000e+01 : f32
    %1549 = vector.broadcast %cst_613 : f32 to vector<16x1xf32>
    %1550 = arith.divf %1548, %1549 : vector<16x1xf32>
    %1551 = vector.broadcast %1543 : vector<16x1xf32> to vector<16x32xf32>
    %1552 = arith.subf %1535, %1551 : vector<16x32xf32>
    %cst_614 = arith.constant 9.99999974E-6 : f32
    %1553 = vector.broadcast %cst_614 : f32 to vector<16x1xf32>
    %1554 = arith.addf %1550, %1553 : vector<16x1xf32>
    %1555 = math.rsqrt %1554 : vector<16x1xf32>
    %1556 = vector.broadcast %1555 : vector<16x1xf32> to vector<16x32xf32>
    %1557 = arith.mulf %1552, %1556 : vector<16x32xf32>
    %1558 = vector.broadcast %1537 : vector<1x32xf32> to vector<16x32xf32>
    %1559 = arith.mulf %1557, %1558 : vector<16x32xf32>
    %1560 = vector.broadcast %1539 : vector<1x32xf32> to vector<16x32xf32>
    %1561 = arith.addf %1559, %1560 : vector<16x32xf32>
    %c0_615 = arith.constant 0 : index
    %c0_616 = arith.constant 0 : index
    %1562 = vector.load %arg37[%c0_615, %c0_616] : memref<1x32xf32, #tpu.memory_space<vmem>>, vector<1x32xf32>
    %c0_617 = arith.constant 0 : index
    %c0_618 = arith.constant 0 : index
    %1563 = vector.load %arg38[%c0_617, %c0_618] : memref<1x32xf32, #tpu.memory_space<vmem>>, vector<1x32xf32>
    %cst_619 = arith.constant dense<0.000000e+00> : vector<16xf32>
    %1564 = vector.multi_reduction <add>, %1561, %cst_619 [1] : vector<16x32xf32> to vector<16xf32>
    %1565 = vector.shape_cast %1564 : vector<16xf32> to vector<16x1xf32>
    %cst_620 = arith.constant 3.200000e+01 : f32
    %1566 = vector.broadcast %cst_620 : f32 to vector<16x1xf32>
    %1567 = arith.divf %1565, %1566 : vector<16x1xf32>
    %1568 = vector.broadcast %1567 : vector<16x1xf32> to vector<16x32xf32>
    %1569 = arith.subf %1561, %1568 : vector<16x32xf32>
    %1570 = arith.mulf %1569, %1569 : vector<16x32xf32>
    %cst_621 = arith.constant dense<0.000000e+00> : vector<16xf32>
    %1571 = vector.multi_reduction <add>, %1570, %cst_621 [1] : vector<16x32xf32> to vector<16xf32>
    %1572 = vector.shape_cast %1571 : vector<16xf32> to vector<16x1xf32>
    %cst_622 = arith.constant 3.200000e+01 : f32
    %1573 = vector.broadcast %cst_622 : f32 to vector<16x1xf32>
    %1574 = arith.divf %1572, %1573 : vector<16x1xf32>
    %1575 = vector.broadcast %1567 : vector<16x1xf32> to vector<16x32xf32>
    %1576 = arith.subf %1561, %1575 : vector<16x32xf32>
    %cst_623 = arith.constant 9.99999974E-6 : f32
    %1577 = vector.broadcast %cst_623 : f32 to vector<16x1xf32>
    %1578 = arith.addf %1574, %1577 : vector<16x1xf32>
    %1579 = math.rsqrt %1578 : vector<16x1xf32>
    %1580 = vector.broadcast %1579 : vector<16x1xf32> to vector<16x32xf32>
    %1581 = arith.mulf %1576, %1580 : vector<16x32xf32>
    %1582 = vector.broadcast %1562 : vector<1x32xf32> to vector<16x32xf32>
    %1583 = arith.mulf %1581, %1582 : vector<16x32xf32>
    %1584 = vector.broadcast %1563 : vector<1x32xf32> to vector<16x32xf32>
    %1585 = arith.addf %1583, %1584 : vector<16x32xf32>
    %c0_624 = arith.constant 0 : index
    %c0_625 = arith.constant 0 : index
    %1586 = vector.load %arg39[%c0_624, %c0_625] : memref<16x32xf32, #tpu.memory_space<vmem>>, vector<16x32xf32>
    tpu.vector_store %arg39[%c0_624, %c0_625], %1585 {strides = array<i32>} : memref<16x32xf32, #tpu.memory_space<vmem>>, vector<16x32xf32>,
    return
  }
  func.func @transform_0(%arg0: i32) -> (i32, i32) {
    %c0_i32 = arith.constant 0 : i32
    %c0_i32_0 = arith.constant 0 : i32
    %c0_i32_1 = arith.constant 0 : i32
    return %c0_i32, %c0_i32_0 : i32, i32
  }
  func.func @transform_1(%arg0: i32) -> (i32, i32) {
    %c0_i32 = arith.constant 0 : i32
    %c0_i32_0 = arith.constant 0 : i32
    %c0_i32_1 = arith.constant 0 : i32
    return %c0_i32, %c0_i32_0 : i32, i32
  }
  func.func @transform_2(%arg0: i32) -> (i32, i32) {
    %c0_i32 = arith.constant 0 : i32
    %c0_i32_0 = arith.constant 0 : i32
    %c0_i32_1 = arith.constant 0 : i32
    return %c0_i32, %c0_i32_0 : i32, i32
  }
  func.func @transform_3(%arg0: i32) -> (i32, i32) {
    %c0_i32 = arith.constant 0 : i32
    %c0_i32_0 = arith.constant 0 : i32
    %c0_i32_1 = arith.constant 0 : i32
    return %c0_i32, %c0_i32_0 : i32, i32
  }
  func.func @transform_4(%arg0: i32) -> (i32, i32, i32) {
    %c0_i32 = arith.constant 0 : i32
    %c0_i32_0 = arith.constant 0 : i32
    %c0_i32_1 = arith.constant 0 : i32
    %c0_i32_2 = arith.constant 0 : i32
    return %c0_i32, %c0_i32_0, %c0_i32_1 : i32, i32, i32
  }
  func.func @transform_5(%arg0: i32) -> (i32, i32, i32) {
    %c0_i32 = arith.constant 0 : i32
    %c0_i32_0 = arith.constant 0 : i32
    %c0_i32_1 = arith.constant 0 : i32
    %c0_i32_2 = arith.constant 0 : i32
    return %c0_i32, %c0_i32_0, %c0_i32_1 : i32, i32, i32
  }
  func.func @transform_6(%arg0: i32) -> (i32, i32, i32) {
    %c0_i32 = arith.constant 0 : i32
    %c0_i32_0 = arith.constant 0 : i32
    %c0_i32_1 = arith.constant 0 : i32
    %c0_i32_2 = arith.constant 0 : i32
    return %c0_i32, %c0_i32_0, %c0_i32_1 : i32, i32, i32
  }
  func.func @transform_7(%arg0: i32) -> (i32, i32, i32) {
    %c0_i32 = arith.constant 0 : i32
    %c0_i32_0 = arith.constant 0 : i32
    %c0_i32_1 = arith.constant 0 : i32
    %c0_i32_2 = arith.constant 0 : i32
    return %c0_i32, %c0_i32_0, %c0_i32_1 : i32, i32, i32
  }
  func.func @transform_8(%arg0: i32) -> (i32, i32, i32) {
    %c0_i32 = arith.constant 0 : i32
    %c0_i32_0 = arith.constant 0 : i32
    %c0_i32_1 = arith.constant 0 : i32
    %c0_i32_2 = arith.constant 0 : i32
    return %c0_i32, %c0_i32_0, %c0_i32_1 : i32, i32, i32
  }
  func.func @transform_9(%arg0: i32) -> (i32, i32, i32) {
    %c0_i32 = arith.constant 0 : i32
    %c0_i32_0 = arith.constant 0 : i32
    %c0_i32_1 = arith.constant 0 : i32
    %c0_i32_2 = arith.constant 0 : i32
    return %c0_i32, %c0_i32_0, %c0_i32_1 : i32, i32, i32
  }
  func.func @transform_10(%arg0: i32) -> (i32, i32, i32) {
    %c0_i32 = arith.constant 0 : i32
    %c0_i32_0 = arith.constant 0 : i32
    %c0_i32_1 = arith.constant 0 : i32
    %c0_i32_2 = arith.constant 0 : i32
    return %c0_i32, %c0_i32_0, %c0_i32_1 : i32, i32, i32
  }
  func.func @transform_11(%arg0: i32) -> (i32, i32, i32) {
    %c0_i32 = arith.constant 0 : i32
    %c0_i32_0 = arith.constant 0 : i32
    %c0_i32_1 = arith.constant 0 : i32
    %c0_i32_2 = arith.constant 0 : i32
    return %c0_i32, %c0_i32_0, %c0_i32_1 : i32, i32, i32
  }
  func.func @transform_12(%arg0: i32) -> (i32, i32, i32) {
    %c0_i32 = arith.constant 0 : i32
    %c0_i32_0 = arith.constant 0 : i32
    %c0_i32_1 = arith.constant 0 : i32
    %c0_i32_2 = arith.constant 0 : i32
    return %c0_i32, %c0_i32_0, %c0_i32_1 : i32, i32, i32
  }
  func.func @transform_13(%arg0: i32) -> (i32, i32, i32) {
    %c0_i32 = arith.constant 0 : i32
    %c0_i32_0 = arith.constant 0 : i32
    %c0_i32_1 = arith.constant 0 : i32
    %c0_i32_2 = arith.constant 0 : i32
    return %c0_i32, %c0_i32_0, %c0_i32_1 : i32, i32, i32
  }
  func.func @transform_14(%arg0: i32) -> (i32, i32, i32) {
    %c0_i32 = arith.constant 0 : i32
    %c0_i32_0 = arith.constant 0 : i32
    %c0_i32_1 = arith.constant 0 : i32
    %c0_i32_2 = arith.constant 0 : i32
    return %c0_i32, %c0_i32_0, %c0_i32_1 : i32, i32, i32
  }
  func.func @transform_15(%arg0: i32) -> (i32, i32, i32) {
    %c0_i32 = arith.constant 0 : i32
    %c0_i32_0 = arith.constant 0 : i32
    %c0_i32_1 = arith.constant 0 : i32
    %c0_i32_2 = arith.constant 0 : i32
    return %c0_i32, %c0_i32_0, %c0_i32_1 : i32, i32, i32
  }
  func.func @transform_16(%arg0: i32) -> (i32, i32) {
    %c0_i32 = arith.constant 0 : i32
    %c0_i32_0 = arith.constant 0 : i32
    %c0_i32_1 = arith.constant 0 : i32
    return %c0_i32, %c0_i32_0 : i32, i32
  }
  func.func @transform_17(%arg0: i32) -> (i32, i32) {
    %c0_i32 = arith.constant 0 : i32
    %c0_i32_0 = arith.constant 0 : i32
    %c0_i32_1 = arith.constant 0 : i32
    return %c0_i32, %c0_i32_0 : i32, i32
  }
  func.func @transform_18(%arg0: i32) -> (i32, i32, i32) {
    %c0_i32 = arith.constant 0 : i32
    %c0_i32_0 = arith.constant 0 : i32
    %c0_i32_1 = arith.constant 0 : i32
    %c0_i32_2 = arith.constant 0 : i32
    return %c0_i32, %c0_i32_0, %c0_i32_1 : i32, i32, i32
  }
  func.func @transform_19(%arg0: i32) -> (i32, i32, i32) {
    %c0_i32 = arith.constant 0 : i32
    %c0_i32_0 = arith.constant 0 : i32
    %c0_i32_1 = arith.constant 0 : i32
    %c0_i32_2 = arith.constant 0 : i32
    return %c0_i32, %c0_i32_0, %c0_i32_1 : i32, i32, i32
  }
  func.func @transform_20(%arg0: i32) -> (i32, i32, i32) {
    %c0_i32 = arith.constant 0 : i32
    %c0_i32_0 = arith.constant 0 : i32
    %c0_i32_1 = arith.constant 0 : i32
    %c0_i32_2 = arith.constant 0 : i32
    return %c0_i32, %c0_i32_0, %c0_i32_1 : i32, i32, i32
  }
  func.func @transform_21(%arg0: i32) -> (i32, i32, i32) {
    %c0_i32 = arith.constant 0 : i32
    %c0_i32_0 = arith.constant 0 : i32
    %c0_i32_1 = arith.constant 0 : i32
    %c0_i32_2 = arith.constant 0 : i32
    return %c0_i32, %c0_i32_0, %c0_i32_1 : i32, i32, i32
  }
  func.func @transform_22(%arg0: i32) -> (i32, i32, i32) {
    %c0_i32 = arith.constant 0 : i32
    %c0_i32_0 = arith.constant 0 : i32
    %c0_i32_1 = arith.constant 0 : i32
    %c0_i32_2 = arith.constant 0 : i32
    return %c0_i32, %c0_i32_0, %c0_i32_1 : i32, i32, i32
  }
  func.func @transform_23(%arg0: i32) -> (i32, i32, i32) {
    %c0_i32 = arith.constant 0 : i32
    %c0_i32_0 = arith.constant 0 : i32
    %c0_i32_1 = arith.constant 0 : i32
    %c0_i32_2 = arith.constant 0 : i32
    return %c0_i32, %c0_i32_0, %c0_i32_1 : i32, i32, i32
  }
  func.func @transform_24(%arg0: i32) -> (i32, i32, i32) {
    %c0_i32 = arith.constant 0 : i32
    %c0_i32_0 = arith.constant 0 : i32
    %c0_i32_1 = arith.constant 0 : i32
    %c0_i32_2 = arith.constant 0 : i32
    return %c0_i32, %c0_i32_0, %c0_i32_1 : i32, i32, i32
  }
  func.func @transform_25(%arg0: i32) -> (i32, i32, i32) {
    %c0_i32 = arith.constant 0 : i32
    %c0_i32_0 = arith.constant 0 : i32
    %c0_i32_1 = arith.constant 0 : i32
    %c0_i32_2 = arith.constant 0 : i32
    return %c0_i32, %c0_i32_0, %c0_i32_1 : i32, i32, i32
  }
  func.func @transform_26(%arg0: i32) -> (i32, i32, i32) {
    %c0_i32 = arith.constant 0 : i32
    %c0_i32_0 = arith.constant 0 : i32
    %c0_i32_1 = arith.constant 0 : i32
    %c0_i32_2 = arith.constant 0 : i32
    return %c0_i32, %c0_i32_0, %c0_i32_1 : i32, i32, i32
  }
  func.func @transform_27(%arg0: i32) -> (i32, i32, i32) {
    %c0_i32 = arith.constant 0 : i32
    %c0_i32_0 = arith.constant 0 : i32
    %c0_i32_1 = arith.constant 0 : i32
    %c0_i32_2 = arith.constant 0 : i32
    return %c0_i32, %c0_i32_0, %c0_i32_1 : i32, i32, i32
  }
  func.func @transform_28(%arg0: i32) -> (i32, i32, i32) {
    %c0_i32 = arith.constant 0 : i32
    %c0_i32_0 = arith.constant 0 : i32
    %c0_i32_1 = arith.constant 0 : i32
    %c0_i32_2 = arith.constant 0 : i32
    return %c0_i32, %c0_i32_0, %c0_i32_1 : i32, i32, i32
  }
  func.func @transform_29(%arg0: i32) -> (i32, i32, i32) {
    %c0_i32 = arith.constant 0 : i32
    %c0_i32_0 = arith.constant 0 : i32
    %c0_i32_1 = arith.constant 0 : i32
    %c0_i32_2 = arith.constant 0 : i32
    return %c0_i32, %c0_i32_0, %c0_i32_1 : i32, i32, i32
  }
  func.func @transform_30(%arg0: i32) -> (i32, i32, i32) {
    %c0_i32 = arith.constant 0 : i32
    %c0_i32_0 = arith.constant 0 : i32
    %c0_i32_1 = arith.constant 0 : i32
    %c0_i32_2 = arith.constant 0 : i32
    return %c0_i32, %c0_i32_0, %c0_i32_1 : i32, i32, i32
  }
  func.func @transform_31(%arg0: i32) -> (i32, i32, i32) {
    %c0_i32 = arith.constant 0 : i32
    %c0_i32_0 = arith.constant 0 : i32
    %c0_i32_1 = arith.constant 0 : i32
    %c0_i32_2 = arith.constant 0 : i32
    return %c0_i32, %c0_i32_0, %c0_i32_1 : i32, i32, i32
  }
  func.func @transform_32(%arg0: i32) -> (i32, i32, i32) {
    %c0_i32 = arith.constant 0 : i32
    %c0_i32_0 = arith.constant 0 : i32
    %c0_i32_1 = arith.constant 0 : i32
    %c0_i32_2 = arith.constant 0 : i32
    return %c0_i32, %c0_i32_0, %c0_i32_1 : i32, i32, i32
  }
  func.func @transform_33(%arg0: i32) -> (i32, i32, i32) {
    %c0_i32 = arith.constant 0 : i32
    %c0_i32_0 = arith.constant 0 : i32
    %c0_i32_1 = arith.constant 0 : i32
    %c0_i32_2 = arith.constant 0 : i32
    return %c0_i32, %c0_i32_0, %c0_i32_1 : i32, i32, i32
  }
  func.func @transform_34(%arg0: i32) -> (i32, i32, i32) {
    %c0_i32 = arith.constant 0 : i32
    %c0_i32_0 = arith.constant 0 : i32
    %c0_i32_1 = arith.constant 0 : i32
    %c0_i32_2 = arith.constant 0 : i32
    return %c0_i32, %c0_i32_0, %c0_i32_1 : i32, i32, i32
  }
  func.func @transform_35(%arg0: i32) -> (i32, i32, i32) {
    %c0_i32 = arith.constant 0 : i32
    %c0_i32_0 = arith.constant 0 : i32
    %c0_i32_1 = arith.constant 0 : i32
    %c0_i32_2 = arith.constant 0 : i32
    return %c0_i32, %c0_i32_0, %c0_i32_1 : i32, i32, i32
  }
  func.func @transform_36(%arg0: i32) -> (i32, i32) {
    %c0_i32 = arith.constant 0 : i32
    %c0_i32_0 = arith.constant 0 : i32
    %c0_i32_1 = arith.constant 0 : i32
    return %c0_i32, %c0_i32_0 : i32, i32
  }
  func.func @transform_37(%arg0: i32) -> (i32, i32) {
    %c0_i32 = arith.constant 0 : i32
    %c0_i32_0 = arith.constant 0 : i32
    %c0_i32_1 = arith.constant 0 : i32
    return %c0_i32, %c0_i32_0 : i32, i32
  }
  func.func @transform_38(%arg0: i32) -> (i32, i32) {
    %c0_i32 = arith.constant 0 : i32
    %c0_i32_0 = arith.constant 0 : i32
    %c0_i32_1 = arith.constant 0 : i32
    return %c0_i32, %c0_i32_0 : i32, i32
  }
}

</mosaic_0001>

<bundles_post_ra>
// kernel: transformer_forward.1
= control target key start
LH: loop header
LB: loop body
LE: loop exit
PB: predicated region body
PF: predicated region fallthrough
CT: control target
= control target key end

     0   :  { %s10016_s6 = smov 1   ;;  %s10017_s10 = smov 2   ;;  %s11827_s0 = inlined_call_operand.smem [shape: u32[39], index: -1, kind: input, shape index: {}] }
   0x1   :  { %s10080_s5 = sld [smem:[%s11827_s0]]   ;;  %s10018_s14 = smov 3  }
   0x2   :  { %s10085_s9 = sld [smem:[%s11827_s0 + %s10016_s6]]   ;;  %s10019_s18 = smov 4  }
   0x3   :  { %s10090_s13 = sld [smem:[%s11827_s0 + %s10017_s10]]   ;;  %s10020_s22 = smov 5  }
   0x4   :  { %s10095_s17 = sld [smem:[%s11827_s0 + %s10018_s14]]   ;;  %s10021_s26 = smov 6  }
   0x5   :  { %s10100_s21 = sld [smem:[%s11827_s0 + %s10019_s18]]   ;;  %s10022_s30 = smov 7  }
   0x6   :  { %s10105_s25 = sld [smem:[%s11827_s0 + %s10020_s22]]   ;;  %s10023_s4 = smov 8  }
   0x7   :  { %s10110_s29 = sld [smem:[%s11827_s0 + %s10021_s26]]   ;;  %s10024_s10 = smov 9  }
   0x8   :  { %11855 = sst [smem:[#allocation6_spill]] %s10085_s9  ;;  %s10025_s15 = smov 10  }
   0x9   :  { %s10115_s3 = sld [smem:[%s11827_s0 + %s10022_s30]]   ;;  %s10026_s20 = smov 11  }
   0xa   :  { %11856 = sst [smem:[#allocation7_spill]] %s10095_s17  ;;  %s10027_s26 = smov 12  }
   0xb   :  { %s10120_s8 = sld [smem:[%s11827_s0 + %s10023_s4]]   ;;  %s10028_s1 = smov 13  }
   0xc   :  { %s10125_s14 = sld [smem:[%s11827_s0 + %s10024_s10]]   ;;  %s10029_s7 = smov 14  }
   0xd   :  { %s10130_s19 = sld [smem:[%s11827_s0 + %s10025_s15]]   ;;  %s10030_s15 = smov 15  }
   0xe   :  { %s10135_s24 = sld [smem:[%s11827_s0 + %s10026_s20]]   ;;  %s10031_s22 = smov 16  }
   0xf   :  { %s10140_s30 = sld [smem:[%s11827_s0 + %s10027_s26]]   ;;  %s10032_s28 = smov 17  }
  0x10   :  { %s10145_s6 = sld [smem:[%s11827_s0 + %s10028_s1]]  }
  0x11   :  { %s10150_s12 = sld [smem:[%s11827_s0 + %s10029_s7]]   ;;  %s10033_s7 = smov 18  }
  0x12   :  { %s10155_s20 = sld [smem:[%s11827_s0 + %s10030_s15]]   ;;  %s10034_s15 = smov 19  }
  0x13   :  { %s10160_s27 = sld [smem:[%s11827_s0 + %s10031_s22]]   ;;  %s10035_s22 = smov 20  }
  0x14   :  { %s10165_s4 = sld [smem:[%s11827_s0 + %s10032_s28]]   ;;  %s10036_s28 = smov 21  }
  0x15   :  { %s10170_s17 = sld [smem:[%s11827_s0 + %s10033_s7]]   ;;  %s10037_s7 = smov 22  }
  0x16   :  { %s10175_s9 = sld [smem:[%s11827_s0 + %s10034_s15]]   ;;  %s10038_s15 = smov 23  }
  0x19   :  { %11857 = sst [smem:[#allocation8_spill]] %s10160_s27 }
  0x1a   :  { %11858 = sst [smem:[#allocation9_spill]] %s10165_s4 }
  0x1b   :  { %11859 = sst [smem:[#allocation10_spill]] %s10170_s17 }
  0x1c   :  { %11860 = sst [smem:[#allocation11_spill]] %s10175_s9 }
  0x1d   :  { %s10180_s27 = sld [smem:[%s11827_s0 + %s10035_s22]]   ;;  %s10039_s22 = smov 24  }
  0x1e   :  { %s10185_s4 = sld [smem:[%s11827_s0 + %s10036_s28]]   ;;  %s10040_s28 = smov 25  }
  0x1f   :  { %s10190_s17 = sld [smem:[%s11827_s0 + %s10037_s7]]   ;;  %s10041_s7 = smov 26  }
  0x20   :  { %s10195_s9 = sld [smem:[%s11827_s0 + %s10038_s15]]   ;;  %s10042_s15 = smov 27  }
  0x23   :  { %11861 = sst [smem:[#allocation12_spill]] %s10180_s27 }
  0x24   :  { %11862 = sst [smem:[#allocation13_spill]] %s10185_s4 }
  0x25   :  { %11863 = sst [smem:[#allocation14_spill]] %s10190_s17 }
  0x26   :  { %11864 = sst [smem:[#allocation15_spill]] %s10195_s9 }
  0x27   :  { %s10200_s27 = sld [smem:[%s11827_s0 + %s10039_s22]]   ;;  %s10043_s22 = smov 28  }
  0x28   :  { %s10205_s4 = sld [smem:[%s11827_s0 + %s10040_s28]]   ;;  %s10044_s28 = smov 29  }
  0x29   :  { %s10210_s17 = sld [smem:[%s11827_s0 + %s10041_s7]]   ;;  %s10045_s7 = smov 30  }
  0x2a   :  { %s10215_s9 = sld [smem:[%s11827_s0 + %s10042_s15]]   ;;  %s10046_s15 = smov 31  }
  0x2d   :  { %11865 = sst [smem:[#allocation16_spill]] %s10200_s27 }
  0x2e   :  { %11866 = sst [smem:[#allocation17_spill]] %s10205_s4 }
  0x2f   :  { %11867 = sst [smem:[#allocation18_spill]] %s10210_s17 }
  0x30   :  { %11868 = sst [smem:[#allocation19_spill]] %s10215_s9 }
  0x31   :  { %s10220_s27 = sld [smem:[%s11827_s0 + %s10043_s22]]   ;;  %s10047_s22 = smov 32  }
  0x32   :  { %s10225_s4 = sld [smem:[%s11827_s0 + %s10044_s28]]   ;;  %s10048_s28 = smov 33  }
  0x33   :  { %s10230_s17 = sld [smem:[%s11827_s0 + %s10045_s7]]   ;;  %s10049_s7 = smov 34  }
  0x34   :  { %s10235_s9 = sld [smem:[%s11827_s0 + %s10046_s15]]   ;;  %s10050_s15 = smov 35  }
  0x37   :  { %11869 = sst [smem:[#allocation20_spill]] %s10220_s27 }
  0x38   :  { %11870 = sst [smem:[#allocation21_spill]] %s10225_s4 }
  0x39   :  { %11871 = sst [smem:[#allocation22_spill]] %s10230_s17 }
  0x3a   :  { %11872 = sst [smem:[#allocation23_spill]] %s10235_s9 }
  0x3b   :  { %s10240_s27 = sld [smem:[%s11827_s0 + %s10047_s22]]   ;;  %s10051_s22 = smov 36  }
  0x3c   :  { %s10245_s4 = sld [smem:[%s11827_s0 + %s10048_s28]]   ;;  %s10052_s28 = smov 37  }
  0x3d   :  { %s10250_s17 = sld [smem:[%s11827_s0 + %s10049_s7]]   ;;  %s10053_s7 = smov 38  }
  0x3e   :  { %s10255_s9 = sld [smem:[%s11827_s0 + %s10050_s15]]  }
  0x41   :  { %11873 = sst [smem:[#allocation24_spill]] %s10240_s27 }
  0x42   :  { %11874 = sst [smem:[#allocation25_spill]] %s10245_s4 }
  0x43   :  { %11875 = sst [smem:[#allocation26_spill]] %s10250_s17 }
  0x44   :  { %s10260_s27 = sld [smem:[%s11827_s0 + %s10051_s22]]  }
  0x45   :  { %s10265_s4 = sld [smem:[%s11827_s0 + %s10052_s28]]  }
  0x46   :  { %s10270_s17 = sld [smem:[%s11827_s0 + %s10053_s7]]  }
  0x47   :  { %v9682_v0 = vld [vmem:[%s10100_s21 + $0x28] sm:$0xff]   ;;  %v10054_v1 = vmov 0.0   ;;  %vm221_vm0 = vcmask 261120   ;;  %v9683_v2 = vld [vmem:[%s10100_s21 + $0x20] sm:$0xff]   ;;  %v9684_v4 = vld [vmem:[%s10100_s21 + $0x18] sm:$0xff]   ;;  %vm10055_vm1 = vmmov 0  }
  0x48   :  { %8818 = vmatprep.subr.bf16.mxu0 %v10054_v1  ;;  %8834 = vmatprep.subr.bf16.mxu1 %v10054_v1  ;;  %v241_v3 = vsel %vm221_vm0, %v9682_v0, 0  ;;  %v9685_v5 = vld [vmem:[%s10100_s21 + $0x10] sm:$0xff]   ;;  %v9686_v6 = vld [vmem:[%s10100_s21 + $0x8] sm:$0xff]   ;;  %v9687_v7 = vld [vmem:[%s10100_s21] sm:$0xff]   ;;  %v238_v8 = vsel %vm221_vm0, %v9683_v2, 0  ;;  %v235_v9 = vsel %vm221_vm0, %v9684_v4, 0 }
  0x49   :  { %8819 = vmatpush3.bf16.xpose.msra.mxu0 %v241_v3  ;;  %v232_v10 = vsel %vm221_vm0, %v9685_v5, 0  ;;  %v229_v11 = vsel %vm221_vm0, %v9686_v6, 0  ;;  %v226_v12 = vsel %vm221_vm0, %v9687_v7, 0  ;;  %8830 = vmatprep.mubr.msk.bf16.mxu0 %vm10055_vm1, %v10054_v1  ;;  %v160_v13 = vld [vmem:[%s10080_s5] sm:$0xff]  ;;  %v161_v14 = vld [vmem:[%s10080_s5 + $0x8] sm:$0xff] }
  0x4a   :  { %8820 = vmatprep.subr.bf16.mxu0 %v10054_v1  ;;  %8836 = vmatprep.mubr.msk.bf16.mxu1 %vm10055_vm1, %v10054_v1  ;;  %v162_v15 = vld [vmem:[%s10090_s13] sm:$0xff]  ;;  %v163_v16 = vld [vmem:[%s10090_s13 + $0x8] sm:$0xff] }
  0x4b   :  { %v10299_v17 = vadd.f32 %v162_v15, %v160_v13  ;;  %v10301_v18 = vadd.f32 %v163_v16, %v161_v14 }
  0x4d   :  { %v184_v19 = vpack.c.bf16 %v10301_v18, %v10299_v17 }
  0x51   :  { %8821 = vmatpush3.bf16.xpose.msra.mxu0 %v238_v8 }
  0x52   :  { %8822 = vmatprep.subr.bf16.mxu0 %v10054_v1 }
  0x59   :  { %8823 = vmatpush3.bf16.xpose.msra.mxu0 %v235_v9 }
  0x5a   :  { %8824 = vmatprep.subr.bf16.mxu0 %v10054_v1 }
  0x61   :  { %8825 = vmatpush3.bf16.xpose.msra.mxu0 %v232_v10 }
  0x62   :  { %8826 = vmatprep.subr.bf16.mxu0 %v10054_v1 }
  0x69   :  { %8827 = vmatpush3.bf16.xpose.msra.mxu0 %v229_v11 }
  0x6a   :  { %8828 = vmatprep.subr.bf16.mxu0 %v10054_v1 }
  0x71   :  { %8829 = vmatpush3.bf16.xpose.msra.mxu0 %v226_v12 }
  0x72   :  { %8870 = vmatprep.subr.bf16.mxu0 %v10054_v1 }
  0x78   :  { %8831 = vmatmul.mubr.msk.bf16.vlgmr.msra.gmra.mxu0 %vm221_vm0, %v184_v19 }
  0x79   :  { %8872 = vmatprep.mubr.msk.bf16.mxu0 %vm10055_vm1, %v10054_v1 }
  0x7a   :  { %82 = vsyncpa [#allocation4], 0  ;;  %v8206_v20 = vld [vmem:[%s10105_s25] ss:$0 sm:$0xff]  ;;  %s10056_s0 = smov 64   ;;  %s10057_s5 = smov 96  }
  0x7b   :  { %vm288_vm2 = vcmask 64512   ;;  %vm353_vm3 = vcmask 1043456   ;;  %s10058_s13 = smov 56   ;;  %s10059_s15 = smov 88   ;;  %vm513_vm4 = vcmask 130112   ;;  %vm630_vm5 = vcmask 195712  }
  0x7c   :  { %s10060_s16 = smov 120   ;;  %s10061_s18 = smov 72   ;;  %vm747_vm6 = vcmask 261312   ;;  %vm1441_vm7 = vcmask 523264  }
  0x7d   :  { %s10062_s22 = smov 80   ;;  %s10063_s23 = smov 112  }
  0x7e   :  { %s10064_s26 = smov 104   ;;  %s10065_s28 = smov 48  }
  0x7f   :  { %s11853_s1 = smov 40   ;;  %s11851_s2 = smov 8  }
  0x80   :  { %s11849_s7 = smov 16   ;;  %s11847_s10 = smov 24  }
  0x81   :  { %s11888_s11 = sld [smem:[#allocation18_spill]] }
 0x138   :  { %v277_v21 = vpop.f32.mrf.mxu0 }
 0x139   :  { %v278_v22 = vadd.f32 %v8206_v20, %v277_v21 }
 0x13a   :  { %v8832_v23 = vpop.f32.mrf.mxu0 }
 0x13b   :  { %v10310_v24 = vpack.c.bf16 %v278_v22, %v278_v22 }
 0x13c   :  { %v280_v25 = vpop.f32.mrf.mxu0 }
 0x13d   :  { %v10312_v26 = vadd.f32 %v8206_v20, %v280_v25  ;;  %348 = vrot.lane.b32.xlu1 %v10310_v24, %s10056_s0  ;;  %286 = vrot.lane.b32.xlu0 %v10310_v24, %s10057_s5 }
 0x13e   :  { %v8833_v27 = vpop.f32.mrf.mxu0 }
 0x13f   :  { %v10350_v62 = vpack.c.bf16 %v10312_v26, %v10312_v26 }
 0x1af   :  { %v287_v28 = vpop.permute.xlu0 %286  ;;  %v349_v30 = vpop.permute.xlu1 %348 }
 0x1b0   :  { %v293_v29 = vsel %vm288_vm2, %v287_v28, 0  ;;  %v355_v31 = vsel %vm353_vm3, %v349_v30, 0 }
 0x1b1   :  { %8835 = vmatpush3.bf16.xpose.msra.mxu1 %v293_v29 }
 0x1b2   :  { %8840 = vmatprep.subr.bf16.mxu1 %v10054_v1 }
 0x1b8   :  { %8837 = vmatmul.mubr.msk.bf16.vlgmr.msra.gmra.mxu1 %vm288_vm2, %v10310_v24 }
 0x1b9   :  { %8841 = vmatpush3.bf16.msra.mxu1 %v355_v31  ;;  %8842 = vmatprep.mubr.msk.bf16.mxu1 %vm10055_vm1, %v10054_v1 }
 0x1ba   :  { %8846 = vmatprep.subr.bf16.mxu1 %v10054_v1 }
 0x278   :  { %v329_v32 = vpop.f32.mrf.mxu1 }
 0x279   :  { %v335_v33 = vmul.f32 0.35355338, %v329_v32 }
 0x27a   :  { %v8838_v34 = vpop.f32.mrf.mxu1 }
 0x27b   :  { %v336_v35 = vsel %vm288_vm2, %v335_v33, -inf }
 0x27c   :  { %337 = vmax.xlane.f32.xlu0 %v336_v35  ;;  %v332_v36 = vpop.f32.mrf.mxu1 }
 0x27e   :  { %v8839_v37 = vpop.f32.mrf.mxu1 }
 0x292   :  { %461 = vrot.lane.b32.xlu0 %v10310_v24, %s10058_s13 }
 0x305   :  { %v338_v38 = vpop.xlane.xlu0 %337 }
 0x306   :  { %v339_v39 = vsub.f32 %v335_v33, %v338_v38 }
 0x308   :  { %v340_v40 = vmul.f32 1.442695, %v339_v39 }
 0x309   :  { %v462_v49 = vpop.permute.xlu0 %461 }
 0x30a   :  { %9754 = vpow2.f32 %v340_v40  ;;  %v467_v51 = vsel %vm353_vm3, %v462_v49, 0 }
 0x317   :  { %v9755_v41 = vpop.eup %9754 }
 0x318   :  { %v342_v42 = vsel %vm288_vm2, %v9755_v41, 0.0 }
 0x319   :  { %343 = vadd.xlane.f32.xlu1 %v342_v42 }
 0x32a   :  { %400 = vrot.lane.b32.xlu1 %v10310_v24, %s10059_s15 }
 0x32e   :  { %398 = vrot.lane.b32.xlu1 %v10310_v24, %s10060_s16 }
 0x3a2   :  { %v344_v43 = vpop.xlane.xlu1 %343 }
 0x3a3   :  { %9756 = vrcp.f32 %v344_v43 }
 0x3a6   :  { %v401_v46 = vpop.permute.xlu1 %400 }
 0x3a7   :  { %v406_v48 = vsel %vm288_vm2, %v401_v46, 0 }
 0x3aa   :  { %v399_v50 = vpop.permute.xlu1 %398 }
 0x3b0   :  { %v9757_v44 = vpop.eup %9756 }
 0x3b1   :  { %v346_v45 = vmul.f32 %v9757_v44, %v9755_v41 }
 0x3b3   :  { %v347_v47 = vpack.c.bf16 %v346_v45, %v346_v45 }
 0x3b5   :  { %8843 = vmatmul.mubr.msk.bf16.vlgmr.msra.gmra.mxu1 %vm288_vm2, %v347_v47 }
 0x3b6   :  { %8847 = vmatpush3.bf16.xpose.msra.mxu1 %v406_v48  ;;  %8848 = vmatprep.mubr.msk.bf16.mxu1 %vm10055_vm1, %v10054_v1 }
 0x3b7   :  { %8852 = vmatprep.subr.bf16.mxu1 %v10054_v1 }
 0x3bd   :  { %8849 = vmatmul.mubr.msk.bf16.vlgmr.msra.gmra.mxu1 %vm288_vm2, %v399_v50 }
 0x3be   :  { %8853 = vmatpush3.bf16.msra.mxu1 %v467_v51  ;;  %8854 = vmatprep.mubr.msk.bf16.mxu1 %vm10055_vm1, %v10054_v1 }
 0x3bf   :  { %8858 = vmatprep.subr.bf16.mxu1 %v10054_v1 }
 0x475   :  { %v391_v52 = vpop.f32.mrf.mxu1 }
 0x476   :  { %397 = vst.msk [vmem:[#allocation2] sm:$0xff] %vm288_vm2, %v391_v52 }
 0x477   :  { %v8844_v53 = vpop.f32.mrf.mxu1 }
 0x479   :  { %v394_v54 = vpop.f32.mrf.mxu1 }
 0x47b   :  { %v8845_v55 = vpop.f32.mrf.mxu1 }
 0x47d   :  { %v442_v56 = vpop.f32.mrf.mxu1 }
 0x47e   :  { %v448_v57 = vmul.f32 0.35355338, %v442_v56 }
 0x47f   :  { %v8850_v58 = vpop.f32.mrf.mxu1 }
 0x480   :  { %v449_v59 = vsel %vm288_vm2, %v448_v57, -inf }
 0x481   :  { %450 = vmax.xlane.f32.xlu1 %v449_v59  ;;  %v445_v60 = vpop.f32.mrf.mxu1 }
 0x483   :  { %v8851_v61 = vpop.f32.mrf.mxu1 }
 0x492   :  { %634 = vrot.lane.b32.xlu1 %v10310_v24, %s10061_s18 }
 0x496   :  { %979 = vrot.lane.b32.xlu1 %v10350_v62, %s10062_s22 }
 0x49a   :  { %1095 = vrot.lane.b32.xlu1 %v10350_v62, %s10061_s18 }
 0x50a   :  { %v451_v63 = vpop.xlane.xlu1 %450 }
 0x50b   :  { %v452_v0 = vsub.f32 %v448_v57, %v451_v63 }
 0x50d   :  { %v453_v2 = vmul.f32 1.442695, %v452_v0 }
 0x50e   :  { %v635_v3 = vpop.permute.xlu1 %634 }
 0x50f   :  { %9758 = vpow2.f32 %v453_v2  ;;  %v640_v4 = vsel %vm288_vm2, %v635_v3, 0 }
 0x510   :  { %8871 = vmatpush3.bf16.xpose.msra.mxu0 %v640_v4 }
 0x511   :  { %8882 = vmatprep.subr.bf16.mxu0 %v10054_v1 }
 0x512   :  { %v980_v21 = vpop.permute.xlu1 %979 }
 0x513   :  { %v985_v23 = vsel %vm288_vm2, %v980_v21, 0 }
 0x516   :  { %v1096_v25 = vpop.permute.xlu1 %1095 }
 0x517   :  { %v1101_v27 = vsel %vm288_vm2, %v1096_v25, 0 }
 0x51c   :  { %v9759_v5 = vpop.eup %9758 }
 0x51d   :  { %v455_v6 = vsel %vm288_vm2, %v9759_v5, 0.0 }
 0x51e   :  { %456 = vadd.xlane.f32.xlu0 %v455_v6 }
 0x534   :  { %517 = vrot.lane.b32.xlu0 %v10310_v24, %s10062_s22 }
 0x538   :  { %515 = vrot.lane.b32.xlu0 %v10310_v24, %s10063_s23 }
 0x53c   :  { %632 = vrot.lane.b32.xlu0 %v10310_v24, %s10064_s26 }
 0x540   :  { %751 = vrot.lane.b32.xlu0 %v10350_v62, %s10057_s5 }
 0x544   :  { %863 = vrot.lane.b32.xlu0 %v10350_v62, %s10059_s15 }
 0x548   :  { %861 = vrot.lane.b32.xlu0 %v10350_v62, %s10060_s16 }
 0x54c   :  { %977 = vrot.lane.b32.xlu0 %v10350_v62, %s10063_s23 }
 0x550   :  { %1093 = vrot.lane.b32.xlu0 %v10350_v62, %s10064_s26 }
 0x5a7   :  { %v457_v7 = vpop.xlane.xlu0 %456 }
 0x5a8   :  { %9760 = vrcp.f32 %v457_v7 }
 0x5ab   :  { %v518_v8 = vpop.permute.xlu0 %517 }
 0x5ac   :  { %v523_v16 = vsel %vm288_vm2, %v518_v8, 0 }
 0x5af   :  { %v516_v9 = vpop.permute.xlu0 %515 }
 0x5b3   :  { %v633_v10 = vpop.permute.xlu0 %632 }
 0x5b4   :  { %8873 = vmatmul.mubr.msk.bf16.vlgmr.msra.gmra.mxu0 %vm288_vm2, %v633_v10 }
 0x5b5   :  { %v9761_v11 = vpop.eup %9760  ;;  %8884 = vmatprep.mubr.msk.bf16.mxu0 %vm10055_vm1, %v10054_v1 }
 0x5b6   :  { %v459_v12 = vmul.f32 %v9761_v11, %v9759_v5 }
 0x5b7   :  { %v752_v13 = vpop.permute.xlu0 %751 }
 0x5b8   :  { %v757_v14 = vsel %vm288_vm2, %v752_v13, 0  ;;  %v460_v15 = vpack.c.bf16 %v459_v12, %v459_v12 }
 0x5b9   :  { %8883 = vmatpush3.bf16.xpose.msra.mxu0 %v757_v14 }
 0x5ba   :  { %8855 = vmatmul.mubr.msk.bf16.vlgmr.msra.gmra.mxu1 %vm288_vm2, %v460_v15  ;;  %8894 = vmatprep.subr.bf16.mxu0 %v10054_v1 }
 0x5bb   :  { %8859 = vmatpush3.bf16.xpose.msra.mxu1 %v523_v16  ;;  %8860 = vmatprep.mubr.msk.bf16.mxu1 %vm10055_vm1, %v10054_v1  ;;  %v864_v19 = vpop.permute.xlu0 %863 }
 0x5bc   :  { %8864 = vmatprep.subr.bf16.mxu1 %v10054_v1  ;;  %v869_v20 = vsel %vm288_vm2, %v864_v19, 0 }
 0x5bf   :  { %v862_v22 = vpop.permute.xlu0 %861 }
 0x5c0   :  { %8885 = vmatmul.mubr.msk.bf16.vlgmr.msra.gmra.mxu0 %vm288_vm2, %v10350_v62 }
 0x5c1   :  { %8895 = vmatpush3.bf16.xpose.msra.mxu0 %v869_v20  ;;  %8896 = vmatprep.mubr.msk.bf16.mxu0 %vm10055_vm1, %v10054_v1 }
 0x5c2   :  { %8861 = vmatmul.mubr.msk.bf16.vlgmr.msra.gmra.mxu1 %vm288_vm2, %v516_v9  ;;  %8906 = vmatprep.subr.bf16.mxu0 %v10054_v1 }
 0x5c3   :  { %8866 = vmatprep.mubr.msk.bf16.mxu1 %vm10055_vm1, %v10054_v1  ;;  %v978_v26 = vpop.permute.xlu0 %977 }
 0x5c7   :  { %v1094_v28 = vpop.permute.xlu0 %1093 }
 0x5c8   :  { %8897 = vmatmul.mubr.msk.bf16.vlgmr.msra.gmra.mxu0 %vm288_vm2, %v862_v22 }
 0x5c9   :  { %8907 = vmatpush3.bf16.xpose.msra.mxu0 %v985_v23  ;;  %8908 = vmatprep.mubr.msk.bf16.mxu0 %vm10055_vm1, %v10054_v1 }
 0x5ca   :  { %8918 = vmatprep.subr.bf16.mxu0 %v10054_v1 }
 0x5d0   :  { %8909 = vmatmul.mubr.msk.bf16.vlgmr.msra.gmra.mxu0 %vm288_vm2, %v978_v26 }
 0x5d1   :  { %8919 = vmatpush3.bf16.xpose.msra.mxu0 %v1101_v27  ;;  %8920 = vmatprep.mubr.msk.bf16.mxu0 %vm10055_vm1, %v10054_v1 }
 0x5d2   :  { %8930 = vmatprep.subr.bf16.mxu0 %v10054_v1 }
 0x5d8   :  { %8921 = vmatmul.mubr.msk.bf16.vlgmr.msra.gmra.mxu0 %vm288_vm2, %v1094_v28 }
 0x5d9   :  { %8934 = vmatprep.mubr.msk.bf16.mxu0 %vm10055_vm1, %v10054_v1 }
 0x674   :  { %v676_v29 = vpop.f32.mrf.mxu0 }
 0x675   :  { %v682_v30 = vmul.f32 0.35355338, %v676_v29 }
 0x676   :  { %v8874_v31 = vpop.f32.mrf.mxu0 }
 0x677   :  { %v683_v32 = vsel %vm288_vm2, %v682_v30, -inf }
 0x678   :  { %684 = vmax.xlane.f32.xlu0 %v683_v32  ;;  %v679_v33 = vpop.f32.mrf.mxu0 }
 0x67a   :  { %v10408_v34 = vpop.f32.mrf.mxu1  ;;  %v8875_v35 = vpop.f32.mrf.mxu0 }
 0x67c   :  { %v8856_v36 = vpop.f32.mrf.mxu1 }
 0x67e   :  { %v506_v37 = vpop.f32.mrf.mxu1 }
 0x680   :  { %v8857_v38 = vpop.f32.mrf.mxu1  ;;  %v793_v39 = vpop.f32.mrf.mxu0 }
 0x681   :  { %v799_v40 = vmul.f32 0.35355338, %v793_v39 }
 0x682   :  { %v559_v41 = vpop.f32.mrf.mxu1  ;;  %v8886_v42 = vpop.f32.mrf.mxu0 }
 0x683   :  { %v565_v43 = vmul.f32 0.35355338, %v559_v41  ;;  %v800_v44 = vsel %vm288_vm2, %v799_v40, -inf }
 0x684   :  { %v8862_v45 = vpop.f32.mrf.mxu1  ;;  %801 = vmax.xlane.f32.xlu0 %v800_v44  ;;  %v796_v46 = vpop.f32.mrf.mxu0 }
 0x685   :  { %v566_v47 = vsel %vm288_vm2, %v565_v43, -inf }
 0x686   :  { %v562_v48 = vpop.f32.mrf.mxu1  ;;  %567 = vmax.xlane.f32.xlu1 %v566_v47  ;;  %v8887_v49 = vpop.f32.mrf.mxu0 }
 0x688   :  { %v8863_v50 = vpop.f32.mrf.mxu1  ;;  %v905_v51 = vpop.f32.mrf.mxu0 }
 0x689   :  { %v911_v52 = vmul.f32 0.35355338, %v905_v51 }
 0x68a   :  { %v8898_v53 = vpop.f32.mrf.mxu0 }
 0x68b   :  { %v912_v54 = vsel %vm288_vm2, %v911_v52, -inf }
 0x68c   :  { %913 = vmax.xlane.f32.xlu1 %v912_v54  ;;  %v908_v55 = vpop.f32.mrf.mxu0 }
 0x68e   :  { %v8899_v56 = vpop.f32.mrf.mxu0 }
 0x690   :  { %v1021_v57 = vpop.f32.mrf.mxu0 }
 0x691   :  { %v1027_v58 = vmul.f32 0.35355338, %v1021_v57 }
 0x692   :  { %v8910_v59 = vpop.f32.mrf.mxu0 }
 0x693   :  { %v1028_v60 = vsel %vm288_vm2, %v1027_v58, -inf }
 0x694   :  { %1029 = vmax.xlane.f32.xlu0 %v1028_v60  ;;  %v1024_v61 = vpop.f32.mrf.mxu0 }
 0x696   :  { %v8911_v63 = vpop.f32.mrf.mxu0 }
 0x698   :  { %v1137_v0 = vpop.f32.mrf.mxu0 }
 0x699   :  { %v1143_v2 = vmul.f32 0.35355338, %v1137_v0 }
 0x69a   :  { %v8922_v3 = vpop.f32.mrf.mxu0 }
 0x69b   :  { %v1144_v4 = vsel %vm288_vm2, %v1143_v2, -inf }
 0x69c   :  { %1145 = vmax.xlane.f32.xlu1 %v1144_v4  ;;  %v1140_v5 = vpop.f32.mrf.mxu0 }
 0x69e   :  { %v8923_v6 = vpop.f32.mrf.mxu0 }
 0x701   :  { %v685_v7 = vpop.xlane.xlu0 %684 }
 0x702   :  { %v686_v8 = vsub.f32 %v682_v30, %v685_v7 }
 0x704   :  { %v687_v9 = vmul.f32 1.442695, %v686_v8 }
 0x706   :  { %9762 = vpow2.f32 %v687_v9 }
 0x70d   :  { %v802_v10 = vpop.xlane.xlu0 %801 }
 0x70e   :  { %v803_v11 = vsub.f32 %v799_v40, %v802_v10 }
 0x70f   :  { %v568_v12 = vpop.xlane.xlu1 %567 }
 0x710   :  { %v804_v13 = vmul.f32 1.442695, %v803_v11  ;;  %v569_v14 = vsub.f32 %v565_v43, %v568_v12 }
 0x712   :  { %9764 = vpow2.f32 %v804_v13  ;;  %v570_v15 = vmul.f32 1.442695, %v569_v14 }
 0x713   :  { %v10415_v16 = vpop.eup %9762 }
 0x714   :  { %9766 = vpow2.f32 %v570_v15  ;;  %v689_v19 = vsel %vm288_vm2, %v10415_v16, 0.0 }
 0x715   :  { %v914_v20 = vpop.xlane.xlu1 %913  ;;  %690 = vadd.xlane.f32.xlu1 %v689_v19 }
 0x716   :  { %v915_v21 = vsub.f32 %v911_v52, %v914_v20 }
 0x718   :  { %v916_v22 = vmul.f32 1.442695, %v915_v21 }
 0x71a   :  { %9768 = vpow2.f32 %v916_v22 }
 0x71d   :  { %v1030_v23 = vpop.xlane.xlu0 %1029 }
 0x71e   :  { %v1031_v25 = vsub.f32 %v1027_v58, %v1030_v23 }
 0x71f   :  { %v10419_v26 = vpop.eup %9764 }
 0x720   :  { %v1032_v27 = vmul.f32 1.442695, %v1031_v25  ;;  %v806_v28 = vsel %vm288_vm2, %v10419_v26, 0.0 }
 0x721   :  { %v9767_v29 = vpop.eup %9766  ;;  %807 = vadd.xlane.f32.xlu0 %v806_v28 }
 0x722   :  { %9770 = vpow2.f32 %v1032_v27  ;;  %v572_v30 = vsel %vm288_vm2, %v9767_v29, 0.0  ;;  %v9688_v27 = vld [vmem:[%s10110_s29 + $0x8] sm:$0xff]  }
 0x725   :  { %573 = vadd.xlane.f32.xlu0 %v572_v30  ;;  %v1146_v36 = vpop.xlane.xlu1 %1145 }
 0x726   :  { %v1147_v37 = vsub.f32 %v1143_v2, %v1146_v36 }
 0x727   :  { %v10424_v31 = vpop.eup %9768 }
 0x728   :  { %v918_v32 = vsel %vm288_vm2, %v10424_v31, 0.0  ;;  %v1148_v38 = vmul.f32 1.442695, %v1147_v37 }
 0x729   :  { %919 = vadd.xlane.f32.xlu1 %v918_v32 }
 0x72a   :  { %9772 = vpow2.f32 %v1148_v38 }
 0x72f   :  { %v10428_v33 = vpop.eup %9770 }
 0x730   :  { %v1034_v35 = vsel %vm288_vm2, %v10428_v33, 0.0 }
 0x731   :  { %1035 = vadd.xlane.f32.xlu1 %v1034_v35 }
 0x737   :  { %v10444_v39 = vpop.eup %9772 }
 0x73b   :  { %578 = vrot.lane.b32.xlu0 %v10310_v24, %s10065_s28 }
 0x742   :  { %695 = vrot.lane.b32.xlu1 %v10310_v24, %s11853_s1  ;;  %v1150_v24 = vsel %vm288_vm2, %v10444_v39, 0.0 }
 0x746   :  { %812 = vrot.lane.b32.xlu1 %v10350_v62, %s10056_s0 }
 0x74a   :  { %924 = vrot.lane.b32.xlu1 %v10350_v62, %s10058_s13 }
 0x74e   :  { %1040 = vrot.lane.b32.xlu1 %v10350_v62, %s10065_s28 }
 0x752   :  { %1156 = vrot.lane.b32.xlu1 %v10350_v62, %s11853_s1 }
 0x756   :  { %510 = vrot.lane.b32.xlu1 %v10408_v34, %s11851_s2 }
 0x75a   :  { %1151 = vadd.xlane.f32.xlu0 %v1150_v24 }
 0x79e   :  { %v691_v42 = vpop.xlane.xlu1 %690 }
 0x7aa   :  { %v808_v40 = vpop.xlane.xlu0 %807 }
 0x7ae   :  { %v574_v41 = vpop.xlane.xlu0 %573 }
 0x7af   :  { %9774 = vrcp.f32 %v574_v41 }
 0x7b0   :  { %9776 = vrcp.f32 %v691_v42 }
 0x7b1   :  { %9778 = vrcp.f32 %v808_v40 }
 0x7b2   :  { %v579_v43 = vpop.permute.xlu0 %578  ;;  %v920_v62 = vpop.xlane.xlu1 %919 }
 0x7b3   :  { %v584_v44 = vsel %vm353_vm3, %v579_v43, 0  ;;  %9780 = vrcp.f32 %v920_v62 }
 0x7b4   :  { %8865 = vmatpush3.bf16.msra.mxu1 %v584_v44 }
 0x7b5   :  { %8876 = vmatprep.subr.bf16.mxu1 %v10054_v1 }
 0x7ba   :  { %v1036_v45 = vpop.xlane.xlu1 %1035 }
 0x7bb   :  { %9782 = vrcp.f32 %v1036_v45 }
 0x7bc   :  { %v9775_v46 = vpop.eup %9774 }
 0x7bd   :  { %v576_v34 = vmul.f32 %v9775_v46, %v9767_v29  ;;  %v9777_v50 = vpop.eup %9776  ;;  %v1235_v29 = vsel %vm221_vm0, %v9688_v27, 0 }
 0x7be   :  { %v696_v47 = vpop.permute.xlu1 %695  ;;  %v693_v52 = vmul.f32 %v9777_v50, %v10415_v16  ;;  %v9779_v55 = vpop.eup %9778  ;;  %8931 = vmatpush3.bf16.xpose.msra.mxu0 %v1235_v29  ;;  %v8230_v50 = vld [vmem:[%s10115_s3] ss:$0 sm:$0xff] }
 0x7bf   :  { %v701_v48 = vsel %vm353_vm3, %v696_v47, 0  ;;  %v577_v49 = vpack.c.bf16 %v576_v34, %v576_v34  ;;  %v810_v58 = vmul.f32 %v9779_v55, %v10419_v26  ;;  %8932 = vmatprep.subr.bf16.mxu0 %v10054_v1 }
 0x7c0   :  { %v694_v54 = vpack.c.bf16 %v693_v52, %v693_v52  ;;  %v9781_v61 = vpop.eup %9780 }
 0x7c1   :  { %8867 = vmatmul.mubr.msk.bf16.vlgmr.msra.gmra.mxu1 %vm288_vm2, %v577_v49  ;;  %v811_v60 = vpack.c.bf16 %v810_v58, %v810_v58  ;;  %v922_v2 = vmul.f32 %v9781_v61, %v10424_v31  ;;  %v9690_v61 = vld [vmem:[%s10130_s19 + $0x18] sm:$0xff]  }
 0x7c2   :  { %8877 = vmatpush3.bf16.msra.mxu1 %v701_v48  ;;  %v813_v51 = vpop.permute.xlu1 %812  ;;  %8878 = vmatprep.mubr.msk.bf16.mxu1 %vm10055_vm1, %v10054_v1 }
 0x7c3   :  { %8888 = vmatprep.subr.bf16.mxu1 %v10054_v1  ;;  %v818_v56 = vsel %vm353_vm3, %v813_v51, 0  ;;  %v923_v3 = vpack.c.bf16 %v922_v2, %v922_v2 }
 0x7c6   :  { %v925_v53 = vpop.permute.xlu1 %924 }
 0x7c7   :  { %v930_v63 = vsel %vm353_vm3, %v925_v53, 0 }
 0x7c8   :  { %v9783_v4 = vpop.eup %9782 }
 0x7c9   :  { %8879 = vmatmul.mubr.msk.bf16.vlgmr.msra.gmra.mxu1 %vm288_vm2, %v694_v54  ;;  %v1038_v6 = vmul.f32 %v9783_v4, %v10428_v33 }
 0x7ca   :  { %8889 = vmatpush3.bf16.msra.mxu1 %v818_v56  ;;  %v1041_v57 = vpop.permute.xlu1 %1040  ;;  %8890 = vmatprep.mubr.msk.bf16.mxu1 %vm10055_vm1, %v10054_v1 }
 0x7cb   :  { %8900 = vmatprep.subr.bf16.mxu1 %v10054_v1  ;;  %v1046_v5 = vsel %vm353_vm3, %v1041_v57, 0  ;;  %v1039_v7 = vpack.c.bf16 %v1038_v6, %v1038_v6 }
 0x7ce   :  { %v1157_v59 = vpop.permute.xlu1 %1156 }
 0x7cf   :  { %v1162_v8 = vsel %vm353_vm3, %v1157_v59, 0 }
 0x7d1   :  { %8891 = vmatmul.mubr.msk.bf16.vlgmr.msra.gmra.mxu1 %vm288_vm2, %v811_v60 }
 0x7d2   :  { %8901 = vmatpush3.bf16.msra.mxu1 %v930_v63  ;;  %v511_v0 = vpop.permute.xlu1 %510  ;;  %8902 = vmatprep.mubr.msk.bf16.mxu1 %vm10055_vm1, %v10054_v1  ;;  %v1379_v63 = vsel %vm221_vm0, %v9690_v61, 0 }
 0x7d3   :  { %514 = vst.msk [vmem:[#allocation2] sm:$0xff] %vm513_vm4, %v511_v0  ;;  %8912 = vmatprep.subr.bf16.mxu1 %v10054_v1 }
 0x7d9   :  { %8903 = vmatmul.mubr.msk.bf16.vlgmr.msra.gmra.mxu1 %vm288_vm2, %v923_v3 }
 0x7da   :  { %8913 = vmatpush3.bf16.msra.mxu1 %v1046_v5  ;;  %8914 = vmatprep.mubr.msk.bf16.mxu1 %vm10055_vm1, %v10054_v1 }
 0x7db   :  { %8924 = vmatprep.subr.bf16.mxu1 %v10054_v1 }
 0x7e1   :  { %8915 = vmatmul.mubr.msk.bf16.vlgmr.msra.gmra.mxu1 %vm288_vm2, %v1039_v7 }
 0x7e2   :  { %8925 = vmatpush3.bf16.msra.mxu1 %v1162_v8  ;;  %8926 = vmatprep.mubr.msk.bf16.mxu1 %vm10055_vm1, %v10054_v1 }
 0x7e3   :  { %v1152_v9 = vpop.xlane.xlu0 %1151  ;;  %8938 = vmatprep.subr.bf16.mxu1 %v10054_v1 }
 0x7e4   :  { %9784 = vrcp.f32 %v1152_v9  ;;  %v9691_v9 = vld [vmem:[%s10130_s19 + $0x10] sm:$0xff]  }
 0x7f1   :  { %v9785_v10 = vpop.eup %9784 }
 0x7f2   :  { %v1154_v11 = vmul.f32 %v9785_v10, %v10444_v39  ;;  %v9689_v39 = vld [vmem:[%s10110_s29] sm:$0xff]   ;;  %v1376_v10 = vsel %vm221_vm0, %v9691_v9, 0 }
 0x7f3   :  { %v1232_v24 = vsel %vm221_vm0, %v9689_v39, 0 }
 0x7f4   :  { %v1155_v12 = vpack.c.bf16 %v1154_v11, %v1154_v11  ;;  %8933 = vmatpush3.bf16.xpose.msra.mxu0 %v1232_v24  ;;  %v9692_v11 = vld [vmem:[%s10130_s19 + $0x8] sm:$0xff]   ;;  %v8236_v24 = vld [vmem:[%s10135_s24] ss:$0 sm:$0xff] }
 0x7f5   :  { %8950 = vmatprep.subr.bf16.mxu0 %v10054_v1 }
 0x7f6   :  { %8927 = vmatmul.mubr.msk.bf16.vlgmr.msra.gmra.mxu1 %vm288_vm2, %v1155_v12  ;;  %v1373_v12 = vsel %vm221_vm0, %v9692_v11, 0 }
 0x7f7   :  { %8946 = vmatprep.mubr.msk.bf16.mxu1 %vm10055_vm1, %v10054_v1  ;;  %8939 = vmatpush3.bf16.xpose.msra.mxu1 %v1379_v63  ;;  %v9698_v63 = vld [vmem:[%s10100_s21 + $0x48] sm:$0xff]  }
 0x7f8   :  { %8940 = vmatprep.subr.bf16.mxu1 %v10054_v1 }
 0x7ff   :  { %8941 = vmatpush3.bf16.xpose.msra.mxu1 %v1376_v10  ;;  %v9699_v10 = vld [vmem:[%s10100_s21 + $0x40] sm:$0xff]  }
 0x800   :  { %8942 = vmatprep.subr.bf16.mxu1 %v10054_v1  ;;  %v1607_v11 = vsel %vm221_vm0, %v9699_v10, 0 }
 0x807   :  { %8943 = vmatpush3.bf16.xpose.msra.mxu1 %v1373_v12  ;;  %v9700_v12 = vld [vmem:[%s10100_s21 + $0x38] sm:$0xff]  }
 0x808   :  { %8944 = vmatprep.subr.bf16.mxu1 %v10054_v1 }
 0x881   :  { %v620_v13 = vpop.f32.mrf.mxu1 }
 0x882   :  { %627 = vrot.lane.b32.xlu1 %v620_v13, %s11849_s7  ;;  %v9693_v13 = vld [vmem:[%s10130_s19] sm:$0xff]  }
 0x883   :  { %v8868_v14 = vpop.f32.mrf.mxu1 }
 0x884   :  { %v1370_v14 = vsel %vm221_vm0, %v9693_v13, 0  ;;  %v1604_v13 = vsel %vm221_vm0, %v9700_v12, 0 }
 0x885   :  { %v623_v15 = vpop.f32.mrf.mxu1  ;;  %8945 = vmatpush3.bf16.xpose.msra.mxu1 %v1370_v14  ;;  %v9701_v14 = vld [vmem:[%s10100_s21 + $0x30] sm:$0xff]  }
 0x886   :  { %8974 = vmatprep.subr.bf16.mxu1 %v10054_v1  ;;  %v9694_v15 = vld [vmem:[%s10140_s30 + $0x8] sm:$0xff]  }
 0x887   :  { %v8869_v16 = vpop.f32.mrf.mxu1 }
 0x888   :  { %v1449_v16 = vsel %vm1441_vm7, %v9694_v15, 0  ;;  %v1601_v15 = vsel %vm221_vm0, %v9701_v14, 0 }
 0x889   :  { %v737_v19 = vpop.f32.mrf.mxu1 }
 0x88a   :  { %744 = vrot.lane.b32.xlu0 %v737_v19, %s11847_s10 }
 0x88b   :  { %v8880_v20 = vpop.f32.mrf.mxu1 }
 0x88d   :  { %v740_v21 = vpop.f32.mrf.mxu1 }
 0x88f   :  { %v8881_v22 = vpop.f32.mrf.mxu1 }
 0x891   :  { %v854_v23 = vpop.f32.mrf.mxu1 }
 0x892   :  { %860 = vst.msk [vmem:[#allocation2 + $0x8] sm:$0xff] %vm288_vm2, %v854_v23 }
 0x893   :  { %v8892_v25 = vpop.f32.mrf.mxu1 }
 0x895   :  { %v857_v26 = vpop.f32.mrf.mxu1 }
 0x897   :  { %v8893_v28 = vpop.f32.mrf.mxu1 }
 0x898   :  { %v8234_v28 = vld [vmem:[%s10120_s8] ss:$0 sm:$0xff] }
 0x899   :  { %v966_v30 = vpop.f32.mrf.mxu1 }
 0x89a   :  { %973 = vrot.lane.b32.xlu1 %v966_v30, %s11851_s2 }
 0x89b   :  { %v8904_v31 = vpop.f32.mrf.mxu1 }
 0x89d   :  { %v969_v32 = vpop.f32.mrf.mxu1 }
 0x89e   :  { %v8235_v32 = vld [vmem:[%s10125_s14] ss:$0 sm:$0xff] }
 0x89f   :  { %v8905_v33 = vpop.f32.mrf.mxu1 }
 0x8a1   :  { %v1082_v35 = vpop.f32.mrf.mxu1 }
 0x8a2   :  { %1089 = vrot.lane.b32.xlu1 %v1082_v35, %s11849_s7 }
 0x8a3   :  { %v8916_v36 = vpop.f32.mrf.mxu1 }
 0x8a5   :  { %v1085_v37 = vpop.f32.mrf.mxu1 }
 0x8a7   :  { %v8917_v38 = vpop.f32.mrf.mxu1 }
 0x8a8   :  { %v9695_v38 = vld [vmem:[%s10140_s30] sm:$0xff]  }
 0x8a9   :  { %v1446_v39 = vsel %vm1441_vm7, %v9695_v38, 0 }
 0x8b6   :  { %v1198_v40 = vpop.f32.mrf.mxu1 }
 0x8b7   :  { %1205 = vrot.lane.b32.xlu1 %v1198_v40, %s11847_s10 }
 0x8b8   :  { %v8928_v41 = vpop.f32.mrf.mxu1 }
 0x8ba   :  { %v1201_v42 = vpop.f32.mrf.mxu1 }
 0x8bc   :  { %v8929_v43 = vpop.f32.mrf.mxu1 }
 0x8f4   :  { %v628_v44 = vpop.permute.xlu1 %627 }
 0x8f5   :  { %631 = vst.msk [vmem:[#allocation2] sm:$0xff] %vm630_vm5, %v628_v44 }
 0x8fc   :  { %v745_v62 = vpop.permute.xlu0 %744 }
 0x8fd   :  { %748 = vst.msk [vmem:[#allocation2] sm:$0xff] %vm747_vm6, %v745_v62 }
 0x904   :  { %v1209_v47 = vld [vmem:[#allocation2] sm:$0xff] }
 0x90c   :  { %v974_v45 = vpop.permute.xlu1 %973 }
 0x90d   :  { %976 = vst.msk [vmem:[#allocation2 + $0x8] sm:$0xff] %vm513_vm4, %v974_v45 }
 0x914   :  { %v1090_v46 = vpop.permute.xlu1 %1089 }
 0x915   :  { %1092 = vst.msk [vmem:[#allocation2 + $0x8] sm:$0xff] %vm630_vm5, %v1090_v46 }
 0x929   :  { %v1206_v34 = vpop.permute.xlu1 %1205 }
 0x92a   :  { %1208 = vst.msk [vmem:[#allocation2 + $0x8] sm:$0xff] %vm747_vm6, %v1206_v34 }
 0x931   :  { %v1210_v48 = vld [vmem:[#allocation2 + $0x8] sm:$0xff] }
 0x932   :  { %v1211_v49 = vpack.c.bf16 %v1210_v48, %v1209_v47  ;;  %v8242_v47 = vld [vmem:[%s10145_s6] ss:$0 sm:$0xff] }
 0x934   :  { %8935 = vmatmul.mubr.msk.bf16.vlgmr.msra.gmra.mxu0 %vm221_vm0, %v1211_v49 }
 0x935   :  { %8954 = vmatprep.mubr.msk.bf16.mxu0 %vm10055_vm1, %v10054_v1  ;;  %8951 = vmatpush3.bf16.xpose.msra.mxu0 %v1449_v16 }
 0x936   :  { %8952 = vmatprep.subr.bf16.mxu0 %v10054_v1 }
 0x93d   :  { %8953 = vmatpush3.bf16.xpose.msra.mxu0 %v1446_v39 }
 0x93e   :  { %8958 = vmatprep.subr.bf16.mxu0 %v10054_v1 }
 0x9f4   :  { %v1271_v51 = vpop.f32.mrf.mxu0 }
 0x9f5   :  { %v1272_v52 = vadd.f32 %v8230_v50, %v1271_v51 }
 0x9f6   :  { %v8936_v53 = vpop.f32.mrf.mxu0 }
 0x9f7   :  { %v1278_v54 = vadd.f32 %v1272_v52, %v10299_v17 }
 0x9f8   :  { %v1274_v55 = vpop.f32.mrf.mxu0 }
 0x9f9   :  { %v1275_v56 = vadd.f32 %v8230_v50, %v1274_v55  ;;  %v1282_v57 = vsel %vm221_vm0, %v1278_v54, 0.0 }
 0x9fa   :  { %1283 = vadd.xlane.f32.xlu1 %v1282_v57  ;;  %v8937_v58 = vpop.f32.mrf.mxu0 }
 0x9fb   :  { %v1279_v59 = vadd.f32 %v1275_v56, %v10301_v18  ;;  %v9696_v58 = vld [vmem:[%s10100_s21 + $0x58] sm:$0xff]  }
 0x9fd   :  { %v1285_v60 = vsel %vm221_vm0, %v1279_v59, 0.0 }
 0x9fe   :  { %1286 = vadd.xlane.f32.xlu0 %v1285_v60  ;;  %v9697_v60 = vld [vmem:[%s10100_s21 + $0x50] sm:$0xff]   ;;  %s11876_s21 = sld [smem:[#allocation10_spill]] }
 0x9ff   :  { %v1613_v61 = vsel %vm221_vm0, %v9697_v60, 0 }
 0xa83   :  { %v1284_v0 = vpop.xlane.xlu1 %1283 }
 0xa84   :  { %v1289_v17 = vmul.f32 0.03125, %v1284_v0  ;;  %v1610_v0 = vsel %vm221_vm0, %v9698_v63, 0 }
 0xa86   :  { %v1291_v2 = vsub.f32 %v1278_v54, %v1289_v17 }
 0xa87   :  { %v1287_v3 = vpop.xlane.xlu0 %1286 }
 0xa88   :  { %v1290_v4 = vmul.f32 0.03125, %v1287_v3  ;;  %v1293_v5 = vmul.f32 %v1291_v2, %v1291_v2 }
 0xa8a   :  { %v1292_v6 = vsub.f32 %v1279_v59, %v1290_v4  ;;  %v1295_v18 = vsel %vm221_vm0, %v1293_v5, 0.0  ;;  %v1616_v59 = vsel %vm221_vm0, %v9696_v58, 0 }
 0xa8b   :  { %1296 = vadd.xlane.f32.xlu1 %v1295_v18 }
 0xa8c   :  { %v1294_v7 = vmul.f32 %v1292_v6, %v1292_v6 }
 0xa8e   :  { %v1298_v8 = vsel %vm221_vm0, %v1294_v7, 0.0 }
 0xa8f   :  { %1299 = vadd.xlane.f32.xlu1 %v1298_v8 }
 0xb14   :  { %v1297_v19 = vpop.xlane.xlu1 %1296 }
 0xb15   :  { %v1301_v20 = vmul.f32 0.03125, %v1297_v19 }
 0xb17   :  { %v1303_v21 = vadd.f32 1e-05, %v1301_v20 }
 0xb18   :  { %v1300_v22 = vpop.xlane.xlu1 %1299 }
 0xb19   :  { %9786 = vrsqrt.f32 %v1303_v21  ;;  %v1302_v23 = vmul.f32 0.03125, %v1300_v22 }
 0xb1b   :  { %v1304_v25 = vadd.f32 1e-05, %v1302_v23 }
 0xb1d   :  { %9788 = vrsqrt.f32 %v1304_v25 }
 0xb26   :  { %v9787_v26 = vpop.eup %9786 }
 0xb27   :  { %v1307_v27 = vmul.f32 %v9787_v26, %v1291_v2 }
 0xb29   :  { %v1315_v31 = vmul.f32 %v8234_v28, %v1307_v27  ;;  %v8246_v27 = vld [vmem:[%s10150_s12] ss:$0 sm:$0xff] }
 0xb2a   :  { %v9789_v29 = vpop.eup %9788 }
 0xb2b   :  { %v1308_v30 = vmul.f32 %v9789_v29, %v1292_v6  ;;  %v1323_v35 = vadd.f32 %v8235_v32, %v1315_v31  ;;  %v8247_v31 = vld [vmem:[%s10155_s20] ss:$0 sm:$0xff] }
 0xb2d   :  { %v1316_v33 = vmul.f32 %v8234_v28, %v1308_v30 }
 0xb2f   :  { %v1324_v36 = vadd.f32 %v8235_v32, %v1316_v33 }
 0xb31   :  { %v1339_v37 = vpack.c.bf16 %v1324_v36, %v1323_v35 }
 0xb33   :  { %8947 = vmatmul.mubr.msk.bf16.vlgmr.msra.gmra.mxu1 %vm221_vm0, %v1339_v37  ;;  %v8266_v37 = vld [vmem:[%s10105_s25 + $0x1] ss:$0 sm:$0xff]  ;;  %s11877_s25 = sld [smem:[#allocation6_spill]] }
 0xb34   :  { %8976 = vmatprep.mubr.msk.bf16.mxu1 %vm10055_vm1, %v10054_v1 }
 0xbf3   :  { %v1415_v40 = vpop.f32.mrf.mxu1 }
 0xbf4   :  { %v1416_v42 = vadd.f32 %v8236_v24, %v1415_v40 }
 0xbf5   :  { %v8948_v41 = vpop.f32.mrf.mxu1 }
 0xbf6   :  { %v1422_v45 = vmax.f32 %v1416_v42, 0.0 }
 0xbf7   :  { %v1418_v43 = vpop.f32.mrf.mxu1 }
 0xbf8   :  { %v1419_v44 = vadd.f32 %v8236_v24, %v1418_v43 }
 0xbf9   :  { %v8949_v62 = vpop.f32.mrf.mxu1 }
 0xbfa   :  { %v1423_v46 = vmax.f32 %v1419_v44, 0.0 }
 0xbfc   :  { %v1424_v34 = vpack.c.bf16 %v1423_v46, %v1422_v45 }
 0xbfe   :  { %8955 = vmatmul.mubr.msk.bf16.vlgmr.msra.gmra.mxu0 %vm1441_vm7, %v1424_v34 }
 0xbff   :  { %8970 = vmatprep.mubr.msk.bf16.mxu0 %vm10055_vm1, %v10054_v1  ;;  %8959 = vmatpush3.bf16.xpose.msra.mxu0 %v1616_v59 }
 0xc00   :  { %8960 = vmatprep.subr.bf16.mxu0 %v10054_v1 }
 0xc07   :  { %8961 = vmatpush3.bf16.xpose.msra.mxu0 %v1613_v61 }
 0xc08   :  { %8962 = vmatprep.subr.bf16.mxu0 %v10054_v1 }
 0xc0f   :  { %8963 = vmatpush3.bf16.xpose.msra.mxu0 %v1610_v0 }
 0xc10   :  { %8964 = vmatprep.subr.bf16.mxu0 %v10054_v1 }
 0xc17   :  { %8965 = vmatpush3.bf16.xpose.msra.mxu0 %v1607_v11 }
 0xc18   :  { %8966 = vmatprep.subr.bf16.mxu0 %v10054_v1 }
 0xc1f   :  { %8967 = vmatpush3.bf16.xpose.msra.mxu0 %v1604_v13 }
 0xc20   :  { %8968 = vmatprep.subr.bf16.mxu0 %v10054_v1 }
 0xc27   :  { %8969 = vmatpush3.bf16.xpose.msra.mxu0 %v1601_v15 }
 0xc28   :  { %9010 = vmatprep.subr.bf16.mxu0 %v10054_v1 }
 0xcbe   :  { %v1485_v48 = vpop.f32.mrf.mxu0 }
 0xcbf   :  { %v1486_v49 = vadd.f32 %v8242_v47, %v1485_v48 }
 0xcc0   :  { %v8956_v50 = vpop.f32.mrf.mxu0 }
 0xcc1   :  { %v1492_v51 = vadd.f32 %v1486_v49, %v1323_v35 }
 0xcc2   :  { %v1488_v52 = vpop.f32.mrf.mxu0 }
 0xcc3   :  { %v1489_v53 = vadd.f32 %v8242_v47, %v1488_v52  ;;  %v1496_v54 = vsel %vm221_vm0, %v1492_v51, 0.0 }
 0xcc4   :  { %1497 = vadd.xlane.f32.xlu1 %v1496_v54  ;;  %v8957_v55 = vpop.f32.mrf.mxu0 }
 0xcc5   :  { %v1493_v56 = vadd.f32 %v1489_v53, %v1324_v36 }
 0xcc7   :  { %v1499_v57 = vsel %vm221_vm0, %v1493_v56, 0.0 }
 0xcc8   :  { %1500 = vadd.xlane.f32.xlu0 %v1499_v57 }
 0xd4d   :  { %v1498_v17 = vpop.xlane.xlu1 %1497 }
 0xd4e   :  { %v1502_v2 = vmul.f32 0.03125, %v1498_v17 }
 0xd50   :  { %v1504_v3 = vsub.f32 %v1492_v51, %v1502_v2 }
 0xd51   :  { %v1501_v4 = vpop.xlane.xlu0 %1500 }
 0xd52   :  { %v1503_v5 = vmul.f32 0.03125, %v1501_v4  ;;  %v1506_v6 = vmul.f32 %v1504_v3, %v1504_v3 }
 0xd54   :  { %v1505_v18 = vsub.f32 %v1493_v56, %v1503_v5  ;;  %v1508_v7 = vsel %vm221_vm0, %v1506_v6, 0.0 }
 0xd55   :  { %1509 = vadd.xlane.f32.xlu1 %v1508_v7 }
 0xd56   :  { %v1507_v8 = vmul.f32 %v1505_v18, %v1505_v18 }
 0xd58   :  { %v1511_v9 = vsel %vm221_vm0, %v1507_v8, 0.0 }
 0xd59   :  { %1512 = vadd.xlane.f32.xlu0 %v1511_v9 }
 0xdde   :  { %v1510_v16 = vpop.xlane.xlu1 %1509 }
 0xddf   :  { %v1514_v19 = vmul.f32 0.03125, %v1510_v16 }
 0xde1   :  { %v1516_v20 = vadd.f32 1e-05, %v1514_v19 }
 0xde2   :  { %v1513_v21 = vpop.xlane.xlu0 %1512 }
 0xde3   :  { %9790 = vrsqrt.f32 %v1516_v20  ;;  %v1515_v22 = vmul.f32 0.03125, %v1513_v21 }
 0xde5   :  { %v1517_v23 = vadd.f32 1e-05, %v1515_v22 }
 0xde7   :  { %9792 = vrsqrt.f32 %v1517_v23 }
 0xdf0   :  { %v9791_v25 = vpop.eup %9790 }
 0xdf1   :  { %v1520_v26 = vmul.f32 %v9791_v25, %v1504_v3 }
 0xdf3   :  { %v1528_v30 = vmul.f32 %v8246_v27, %v1520_v26 }
 0xdf4   :  { %v9793_v28 = vpop.eup %9792 }
 0xdf5   :  { %v1521_v29 = vmul.f32 %v9793_v28, %v1505_v18  ;;  %v10565_v33 = vadd.f32 %v8247_v31, %v1528_v30 }
 0xdf7   :  { %v1529_v32 = vmul.f32 %v8246_v27, %v1521_v29 }
 0xdf9   :  { %v10567_v35 = vadd.f32 %v8247_v31, %v1529_v32 }
 0xdfb   :  { %v1560_v36 = vpack.c.bf16 %v10567_v35, %v10565_v33 }
 0xdfd   :  { %8971 = vmatmul.mubr.msk.bf16.vlgmr.msra.gmra.mxu0 %vm221_vm0, %v1560_v36 }
 0xdfe   :  { %9012 = vmatprep.mubr.msk.bf16.mxu0 %vm10055_vm1, %v10054_v1 }
 0xebd   :  { %v1652_v38 = vpop.f32.mrf.mxu0 }
 0xebe   :  { %v1653_v39 = vadd.f32 %v8266_v37, %v1652_v38 }
 0xebf   :  { %v8972_v24 = vpop.f32.mrf.mxu0 }
 0xec0   :  { %v10575_v40 = vpack.c.bf16 %v1653_v39, %v1653_v39 }
 0xec1   :  { %v1655_v41 = vpop.f32.mrf.mxu0 }
 0xec2   :  { %v1656_v42 = vadd.f32 %v8266_v37, %v1655_v41  ;;  %1661 = vrot.lane.b32.xlu1 %v10575_v40, %s10057_s5 }
 0xec3   :  { %v8973_v43 = vpop.f32.mrf.mxu0 }
 0xec4   :  { %v10611_v10 = vpack.c.bf16 %v1656_v42, %v1656_v42 }
 0xec6   :  { %1773 = vrot.lane.b32.xlu1 %v10575_v40, %s10059_s15 }
 0xeca   :  { %1771 = vrot.lane.b32.xlu1 %v10575_v40, %s10060_s16 }
 0xf34   :  { %v1662_v44 = vpop.permute.xlu1 %1661 }
 0xf35   :  { %v1667_v62 = vsel %vm288_vm2, %v1662_v44, 0 }
 0xf36   :  { %8975 = vmatpush3.bf16.xpose.msra.mxu1 %v1667_v62 }
 0xf37   :  { %8980 = vmatprep.subr.bf16.mxu1 %v10054_v1 }
 0xf38   :  { %v1774_v60 = vpop.permute.xlu1 %1773 }
 0xf39   :  { %v1779_v63 = vsel %vm288_vm2, %v1774_v60, 0 }
 0xf3c   :  { %v1772_v0 = vpop.permute.xlu1 %1771 }
 0xf3d   :  { %8977 = vmatmul.mubr.msk.bf16.vlgmr.msra.gmra.mxu1 %vm288_vm2, %v10575_v40 }
 0xf3e   :  { %8982 = vmatprep.mubr.msk.bf16.mxu1 %vm10055_vm1, %v10054_v1 }
 0xffd   :  { %v1703_v45 = vpop.f32.mrf.mxu1 }
 0xffe   :  { %v1709_v46 = vmul.f32 0.35355338, %v1703_v45 }
 0xfff   :  { %v8978_v34 = vpop.f32.mrf.mxu1 }
0x1000   :  { %v1710_v47 = vsel %vm288_vm2, %v1709_v46, -inf }
0x1001   :  { %1711 = vmax.xlane.f32.xlu0 %v1710_v47  ;;  %v1706_v48 = vpop.f32.mrf.mxu1 }
0x1003   :  { %v8979_v49 = vpop.f32.mrf.mxu1 }
0x108a   :  { %v1712_v50 = vpop.xlane.xlu0 %1711 }
0x108b   :  { %v1713_v51 = vsub.f32 %v1709_v46, %v1712_v50 }
0x108d   :  { %v1714_v52 = vmul.f32 1.442695, %v1713_v51 }
0x108f   :  { %9794 = vpow2.f32 %v1714_v52 }
0x109c   :  { %v9795_v53 = vpop.eup %9794 }
0x109d   :  { %v1716_v54 = vsel %vm288_vm2, %v9795_v53, 0.0 }
0x109e   :  { %1717 = vadd.xlane.f32.xlu0 %v1716_v54 }
0x10b4   :  { %1722 = vrot.lane.b32.xlu0 %v10575_v40, %s10056_s0 }
0x1127   :  { %v1718_v55 = vpop.xlane.xlu0 %1717 }
0x1128   :  { %9796 = vrcp.f32 %v1718_v55 }
0x112b   :  { %v1723_v56 = vpop.permute.xlu0 %1722 }
0x112c   :  { %v1728_v57 = vsel %vm353_vm3, %v1723_v56, 0 }
0x112d   :  { %8981 = vmatpush3.bf16.msra.mxu1 %v1728_v57 }
0x112e   :  { %8986 = vmatprep.subr.bf16.mxu1 %v10054_v1 }
0x1135   :  { %v9797_v58 = vpop.eup %9796 }
0x1136   :  { %v1720_v59 = vmul.f32 %v9797_v58, %v9795_v53 }
0x1138   :  { %v1721_v61 = vpack.c.bf16 %v1720_v59, %v1720_v59 }
0x113a   :  { %8983 = vmatmul.mubr.msk.bf16.vlgmr.msra.gmra.mxu1 %vm288_vm2, %v1721_v61 }
0x113b   :  { %8987 = vmatpush3.bf16.xpose.msra.mxu1 %v1779_v63  ;;  %8988 = vmatprep.mubr.msk.bf16.mxu1 %vm10055_vm1, %v10054_v1 }
0x113c   :  { %8992 = vmatprep.subr.bf16.mxu1 %v10054_v1 }
0x1142   :  { %8989 = vmatmul.mubr.msk.bf16.vlgmr.msra.gmra.mxu1 %vm288_vm2, %v1772_v0 }
0x1143   :  { %8994 = vmatprep.mubr.msk.bf16.mxu1 %vm10055_vm1, %v10054_v1 }
0x11fa   :  { %v1764_v17 = vpop.f32.mrf.mxu1 }
0x11fb   :  { %1770 = vst.msk [vmem:[#allocation2] sm:$0xff] %vm288_vm2, %v1764_v17 }
0x11fc   :  { %v8984_v2 = vpop.f32.mrf.mxu1 }
0x11fe   :  { %v1767_v3 = vpop.f32.mrf.mxu1 }
0x1200   :  { %v8985_v4 = vpop.f32.mrf.mxu1 }
0x1202   :  { %v1815_v5 = vpop.f32.mrf.mxu1 }
0x1203   :  { %v1821_v6 = vmul.f32 0.35355338, %v1815_v5 }
0x1204   :  { %v8990_v18 = vpop.f32.mrf.mxu1 }
0x1205   :  { %v1822_v7 = vsel %vm288_vm2, %v1821_v6, -inf }
0x1206   :  { %1823 = vmax.xlane.f32.xlu1 %v1822_v7  ;;  %v1818_v8 = vpop.f32.mrf.mxu1 }
0x1208   :  { %v8991_v9 = vpop.f32.mrf.mxu1 }
0x1217   :  { %1834 = vrot.lane.b32.xlu1 %v10575_v40, %s10058_s13 }
0x121b   :  { %1887 = vrot.lane.b32.xlu1 %v10575_v40, %s10063_s23 }
0x121f   :  { %2005 = vrot.lane.b32.xlu1 %v10575_v40, %s10061_s18 }
0x1223   :  { %2121 = vrot.lane.b32.xlu1 %v10611_v10, %s10057_s5 }
0x1227   :  { %2231 = vrot.lane.b32.xlu1 %v10611_v10, %s10060_s16 }
0x122b   :  { %2347 = vrot.lane.b32.xlu1 %v10611_v10, %s10063_s23 }
0x122f   :  { %2463 = vrot.lane.b32.xlu1 %v10611_v10, %s10064_s26 }
0x128f   :  { %v1824_v11 = vpop.xlane.xlu1 %1823 }
0x1290   :  { %v1825_v12 = vsub.f32 %v1821_v6, %v1824_v11 }
0x1292   :  { %v1826_v13 = vmul.f32 1.442695, %v1825_v12 }
0x1293   :  { %v1835_v14 = vpop.permute.xlu1 %1834 }
0x1294   :  { %9798 = vpow2.f32 %v1826_v13  ;;  %v1840_v15 = vsel %vm353_vm3, %v1835_v14, 0 }
0x1295   :  { %8993 = vmatpush3.bf16.msra.mxu1 %v1840_v15 }
0x1296   :  { %8998 = vmatprep.subr.bf16.mxu1 %v10054_v1 }
0x1297   :  { %v1888_v16 = vpop.permute.xlu1 %1887 }
0x129b   :  { %v2006_v19 = vpop.permute.xlu1 %2005 }
0x129c   :  { %v2011_v20 = vsel %vm288_vm2, %v2006_v19, 0 }
0x129d   :  { %9011 = vmatpush3.bf16.xpose.msra.mxu0 %v2011_v20 }
0x129e   :  { %9022 = vmatprep.subr.bf16.mxu0 %v10054_v1 }
0x129f   :  { %v2122_v26 = vpop.permute.xlu1 %2121 }
0x12a0   :  { %v2127_v28 = vsel %vm288_vm2, %v2122_v26, 0 }
0x12a1   :  { %v9799_v21 = vpop.eup %9798 }
0x12a2   :  { %v1828_v22 = vsel %vm288_vm2, %v9799_v21, 0.0 }
0x12a3   :  { %1829 = vadd.xlane.f32.xlu0 %v1828_v22  ;;  %v2232_v39 = vpop.permute.xlu1 %2231 }
0x12a7   :  { %v2348_v42 = vpop.permute.xlu1 %2347 }
0x12ab   :  { %v2464_v44 = vpop.permute.xlu1 %2463 }
0x12b9   :  { %1889 = vrot.lane.b32.xlu0 %v10575_v40, %s10062_s22 }
0x12bd   :  { %2003 = vrot.lane.b32.xlu0 %v10575_v40, %s10064_s26 }
0x12c1   :  { %2233 = vrot.lane.b32.xlu0 %v10611_v10, %s10059_s15 }
0x12c5   :  { %2349 = vrot.lane.b32.xlu0 %v10611_v10, %s10062_s22 }
0x12c9   :  { %2465 = vrot.lane.b32.xlu0 %v10611_v10, %s10061_s18 }
0x132c   :  { %v1830_v23 = vpop.xlane.xlu0 %1829 }
0x132d   :  { %9800 = vrcp.f32 %v1830_v23 }
0x1330   :  { %v1890_v25 = vpop.permute.xlu0 %1889 }
0x1331   :  { %v1895_v37 = vsel %vm288_vm2, %v1890_v25, 0 }
0x1334   :  { %v2004_v27 = vpop.permute.xlu0 %2003 }
0x1335   :  { %9013 = vmatmul.mubr.msk.bf16.vlgmr.msra.gmra.mxu0 %vm288_vm2, %v2004_v27 }
0x1336   :  { %9023 = vmatpush3.bf16.xpose.msra.mxu0 %v2127_v28  ;;  %9024 = vmatprep.mubr.msk.bf16.mxu0 %vm10055_vm1, %v10054_v1 }
0x1337   :  { %9034 = vmatprep.subr.bf16.mxu0 %v10054_v1 }
0x1338   :  { %v2234_v30 = vpop.permute.xlu0 %2233 }
0x1339   :  { %v2239_v32 = vsel %vm288_vm2, %v2234_v30, 0 }
0x133a   :  { %v9801_v29 = vpop.eup %9800 }
0x133b   :  { %v1832_v31 = vmul.f32 %v9801_v29, %v9799_v21 }
0x133c   :  { %v2350_v38 = vpop.permute.xlu0 %2349 }
0x133d   :  { %9025 = vmatmul.mubr.msk.bf16.vlgmr.msra.gmra.mxu0 %vm288_vm2, %v10611_v10  ;;  %v1833_v36 = vpack.c.bf16 %v1832_v31, %v1832_v31  ;;  %v2355_v24 = vsel %vm288_vm2, %v2350_v38, 0 }
0x133e   :  { %9035 = vmatpush3.bf16.xpose.msra.mxu0 %v2239_v32  ;;  %9036 = vmatprep.mubr.msk.bf16.mxu0 %vm10055_vm1, %v10054_v1 }
0x133f   :  { %8995 = vmatmul.mubr.msk.bf16.vlgmr.msra.gmra.mxu1 %vm288_vm2, %v1833_v36  ;;  %9046 = vmatprep.subr.bf16.mxu0 %v10054_v1 }
0x1340   :  { %8999 = vmatpush3.bf16.xpose.msra.mxu1 %v1895_v37  ;;  %9000 = vmatprep.mubr.msk.bf16.mxu1 %vm10055_vm1, %v10054_v1  ;;  %v2466_v41 = vpop.permute.xlu0 %2465 }
0x1341   :  { %9004 = vmatprep.subr.bf16.mxu1 %v10054_v1  ;;  %v2471_v43 = vsel %vm288_vm2, %v2466_v41, 0 }
0x1345   :  { %9037 = vmatmul.mubr.msk.bf16.vlgmr.msra.gmra.mxu0 %vm288_vm2, %v2232_v39 }
0x1346   :  { %9047 = vmatpush3.bf16.xpose.msra.mxu0 %v2355_v24  ;;  %9048 = vmatprep.mubr.msk.bf16.mxu0 %vm10055_vm1, %v10054_v1 }
0x1347   :  { %9001 = vmatmul.mubr.msk.bf16.vlgmr.msra.gmra.mxu1 %vm288_vm2, %v1888_v16  ;;  %9058 = vmatprep.subr.bf16.mxu0 %v10054_v1 }
0x1348   :  { %9006 = vmatprep.mubr.msk.bf16.mxu1 %vm10055_vm1, %v10054_v1 }
0x134d   :  { %9049 = vmatmul.mubr.msk.bf16.vlgmr.msra.gmra.mxu0 %vm288_vm2, %v2348_v42 }
0x134e   :  { %9059 = vmatpush3.bf16.xpose.msra.mxu0 %v2471_v43  ;;  %9060 = vmatprep.mubr.msk.bf16.mxu0 %vm10055_vm1, %v10054_v1 }
0x134f   :  { %9070 = vmatprep.subr.bf16.mxu0 %v10054_v1 }
0x1355   :  { %9061 = vmatmul.mubr.msk.bf16.vlgmr.msra.gmra.mxu0 %vm288_vm2, %v2464_v44 }
0x1356   :  { %9074 = vmatprep.mubr.msk.bf16.mxu0 %vm10055_vm1, %v10054_v1 }
0x13f5   :  { %v2047_v62 = vpop.f32.mrf.mxu0 }
0x13f6   :  { %v2053_v45 = vmul.f32 0.35355338, %v2047_v62 }
0x13f7   :  { %v9014_v46 = vpop.f32.mrf.mxu0 }
0x13f8   :  { %v2054_v34 = vsel %vm288_vm2, %v2053_v45, -inf }
0x13f9   :  { %2055 = vmax.xlane.f32.xlu1 %v2054_v34  ;;  %v2050_v47 = vpop.f32.mrf.mxu0 }
0x13fb   :  { %v9015_v48 = vpop.f32.mrf.mxu0 }
0x13fd   :  { %v2163_v49 = vpop.f32.mrf.mxu0 }
0x13fe   :  { %v2169_v0 = vmul.f32 0.35355338, %v2163_v49 }
0x13ff   :  { %v10669_v50 = vpop.f32.mrf.mxu1  ;;  %v9026_v51 = vpop.f32.mrf.mxu0 }
0x1400   :  { %v2170_v7 = vsel %vm288_vm2, %v2169_v0, -inf }
0x1401   :  { %v8996_v52 = vpop.f32.mrf.mxu1  ;;  %v2166_v53 = vpop.f32.mrf.mxu0 }
0x1403   :  { %v1879_v54 = vpop.f32.mrf.mxu1  ;;  %v9027_v55 = vpop.f32.mrf.mxu0 }
0x1405   :  { %v8997_v56 = vpop.f32.mrf.mxu1  ;;  %v2275_v57 = vpop.f32.mrf.mxu0 }
0x1406   :  { %v2281_v6 = vmul.f32 0.35355338, %v2275_v57 }
0x1407   :  { %v1931_v58 = vpop.f32.mrf.mxu1  ;;  %v9038_v59 = vpop.f32.mrf.mxu0 }
0x1408   :  { %v1937_v60 = vmul.f32 0.35355338, %v1931_v58  ;;  %v2282_v12 = vsel %vm288_vm2, %v2281_v6, -inf }
0x1409   :  { %v9002_v61 = vpop.f32.mrf.mxu1  ;;  %v2278_v63 = vpop.f32.mrf.mxu0 }
0x140a   :  { %v1938_v17 = vsel %vm288_vm2, %v1937_v60, -inf }
0x140b   :  { %v1934_v2 = vpop.f32.mrf.mxu1  ;;  %1939 = vmax.xlane.f32.xlu0 %v1938_v17  ;;  %v9039_v3 = vpop.f32.mrf.mxu0 }
0x140d   :  { %v9003_v4 = vpop.f32.mrf.mxu1  ;;  %v2391_v5 = vpop.f32.mrf.mxu0 }
0x140e   :  { %v2397_v18 = vmul.f32 0.35355338, %v2391_v5 }
0x140f   :  { %2171 = vmax.xlane.f32.xlu0 %v2170_v7  ;;  %v9050_v8 = vpop.f32.mrf.mxu0 }
0x1410   :  { %v2398_v9 = vsel %vm288_vm2, %v2397_v18, -inf }
0x1411   :  { %2399 = vmax.xlane.f32.xlu1 %v2398_v9  ;;  %v2394_v11 = vpop.f32.mrf.mxu0 }
0x1413   :  { %2283 = vmax.xlane.f32.xlu0 %v2282_v12  ;;  %v9051_v13 = vpop.f32.mrf.mxu0 }
0x1415   :  { %v2507_v14 = vpop.f32.mrf.mxu0 }
0x1416   :  { %v2513_v15 = vmul.f32 0.35355338, %v2507_v14 }
0x1417   :  { %v9062_v16 = vpop.f32.mrf.mxu0 }
0x1418   :  { %v2514_v19 = vsel %vm288_vm2, %v2513_v15, -inf }
0x1419   :  { %2515 = vmax.xlane.f32.xlu0 %v2514_v19  ;;  %v2510_v20 = vpop.f32.mrf.mxu0 }
0x141b   :  { %v9063_v21 = vpop.f32.mrf.mxu0 }
0x1482   :  { %v2056_v22 = vpop.xlane.xlu1 %2055 }
0x1483   :  { %v2057_v23 = vsub.f32 %v2053_v45, %v2056_v22 }
0x1485   :  { %v2058_v25 = vmul.f32 1.442695, %v2057_v23 }
0x1487   :  { %9802 = vpow2.f32 %v2058_v25 }
0x1494   :  { %v10676_v26 = vpop.eup %9802  ;;  %v1940_v27 = vpop.xlane.xlu0 %1939 }
0x1495   :  { %v2060_v28 = vsel %vm288_vm2, %v10676_v26, 0.0  ;;  %v1941_v29 = vsub.f32 %v1937_v60, %v1940_v27 }
0x1496   :  { %2061 = vadd.xlane.f32.xlu0 %v2060_v28 }
0x1497   :  { %v1942_v36 = vmul.f32 1.442695, %v1941_v29 }
0x1498   :  { %v2172_v30 = vpop.xlane.xlu0 %2171 }
0x1499   :  { %v2173_v31 = vsub.f32 %v2169_v0, %v2172_v30 }
0x149a   :  { %v2400_v32 = vpop.xlane.xlu1 %2399 }
0x149b   :  { %v2174_v37 = vmul.f32 1.442695, %v2173_v31  ;;  %v2401_v38 = vsub.f32 %v2397_v18, %v2400_v32 }
0x149c   :  { %v2284_v39 = vpop.xlane.xlu0 %2283 }
0x149d   :  { %9804 = vpow2.f32 %v2174_v37  ;;  %v2285_v24 = vsub.f32 %v2281_v6, %v2284_v39  ;;  %v2402_v41 = vmul.f32 1.442695, %v2401_v38 }
0x149e   :  { %9806 = vpow2.f32 %v1942_v36 }
0x149f   :  { %v2286_v42 = vmul.f32 1.442695, %v2285_v24 }
0x14a1   :  { %9808 = vpow2.f32 %v2286_v42 }
0x14a2   :  { %9810 = vpow2.f32 %v2402_v41  ;;  %v2516_v49 = vpop.xlane.xlu0 %2515 }
0x14a3   :  { %v2517_v51 = vsub.f32 %v2513_v15, %v2516_v49 }
0x14a5   :  { %v2518_v52 = vmul.f32 1.442695, %v2517_v51 }
0x14a7   :  { %9812 = vpow2.f32 %v2518_v52 }
0x14aa   :  { %v10680_v43 = vpop.eup %9804 }
0x14ab   :  { %v2176_v44 = vsel %vm288_vm2, %v10680_v43, 0.0  ;;  %v9807_v62 = vpop.eup %9806 }
0x14ac   :  { %2177 = vadd.xlane.f32.xlu1 %v2176_v44  ;;  %v1944_v46 = vsel %vm288_vm2, %v9807_v62, 0.0 }
0x14ae   :  { %v10684_v45 = vpop.eup %9808 }
0x14af   :  { %v2288_v34 = vsel %vm288_vm2, %v10684_v45, 0.0  ;;  %v10689_v47 = vpop.eup %9810 }
0x14b0   :  { %1945 = vadd.xlane.f32.xlu1 %v1944_v46  ;;  %2289 = vadd.xlane.f32.xlu0 %v2288_v34  ;;  %v2404_v48 = vsel %vm288_vm2, %v10689_v47, 0.0 }
0x14b4   :  { %2405 = vadd.xlane.f32.xlu0 %v2404_v48  ;;  %v10707_v53 = vpop.eup %9812 }
0x14c1   :  { %1950 = vrot.lane.b32.xlu1 %v10575_v40, %s10065_s28 }
0x14ca   :  { %2066 = vrot.lane.b32.xlu0 %v10575_v40, %s11853_s1  ;;  %v2520_v40 = vsel %vm288_vm2, %v10707_v53, 0.0 }
0x14ce   :  { %2182 = vrot.lane.b32.xlu0 %v10611_v10, %s10056_s0 }
0x14d2   :  { %2294 = vrot.lane.b32.xlu0 %v10611_v10, %s10058_s13 }
0x14d6   :  { %2410 = vrot.lane.b32.xlu0 %v10611_v10, %s10065_s28 }
0x14da   :  { %2526 = vrot.lane.b32.xlu0 %v10611_v10, %s11853_s1 }
0x14de   :  { %1883 = vrot.lane.b32.xlu0 %v10669_v50, %s11851_s2 }
0x14e5   :  { %2521 = vadd.xlane.f32.xlu1 %v2520_v40 }
0x151f   :  { %v2062_v54 = vpop.xlane.xlu0 %2061 }
0x1535   :  { %v2178_v55 = vpop.xlane.xlu1 %2177 }
0x1539   :  { %v1946_v56 = vpop.xlane.xlu1 %1945  ;;  %v2290_v57 = vpop.xlane.xlu0 %2289 }
0x153a   :  { %9814 = vrcp.f32 %v1946_v56 }
0x153b   :  { %9816 = vrcp.f32 %v2062_v54 }
0x153c   :  { %9818 = vrcp.f32 %v2178_v55 }
0x153d   :  { %v1951_v58 = vpop.permute.xlu1 %1950  ;;  %v2406_v59 = vpop.xlane.xlu0 %2405  ;;  %9820 = vrcp.f32 %v2290_v57 }
0x153e   :  { %v1956_v60 = vsel %vm353_vm3, %v1951_v58, 0  ;;  %9822 = vrcp.f32 %v2406_v59 }
0x153f   :  { %9005 = vmatpush3.bf16.msra.mxu1 %v1956_v60 }
0x1540   :  { %9016 = vmatprep.subr.bf16.mxu1 %v10054_v1 }
0x1541   :  { %v2067_v10 = vpop.permute.xlu0 %2066 }
0x1542   :  { %v2072_v3 = vsel %vm353_vm3, %v2067_v10, 0 }
0x1545   :  { %v2183_v50 = vpop.permute.xlu0 %2182 }
0x1546   :  { %v2188_v8 = vsel %vm353_vm3, %v2183_v50, 0 }
0x1547   :  { %v9815_v61 = vpop.eup %9814 }
0x1548   :  { %v1948_v63 = vmul.f32 %v9815_v61, %v9807_v62  ;;  %v9817_v2 = vpop.eup %9816 }
0x1549   :  { %v2295_v0 = vpop.permute.xlu0 %2294  ;;  %v2064_v5 = vmul.f32 %v9817_v2, %v10676_v26  ;;  %v9819_v7 = vpop.eup %9818 }
0x154a   :  { %v1949_v17 = vpack.c.bf16 %v1948_v63, %v1948_v63  ;;  %v2180_v11 = vmul.f32 %v9819_v7, %v10680_v43  ;;  %v9821_v13 = vpop.eup %9820  ;;  %v2300_v14 = vsel %vm353_vm3, %v2295_v0, 0  ;;  %v9702_v43 = vld [vmem:[%s10110_s29 + $0x18] sm:$0xff]  }
0x154b   :  { %v2065_v18 = vpack.c.bf16 %v2064_v5, %v2064_v5  ;;  %v2292_v15 = vmul.f32 %v9821_v13, %v10684_v45  ;;  %v9823_v19 = vpop.eup %9822  ;;  %v2605_v62 = vsel %vm221_vm0, %v9702_v43, 0 }
0x154c   :  { %9007 = vmatmul.mubr.msk.bf16.vlgmr.msra.gmra.mxu1 %vm288_vm2, %v1949_v17  ;;  %v2181_v12 = vpack.c.bf16 %v2180_v11, %v2180_v11  ;;  %v2408_v21 = vmul.f32 %v9823_v19, %v10689_v47  ;;  %9071 = vmatpush3.bf16.xpose.msra.mxu0 %v2605_v62  ;;  %v8290_v17 = vld [vmem:[%s10115_s3 + $0x1] ss:$0 sm:$0xff]  ;;  %s11879_s3 = sld [smem:[#allocation11_spill]] }
0x154d   :  { %9017 = vmatpush3.bf16.msra.mxu1 %v2072_v3  ;;  %v2411_v4 = vpop.permute.xlu0 %2410  ;;  %9018 = vmatprep.mubr.msk.bf16.mxu1 %vm10055_vm1, %v10054_v1  ;;  %v2293_v16 = vpack.c.bf16 %v2292_v15, %v2292_v15 }
0x154e   :  { %9028 = vmatprep.subr.bf16.mxu1 %v10054_v1  ;;  %v2416_v20 = vsel %vm353_vm3, %v2411_v4, 0  ;;  %v2409_v22 = vpack.c.bf16 %v2408_v21, %v2408_v21  ;;  %9072 = vmatprep.subr.bf16.mxu0 %v10054_v1 }
0x1551   :  { %v2527_v6 = vpop.permute.xlu0 %2526 }
0x1552   :  { %v2532_v23 = vsel %vm353_vm3, %v2527_v6, 0 }
0x1554   :  { %9019 = vmatmul.mubr.msk.bf16.vlgmr.msra.gmra.mxu1 %vm288_vm2, %v2065_v18 }
0x1555   :  { %9029 = vmatpush3.bf16.msra.mxu1 %v2188_v8  ;;  %v1884_v9 = vpop.permute.xlu0 %1883  ;;  %9030 = vmatprep.mubr.msk.bf16.mxu1 %vm10055_vm1, %v10054_v1 }
0x1556   :  { %1886 = vst.msk [vmem:[#allocation2] sm:$0xff] %vm513_vm4, %v1884_v9  ;;  %9040 = vmatprep.subr.bf16.mxu1 %v10054_v1 }
0x155c   :  { %9031 = vmatmul.mubr.msk.bf16.vlgmr.msra.gmra.mxu1 %vm288_vm2, %v2181_v12  ;;  %v9704_v12 = vld [vmem:[%s10130_s19 + $0x38] sm:$0xff]  }
0x155d   :  { %9041 = vmatpush3.bf16.msra.mxu1 %v2300_v14  ;;  %9042 = vmatprep.mubr.msk.bf16.mxu1 %vm10055_vm1, %v10054_v1  ;;  %v2754_v13 = vsel %vm221_vm0, %v9704_v12, 0 }
0x155e   :  { %9052 = vmatprep.subr.bf16.mxu1 %v10054_v1 }
0x1564   :  { %9043 = vmatmul.mubr.msk.bf16.vlgmr.msra.gmra.mxu1 %vm288_vm2, %v2293_v16 }
0x1565   :  { %9053 = vmatpush3.bf16.msra.mxu1 %v2416_v20  ;;  %9054 = vmatprep.mubr.msk.bf16.mxu1 %vm10055_vm1, %v10054_v1 }
0x1566   :  { %9064 = vmatprep.subr.bf16.mxu1 %v10054_v1 }
0x156c   :  { %9055 = vmatmul.mubr.msk.bf16.vlgmr.msra.gmra.mxu1 %vm288_vm2, %v2409_v22 }
0x156d   :  { %9065 = vmatpush3.bf16.msra.mxu1 %v2532_v23  ;;  %9066 = vmatprep.mubr.msk.bf16.mxu1 %vm10055_vm1, %v10054_v1 }
0x156e   :  { %v2522_v25 = vpop.xlane.xlu1 %2521  ;;  %9078 = vmatprep.subr.bf16.mxu1 %v10054_v1 }
0x156f   :  { %9824 = vrcp.f32 %v2522_v25  ;;  %v9705_v25 = vld [vmem:[%s10130_s19 + $0x30] sm:$0xff]  }
0x157c   :  { %v9825_v26 = vpop.eup %9824 }
0x157d   :  { %v2524_v27 = vmul.f32 %v9825_v26, %v10707_v53  ;;  %v9703_v53 = vld [vmem:[%s10110_s29 + $0x10] sm:$0xff]   ;;  %v2751_v26 = vsel %vm221_vm0, %v9705_v25, 0  ;;  %s11878_s29 = sld [smem:[#allocation7_spill]] }
0x157e   :  { %v2602_v40 = vsel %vm221_vm0, %v9703_v53, 0 }
0x157f   :  { %v2525_v28 = vpack.c.bf16 %v2524_v27, %v2524_v27  ;;  %9073 = vmatpush3.bf16.xpose.msra.mxu0 %v2602_v40  ;;  %v9706_v27 = vld [vmem:[%s10130_s19 + $0x28] sm:$0xff]   ;;  %v8312_v40 = vld [vmem:[%s10135_s24 + $0x1] ss:$0 sm:$0xff]  ;;  %s11883_s24 = sld [smem:[#allocation17_spill]] }
0x1580   :  { %9090 = vmatprep.subr.bf16.mxu0 %v10054_v1 }
0x1581   :  { %9067 = vmatmul.mubr.msk.bf16.vlgmr.msra.gmra.mxu1 %vm288_vm2, %v2525_v28  ;;  %v2748_v28 = vsel %vm221_vm0, %v9706_v27, 0 }
0x1582   :  { %9086 = vmatprep.mubr.msk.bf16.mxu1 %vm10055_vm1, %v10054_v1  ;;  %9079 = vmatpush3.bf16.xpose.msra.mxu1 %v2754_v13 }
0x1583   :  { %9080 = vmatprep.subr.bf16.mxu1 %v10054_v1  ;;  %v2961_v12 = vld [vmem:[%s11878_s29 + $0x8] sm:$0xff] }
0x158a   :  { %9081 = vmatpush3.bf16.xpose.msra.mxu1 %v2751_v26 }
0x158b   :  { %9082 = vmatprep.subr.bf16.mxu1 %v10054_v1 }
0x1592   :  { %9083 = vmatpush3.bf16.xpose.msra.mxu1 %v2748_v28 }
0x1593   :  { %9084 = vmatprep.subr.bf16.mxu1 %v10054_v1 }
0x160c   :  { %v1992_v29 = vpop.f32.mrf.mxu1 }
0x160d   :  { %1999 = vrot.lane.b32.xlu0 %v1992_v29, %s11849_s7  ;;  %v9707_v29 = vld [vmem:[%s10130_s19 + $0x20] sm:$0xff]   ;;  %s11882_s19 = sld [smem:[#allocation16_spill]] }
0x160e   :  { %v9008_v30 = vpop.f32.mrf.mxu1 }
0x160f   :  { %v2745_v30 = vsel %vm221_vm0, %v9707_v29, 0 }
0x1610   :  { %v1995_v31 = vpop.f32.mrf.mxu1  ;;  %9085 = vmatpush3.bf16.xpose.msra.mxu1 %v2745_v30 }
0x1611   :  { %9114 = vmatprep.subr.bf16.mxu1 %v10054_v1  ;;  %v9708_v31 = vld [vmem:[%s10140_s30 + $0x18] sm:$0xff]  }
0x1612   :  { %v9009_v32 = vpop.f32.mrf.mxu1 }
0x1613   :  { %v2823_v32 = vsel %vm1441_vm7, %v9708_v31, 0 }
0x1614   :  { %v2108_v36 = vpop.f32.mrf.mxu1 }
0x1616   :  { %v9020_v37 = vpop.f32.mrf.mxu1 }
0x1618   :  { %v2111_v38 = vpop.f32.mrf.mxu1 }
0x161a   :  { %v9021_v39 = vpop.f32.mrf.mxu1 }
0x161c   :  { %v2224_v24 = vpop.f32.mrf.mxu1 }
0x161d   :  { %2230 = vst.msk [vmem:[#allocation2 + $0x8] sm:$0xff] %vm288_vm2, %v2224_v24 }
0x161e   :  { %v9032_v41 = vpop.f32.mrf.mxu1 }
0x1620   :  { %v2227_v42 = vpop.f32.mrf.mxu1 }
0x1622   :  { %v9033_v44 = vpop.f32.mrf.mxu1 }
0x1623   :  { %v8296_v44 = vld [vmem:[%s10120_s8 + $0x1] ss:$0 sm:$0xff]  ;;  %s11880_s8 = sld [smem:[#allocation12_spill]] }
0x1624   :  { %v2336_v45 = vpop.f32.mrf.mxu1 }
0x1625   :  { %2343 = vrot.lane.b32.xlu0 %v2336_v45, %s11851_s2 }
0x1626   :  { %v9044_v46 = vpop.f32.mrf.mxu1 }
0x1628   :  { %v2339_v34 = vpop.f32.mrf.mxu1 }
0x1629   :  { %2115 = vrot.lane.b32.xlu0 %v2108_v36, %s11847_s10  ;;  %v8297_v34 = vld [vmem:[%s10125_s14 + $0x1] ss:$0 sm:$0xff]  ;;  %s11881_s14 = sld [smem:[#allocation13_spill]] }
0x162a   :  { %v9045_v47 = vpop.f32.mrf.mxu1 }
0x162c   :  { %v2452_v48 = vpop.f32.mrf.mxu1 }
0x162d   :  { %2459 = vrot.lane.b32.xlu1 %v2452_v48, %s11849_s7 }
0x162e   :  { %v9056_v49 = vpop.f32.mrf.mxu1 }
0x1630   :  { %v2455_v51 = vpop.f32.mrf.mxu1 }
0x1632   :  { %v9057_v52 = vpop.f32.mrf.mxu1 }
0x1633   :  { %v9709_v52 = vld [vmem:[%s10140_s30 + $0x10] sm:$0xff]   ;;  %s11884_s30 = sld [smem:[#allocation8_spill]] }
0x1634   :  { %v2820_v53 = vsel %vm1441_vm7, %v9709_v52, 0 }
0x1641   :  { %v2568_v54 = vpop.f32.mrf.mxu1 }
0x1642   :  { %2575 = vrot.lane.b32.xlu0 %v2568_v54, %s11847_s10 }
0x1643   :  { %v9068_v55 = vpop.f32.mrf.mxu1 }
0x1645   :  { %v2571_v56 = vpop.f32.mrf.mxu1 }
0x1647   :  { %v9069_v57 = vpop.f32.mrf.mxu1 }
0x167f   :  { %v2000_v58 = vpop.permute.xlu0 %1999 }
0x1680   :  { %2002 = vst.msk [vmem:[#allocation2] sm:$0xff] %vm630_vm5, %v2000_v58 }
0x1697   :  { %v2344_v59 = vpop.permute.xlu0 %2343 }
0x1698   :  { %2346 = vst.msk [vmem:[#allocation2 + $0x8] sm:$0xff] %vm513_vm4, %v2344_v59  ;;  %v9710_v59 = vld [vmem:[%s11876_s21 + $0x28] sm:$0xff]  }
0x169b   :  { %v2116_v60 = vpop.permute.xlu0 %2115 }
0x169c   :  { %2118 = vst.msk [vmem:[#allocation2] sm:$0xff] %vm747_vm6, %v2116_v60 }
0x169f   :  { %v2460_v10 = vpop.permute.xlu1 %2459 }
0x16a0   :  { %2462 = vst.msk [vmem:[#allocation2 + $0x8] sm:$0xff] %vm630_vm5, %v2460_v10 }
0x16a3   :  { %v2579_v61 = vld [vmem:[#allocation2] sm:$0xff] }
0x16b4   :  { %v2576_v50 = vpop.permute.xlu0 %2575 }
0x16b5   :  { %2578 = vst.msk [vmem:[#allocation2 + $0x8] sm:$0xff] %vm747_vm6, %v2576_v50 }
0x16bc   :  { %v2580_v63 = vld [vmem:[#allocation2 + $0x8] sm:$0xff] }
0x16bd   :  { %v2581_v0 = vpack.c.bf16 %v2580_v63, %v2579_v61  ;;  %v3038_v63 = vsel %vm221_vm0, %v9710_v59, 0 }
0x16bf   :  { %9075 = vmatmul.mubr.msk.bf16.vlgmr.msra.gmra.mxu0 %vm221_vm0, %v2581_v0  ;;  %v9711_v0 = vld [vmem:[%s11876_s21 + $0x20] sm:$0xff]  }
0x16c0   :  { %9094 = vmatprep.mubr.msk.bf16.mxu0 %vm10055_vm1, %v10054_v1  ;;  %9091 = vmatpush3.bf16.xpose.msra.mxu0 %v2823_v32 }
0x16c1   :  { %9092 = vmatprep.subr.bf16.mxu0 %v10054_v1 }
0x16c8   :  { %9093 = vmatpush3.bf16.xpose.msra.mxu0 %v2820_v53 }
0x16c9   :  { %9098 = vmatprep.subr.bf16.mxu0 %v10054_v1 }
0x177f   :  { %v2641_v2 = vpop.f32.mrf.mxu0 }
0x1780   :  { %v2642_v3 = vadd.f32 %v8290_v17, %v2641_v2  ;;  %v9712_v2 = vld [vmem:[%s11876_s21 + $0x18] sm:$0xff]  }
0x1781   :  { %v9076_v4 = vpop.f32.mrf.mxu0 }
0x1782   :  { %v2648_v5 = vadd.f32 %v2642_v3, %v10565_v33  ;;  %v3032_v3 = vsel %vm221_vm0, %v9712_v2, 0  ;;  %v9713_v4 = vld [vmem:[%s11876_s21 + $0x10] sm:$0xff]  }
0x1783   :  { %v2644_v6 = vpop.f32.mrf.mxu0 }
0x1784   :  { %v2645_v18 = vadd.f32 %v8290_v17, %v2644_v6  ;;  %v2654_v7 = vsel %vm221_vm0, %v2648_v5, 0.0  ;;  %v3035_v17 = vsel %vm221_vm0, %v9711_v0, 0  ;;  %v9714_v6 = vld [vmem:[%s11876_s21 + $0x8] sm:$0xff]  }
0x1785   :  { %2655 = vadd.xlane.f32.xlu0 %v2654_v7  ;;  %v9077_v8 = vpop.f32.mrf.mxu0  ;;  %v9715_v7 = vld [vmem:[%s11876_s21] sm:$0xff]  }
0x1786   :  { %v2649_v9 = vadd.f32 %v2645_v18, %v10567_v35  ;;  %v3026_v18 = vsel %vm221_vm0, %v9714_v6, 0  ;;  %v2958_v8 = vld [vmem:[%s11877_s25] sm:$0xff]  ;;  %v3023_v13 = vsel %vm221_vm0, %v9715_v7, 0 }
0x1788   :  { %v2657_v11 = vsel %vm221_vm0, %v2649_v9, 0.0 }
0x1789   :  { %2658 = vadd.xlane.f32.xlu1 %v2657_v11  ;;  %v2960_v11 = vld [vmem:[%s11878_s29] sm:$0xff]  ;;  %s11890_s29 = sld [smem:[#allocation22_spill]] }
0x180e   :  { %v2656_v14 = vpop.xlane.xlu0 %2655 }
0x180f   :  { %v2660_v33 = vmul.f32 0.03125, %v2656_v14  ;;  %v10828_v14 = vadd.f32 %v2960_v11, %v2958_v8 }
0x1811   :  { %v2662_v15 = vsub.f32 %v2648_v5, %v2660_v33  ;;  %v3029_v5 = vsel %vm221_vm0, %v9713_v4, 0 }
0x1812   :  { %v2659_v16 = vpop.xlane.xlu1 %2658 }
0x1813   :  { %v2661_v19 = vmul.f32 0.03125, %v2659_v16  ;;  %v2664_v20 = vmul.f32 %v2662_v15, %v2662_v15 }
0x1815   :  { %v2663_v21 = vsub.f32 %v2649_v9, %v2661_v19  ;;  %v2666_v35 = vsel %vm221_vm0, %v2664_v20, 0.0  ;;  %v2959_v9 = vld [vmem:[%s11877_s25 + $0x8] sm:$0xff]  ;;  %s11889_s25 = sld [smem:[#allocation19_spill]] }
0x1816   :  { %2667 = vadd.xlane.f32.xlu0 %v2666_v35  ;;  %v10830_v33 = vadd.f32 %v2961_v12, %v2959_v9  ;;  %v8328_v35 = vld [vmem:[%s11879_s3] ss:$0 sm:$0xff] }
0x1817   :  { %v2665_v22 = vmul.f32 %v2663_v21, %v2663_v21 }
0x1819   :  { %v2669_v23 = vsel %vm221_vm0, %v2665_v22, 0.0 }
0x181a   :  { %2670 = vadd.xlane.f32.xlu0 %v2669_v23 }
0x189f   :  { %v2668_v36 = vpop.xlane.xlu0 %2667 }
0x18a0   :  { %v2672_v37 = vmul.f32 0.03125, %v2668_v36 }
0x18a2   :  { %v2674_v38 = vadd.f32 1e-05, %v2672_v37 }
0x18a3   :  { %v2671_v39 = vpop.xlane.xlu0 %2670 }
0x18a4   :  { %9826 = vrsqrt.f32 %v2674_v38  ;;  %v2673_v24 = vmul.f32 0.03125, %v2671_v39 }
0x18a6   :  { %v2675_v41 = vadd.f32 1e-05, %v2673_v24 }
0x18a8   :  { %9828 = vrsqrt.f32 %v2675_v41 }
0x18b1   :  { %v9827_v42 = vpop.eup %9826 }
0x18b2   :  { %v2678_v43 = vmul.f32 %v9827_v42, %v2662_v15  ;;  %v2982_v15 = vpack.c.bf16 %v10830_v33, %v10828_v14 }
0x18b4   :  { %v2686_v46 = vmul.f32 %v8296_v44, %v2678_v43 }
0x18b5   :  { %v9829_v62 = vpop.eup %9828 }
0x18b6   :  { %v2679_v45 = vmul.f32 %v9829_v62, %v2663_v21  ;;  %v10791_v48 = vadd.f32 %v8297_v34, %v2686_v46 }
0x18b8   :  { %v2687_v47 = vmul.f32 %v8296_v44, %v2679_v45 }
0x18ba   :  { %v10793_v49 = vadd.f32 %v8297_v34, %v2687_v47 }
0x18bc   :  { %v2714_v51 = vpack.c.bf16 %v10793_v49, %v10791_v48 }
0x18be   :  { %9087 = vmatmul.mubr.msk.bf16.vlgmr.msra.gmra.mxu1 %vm221_vm0, %v2714_v51 }
0x18bf   :  { %9116 = vmatprep.mubr.msk.bf16.mxu1 %vm10055_vm1, %v10054_v1 }
0x197e   :  { %v2790_v54 = vpop.f32.mrf.mxu1 }
0x197f   :  { %v2791_v56 = vadd.f32 %v8312_v40, %v2790_v54 }
0x1980   :  { %v9088_v55 = vpop.f32.mrf.mxu1 }
0x1981   :  { %v2797_v10 = vmax.f32 %v2791_v56, 0.0 }
0x1982   :  { %v2793_v57 = vpop.f32.mrf.mxu1 }
0x1983   :  { %v2794_v58 = vadd.f32 %v8312_v40, %v2793_v57 }
0x1984   :  { %v9089_v60 = vpop.f32.mrf.mxu1 }
0x1985   :  { %v2798_v50 = vmax.f32 %v2794_v58, 0.0 }
0x1987   :  { %v2799_v61 = vpack.c.bf16 %v2798_v50, %v2797_v10 }
0x1989   :  { %9095 = vmatmul.mubr.msk.bf16.vlgmr.msra.gmra.mxu0 %vm1441_vm7, %v2799_v61 }
0x198a   :  { %9099 = vmatpush3.bf16.xpose.msra.mxu0 %v3038_v63  ;;  %9110 = vmatprep.mubr.msk.bf16.mxu0 %vm10055_vm1, %v10054_v1 }
0x198b   :  { %9100 = vmatprep.subr.bf16.mxu0 %v10054_v1 }
0x1992   :  { %9101 = vmatpush3.bf16.xpose.msra.mxu0 %v3035_v17 }
0x1993   :  { %9102 = vmatprep.subr.bf16.mxu0 %v10054_v1 }
0x199a   :  { %9103 = vmatpush3.bf16.xpose.msra.mxu0 %v3032_v3 }
0x199b   :  { %9104 = vmatprep.subr.bf16.mxu0 %v10054_v1 }
0x19a2   :  { %9105 = vmatpush3.bf16.xpose.msra.mxu0 %v3029_v5 }
0x19a3   :  { %9106 = vmatprep.subr.bf16.mxu0 %v10054_v1 }
0x19aa   :  { %9107 = vmatpush3.bf16.xpose.msra.mxu0 %v3026_v18 }
0x19ab   :  { %9108 = vmatprep.subr.bf16.mxu0 %v10054_v1 }
0x19b2   :  { %9109 = vmatpush3.bf16.xpose.msra.mxu0 %v3023_v13 }
0x19b3   :  { %9150 = vmatprep.subr.bf16.mxu0 %v10054_v1 }
0x19b9   :  { %9111 = vmatmul.mubr.msk.bf16.vlgmr.msra.gmra.mxu0 %vm221_vm0, %v2982_v15 }
0x19ba   :  { %9152 = vmatprep.mubr.msk.bf16.mxu0 %vm10055_vm1, %v10054_v1 }
0x1a49   :  { %v10838_v16 = vpop.f32.mrf.mxu0 }
0x1a4b   :  { %v9096_v19 = vpop.f32.mrf.mxu0 }
0x1a4d   :  { %v10840_v20 = vpop.f32.mrf.mxu0 }
0x1a4f   :  { %v9097_v21 = vpop.f32.mrf.mxu0 }
0x1a79   :  { %v3074_v22 = vpop.f32.mrf.mxu0 }
0x1a7a   :  { %v3075_v23 = vadd.f32 %v8328_v35, %v3074_v22 }
0x1a7b   :  { %v9112_v25 = vpop.f32.mrf.mxu0 }
0x1a7c   :  { %v10843_v26 = vpack.c.bf16 %v3075_v23, %v3075_v23 }
0x1a7d   :  { %v3077_v27 = vpop.f32.mrf.mxu0 }
0x1a7e   :  { %v3078_v28 = vadd.f32 %v8328_v35, %v3077_v27  ;;  %3083 = vrot.lane.b32.xlu0 %v10843_v26, %s10057_s5 }
0x1a7f   :  { %v9113_v29 = vpop.f32.mrf.mxu0 }
0x1a80   :  { %v10879_v0 = vpack.c.bf16 %v3078_v28, %v3078_v28 }
0x1a82   :  { %3195 = vrot.lane.b32.xlu0 %v10843_v26, %s10059_s15 }
0x1a86   :  { %3193 = vrot.lane.b32.xlu0 %v10843_v26, %s10060_s16 }
0x1af0   :  { %v3084_v30 = vpop.permute.xlu0 %3083 }
0x1af1   :  { %v3089_v31 = vsel %vm288_vm2, %v3084_v30, 0 }
0x1af2   :  { %9115 = vmatpush3.bf16.xpose.msra.mxu1 %v3089_v31 }
0x1af3   :  { %9120 = vmatprep.subr.bf16.mxu1 %v10054_v1 }
0x1af4   :  { %v3196_v52 = vpop.permute.xlu0 %3195 }
0x1af5   :  { %v3201_v40 = vsel %vm288_vm2, %v3196_v52, 0 }
0x1af8   :  { %v3194_v54 = vpop.permute.xlu0 %3193 }
0x1af9   :  { %9117 = vmatmul.mubr.msk.bf16.vlgmr.msra.gmra.mxu1 %vm288_vm2, %v10843_v26 }
0x1afa   :  { %9122 = vmatprep.mubr.msk.bf16.mxu1 %vm10055_vm1, %v10054_v1 }
0x1bb9   :  { %v3125_v32 = vpop.f32.mrf.mxu1 }
0x1bba   :  { %v3131_v36 = vmul.f32 0.35355338, %v3125_v32 }
0x1bbb   :  { %v9118_v37 = vpop.f32.mrf.mxu1 }
0x1bbc   :  { %v3132_v38 = vsel %vm288_vm2, %v3131_v36, -inf }
0x1bbd   :  { %3133 = vmax.xlane.f32.xlu1 %v3132_v38  ;;  %v3128_v39 = vpop.f32.mrf.mxu1 }
0x1bbf   :  { %v9119_v24 = vpop.f32.mrf.mxu1 }
0x1c46   :  { %v3134_v41 = vpop.xlane.xlu1 %3133 }
0x1c47   :  { %v3135_v42 = vsub.f32 %v3131_v36, %v3134_v41 }
0x1c49   :  { %v3136_v43 = vmul.f32 1.442695, %v3135_v42 }
0x1c4b   :  { %9830 = vpow2.f32 %v3136_v43 }
0x1c58   :  { %v9831_v44 = vpop.eup %9830 }
0x1c59   :  { %v3138_v62 = vsel %vm288_vm2, %v9831_v44, 0.0 }
0x1c5a   :  { %3139 = vadd.xlane.f32.xlu1 %v3138_v62 }
0x1c6b   :  { %3144 = vrot.lane.b32.xlu1 %v10843_v26, %s10056_s0 }
0x1ce3   :  { %v3140_v45 = vpop.xlane.xlu1 %3139 }
0x1ce4   :  { %9832 = vrcp.f32 %v3140_v45 }
0x1ce7   :  { %v3145_v46 = vpop.permute.xlu1 %3144 }
0x1ce8   :  { %v3150_v34 = vsel %vm353_vm3, %v3145_v46, 0 }
0x1ce9   :  { %9121 = vmatpush3.bf16.msra.mxu1 %v3150_v34 }
0x1cea   :  { %9126 = vmatprep.subr.bf16.mxu1 %v10054_v1 }
0x1cf1   :  { %v9833_v47 = vpop.eup %9832 }
0x1cf2   :  { %v3142_v51 = vmul.f32 %v9833_v47, %v9831_v44 }
0x1cf4   :  { %v3143_v53 = vpack.c.bf16 %v3142_v51, %v3142_v51 }
0x1cf6   :  { %9123 = vmatmul.mubr.msk.bf16.vlgmr.msra.gmra.mxu1 %vm288_vm2, %v3143_v53 }
0x1cf7   :  { %9127 = vmatpush3.bf16.xpose.msra.mxu1 %v3201_v40  ;;  %9128 = vmatprep.mubr.msk.bf16.mxu1 %vm10055_vm1, %v10054_v1 }
0x1cf8   :  { %9132 = vmatprep.subr.bf16.mxu1 %v10054_v1 }
0x1cfe   :  { %9129 = vmatmul.mubr.msk.bf16.vlgmr.msra.gmra.mxu1 %vm288_vm2, %v3194_v54 }
0x1cff   :  { %9134 = vmatprep.mubr.msk.bf16.mxu1 %vm10055_vm1, %v10054_v1 }
0x1db6   :  { %v3186_v55 = vpop.f32.mrf.mxu1 }
0x1db7   :  { %3192 = vst.msk [vmem:[#allocation2] sm:$0xff] %vm288_vm2, %v3186_v55 }
0x1db8   :  { %v9124_v56 = vpop.f32.mrf.mxu1 }
0x1dba   :  { %v3189_v57 = vpop.f32.mrf.mxu1 }
0x1dbc   :  { %v9125_v58 = vpop.f32.mrf.mxu1 }
0x1dbe   :  { %v3237_v59 = vpop.f32.mrf.mxu1 }
0x1dbf   :  { %v3243_v60 = vmul.f32 0.35355338, %v3237_v59 }
0x1dc0   :  { %v9130_v10 = vpop.f32.mrf.mxu1 }
0x1dc1   :  { %v3244_v50 = vsel %vm288_vm2, %v3243_v60, -inf }
0x1dc2   :  { %3245 = vmax.xlane.f32.xlu1 %v3244_v50  ;;  %v3240_v61 = vpop.f32.mrf.mxu1 }
0x1dc4   :  { %v9131_v63 = vpop.f32.mrf.mxu1 }
0x1dd3   :  { %3311 = vrot.lane.b32.xlu1 %v10843_v26, %s10062_s22 }
0x1dd7   :  { %3309 = vrot.lane.b32.xlu1 %v10843_v26, %s10063_s23 }
0x1ddb   :  { %3425 = vrot.lane.b32.xlu1 %v10843_v26, %s10064_s26 }
0x1ddf   :  { %3655 = vrot.lane.b32.xlu1 %v10879_v0, %s10059_s15 }
0x1de3   :  { %3771 = vrot.lane.b32.xlu1 %v10879_v0, %s10062_s22 }
0x1de7   :  { %3887 = vrot.lane.b32.xlu1 %v10879_v0, %s10061_s18 }
0x1e4b   :  { %v3246_v17 = vpop.xlane.xlu1 %3245 }
0x1e4c   :  { %v3247_v2 = vsub.f32 %v3243_v60, %v3246_v17 }
0x1e4e   :  { %v3248_v3 = vmul.f32 1.442695, %v3247_v2 }
0x1e4f   :  { %v3312_v18 = vpop.permute.xlu1 %3311 }
0x1e50   :  { %9834 = vpow2.f32 %v3248_v3  ;;  %v3317_v23 = vsel %vm288_vm2, %v3312_v18, 0 }
0x1e53   :  { %v3310_v12 = vpop.permute.xlu1 %3309 }
0x1e57   :  { %v3426_v21 = vpop.permute.xlu1 %3425 }
0x1e5b   :  { %v3656_v25 = vpop.permute.xlu1 %3655 }
0x1e5c   :  { %v3661_v27 = vsel %vm288_vm2, %v3656_v25, 0 }
0x1e5d   :  { %v9835_v4 = vpop.eup %9834 }
0x1e5e   :  { %v3250_v5 = vsel %vm288_vm2, %v9835_v4, 0.0 }
0x1e5f   :  { %3251 = vadd.xlane.f32.xlu0 %v3250_v5  ;;  %v3772_v28 = vpop.permute.xlu1 %3771 }
0x1e60   :  { %v3777_v30 = vsel %vm288_vm2, %v3772_v28, 0 }
0x1e63   :  { %v3888_v31 = vpop.permute.xlu1 %3887 }
0x1e64   :  { %v3893_v36 = vsel %vm288_vm2, %v3888_v31, 0 }
0x1e75   :  { %3256 = vrot.lane.b32.xlu0 %v10843_v26, %s10058_s13 }
0x1e79   :  { %3427 = vrot.lane.b32.xlu0 %v10843_v26, %s10061_s18 }
0x1e7d   :  { %3543 = vrot.lane.b32.xlu0 %v10879_v0, %s10057_s5 }
0x1e81   :  { %3653 = vrot.lane.b32.xlu0 %v10879_v0, %s10060_s16 }
0x1e85   :  { %3769 = vrot.lane.b32.xlu0 %v10879_v0, %s10063_s23 }
0x1e89   :  { %3885 = vrot.lane.b32.xlu0 %v10879_v0, %s10064_s26 }
0x1ee8   :  { %v3252_v6 = vpop.xlane.xlu0 %3251 }
0x1ee9   :  { %9836 = vrcp.f32 %v3252_v6 }
0x1eec   :  { %v3257_v7 = vpop.permute.xlu0 %3256 }
0x1eed   :  { %v3262_v8 = vsel %vm353_vm3, %v3257_v7, 0 }
0x1eee   :  { %9133 = vmatpush3.bf16.msra.mxu1 %v3262_v8 }
0x1eef   :  { %9138 = vmatprep.subr.bf16.mxu1 %v10054_v1 }
0x1ef0   :  { %v3428_v9 = vpop.permute.xlu0 %3427 }
0x1ef1   :  { %v3433_v11 = vsel %vm288_vm2, %v3428_v9, 0 }
0x1ef2   :  { %9151 = vmatpush3.bf16.xpose.msra.mxu0 %v3433_v11 }
0x1ef3   :  { %9162 = vmatprep.subr.bf16.mxu0 %v10054_v1 }
0x1ef4   :  { %v3544_v15 = vpop.permute.xlu0 %3543 }
0x1ef5   :  { %v3549_v35 = vsel %vm288_vm2, %v3544_v15, 0 }
0x1ef6   :  { %v9837_v13 = vpop.eup %9836 }
0x1ef7   :  { %v3254_v19 = vmul.f32 %v9837_v13, %v9835_v4 }
0x1ef8   :  { %v3654_v29 = vpop.permute.xlu0 %3653 }
0x1ef9   :  { %9153 = vmatmul.mubr.msk.bf16.vlgmr.msra.gmra.mxu0 %vm288_vm2, %v3426_v21  ;;  %v3255_v22 = vpack.c.bf16 %v3254_v19, %v3254_v19 }
0x1efa   :  { %9163 = vmatpush3.bf16.xpose.msra.mxu0 %v3549_v35  ;;  %9164 = vmatprep.mubr.msk.bf16.mxu0 %vm10055_vm1, %v10054_v1 }
0x1efb   :  { %9135 = vmatmul.mubr.msk.bf16.vlgmr.msra.gmra.mxu1 %vm288_vm2, %v3255_v22  ;;  %9174 = vmatprep.subr.bf16.mxu0 %v10054_v1 }
0x1efc   :  { %9139 = vmatpush3.bf16.xpose.msra.mxu1 %v3317_v23  ;;  %9140 = vmatprep.mubr.msk.bf16.mxu1 %vm10055_vm1, %v10054_v1  ;;  %v3770_v32 = vpop.permute.xlu0 %3769 }
0x1efd   :  { %9144 = vmatprep.subr.bf16.mxu1 %v10054_v1 }
0x1f00   :  { %v3886_v37 = vpop.permute.xlu0 %3885 }
0x1f01   :  { %9165 = vmatmul.mubr.msk.bf16.vlgmr.msra.gmra.mxu0 %vm288_vm2, %v10879_v0 }
0x1f02   :  { %9175 = vmatpush3.bf16.xpose.msra.mxu0 %v3661_v27  ;;  %9176 = vmatprep.mubr.msk.bf16.mxu0 %vm10055_vm1, %v10054_v1 }
0x1f03   :  { %9141 = vmatmul.mubr.msk.bf16.vlgmr.msra.gmra.mxu1 %vm288_vm2, %v3310_v12  ;;  %9186 = vmatprep.subr.bf16.mxu0 %v10054_v1 }
0x1f04   :  { %9146 = vmatprep.mubr.msk.bf16.mxu1 %vm10055_vm1, %v10054_v1 }
0x1f09   :  { %9177 = vmatmul.mubr.msk.bf16.vlgmr.msra.gmra.mxu0 %vm288_vm2, %v3654_v29 }
0x1f0a   :  { %9187 = vmatpush3.bf16.xpose.msra.mxu0 %v3777_v30  ;;  %9188 = vmatprep.mubr.msk.bf16.mxu0 %vm10055_vm1, %v10054_v1 }
0x1f0b   :  { %9198 = vmatprep.subr.bf16.mxu0 %v10054_v1 }
0x1f11   :  { %9189 = vmatmul.mubr.msk.bf16.vlgmr.msra.gmra.mxu0 %vm288_vm2, %v3770_v32 }
0x1f12   :  { %9199 = vmatpush3.bf16.xpose.msra.mxu0 %v3893_v36  ;;  %9200 = vmatprep.mubr.msk.bf16.mxu0 %vm10055_vm1, %v10054_v1 }
0x1f13   :  { %9210 = vmatprep.subr.bf16.mxu0 %v10054_v1 }
0x1f19   :  { %9201 = vmatmul.mubr.msk.bf16.vlgmr.msra.gmra.mxu0 %vm288_vm2, %v3886_v37 }
0x1f1a   :  { %9214 = vmatprep.mubr.msk.bf16.mxu0 %vm10055_vm1, %v10054_v1 }
0x1fb9   :  { %v3469_v38 = vpop.f32.mrf.mxu0 }
0x1fba   :  { %v3475_v39 = vmul.f32 0.35355338, %v3469_v38 }
0x1fbb   :  { %v10936_v24 = vpop.f32.mrf.mxu1  ;;  %v9154_v41 = vpop.f32.mrf.mxu0 }
0x1fbc   :  { %v3476_v42 = vsel %vm288_vm2, %v3475_v39, -inf }
0x1fbd   :  { %v9136_v43 = vpop.f32.mrf.mxu1  ;;  %3477 = vmax.xlane.f32.xlu0 %v3476_v42  ;;  %v3472_v44 = vpop.f32.mrf.mxu0 }
0x1fbf   :  { %v3301_v62 = vpop.f32.mrf.mxu1  ;;  %v9155_v45 = vpop.f32.mrf.mxu0 }
0x1fc1   :  { %v9137_v46 = vpop.f32.mrf.mxu1  ;;  %v3585_v34 = vpop.f32.mrf.mxu0 }
0x1fc2   :  { %v3591_v47 = vmul.f32 0.35355338, %v3585_v34 }
0x1fc3   :  { %v3353_v51 = vpop.f32.mrf.mxu1  ;;  %v9166_v52 = vpop.f32.mrf.mxu0 }
0x1fc4   :  { %v3359_v53 = vmul.f32 0.35355338, %v3353_v51  ;;  %v3592_v40 = vsel %vm288_vm2, %v3591_v47, -inf }
0x1fc5   :  { %v9142_v54 = vpop.f32.mrf.mxu1  ;;  %3593 = vmax.xlane.f32.xlu0 %v3592_v40  ;;  %v3588_v55 = vpop.f32.mrf.mxu0 }
0x1fc6   :  { %v3360_v56 = vsel %vm288_vm2, %v3359_v53, -inf }
0x1fc7   :  { %v3356_v57 = vpop.f32.mrf.mxu1  ;;  %3361 = vmax.xlane.f32.xlu1 %v3360_v56  ;;  %v9167_v58 = vpop.f32.mrf.mxu0 }
0x1fc9   :  { %v9143_v59 = vpop.f32.mrf.mxu1  ;;  %v3697_v60 = vpop.f32.mrf.mxu0 }
0x1fca   :  { %v3703_v10 = vmul.f32 0.35355338, %v3697_v60 }
0x1fcb   :  { %v9178_v50 = vpop.f32.mrf.mxu0 }
0x1fcc   :  { %v3704_v61 = vsel %vm288_vm2, %v3703_v10, -inf }
0x1fcd   :  { %3705 = vmax.xlane.f32.xlu1 %v3704_v61  ;;  %v3700_v63 = vpop.f32.mrf.mxu0 }
0x1fcf   :  { %v9179_v17 = vpop.f32.mrf.mxu0 }
0x1fd1   :  { %v3813_v2 = vpop.f32.mrf.mxu0 }
0x1fd2   :  { %v3819_v3 = vmul.f32 0.35355338, %v3813_v2 }
0x1fd3   :  { %v9190_v4 = vpop.f32.mrf.mxu0 }
0x1fd4   :  { %v3820_v5 = vsel %vm288_vm2, %v3819_v3, -inf }
0x1fd5   :  { %3821 = vmax.xlane.f32.xlu0 %v3820_v5  ;;  %v3816_v6 = vpop.f32.mrf.mxu0 }
0x1fd7   :  { %v9191_v18 = vpop.f32.mrf.mxu0 }
0x1fd9   :  { %v3929_v7 = vpop.f32.mrf.mxu0 }
0x1fda   :  { %v3935_v8 = vmul.f32 0.35355338, %v3929_v7 }
0x1fdb   :  { %v9202_v9 = vpop.f32.mrf.mxu0 }
0x1fdc   :  { %v3936_v11 = vsel %vm288_vm2, %v3935_v8, -inf }
0x1fdd   :  { %3937 = vmax.xlane.f32.xlu1 %v3936_v11  ;;  %v3932_v12 = vpop.f32.mrf.mxu0 }
0x1fdf   :  { %v9203_v13 = vpop.f32.mrf.mxu0 }
0x2046   :  { %v3478_v15 = vpop.xlane.xlu0 %3477 }
0x2047   :  { %v3479_v19 = vsub.f32 %v3475_v39, %v3478_v15 }
0x2049   :  { %v3480_v21 = vmul.f32 1.442695, %v3479_v19 }
0x204b   :  { %9838 = vpow2.f32 %v3480_v21 }
0x204e   :  { %v3594_v35 = vpop.xlane.xlu0 %3593 }
0x204f   :  { %v3595_v22 = vsub.f32 %v3591_v47, %v3594_v35 }
0x2050   :  { %v3362_v23 = vpop.xlane.xlu1 %3361 }
0x2051   :  { %v3596_v25 = vmul.f32 1.442695, %v3595_v22  ;;  %v3363_v27 = vsub.f32 %v3359_v53, %v3362_v23 }
0x2053   :  { %9840 = vpow2.f32 %v3596_v25  ;;  %v3364_v28 = vmul.f32 1.442695, %v3363_v27 }
0x2055   :  { %9842 = vpow2.f32 %v3364_v28 }
0x2056   :  { %v3706_v29 = vpop.xlane.xlu1 %3705 }
0x2057   :  { %v3707_v30 = vsub.f32 %v3703_v10, %v3706_v29 }
0x2058   :  { %v9839_v31 = vpop.eup %9838 }
0x2059   :  { %v3708_v32 = vmul.f32 1.442695, %v3707_v30  ;;  %v3482_v36 = vsel %vm288_vm2, %v9839_v31, 0.0 }
0x205a   :  { %3483 = vadd.xlane.f32.xlu1 %v3482_v36 }
0x205b   :  { %9844 = vpow2.f32 %v3708_v32 }
0x205e   :  { %v3822_v37 = vpop.xlane.xlu0 %3821 }
0x205f   :  { %v3823_v38 = vsub.f32 %v3819_v3, %v3822_v37 }
0x2060   :  { %v9841_v39 = vpop.eup %9840 }
0x2061   :  { %v3824_v41 = vmul.f32 1.442695, %v3823_v38  ;;  %v3598_v42 = vsel %vm288_vm2, %v9841_v39, 0.0 }
0x2062   :  { %v9843_v43 = vpop.eup %9842  ;;  %3599 = vadd.xlane.f32.xlu0 %v3598_v42 }
0x2063   :  { %9846 = vpow2.f32 %v3824_v41  ;;  %v3366_v44 = vsel %vm288_vm2, %v9843_v43, 0.0 }
0x2066   :  { %3367 = vadd.xlane.f32.xlu0 %v3366_v44  ;;  %v3938_v47 = vpop.xlane.xlu1 %3937 }
0x2067   :  { %v3939_v51 = vsub.f32 %v3935_v8, %v3938_v47 }
0x2068   :  { %v10947_v62 = vpop.eup %9844 }
0x2069   :  { %v3710_v45 = vsel %vm288_vm2, %v10947_v62, 0.0  ;;  %v3940_v52 = vmul.f32 1.442695, %v3939_v51 }
0x206a   :  { %3711 = vadd.xlane.f32.xlu1 %v3710_v45 }
0x206b   :  { %9848 = vpow2.f32 %v3940_v52  ;;  %v8318_v52 = vld [vmem:[%s10145_s6 + $0x1] ss:$0 sm:$0xff]  ;;  %s11885_s6 = sld [smem:[#allocation14_spill]] }
0x2070   :  { %v10951_v46 = vpop.eup %9846 }
0x2071   :  { %v3826_v34 = vsel %vm288_vm2, %v10951_v46, 0.0 }
0x2072   :  { %3827 = vadd.xlane.f32.xlu1 %v3826_v34 }
0x2078   :  { %v10967_v53 = vpop.eup %9848 }
0x207c   :  { %3372 = vrot.lane.b32.xlu0 %v10843_v26, %s10065_s28 }
0x2083   :  { %3488 = vrot.lane.b32.xlu1 %v10843_v26, %s11853_s1  ;;  %v3942_v26 = vsel %vm288_vm2, %v10967_v53, 0.0 }
0x2087   :  { %3604 = vrot.lane.b32.xlu1 %v10879_v0, %s10056_s0 }
0x208b   :  { %3716 = vrot.lane.b32.xlu1 %v10879_v0, %s10058_s13 }
0x208f   :  { %3832 = vrot.lane.b32.xlu1 %v10879_v0, %s10065_s28 }
0x2093   :  { %3948 = vrot.lane.b32.xlu1 %v10879_v0, %s11853_s1  ;;  %s11896_s1 = sld [smem:[#allocation26_spill]] }
0x2097   :  { %3305 = vrot.lane.b32.xlu1 %v10936_v24, %s11851_s2 }
0x209b   :  { %3943 = vadd.xlane.f32.xlu0 %v3942_v26  ;;  %v2863_v26 = vadd.f32 %v8318_v52, %v10840_v20 }
0x20e3   :  { %v3484_v55 = vpop.xlane.xlu1 %3483 }
0x20eb   :  { %v3600_v40 = vpop.xlane.xlu0 %3599 }
0x20ef   :  { %v3368_v54 = vpop.xlane.xlu0 %3367 }
0x20f0   :  { %9850 = vrcp.f32 %v3368_v54 }
0x20f1   :  { %9852 = vrcp.f32 %v3484_v55  ;;  %v2867_v55 = vadd.f32 %v2863_v26, %v10793_v49 }
0x20f2   :  { %9854 = vrcp.f32 %v3600_v40 }
0x20f3   :  { %v3373_v56 = vpop.permute.xlu0 %3372  ;;  %v3712_v0 = vpop.xlane.xlu1 %3711 }
0x20f4   :  { %v3378_v57 = vsel %vm353_vm3, %v3373_v56, 0  ;;  %9856 = vrcp.f32 %v3712_v0  ;;  %v2875_v0 = vsel %vm221_vm0, %v2867_v55, 0.0 }
0x20f5   :  { %9145 = vmatpush3.bf16.msra.mxu1 %v3378_v57 }
0x20f6   :  { %9156 = vmatprep.subr.bf16.mxu1 %v10054_v1 }
0x20fb   :  { %v3828_v58 = vpop.xlane.xlu1 %3827 }
0x20fc   :  { %9858 = vrcp.f32 %v3828_v58  ;;  %v9717_v58 = vld [vmem:[%s11880_s8] sm:$0xff]  }
0x20fd   :  { %v9851_v59 = vpop.eup %9850 }
0x20fe   :  { %v3370_v24 = vmul.f32 %v9851_v59, %v9843_v43  ;;  %v9853_v61 = vpop.eup %9852  ;;  %v4024_v59 = vsel %vm221_vm0, %v9717_v58, 0 }
0x20ff   :  { %v3489_v60 = vpop.permute.xlu1 %3488  ;;  %v3486_v17 = vmul.f32 %v9853_v61, %v9839_v31  ;;  %v9855_v4 = vpop.eup %9854 }
0x2100   :  { %v3371_v10 = vpack.c.bf16 %v3370_v24, %v3370_v24  ;;  %v3494_v50 = vsel %vm353_vm3, %v3489_v60, 0  ;;  %v3602_v18 = vmul.f32 %v9855_v4, %v9841_v39 }
0x2101   :  { %v3487_v3 = vpack.c.bf16 %v3486_v17, %v3486_v17  ;;  %v9857_v9 = vpop.eup %9856 }
0x2102   :  { %9147 = vmatmul.mubr.msk.bf16.vlgmr.msra.gmra.mxu1 %vm288_vm2, %v3371_v10  ;;  %v3603_v8 = vpack.c.bf16 %v3602_v18, %v3602_v18  ;;  %v3714_v13 = vmul.f32 %v9857_v9, %v10947_v62  ;;  %v9716_v62 = vld [vmem:[%s11880_s8 + $0x8] sm:$0xff]  }
0x2103   :  { %9157 = vmatpush3.bf16.msra.mxu1 %v3494_v50  ;;  %v3605_v63 = vpop.permute.xlu1 %3604  ;;  %9158 = vmatprep.mubr.msk.bf16.mxu1 %vm10055_vm1, %v10054_v1  ;;  %v2860_v50 = vadd.f32 %v8318_v52, %v10838_v16 }
0x2104   :  { %9168 = vmatprep.subr.bf16.mxu1 %v10054_v1  ;;  %v3610_v5 = vsel %vm353_vm3, %v3605_v63, 0  ;;  %v3715_v15 = vpack.c.bf16 %v3714_v13, %v3714_v13 }
0x2105   :  { %v2866_v49 = vadd.f32 %v2860_v50, %v10791_v48 }
0x2107   :  { %v3717_v2 = vpop.permute.xlu1 %3716  ;;  %v2872_v61 = vsel %vm221_vm0, %v2866_v49, 0.0 }
0x2108   :  { %v3722_v11 = vsel %vm353_vm3, %v3717_v2, 0 }
0x2109   :  { %v9859_v19 = vpop.eup %9858 }
0x210a   :  { %9159 = vmatmul.mubr.msk.bf16.vlgmr.msra.gmra.mxu1 %vm288_vm2, %v3487_v3  ;;  %v3830_v35 = vmul.f32 %v9859_v19, %v10951_v46  ;;  %v4027_v46 = vsel %vm221_vm0, %v9716_v62, 0 }
0x210b   :  { %9169 = vmatpush3.bf16.msra.mxu1 %v3610_v5  ;;  %v3833_v6 = vpop.permute.xlu1 %3832  ;;  %9170 = vmatprep.mubr.msk.bf16.mxu1 %vm10055_vm1, %v10054_v1 }
0x210c   :  { %9180 = vmatprep.subr.bf16.mxu1 %v10054_v1  ;;  %v3838_v21 = vsel %vm353_vm3, %v3833_v6, 0  ;;  %v3831_v22 = vpack.c.bf16 %v3830_v35, %v3830_v35  ;;  %9211 = vmatpush3.bf16.xpose.msra.mxu0 %v4027_v46 }
0x210d   :  { %9212 = vmatprep.subr.bf16.mxu0 %v10054_v1 }
0x210f   :  { %v3949_v7 = vpop.permute.xlu1 %3948 }
0x2110   :  { %v3954_v23 = vsel %vm353_vm3, %v3949_v7, 0 }
0x2112   :  { %9171 = vmatmul.mubr.msk.bf16.vlgmr.msra.gmra.mxu1 %vm288_vm2, %v3603_v8 }
0x2113   :  { %9181 = vmatpush3.bf16.msra.mxu1 %v3722_v11  ;;  %v3306_v12 = vpop.permute.xlu1 %3305  ;;  %9182 = vmatprep.mubr.msk.bf16.mxu1 %vm10055_vm1, %v10054_v1 }
0x2114   :  { %3308 = vst.msk [vmem:[#allocation2] sm:$0xff] %vm513_vm4, %v3306_v12  ;;  %9192 = vmatprep.subr.bf16.mxu1 %v10054_v1  ;;  %9213 = vmatpush3.bf16.xpose.msra.mxu0 %v4024_v59 }
0x2115   :  { %9226 = vmatprep.subr.bf16.mxu0 %v10054_v1 }
0x211a   :  { %9183 = vmatmul.mubr.msk.bf16.vlgmr.msra.gmra.mxu1 %vm288_vm2, %v3715_v15 }
0x211b   :  { %9193 = vmatpush3.bf16.msra.mxu1 %v3838_v21  ;;  %9194 = vmatprep.mubr.msk.bf16.mxu1 %vm10055_vm1, %v10054_v1 }
0x211c   :  { %9204 = vmatprep.subr.bf16.mxu1 %v10054_v1 }
0x2122   :  { %9195 = vmatmul.mubr.msk.bf16.vlgmr.msra.gmra.mxu1 %vm288_vm2, %v3831_v22 }
0x2123   :  { %9205 = vmatpush3.bf16.msra.mxu1 %v3954_v23  ;;  %9206 = vmatprep.mubr.msk.bf16.mxu1 %vm10055_vm1, %v10054_v1 }
0x2124   :  { %v3944_v25 = vpop.xlane.xlu0 %3943  ;;  %9218 = vmatprep.subr.bf16.mxu1 %v10054_v1 }
0x2125   :  { %9860 = vrcp.f32 %v3944_v25 }
0x2132   :  { %v9861_v27 = vpop.eup %9860 }
0x2133   :  { %v3946_v28 = vmul.f32 %v9861_v27, %v10967_v53 }
0x2135   :  { %v3947_v29 = vpack.c.bf16 %v3946_v28, %v3946_v28 }
0x2137   :  { %9207 = vmatmul.mubr.msk.bf16.vlgmr.msra.gmra.mxu1 %vm288_vm2, %v3947_v29 }
0x2138   :  { %9222 = vmatprep.mubr.msk.bf16.mxu1 %vm10055_vm1, %v10054_v1 }
0x21c2   :  { %v3414_v30 = vpop.f32.mrf.mxu1 }
0x21c3   :  { %3421 = vrot.lane.b32.xlu1 %v3414_v30, %s11849_s7 }
0x21c4   :  { %v9148_v31 = vpop.f32.mrf.mxu1 }
0x21c6   :  { %v3417_v32 = vpop.f32.mrf.mxu1 }
0x21c8   :  { %v9149_v36 = vpop.f32.mrf.mxu1 }
0x21c9   :  { %v8352_v36 = vld [vmem:[%s11881_s14] ss:$0 sm:$0xff] }
0x21ca   :  { %v3530_v37 = vpop.f32.mrf.mxu1 }
0x21cb   :  { %3537 = vrot.lane.b32.xlu0 %v3530_v37, %s11847_s10  ;;  %v8324_v37 = vld [vmem:[%s10150_s12 + $0x1] ss:$0 sm:$0xff]  ;;  %s11886_s12 = sld [smem:[#allocation9_spill]] }
0x21cc   :  { %v9160_v38 = vpop.f32.mrf.mxu1 }
0x21ce   :  { %v3533_v39 = vpop.f32.mrf.mxu1 }
0x21cf   :  { %v8325_v39 = vld [vmem:[%s10155_s20 + $0x1] ss:$0 sm:$0xff]  ;;  %s11887_s20 = sld [smem:[#allocation15_spill]] }
0x21d0   :  { %v9161_v41 = vpop.f32.mrf.mxu1 }
0x21d2   :  { %v3646_v42 = vpop.f32.mrf.mxu1 }
0x21d3   :  { %3652 = vst.msk [vmem:[#allocation2 + $0x8] sm:$0xff] %vm288_vm2, %v3646_v42 }
0x21d4   :  { %v9172_v43 = vpop.f32.mrf.mxu1 }
0x21d6   :  { %v3649_v44 = vpop.f32.mrf.mxu1 }
0x21d8   :  { %v9173_v45 = vpop.f32.mrf.mxu1 }
0x21da   :  { %v3758_v34 = vpop.f32.mrf.mxu1 }
0x21db   :  { %3765 = vrot.lane.b32.xlu1 %v3758_v34, %s11851_s2 }
0x21dc   :  { %v9184_v47 = vpop.f32.mrf.mxu1 }
0x21de   :  { %v3761_v51 = vpop.f32.mrf.mxu1 }
0x21e0   :  { %v9185_v53 = vpop.f32.mrf.mxu1 }
0x21e2   :  { %v3874_v40 = vpop.f32.mrf.mxu1 }
0x21e3   :  { %3881 = vrot.lane.b32.xlu1 %v3874_v40, %s11849_s7 }
0x21e4   :  { %v9196_v54 = vpop.f32.mrf.mxu1 }
0x21e5   :  { %v9718_v54 = vld [vmem:[%s11882_s19 + $0x28] sm:$0xff]  }
0x21e6   :  { %v3877_v56 = vpop.f32.mrf.mxu1 }
0x21e8   :  { %v9197_v57 = vpop.f32.mrf.mxu1 }
0x21ea   :  { %2876 = vadd.xlane.f32.xlu0 %v2875_v0 }
0x21f7   :  { %v3990_v24 = vpop.f32.mrf.mxu1 }
0x21f8   :  { %3997 = vrot.lane.b32.xlu1 %v3990_v24, %s11847_s10 }
0x21f9   :  { %v9208_v20 = vpop.f32.mrf.mxu1 }
0x21fb   :  { %v3993_v60 = vpop.f32.mrf.mxu1 }
0x21fd   :  { %v9209_v10 = vpop.f32.mrf.mxu1 }
0x221c   :  { %2873 = vadd.xlane.f32.xlu1 %v2872_v61 }
0x2235   :  { %v3422_v63 = vpop.permute.xlu1 %3421 }
0x2236   :  { %3424 = vst.msk [vmem:[#allocation2] sm:$0xff] %vm630_vm5, %v3422_v63 }
0x223d   :  { %v3538_v17 = vpop.permute.xlu0 %3537 }
0x223e   :  { %3540 = vst.msk [vmem:[#allocation2] sm:$0xff] %vm747_vm6, %v3538_v17 }
0x2245   :  { %v4001_v16 = vld [vmem:[#allocation2] sm:$0xff] }
0x224d   :  { %v3766_v2 = vpop.permute.xlu1 %3765 }
0x224e   :  { %3768 = vst.msk [vmem:[#allocation2 + $0x8] sm:$0xff] %vm513_vm4, %v3766_v2 }
0x2255   :  { %v3882_v3 = vpop.permute.xlu1 %3881 }
0x2256   :  { %3884 = vst.msk [vmem:[#allocation2 + $0x8] sm:$0xff] %vm630_vm5, %v3882_v3 }
0x226a   :  { %v3998_v4 = vpop.permute.xlu1 %3997 }
0x226b   :  { %4000 = vst.msk [vmem:[#allocation2 + $0x8] sm:$0xff] %vm747_vm6, %v3998_v4 }
0x2272   :  { %v4002_v48 = vld [vmem:[#allocation2 + $0x8] sm:$0xff] }
0x2273   :  { %v4003_v5 = vpack.c.bf16 %v4002_v48, %v4001_v16  ;;  %v2877_v6 = vpop.xlane.xlu0 %2876  ;;  %v9719_v48 = vld [vmem:[%s11882_s19 + $0x20] sm:$0xff]  }
0x2274   :  { %v2879_v18 = vmul.f32 0.03125, %v2877_v6  ;;  %v9720_v6 = vld [vmem:[%s11882_s19 + $0x18] sm:$0xff]  }
0x2275   :  { %9215 = vmatmul.mubr.msk.bf16.vlgmr.msra.gmra.mxu0 %vm221_vm0, %v4003_v5  ;;  %v4235_v5 = vsel %vm221_vm0, %v9719_v48, 0 }
0x2276   :  { %9234 = vmatprep.mubr.msk.bf16.mxu0 %vm10055_vm1, %v10054_v1  ;;  %v2881_v9 = vsub.f32 %v2867_v55, %v2879_v18  ;;  %v4232_v18 = vsel %vm221_vm0, %v9720_v6, 0 }
0x2278   :  { %v2883_v15 = vmul.f32 %v2881_v9, %v2881_v9 }
0x227a   :  { %v2887_v19 = vsel %vm221_vm0, %v2883_v15, 0.0  ;;  %v11068_v15 = vld [vmem:[%s11883_s24] ss:$0 sm:$0xff] }
0x22a5   :  { %v2874_v7 = vpop.xlane.xlu1 %2873 }
0x22a6   :  { %v2878_v8 = vmul.f32 0.03125, %v2874_v7  ;;  %v9721_v7 = vld [vmem:[%s11882_s19 + $0x8] sm:$0xff]  }
0x22a8   :  { %v2880_v11 = vsub.f32 %v2866_v49, %v2878_v8  ;;  %v4158_v8 = vsel %vm221_vm0, %v9721_v7, 0 }
0x22a9   :  { %9219 = vmatpush3.bf16.xpose.msra.mxu1 %v4158_v8 }
0x22aa   :  { %v2882_v12 = vmul.f32 %v2880_v11, %v2880_v11  ;;  %9220 = vmatprep.subr.bf16.mxu1 %v10054_v1 }
0x22ac   :  { %v2884_v13 = vsel %vm221_vm0, %v2882_v12, 0.0  ;;  %v9723_v12 = vld [vmem:[%s11882_s19] sm:$0xff]  }
0x22ad   :  { %2885 = vadd.xlane.f32.xlu1 %v2884_v13  ;;  %v4155_v13 = vsel %vm221_vm0, %v9723_v12, 0 }
0x22b1   :  { %2888 = vadd.xlane.f32.xlu1 %v2887_v19  ;;  %9221 = vmatpush3.bf16.xpose.msra.mxu1 %v4155_v13 }
0x22b2   :  { %9238 = vmatprep.subr.bf16.mxu1 %v10054_v1 }
0x2335   :  { %v4063_v21 = vpop.f32.mrf.mxu0 }
0x2336   :  { %v2886_v35 = vpop.xlane.xlu1 %2885  ;;  %v4064_v41 = vadd.f32 %v8352_v36, %v4063_v21 }
0x2337   :  { %v2890_v22 = vmul.f32 0.03125, %v2886_v35  ;;  %v9216_v23 = vpop.f32.mrf.mxu0 }
0x2338   :  { %v4070_v45 = vadd.f32 %v4064_v41, %v10828_v14  ;;  %v4238_v14 = vsel %vm221_vm0, %v9718_v54, 0 }
0x2339   :  { %v2892_v25 = vadd.f32 1e-05, %v2890_v22  ;;  %v4066_v27 = vpop.f32.mrf.mxu0  ;;  %9227 = vmatpush3.bf16.xpose.msra.mxu0 %v4238_v14 }
0x233a   :  { %v2889_v28 = vpop.xlane.xlu1 %2888  ;;  %v4067_v46 = vadd.f32 %v8352_v36, %v4066_v27  ;;  %v4074_v26 = vsel %vm221_vm0, %v4070_v45, 0.0  ;;  %9228 = vmatprep.subr.bf16.mxu0 %v10054_v1 }
0x233b   :  { %9862 = vrsqrt.f32 %v2892_v25  ;;  %v2891_v29 = vmul.f32 0.03125, %v2889_v28  ;;  %v9217_v30 = vpop.f32.mrf.mxu0 }
0x233c   :  { %v4071_v52 = vadd.f32 %v4067_v46, %v10830_v33 }
0x233d   :  { %v2893_v31 = vadd.f32 1e-05, %v2891_v29 }
0x233e   :  { %v4077_v40 = vsel %vm221_vm0, %v4071_v52, 0.0 }
0x233f   :  { %9864 = vrsqrt.f32 %v2893_v31 }
0x2341   :  { %9229 = vmatpush3.bf16.xpose.msra.mxu0 %v4235_v5 }
0x2342   :  { %9230 = vmatprep.subr.bf16.mxu0 %v10054_v1 }
0x2348   :  { %v9863_v32 = vpop.eup %9862 }
0x2349   :  { %v2896_v38 = vmul.f32 %v9863_v32, %v2880_v11  ;;  %9231 = vmatpush3.bf16.xpose.msra.mxu0 %v4232_v18 }
0x234a   :  { %9232 = vmatprep.subr.bf16.mxu0 %v10054_v1 }
0x234b   :  { %v2904_v42 = vmul.f32 %v8324_v37, %v2896_v38  ;;  %v8326_v38 = vld [vmem:[%s11884_s30] ss:$0 sm:$0xff]  ;;  %s11891_s30 = sld [smem:[#allocation24_spill]] }
0x234c   :  { %v9865_v43 = vpop.eup %9864 }
0x234d   :  { %v2912_v44 = vadd.f32 %v8325_v39, %v2904_v42  ;;  %v2897_v62 = vmul.f32 %v9865_v43, %v2881_v9  ;;  %v9722_v9 = vld [vmem:[%s11882_s19 + $0x10] sm:$0xff]   ;;  %v8356_v43 = vld [vmem:[%s11885_s6] ss:$0 sm:$0xff] }
0x234e   :  { %v4229_v11 = vsel %vm221_vm0, %v9722_v9, 0 }
0x234f   :  { %v2916_v34 = vsel %vm221_vm0, %v2912_v44, 0.0  ;;  %v2905_v47 = vmul.f32 %v8324_v37, %v2897_v62 }
0x2350   :  { %2917 = vadd.xlane.f32.xlu1 %v2916_v34 }
0x2351   :  { %v2913_v51 = vadd.f32 %v8325_v39, %v2905_v47  ;;  %9233 = vmatpush3.bf16.xpose.msra.mxu0 %v4229_v11 }
0x2352   :  { %9262 = vmatprep.subr.bf16.mxu0 %v10054_v1 }
0x2353   :  { %v2919_v53 = vsel %vm221_vm0, %v2913_v51, 0.0 }
0x2354   :  { %2920 = vadd.xlane.f32.xlu0 %v2919_v53  ;;  %4075 = vadd.xlane.f32.xlu1 %v4074_v26  ;;  %v8357_v26 = vld [vmem:[%s11887_s20] ss:$0 sm:$0xff] }
0x2358   :  { %4078 = vadd.xlane.f32.xlu0 %v4077_v40 }
0x23d9   :  { %v2918_v55 = vpop.xlane.xlu1 %2917 }
0x23da   :  { %v2922_v56 = vmul.f32 0.03125, %v2918_v55 }
0x23dc   :  { %v2924_v57 = vsub.f32 %v2912_v44, %v2922_v56 }
0x23dd   :  { %v2921_v0 = vpop.xlane.xlu0 %2920  ;;  %v4076_v33 = vpop.xlane.xlu1 %4075 }
0x23de   :  { %v2923_v58 = vmul.f32 0.03125, %v2921_v0  ;;  %v4080_v59 = vmul.f32 0.03125, %v4076_v33  ;;  %v2926_v24 = vmul.f32 %v2924_v57, %v2924_v57 }
0x23e0   :  { %v2925_v20 = vsub.f32 %v2913_v51, %v2923_v58  ;;  %v4082_v60 = vsub.f32 %v4070_v45, %v4080_v59  ;;  %v2928_v10 = vsel %vm221_vm0, %v2926_v24, 0.0  ;;  %v8327_v45 = vld [vmem:[%s11886_s12] ss:$0 sm:$0xff]  ;;  %s11892_s12 = sld [smem:[#allocation20_spill]] }
0x23e1   :  { %2929 = vadd.xlane.f32.xlu1 %v2928_v10  ;;  %v4079_v50 = vpop.xlane.xlu0 %4078 }
0x23e2   :  { %v4081_v49 = vmul.f32 0.03125, %v4079_v50  ;;  %v4084_v61 = vmul.f32 %v4082_v60, %v4082_v60  ;;  %v2927_v63 = vmul.f32 %v2925_v20, %v2925_v20 }
0x23e4   :  { %v4083_v17 = vsub.f32 %v4071_v52, %v4081_v49  ;;  %v4086_v2 = vsel %vm221_vm0, %v4084_v61, 0.0  ;;  %v2931_v3 = vsel %vm221_vm0, %v2927_v63, 0.0 }
0x23e5   :  { %4087 = vadd.xlane.f32.xlu1 %v4086_v2  ;;  %2932 = vadd.xlane.f32.xlu0 %v2931_v3 }
0x23e6   :  { %v4085_v4 = vmul.f32 %v4083_v17, %v4083_v17 }
0x23e8   :  { %v4089_v16 = vsel %vm221_vm0, %v4085_v4, 0.0 }
0x23e9   :  { %4090 = vadd.xlane.f32.xlu0 %v4089_v16 }
0x23f6   :  { %4222 = vrot.lane.b32.xlu1 %v11068_v15, %s10057_s5 }
0x246a   :  { %v2930_v19 = vpop.xlane.xlu1 %2929 }
0x246b   :  { %v2934_v21 = vmul.f32 0.03125, %v2930_v19 }
0x246d   :  { %v2936_v35 = vadd.f32 1e-05, %v2934_v21 }
0x246e   :  { %v4088_v22 = vpop.xlane.xlu1 %4087  ;;  %v2933_v23 = vpop.xlane.xlu0 %2932 }
0x246f   :  { %9866 = vrsqrt.f32 %v2936_v35  ;;  %v4092_v25 = vmul.f32 0.03125, %v4088_v22  ;;  %v2935_v27 = vmul.f32 0.03125, %v2933_v23 }
0x2471   :  { %v4094_v28 = vadd.f32 1e-05, %v4092_v25  ;;  %v2937_v29 = vadd.f32 1e-05, %v2935_v27 }
0x2472   :  { %v4091_v30 = vpop.xlane.xlu0 %4090 }
0x2473   :  { %9868 = vrsqrt.f32 %v4094_v28  ;;  %v4093_v31 = vmul.f32 0.03125, %v4091_v30 }
0x2474   :  { %9870 = vrsqrt.f32 %v2937_v29 }
0x2475   :  { %v4095_v32 = vadd.f32 1e-05, %v4093_v31 }
0x2477   :  { %9872 = vrsqrt.f32 %v4095_v32 }
0x247c   :  { %v9867_v36 = vpop.eup %9866 }
0x247d   :  { %v2940_v37 = vmul.f32 %v9867_v36, %v2924_v57  ;;  %v4223_v57 = vpop.permute.xlu1 %4222 }
0x247f   :  { %v2948_v62 = vmul.f32 %v8326_v38, %v2940_v37 }
0x2480   :  { %v9869_v39 = vpop.eup %9868 }
0x2481   :  { %v9871_v41 = vpop.eup %9870  ;;  %v4098_v42 = vmul.f32 %v9869_v39, %v4082_v60  ;;  %v2956_v52 = vadd.f32 %v8327_v45, %v2948_v62 }
0x2482   :  { %v2941_v44 = vmul.f32 %v9871_v41, %v2925_v20 }
0x2483   :  { %v4106_v47 = vmul.f32 %v8356_v43, %v4098_v42 }
0x2484   :  { %v9873_v46 = vpop.eup %9872  ;;  %v2949_v34 = vmul.f32 %v8326_v38, %v2941_v44 }
0x2485   :  { %v4099_v51 = vmul.f32 %v9873_v46, %v4083_v17  ;;  %v11078_v14 = vadd.f32 %v8357_v26, %v4106_v47 }
0x2486   :  { %v2957_v53 = vadd.f32 %v8327_v45, %v2949_v34 }
0x2487   :  { %v4107_v40 = vmul.f32 %v8356_v43, %v4099_v51 }
0x2488   :  { %v11076_v54 = vpack.c.bf16 %v2957_v53, %v2956_v52 }
0x2489   :  { %v11080_v55 = vadd.f32 %v8357_v26, %v4107_v40 }
0x248a   :  { %9235 = vmatmul.mubr.msk.bf16.vlgmr.msra.gmra.mxu0 %vm221_vm0, %v11076_v54 }
0x248b   :  { %v4134_v56 = vpack.c.bf16 %v11080_v55, %v11078_v14  ;;  %9264 = vmatprep.mubr.msk.bf16.mxu0 %vm10055_vm1, %v10054_v1 }
0x248d   :  { %9223 = vmatmul.mubr.msk.bf16.vlgmr.msra.gmra.mxu1 %vm221_vm0, %v4134_v56 }
0x248e   :  { %9240 = vmatprep.mubr.msk.bf16.mxu1 %vm10055_vm1, %v10054_v1 }
0x254a   :  { %v4274_v0 = vpop.f32.mrf.mxu0 }
0x254b   :  { %v4275_v33 = vadd.f32 %v4274_v0, %v4223_v57 }
0x254c   :  { %v9236_v58 = vpop.f32.mrf.mxu0 }
0x254d   :  { %v11091_v59 = vpack.c.bf16 %v4275_v33, %v4275_v33  ;;  %v4194_v24 = vpop.f32.mrf.mxu1 }
0x254e   :  { %v4195_v20 = vadd.f32 %v11068_v15, %v4194_v24  ;;  %v4277_v60 = vpop.f32.mrf.mxu0 }
0x254f   :  { %4395 = vrot.lane.b32.xlu1 %v11091_v59, %s10060_s16  ;;  %v9224_v10 = vpop.f32.mrf.mxu1  ;;  %v4287_v50 = vsel %vm288_vm2, %v11091_v59, 0  ;;  %v4278_v30 = vadd.f32 %v4277_v60, %v4223_v57 }
0x2550   :  { %v4281_v49 = vpack.c.bf16 %v4195_v20, %v4195_v20  ;;  %v9237_v61 = vpop.f32.mrf.mxu0  ;;  %9239 = vmatpush3.bf16.xpose.msra.mxu1 %v4287_v50 }
0x2551   :  { %v4197_v63 = vpop.f32.mrf.mxu1  ;;  %9244 = vmatprep.subr.bf16.mxu1 %v10054_v1  ;;  %v11133_v31 = vpack.c.bf16 %v4278_v30, %v4278_v30 }
0x2552   :  { %v4198_v2 = vadd.f32 %v11068_v15, %v4197_v63 }
0x2553   :  { %4393 = vrot.lane.b32.xlu1 %v4281_v49, %s10060_s16  ;;  %v9225_v17 = vpop.f32.mrf.mxu1  ;;  %v4747_v62 = vsel %vm288_vm2, %v11133_v31, 0 }
0x2554   :  { %v11108_v3 = vpack.c.bf16 %v4198_v2, %v4198_v2 }
0x2557   :  { %4511 = vrot.lane.b32.xlu1 %v11091_v59, %s10063_s23  ;;  %9241 = vmatmul.mubr.msk.bf16.vlgmr.msra.gmra.mxu1 %vm288_vm2, %v4281_v49 }
0x2558   :  { %9246 = vmatprep.mubr.msk.bf16.mxu1 %vm10055_vm1, %v10054_v1 }
0x255b   :  { %4509 = vrot.lane.b32.xlu1 %v4281_v49, %s10063_s23 }
0x255f   :  { %4625 = vrot.lane.b32.xlu1 %v4281_v49, %s10064_s26 }
0x2563   :  { %4853 = vrot.lane.b32.xlu1 %v11108_v3, %s10060_s16 }
0x2567   :  { %4969 = vrot.lane.b32.xlu1 %v11108_v3, %s10063_s23 }
0x256b   :  { %5085 = vrot.lane.b32.xlu1 %v11108_v3, %s10064_s26 }
0x25c1   :  { %v4396_v4 = vpop.permute.xlu1 %4395 }
0x25c2   :  { %v4401_v45 = vsel %vm288_vm2, %v4396_v4, 0 }
0x25c5   :  { %v11116_v16 = vpop.permute.xlu1 %4393 }
0x25c9   :  { %v4512_v48 = vpop.permute.xlu1 %4511 }
0x25ca   :  { %v4517_v5 = vsel %vm288_vm2, %v4512_v48, 0 }
0x25cb   :  { %9263 = vmatpush3.bf16.xpose.msra.mxu0 %v4517_v5 }
0x25cc   :  { %9274 = vmatprep.subr.bf16.mxu0 %v10054_v1 }
0x25cd   :  { %v4510_v6 = vpop.permute.xlu1 %4509 }
0x25d1   :  { %v4626_v43 = vpop.permute.xlu1 %4625 }
0x25d2   :  { %9265 = vmatmul.mubr.msk.bf16.vlgmr.msra.gmra.mxu0 %vm288_vm2, %v4510_v6 }
0x25d3   :  { %9276 = vmatprep.mubr.msk.bf16.mxu0 %vm10055_vm1, %v10054_v1 }
0x25d5   :  { %v4854_v51 = vpop.permute.xlu1 %4853 }
0x25d9   :  { %v4970_v26 = vpop.permute.xlu1 %4969 }
0x25dd   :  { %v5086_v56 = vpop.permute.xlu1 %5085 }
0x2617   :  { %v4323_v18 = vpop.f32.mrf.mxu1 }
0x2618   :  { %v4329_v7 = vmul.f32 0.35355338, %v4323_v18 }
0x2619   :  { %v9242_v8 = vpop.f32.mrf.mxu1 }
0x261a   :  { %v4330_v9 = vsel %vm288_vm2, %v4329_v7, -inf }
0x261b   :  { %4331 = vmax.xlane.f32.xlu0 %v4330_v9  ;;  %v4326_v11 = vpop.f32.mrf.mxu1 }
0x261d   :  { %v9243_v12 = vpop.f32.mrf.mxu1 }
0x2692   :  { %v4553_v13 = vpop.f32.mrf.mxu0 }
0x2693   :  { %v11124_v15 = vmul.f32 0.35355338, %v4553_v13 }
0x2694   :  { %v9266_v19 = vpop.f32.mrf.mxu0 }
0x2695   :  { %v4560_v21 = vsel %vm288_vm2, %v11124_v15, -inf }
0x2696   :  { %4561 = vmax.xlane.f32.xlu1 %v4560_v21  ;;  %v4556_v35 = vpop.f32.mrf.mxu0 }
0x2698   :  { %v9267_v22 = vpop.f32.mrf.mxu0 }
0x26a4   :  { %v4332_v23 = vpop.xlane.xlu0 %4331 }
0x26a5   :  { %v4333_v25 = vsub.f32 %v4329_v7, %v4332_v23 }
0x26a7   :  { %v4334_v27 = vmul.f32 1.442695, %v4333_v25 }
0x26a9   :  { %9874 = vpow2.f32 %v4334_v27 }
0x26b6   :  { %v9875_v28 = vpop.eup %9874 }
0x26b7   :  { %v4336_v29 = vsel %vm288_vm2, %v9875_v28, 0.0 }
0x26b8   :  { %4337 = vadd.xlane.f32.xlu0 %v4336_v29 }
0x26ce   :  { %4343 = vrot.lane.b32.xlu0 %v11091_v59, %s10057_s5 }
0x26d2   :  { %4627 = vrot.lane.b32.xlu0 %v11091_v59, %s10064_s26 }
0x26d6   :  { %4855 = vrot.lane.b32.xlu0 %v11133_v31, %s10060_s16 }
0x26da   :  { %4971 = vrot.lane.b32.xlu0 %v11133_v31, %s10063_s23 }
0x26de   :  { %5087 = vrot.lane.b32.xlu0 %v11133_v31, %s10064_s26 }
0x271f   :  { %v4562_v63 = vpop.xlane.xlu1 %4561 }
0x2720   :  { %v4563_v6 = vsub.f32 %v11124_v15, %v4562_v63 }
0x2722   :  { %v4564_v13 = vmul.f32 1.442695, %v4563_v6 }
0x2741   :  { %v4338_v32 = vpop.xlane.xlu0 %4337 }
0x2742   :  { %9876 = vrcp.f32 %v4338_v32 }
0x2743   :  { %9878 = vpow2.f32 %v4564_v13 }
0x2745   :  { %v4344_v36 = vpop.permute.xlu0 %4343 }
0x2746   :  { %v4349_v37 = vsel %vm353_vm3, %v4344_v36, 0 }
0x2747   :  { %9245 = vmatpush3.bf16.msra.mxu1 %v4349_v37 }
0x2748   :  { %9250 = vmatprep.subr.bf16.mxu1 %v10054_v1 }
0x2749   :  { %v4628_v38 = vpop.permute.xlu0 %4627 }
0x274a   :  { %v4633_v39 = vsel %vm288_vm2, %v4628_v38, 0 }
0x274b   :  { %9275 = vmatpush3.bf16.xpose.msra.mxu0 %v4633_v39 }
0x274c   :  { %9286 = vmatprep.subr.bf16.mxu0 %v10054_v1 }
0x274d   :  { %v4856_v46 = vpop.permute.xlu0 %4855 }
0x274e   :  { %v4861_v34 = vsel %vm288_vm2, %v4856_v46, 0 }
0x274f   :  { %v9877_v41 = vpop.eup %9876 }
0x2750   :  { %v4340_v42 = vmul.f32 %v9877_v41, %v9875_v28  ;;  %v11187_v38 = vpop.eup %9878 }
0x2751   :  { %v4972_v47 = vpop.permute.xlu0 %4971 }
0x2752   :  { %v4341_v44 = vpack.c.bf16 %v4340_v42, %v4340_v42  ;;  %9277 = vmatmul.mubr.msk.bf16.vlgmr.msra.gmra.mxu0 %vm288_vm2, %v4626_v43  ;;  %v4977_v52 = vsel %vm288_vm2, %v4972_v47, 0  ;;  %v4566_v42 = vsel %vm288_vm2, %v11187_v38, 0.0 }
0x2753   :  { %9287 = vmatpush3.bf16.xpose.msra.mxu0 %v4747_v62  ;;  %9288 = vmatprep.mubr.msk.bf16.mxu0 %vm10055_vm1, %v10054_v1 }
0x2754   :  { %9247 = vmatmul.mubr.msk.bf16.vlgmr.msra.gmra.mxu1 %vm288_vm2, %v4341_v44  ;;  %9298 = vmatprep.subr.bf16.mxu0 %v10054_v1 }
0x2755   :  { %9251 = vmatpush3.bf16.xpose.msra.mxu1 %v4401_v45  ;;  %9252 = vmatprep.mubr.msk.bf16.mxu1 %vm10055_vm1, %v10054_v1  ;;  %v5088_v53 = vpop.permute.xlu0 %5087 }
0x2756   :  { %9256 = vmatprep.subr.bf16.mxu1 %v10054_v1  ;;  %v5093_v40 = vsel %vm288_vm2, %v5088_v53, 0 }
0x275a   :  { %9289 = vmatmul.mubr.msk.bf16.vlgmr.msra.gmra.mxu0 %vm288_vm2, %v11108_v3 }
0x275b   :  { %9299 = vmatpush3.bf16.xpose.msra.mxu0 %v4861_v34  ;;  %9300 = vmatprep.mubr.msk.bf16.mxu0 %vm10055_vm1, %v10054_v1 }
0x275c   :  { %9253 = vmatmul.mubr.msk.bf16.vlgmr.msra.gmra.mxu1 %vm288_vm2, %v11116_v16  ;;  %9310 = vmatprep.subr.bf16.mxu0 %v10054_v1 }
0x275d   :  { %9258 = vmatprep.mubr.msk.bf16.mxu1 %vm10055_vm1, %v10054_v1 }
0x2762   :  { %9301 = vmatmul.mubr.msk.bf16.vlgmr.msra.gmra.mxu0 %vm288_vm2, %v4854_v51 }
0x2763   :  { %9311 = vmatpush3.bf16.xpose.msra.mxu0 %v4977_v52  ;;  %9312 = vmatprep.mubr.msk.bf16.mxu0 %vm10055_vm1, %v10054_v1 }
0x2764   :  { %9322 = vmatprep.subr.bf16.mxu0 %v10054_v1 }
0x276a   :  { %9313 = vmatmul.mubr.msk.bf16.vlgmr.msra.gmra.mxu0 %vm288_vm2, %v4970_v26 }
0x276b   :  { %9323 = vmatpush3.bf16.xpose.msra.mxu0 %v5093_v40  ;;  %9324 = vmatprep.mubr.msk.bf16.mxu0 %vm10055_vm1, %v10054_v1 }
0x276c   :  { %9334 = vmatprep.subr.bf16.mxu0 %v10054_v1 }
0x2772   :  { %9325 = vmatmul.mubr.msk.bf16.vlgmr.msra.gmra.mxu0 %vm288_vm2, %v5086_v56 }
0x2773   :  { %9338 = vmatprep.mubr.msk.bf16.mxu0 %vm10055_vm1, %v10054_v1 }
0x2812   :  { %v4669_v57 = vpop.f32.mrf.mxu0 }
0x2813   :  { %v4675_v4 = vmul.f32 0.35355338, %v4669_v57 }
0x2814   :  { %v4385_v0 = vpop.f32.mrf.mxu1  ;;  %v9278_v33 = vpop.f32.mrf.mxu0 }
0x2815   :  { %4391 = vst.msk [vmem:[#allocation2] sm:$0xff] %vm288_vm2, %v4385_v0  ;;  %v4676_v11 = vsel %vm288_vm2, %v4675_v4, -inf }
0x2816   :  { %v9248_v58 = vpop.f32.mrf.mxu1  ;;  %v4672_v24 = vpop.f32.mrf.mxu0 }
0x2818   :  { %v4388_v20 = vpop.f32.mrf.mxu1  ;;  %v9279_v60 = vpop.f32.mrf.mxu0 }
0x281a   :  { %v9249_v10 = vpop.f32.mrf.mxu1  ;;  %v4783_v50 = vpop.f32.mrf.mxu0 }
0x281b   :  { %v4789_v8 = vmul.f32 0.35355338, %v4783_v50 }
0x281c   :  { %v4437_v49 = vpop.f32.mrf.mxu1  ;;  %v9290_v61 = vpop.f32.mrf.mxu0 }
0x281d   :  { %v4443_v17 = vmul.f32 0.35355338, %v4437_v49  ;;  %v4790_v35 = vsel %vm288_vm2, %v4789_v8, -inf }
0x281e   :  { %v9254_v2 = vpop.f32.mrf.mxu1  ;;  %v4786_v3 = vpop.f32.mrf.mxu0 }
0x281f   :  { %v4444_v16 = vsel %vm288_vm2, %v4443_v17, -inf }
0x2820   :  { %v4440_v48 = vpop.f32.mrf.mxu1  ;;  %4445 = vmax.xlane.f32.xlu0 %v4444_v16  ;;  %v9291_v5 = vpop.f32.mrf.mxu0 }
0x2822   :  { %v9255_v18 = vpop.f32.mrf.mxu1  ;;  %v4897_v7 = vpop.f32.mrf.mxu0 }
0x2823   :  { %v4903_v9 = vmul.f32 0.35355338, %v4897_v7 }
0x2824   :  { %4677 = vmax.xlane.f32.xlu0 %v4676_v11  ;;  %v9302_v12 = vpop.f32.mrf.mxu0 }
0x2825   :  { %v4904_v19 = vsel %vm288_vm2, %v4903_v9, -inf }
0x2826   :  { %4905 = vmax.xlane.f32.xlu1 %v4904_v19  ;;  %v4900_v21 = vpop.f32.mrf.mxu0 }
0x2828   :  { %4791 = vmax.xlane.f32.xlu0 %v4790_v35  ;;  %v9303_v22 = vpop.f32.mrf.mxu0 }
0x282a   :  { %v5013_v23 = vpop.f32.mrf.mxu0 }
0x282b   :  { %v5019_v15 = vmul.f32 0.35355338, %v5013_v23 }
0x282c   :  { %v9314_v25 = vpop.f32.mrf.mxu0 }
0x282d   :  { %v5020_v27 = vsel %vm288_vm2, %v5019_v15, -inf }
0x282e   :  { %5021 = vmax.xlane.f32.xlu0 %v5020_v27  ;;  %v5016_v28 = vpop.f32.mrf.mxu0 }
0x2830   :  { %v9315_v29 = vpop.f32.mrf.mxu0 }
0x2832   :  { %v5129_v30 = vpop.f32.mrf.mxu0 }
0x2833   :  { %v5135_v32 = vmul.f32 0.35355338, %v5129_v30 }
0x2834   :  { %v9326_v36 = vpop.f32.mrf.mxu0 }
0x2835   :  { %v5136_v37 = vsel %vm288_vm2, %v5135_v32, -inf }
0x2836   :  { %5137 = vmax.xlane.f32.xlu1 %v5136_v37  ;;  %v5132_v39 = vpop.f32.mrf.mxu0 }
0x2838   :  { %v9327_v41 = vpop.f32.mrf.mxu0 }
0x283a   :  { %4567 = vadd.xlane.f32.xlu1 %v4566_v42 }
0x28a9   :  { %v4446_v43 = vpop.xlane.xlu0 %4445 }
0x28aa   :  { %v4447_v44 = vsub.f32 %v4443_v17, %v4446_v43 }
0x28ac   :  { %v4448_v34 = vmul.f32 1.442695, %v4447_v44 }
0x28ad   :  { %v4678_v62 = vpop.xlane.xlu0 %4677 }
0x28ae   :  { %v4679_v45 = vsub.f32 %v4675_v4, %v4678_v62 }
0x28af   :  { %v4906_v46 = vpop.xlane.xlu1 %4905 }
0x28b0   :  { %v4680_v47 = vmul.f32 1.442695, %v4679_v45  ;;  %v4907_v51 = vsub.f32 %v4903_v9, %v4906_v46 }
0x28b1   :  { %v4792_v52 = vpop.xlane.xlu0 %4791 }
0x28b2   :  { %9880 = vpow2.f32 %v4680_v47  ;;  %v4793_v53 = vsub.f32 %v4789_v8, %v4792_v52  ;;  %v4908_v26 = vmul.f32 1.442695, %v4907_v51 }
0x28b3   :  { %9882 = vpow2.f32 %v4448_v34 }
0x28b4   :  { %v4794_v40 = vmul.f32 1.442695, %v4793_v53 }
0x28b6   :  { %9884 = vpow2.f32 %v4794_v40 }
0x28b7   :  { %9886 = vpow2.f32 %v4908_v26  ;;  %v5022_v10 = vpop.xlane.xlu0 %5021 }
0x28b8   :  { %v5023_v50 = vsub.f32 %v5019_v15, %v5022_v10 }
0x28ba   :  { %v5024_v49 = vmul.f32 1.442695, %v5023_v50 }
0x28bc   :  { %9888 = vpow2.f32 %v5024_v49 }
0x28bf   :  { %v11191_v56 = vpop.eup %9880  ;;  %v5138_v61 = vpop.xlane.xlu1 %5137 }
0x28c0   :  { %v4682_v57 = vsel %vm288_vm2, %v11191_v56, 0.0  ;;  %v9883_v0 = vpop.eup %9882  ;;  %v5139_v63 = vsub.f32 %v5135_v32, %v5138_v61 }
0x28c1   :  { %4683 = vadd.xlane.f32.xlu0 %v4682_v57  ;;  %v4450_v58 = vsel %vm288_vm2, %v9883_v0, 0.0 }
0x28c2   :  { %v5140_v17 = vmul.f32 1.442695, %v5139_v63 }
0x28c3   :  { %v11195_v33 = vpop.eup %9884  ;;  %v4568_v48 = vpop.xlane.xlu1 %4567 }
0x28c4   :  { %v4796_v24 = vsel %vm288_vm2, %v11195_v33, 0.0  ;;  %v11200_v20 = vpop.eup %9886  ;;  %9890 = vpow2.f32 %v5140_v17 }
0x28c5   :  { %4451 = vadd.xlane.f32.xlu0 %v4450_v58  ;;  %4797 = vadd.xlane.f32.xlu1 %v4796_v24  ;;  %v4910_v60 = vsel %vm288_vm2, %v11200_v20, 0.0 }
0x28c9   :  { %4911 = vadd.xlane.f32.xlu1 %v4910_v60  ;;  %v11210_v2 = vpop.eup %9888 }
0x28ca   :  { %v5026_v3 = vsel %vm288_vm2, %v11210_v2, 0.0 }
0x28d1   :  { %v11214_v4 = vpop.eup %9890 }
0x28d2   :  { %v5142_v16 = vsel %vm288_vm2, %v11214_v4, 0.0 }
0x28da   :  { %4572 = vrot.lane.b32.xlu1 %v11091_v59, %s10062_s22 }
0x28db   :  { %4456 = vrot.lane.b32.xlu0 %v11091_v59, %s10059_s15 }
0x28de   :  { %4688 = vrot.lane.b32.xlu1 %v11091_v59, %s10061_s18 }
0x28fa   :  { %5027 = vadd.xlane.f32.xlu0 %v5026_v3  ;;  %v9724_v3 = vld [vmem:[%s11888_s11 + $0x8] sm:$0xff]  }
0x2902   :  { %5143 = vadd.xlane.f32.xlu1 %v5142_v16  ;;  %v5227_v16 = vsel %vm221_vm0, %v9724_v3, 0 }
0x2903   :  { %9335 = vmatpush3.bf16.xpose.msra.mxu0 %v5227_v16 }
0x2904   :  { %9336 = vmatprep.subr.bf16.mxu0 %v10054_v1 }
0x2910   :  { %4803 = vrot.lane.b32.xlu0 %v11133_v31, %s10057_s5 }
0x2913   :  { %4916 = vrot.lane.b32.xlu1 %v11133_v31, %s10059_s15 }
0x2914   :  { %5032 = vrot.lane.b32.xlu0 %v11133_v31, %s10062_s22 }
0x2918   :  { %5148 = vrot.lane.b32.xlu0 %v11133_v31, %s10061_s18 }
0x294a   :  { %v4684_v59 = vpop.xlane.xlu0 %4683 }
0x294e   :  { %v4452_v5 = vpop.xlane.xlu0 %4451  ;;  %v4798_v6 = vpop.xlane.xlu1 %4797 }
0x294f   :  { %9892 = vrcp.f32 %v4452_v5 }
0x2950   :  { %9894 = vrcp.f32 %v4568_v48 }
0x2951   :  { %9896 = vrcp.f32 %v4684_v59 }
0x2952   :  { %v4457_v18 = vpop.permute.xlu0 %4456  ;;  %v4912_v8 = vpop.xlane.xlu1 %4911  ;;  %9898 = vrcp.f32 %v4798_v6  ;;  %v9725_v6 = vld [vmem:[%s11888_s11] sm:$0xff]  }
0x2953   :  { %v4462_v7 = vsel %vm353_vm3, %v4457_v18, 0  ;;  %9900 = vrcp.f32 %v4912_v8 }
0x2954   :  { %9257 = vmatpush3.bf16.msra.mxu1 %v4462_v7  ;;  %v5224_v7 = vsel %vm221_vm0, %v9725_v6, 0 }
0x2955   :  { %9268 = vmatprep.subr.bf16.mxu1 %v10054_v1  ;;  %9337 = vmatpush3.bf16.xpose.msra.mxu0 %v5224_v7 }
0x2956   :  { %v4573_v12 = vpop.permute.xlu1 %4572  ;;  %9354 = vmatprep.subr.bf16.mxu0 %v10054_v1 }
0x2957   :  { %v4578_v31 = vsel %vm353_vm3, %v4573_v12, 0 }
0x295a   :  { %v4689_v35 = vpop.permute.xlu1 %4688 }
0x295b   :  { %v4694_v15 = vsel %vm353_vm3, %v4689_v35, 0 }
0x295c   :  { %v9893_v9 = vpop.eup %9892 }
0x295d   :  { %v4454_v11 = vmul.f32 %v9893_v9, %v9883_v0  ;;  %v9895_v19 = vpop.eup %9894 }
0x295e   :  { %v4570_v21 = vmul.f32 %v9895_v19, %v11187_v38  ;;  %v9897_v23 = vpop.eup %9896 }
0x295f   :  { %v4455_v13 = vpack.c.bf16 %v4454_v11, %v4454_v11  ;;  %v4686_v25 = vmul.f32 %v9897_v23, %v11191_v56  ;;  %v9899_v28 = vpop.eup %9898 }
0x2960   :  { %v4571_v22 = vpack.c.bf16 %v4570_v21, %v4570_v21  ;;  %v4800_v30 = vmul.f32 %v9899_v28, %v11195_v33  ;;  %v9901_v38 = vpop.eup %9900 }
0x2961   :  { %9259 = vmatmul.mubr.msk.bf16.vlgmr.msra.gmra.mxu1 %vm288_vm2, %v4455_v13  ;;  %v4687_v27 = vpack.c.bf16 %v4686_v25, %v4686_v25  ;;  %v4914_v41 = vmul.f32 %v9901_v38, %v11200_v20 }
0x2962   :  { %9269 = vmatpush3.bf16.msra.mxu1 %v4578_v31  ;;  %9270 = vmatprep.mubr.msk.bf16.mxu1 %vm10055_vm1, %v10054_v1  ;;  %v4801_v37 = vpack.c.bf16 %v4800_v30, %v4800_v30 }
0x2963   :  { %9280 = vmatprep.subr.bf16.mxu1 %v10054_v1  ;;  %v4915_v62 = vpack.c.bf16 %v4914_v41, %v4914_v41 }
0x2969   :  { %9271 = vmatmul.mubr.msk.bf16.vlgmr.msra.gmra.mxu1 %vm288_vm2, %v4571_v22 }
0x296a   :  { %9281 = vmatpush3.bf16.msra.mxu1 %v4694_v15  ;;  %9282 = vmatprep.mubr.msk.bf16.mxu1 %vm10055_vm1, %v10054_v1 }
0x296b   :  { %9292 = vmatprep.subr.bf16.mxu1 %v10054_v1 }
0x2971   :  { %9283 = vmatmul.mubr.msk.bf16.vlgmr.msra.gmra.mxu1 %vm288_vm2, %v4687_v27 }
0x2972   :  { %9294 = vmatprep.mubr.msk.bf16.mxu1 %vm10055_vm1, %v10054_v1 }
0x2983   :  { %v5028_v29 = vpop.xlane.xlu0 %5027 }
0x2984   :  { %9902 = vrcp.f32 %v5028_v29 }
0x2987   :  { %v4804_v32 = vpop.permute.xlu0 %4803 }
0x2988   :  { %v4809_v36 = vsel %vm353_vm3, %v4804_v32, 0  ;;  %v8383_v32 = vld [vmem:[%s11889_s25] ss:$0 sm:$0xff] }
0x2989   :  { %9293 = vmatpush3.bf16.msra.mxu1 %v4809_v36 }
0x298a   :  { %9304 = vmatprep.subr.bf16.mxu1 %v10054_v1 }
0x298b   :  { %v5144_v39 = vpop.xlane.xlu1 %5143  ;;  %v5033_v44 = vpop.permute.xlu0 %5032 }
0x298c   :  { %9295 = vmatmul.mubr.msk.bf16.vlgmr.msra.gmra.mxu1 %vm288_vm2, %v4801_v37  ;;  %9904 = vrcp.f32 %v5144_v39  ;;  %v5038_v46 = vsel %vm353_vm3, %v5033_v44, 0 }
0x298d   :  { %9306 = vmatprep.mubr.msk.bf16.mxu1 %vm10055_vm1, %v10054_v1 }
0x298f   :  { %v4917_v42 = vpop.permute.xlu1 %4916  ;;  %v5149_v47 = vpop.permute.xlu0 %5148 }
0x2990   :  { %v4922_v43 = vsel %vm353_vm3, %v4917_v42, 0  ;;  %v5154_v53 = vsel %vm353_vm3, %v5149_v47, 0 }
0x2991   :  { %9305 = vmatpush3.bf16.msra.mxu1 %v4922_v43  ;;  %v9903_v45 = vpop.eup %9902 }
0x2992   :  { %9316 = vmatprep.subr.bf16.mxu1 %v10054_v1  ;;  %v5030_v34 = vmul.f32 %v9903_v45, %v11210_v2 }
0x2994   :  { %9307 = vmatmul.mubr.msk.bf16.vlgmr.msra.gmra.mxu1 %vm288_vm2, %v4915_v62  ;;  %v5031_v51 = vpack.c.bf16 %v5030_v34, %v5030_v34 }
0x2995   :  { %9317 = vmatpush3.bf16.msra.mxu1 %v5038_v46  ;;  %9318 = vmatprep.mubr.msk.bf16.mxu1 %vm10055_vm1, %v10054_v1  ;;  %v9726_v46 = vld [vmem:[%s11890_s29 + $0x18] sm:$0xff]  }
0x2996   :  { %9328 = vmatprep.subr.bf16.mxu1 %v10054_v1  ;;  %v5370_v34 = vsel %vm221_vm0, %v9726_v46, 0  ;;  %v9733_v46 = vld [vmem:[%s11876_s21 + $0x50] sm:$0xff]  }
0x2999   :  { %v9905_v52 = vpop.eup %9904 }
0x299a   :  { %v5146_v26 = vmul.f32 %v9905_v52, %v11214_v4 }
0x299c   :  { %9319 = vmatmul.mubr.msk.bf16.vlgmr.msra.gmra.mxu1 %vm288_vm2, %v5031_v51  ;;  %v5147_v40 = vpack.c.bf16 %v5146_v26, %v5146_v26 }
0x299d   :  { %9329 = vmatpush3.bf16.msra.mxu1 %v5154_v53  ;;  %9330 = vmatprep.mubr.msk.bf16.mxu1 %vm10055_vm1, %v10054_v1 }
0x299e   :  { %9342 = vmatprep.subr.bf16.mxu1 %v10054_v1 }
0x29a4   :  { %9331 = vmatmul.mubr.msk.bf16.vlgmr.msra.gmra.mxu1 %vm288_vm2, %v5147_v40 }
0x29a5   :  { %9350 = vmatprep.mubr.msk.bf16.mxu1 %vm10055_vm1, %v10054_v1  ;;  %9343 = vmatpush3.bf16.xpose.msra.mxu1 %v5370_v34  ;;  %v5603_v34 = vsel %vm221_vm0, %v9733_v46, 0 }
0x29a6   :  { %9344 = vmatprep.subr.bf16.mxu1 %v10054_v1 }
0x2a21   :  { %v4498_v56 = vpop.f32.mrf.mxu1 }
0x2a22   :  { %4505 = vrot.lane.b32.xlu1 %v4498_v56, %s11851_s2 }
0x2a23   :  { %v9260_v57 = vpop.f32.mrf.mxu1 }
0x2a25   :  { %v4501_v0 = vpop.f32.mrf.mxu1 }
0x2a26   :  { %v9727_v0 = vld [vmem:[%s11890_s29 + $0x10] sm:$0xff]  }
0x2a27   :  { %v9261_v33 = vpop.f32.mrf.mxu1 }
0x2a28   :  { %v5367_v33 = vsel %vm221_vm0, %v9727_v0, 0 }
0x2a29   :  { %v4614_v58 = vpop.f32.mrf.mxu1  ;;  %9345 = vmatpush3.bf16.xpose.msra.mxu1 %v5367_v33 }
0x2a2a   :  { %4621 = vrot.lane.b32.xlu1 %v4614_v58, %s11849_s7  ;;  %9346 = vmatprep.subr.bf16.mxu1 %v10054_v1  ;;  %v9728_v58 = vld [vmem:[%s11890_s29 + $0x8] sm:$0xff]  }
0x2a2b   :  { %v9272_v24 = vpop.f32.mrf.mxu1 }
0x2a2c   :  { %v5364_v24 = vsel %vm221_vm0, %v9728_v58, 0  ;;  %v9735_v58 = vld [vmem:[%s11876_s21 + $0x40] sm:$0xff]  }
0x2a2d   :  { %v4617_v20 = vpop.f32.mrf.mxu1 }
0x2a2e   :  { %v9729_v20 = vld [vmem:[%s11890_s29] sm:$0xff]  }
0x2a2f   :  { %v9273_v60 = vpop.f32.mrf.mxu1 }
0x2a30   :  { %v5361_v60 = vsel %vm221_vm0, %v9729_v20, 0  ;;  %v9736_v20 = vld [vmem:[%s11876_s21 + $0x38] sm:$0xff]  }
0x2a31   :  { %v4730_v10 = vpop.f32.mrf.mxu1  ;;  %9347 = vmatpush3.bf16.xpose.msra.mxu1 %v5364_v24  ;;  %v5597_v24 = vsel %vm221_vm0, %v9735_v58, 0 }
0x2a32   :  { %4737 = vrot.lane.b32.xlu1 %v4730_v10, %s11847_s10  ;;  %9348 = vmatprep.subr.bf16.mxu1 %v10054_v1  ;;  %v9730_v10 = vld [vmem:[%s11891_s30 + $0x8] sm:$0xff]  }
0x2a33   :  { %v9284_v50 = vpop.f32.mrf.mxu1 }
0x2a34   :  { %v5439_v50 = vsel %vm1441_vm7, %v9730_v10, 0  ;;  %v9737_v10 = vld [vmem:[%s11876_s21 + $0x30] sm:$0xff]  }
0x2a35   :  { %v4733_v49 = vpop.f32.mrf.mxu1 }
0x2a37   :  { %v9285_v61 = vpop.f32.mrf.mxu1 }
0x2a39   :  { %9349 = vmatpush3.bf16.xpose.msra.mxu1 %v5361_v60  ;;  %v5594_v60 = vsel %vm221_vm0, %v9736_v20, 0 }
0x2a3a   :  { %9378 = vmatprep.subr.bf16.mxu1 %v10054_v1 }
0x2a4c   :  { %v4845_v63 = vpop.f32.mrf.mxu1 }
0x2a4d   :  { %4851 = vst.msk [vmem:[#allocation2 + $0x8] sm:$0xff] %vm288_vm2, %v4845_v63 }
0x2a4e   :  { %v9296_v17 = vpop.f32.mrf.mxu1 }
0x2a50   :  { %v4848_v2 = vpop.f32.mrf.mxu1 }
0x2a52   :  { %v9297_v4 = vpop.f32.mrf.mxu1 }
0x2a54   :  { %v4958_v59 = vpop.f32.mrf.mxu1 }
0x2a55   :  { %4965 = vrot.lane.b32.xlu0 %v4958_v59, %s11851_s2  ;;  %v8387_v59 = vld [vmem:[%s11892_s12] ss:$0 sm:$0xff]  ;;  %s11895_s2 = sld [smem:[#allocation25_spill]] }
0x2a56   :  { %v9308_v48 = vpop.f32.mrf.mxu1 }
0x2a58   :  { %v4961_v5 = vpop.f32.mrf.mxu1 }
0x2a5a   :  { %v9309_v18 = vpop.f32.mrf.mxu1 }
0x2a5c   :  { %v5074_v8 = vpop.f32.mrf.mxu1 }
0x2a5d   :  { %5081 = vrot.lane.b32.xlu0 %v5074_v8, %s11849_s7  ;;  %s11894_s7 = sld [smem:[#allocation23_spill]] }
0x2a5e   :  { %v9320_v9 = vpop.f32.mrf.mxu1 }
0x2a60   :  { %v5077_v11 = vpop.f32.mrf.mxu1 }
0x2a62   :  { %v9321_v12 = vpop.f32.mrf.mxu1 }
0x2a63   :  { %v9731_v12 = vld [vmem:[%s11891_s30] sm:$0xff]  }
0x2a64   :  { %v5190_v13 = vpop.f32.mrf.mxu1 }
0x2a65   :  { %5197 = vrot.lane.b32.xlu0 %v5190_v13, %s11847_s10  ;;  %s11893_s10 = sld [smem:[#allocation21_spill]]  ;;  %v5436_v13 = vsel %vm1441_vm7, %v9731_v12, 0  ;;  %v8419_v12 = vld [vmem:[%s11879_s3 + $0x1] ss:$0 sm:$0xff]  ;;  %s11898_s3 = smov 8  }
0x2a66   :  { %v9332_v19 = vpop.f32.mrf.mxu1 }
0x2a67   :  { %v8389_v19 = vld [vmem:[%s11894_s7] ss:$0 sm:$0xff] }
0x2a68   :  { %v5193_v31 = vpop.f32.mrf.mxu1 }
0x2a6a   :  { %v9333_v21 = vpop.f32.mrf.mxu1 }
0x2a6b   :  { %v8388_v18 = vld [vmem:[%s11893_s10] ss:$0 sm:$0xff] }
0x2a94   :  { %v4506_v35 = vpop.permute.xlu1 %4505 }
0x2a95   :  { %4508 = vst.msk [vmem:[#allocation2] sm:$0xff] %vm513_vm4, %v4506_v35 }
0x2a9c   :  { %v4622_v22 = vpop.permute.xlu1 %4621 }
0x2a9d   :  { %4624 = vst.msk [vmem:[#allocation2] sm:$0xff] %vm630_vm5, %v4622_v22 }
0x2aa4   :  { %v4738_v23 = vpop.permute.xlu1 %4737 }
0x2aa5   :  { %4740 = vst.msk [vmem:[#allocation2] sm:$0xff] %vm747_vm6, %v4738_v23 }
0x2aac   :  { %v5201_v28 = vld [vmem:[#allocation2] sm:$0xff] }
0x2ac7   :  { %v4966_v15 = vpop.permute.xlu0 %4965 }
0x2ac8   :  { %4968 = vst.msk [vmem:[#allocation2 + $0x8] sm:$0xff] %vm513_vm4, %v4966_v15 }
0x2acf   :  { %v5082_v25 = vpop.permute.xlu0 %5081 }
0x2ad0   :  { %5084 = vst.msk [vmem:[#allocation2 + $0x8] sm:$0xff] %vm630_vm5, %v5082_v25 }
0x2ad7   :  { %v5198_v27 = vpop.permute.xlu0 %5197 }
0x2ad8   :  { %5200 = vst.msk [vmem:[#allocation2 + $0x8] sm:$0xff] %vm747_vm6, %v5198_v27 }
0x2adf   :  { %v5202_v29 = vld [vmem:[#allocation2 + $0x8] sm:$0xff] }
0x2ae0   :  { %v5203_v30 = vpack.c.bf16 %v5202_v29, %v5201_v28  ;;  %v8395_v29 = vld [vmem:[%s11895_s2] ss:$0 sm:$0xff] }
0x2ae2   :  { %9339 = vmatmul.mubr.msk.bf16.vlgmr.msra.gmra.mxu0 %vm221_vm0, %v5203_v30 }
0x2ae3   :  { %9358 = vmatprep.mubr.msk.bf16.mxu0 %vm10055_vm1, %v10054_v1  ;;  %9355 = vmatpush3.bf16.xpose.msra.mxu0 %v5439_v50  ;;  %v5591_v50 = vsel %vm221_vm0, %v9737_v10, 0 }
0x2ae4   :  { %9356 = vmatprep.subr.bf16.mxu0 %v10054_v1 }
0x2aeb   :  { %9357 = vmatpush3.bf16.xpose.msra.mxu0 %v5436_v13 }
0x2aec   :  { %9362 = vmatprep.subr.bf16.mxu0 %v10054_v1 }
0x2ba2   :  { %v5263_v36 = vpop.f32.mrf.mxu0 }
0x2ba3   :  { %v5264_v37 = vadd.f32 %v8383_v32, %v5263_v36 }
0x2ba4   :  { %v9340_v38 = vpop.f32.mrf.mxu0 }
0x2ba5   :  { %v5270_v39 = vadd.f32 %v5264_v37, %v11078_v14 }
0x2ba6   :  { %v5266_v41 = vpop.f32.mrf.mxu0 }
0x2ba7   :  { %v5267_v42 = vadd.f32 %v8383_v32, %v5266_v41  ;;  %v5274_v43 = vsel %vm221_vm0, %v5270_v39, 0.0 }
0x2ba8   :  { %5275 = vadd.xlane.f32.xlu1 %v5274_v43  ;;  %v9341_v44 = vpop.f32.mrf.mxu0 }
0x2ba9   :  { %v5271_v62 = vadd.f32 %v5267_v42, %v11080_v55 }
0x2bab   :  { %v5277_v45 = vsel %vm221_vm0, %v5271_v62, 0.0 }
0x2bac   :  { %5278 = vadd.xlane.f32.xlu0 %v5277_v45 }
0x2c31   :  { %v5276_v47 = vpop.xlane.xlu1 %5275 }
0x2c32   :  { %v5280_v14 = vmul.f32 0.03125, %v5276_v47  ;;  %v9734_v47 = vld [vmem:[%s11876_s21 + $0x48] sm:$0xff]  }
0x2c34   :  { %v5282_v51 = vsub.f32 %v5270_v39, %v5280_v14  ;;  %v5600_v14 = vsel %vm221_vm0, %v9734_v47, 0 }
0x2c35   :  { %v5279_v52 = vpop.xlane.xlu0 %5278 }
0x2c36   :  { %v5281_v53 = vmul.f32 0.03125, %v5279_v52  ;;  %v5284_v26 = vmul.f32 %v5282_v51, %v5282_v51 }
0x2c38   :  { %v5283_v40 = vsub.f32 %v5271_v62, %v5281_v53  ;;  %v5286_v55 = vsel %vm221_vm0, %v5284_v26, 0.0  ;;  %v9732_v62 = vld [vmem:[%s11876_s21 + $0x58] sm:$0xff]   ;;  %s11897_s21 = smov 40  }
0x2c39   :  { %5287 = vadd.xlane.f32.xlu0 %v5286_v55  ;;  %v5606_v45 = vsel %vm221_vm0, %v9732_v62, 0 }
0x2c3a   :  { %v5285_v56 = vmul.f32 %v5283_v40, %v5283_v40 }
0x2c3c   :  { %v5289_v57 = vsel %vm221_vm0, %v5285_v56, 0.0 }
0x2c3d   :  { %5290 = vadd.xlane.f32.xlu1 %v5289_v57 }
0x2cc2   :  { %v5288_v49 = vpop.xlane.xlu0 %5287 }
0x2cc3   :  { %v5292_v61 = vmul.f32 0.03125, %v5288_v49 }
0x2cc5   :  { %v5294_v63 = vadd.f32 1e-05, %v5292_v61 }
0x2cc6   :  { %v5291_v17 = vpop.xlane.xlu1 %5290 }
0x2cc7   :  { %9906 = vrsqrt.f32 %v5294_v63  ;;  %v5293_v2 = vmul.f32 0.03125, %v5291_v17 }
0x2cc9   :  { %v5295_v3 = vadd.f32 1e-05, %v5293_v2 }
0x2ccb   :  { %9908 = vrsqrt.f32 %v5295_v3 }
0x2cd4   :  { %v9907_v4 = vpop.eup %9906 }
0x2cd5   :  { %v5298_v16 = vmul.f32 %v9907_v4, %v5282_v51 }
0x2cd7   :  { %v5306_v5 = vmul.f32 %v8387_v59, %v5298_v16 }
0x2cd8   :  { %v9909_v48 = vpop.eup %9908 }
0x2cd9   :  { %v5299_v6 = vmul.f32 %v9909_v48, %v5283_v40  ;;  %v5314_v8 = vadd.f32 %v8388_v18, %v5306_v5 }
0x2cdb   :  { %v5307_v7 = vmul.f32 %v8387_v59, %v5299_v6  ;;  %v8399_v59 = vld [vmem:[%s11896_s1] ss:$0 sm:$0xff] }
0x2cdd   :  { %v5315_v9 = vadd.f32 %v8388_v18, %v5307_v7  ;;  %v8400_v18 = vld [vmem:[%s10255_s9] ss:$0 sm:$0xff] }
0x2cdf   :  { %v5330_v11 = vpack.c.bf16 %v5315_v9, %v5314_v8 }
0x2ce1   :  { %9351 = vmatmul.mubr.msk.bf16.vlgmr.msra.gmra.mxu1 %vm221_vm0, %v5330_v11 }
0x2ce2   :  { %9380 = vmatprep.mubr.msk.bf16.mxu1 %vm10055_vm1, %v10054_v1 }
0x2da1   :  { %v5406_v31 = vpop.f32.mrf.mxu1 }
0x2da2   :  { %v5407_v35 = vadd.f32 %v8389_v19, %v5406_v31 }
0x2da3   :  { %v9352_v21 = vpop.f32.mrf.mxu1 }
0x2da4   :  { %v5413_v25 = vmax.f32 %v5407_v35, 0.0 }
0x2da5   :  { %v5409_v22 = vpop.f32.mrf.mxu1 }
0x2da6   :  { %v5410_v23 = vadd.f32 %v8389_v19, %v5409_v22 }
0x2da7   :  { %v9353_v15 = vpop.f32.mrf.mxu1 }
0x2da8   :  { %v5414_v27 = vmax.f32 %v5410_v23, 0.0 }
0x2daa   :  { %v5415_v28 = vpack.c.bf16 %v5414_v27, %v5413_v25 }
0x2dac   :  { %9359 = vmatmul.mubr.msk.bf16.vlgmr.msra.gmra.mxu0 %vm1441_vm7, %v5415_v28 }
0x2dad   :  { %9374 = vmatprep.mubr.msk.bf16.mxu0 %vm10055_vm1, %v10054_v1  ;;  %9363 = vmatpush3.bf16.xpose.msra.mxu0 %v5606_v45 }
0x2dae   :  { %9364 = vmatprep.subr.bf16.mxu0 %v10054_v1 }
0x2db5   :  { %9365 = vmatpush3.bf16.xpose.msra.mxu0 %v5603_v34 }
0x2db6   :  { %9366 = vmatprep.subr.bf16.mxu0 %v10054_v1 }
0x2dbd   :  { %9367 = vmatpush3.bf16.xpose.msra.mxu0 %v5600_v14 }
0x2dbe   :  { %9368 = vmatprep.subr.bf16.mxu0 %v10054_v1 }
0x2dc5   :  { %9369 = vmatpush3.bf16.xpose.msra.mxu0 %v5597_v24 }
0x2dc6   :  { %9370 = vmatprep.subr.bf16.mxu0 %v10054_v1 }
0x2dcd   :  { %9371 = vmatpush3.bf16.xpose.msra.mxu0 %v5594_v60 }
0x2dce   :  { %9372 = vmatprep.subr.bf16.mxu0 %v10054_v1 }
0x2dd5   :  { %9373 = vmatpush3.bf16.xpose.msra.mxu0 %v5591_v50 }
0x2dd6   :  { %9414 = vmatprep.subr.bf16.mxu0 %v10054_v1 }
0x2e6c   :  { %v5475_v30 = vpop.f32.mrf.mxu0 }
0x2e6d   :  { %v5476_v32 = vadd.f32 %v8395_v29, %v5475_v30 }
0x2e6e   :  { %v9360_v36 = vpop.f32.mrf.mxu0 }
0x2e6f   :  { %v5482_v37 = vadd.f32 %v5476_v32, %v5314_v8 }
0x2e70   :  { %v5478_v38 = vpop.f32.mrf.mxu0 }
0x2e71   :  { %v5479_v39 = vadd.f32 %v8395_v29, %v5478_v38  ;;  %v5486_v41 = vsel %vm221_vm0, %v5482_v37, 0.0 }
0x2e72   :  { %5487 = vadd.xlane.f32.xlu0 %v5486_v41  ;;  %v9361_v42 = vpop.f32.mrf.mxu0 }
0x2e73   :  { %v5483_v43 = vadd.f32 %v5479_v39, %v5315_v9 }
0x2e75   :  { %v5489_v44 = vsel %vm221_vm0, %v5483_v43, 0.0 }
0x2e76   :  { %5490 = vadd.xlane.f32.xlu1 %v5489_v44 }
0x2efb   :  { %v5488_v51 = vpop.xlane.xlu0 %5487 }
0x2efc   :  { %v5492_v52 = vmul.f32 0.03125, %v5488_v51 }
0x2efe   :  { %v5494_v53 = vsub.f32 %v5482_v37, %v5492_v52 }
0x2eff   :  { %v5491_v26 = vpop.xlane.xlu1 %5490 }
0x2f00   :  { %v5493_v40 = vmul.f32 0.03125, %v5491_v26  ;;  %v5496_v55 = vmul.f32 %v5494_v53, %v5494_v53 }
0x2f02   :  { %v5495_v56 = vsub.f32 %v5483_v43, %v5493_v40  ;;  %v5498_v57 = vsel %vm221_vm0, %v5496_v55, 0.0 }
0x2f03   :  { %5499 = vadd.xlane.f32.xlu0 %v5498_v57 }
0x2f04   :  { %v5497_v0 = vmul.f32 %v5495_v56, %v5495_v56 }
0x2f06   :  { %v5501_v33 = vsel %vm221_vm0, %v5497_v0, 0.0 }
0x2f07   :  { %5502 = vadd.xlane.f32.xlu1 %v5501_v33 }
0x2f8c   :  { %v5500_v49 = vpop.xlane.xlu0 %5499 }
0x2f8d   :  { %v5504_v61 = vmul.f32 0.03125, %v5500_v49 }
0x2f8f   :  { %v5506_v63 = vadd.f32 1e-05, %v5504_v61 }
0x2f90   :  { %v5503_v17 = vpop.xlane.xlu1 %5502 }
0x2f91   :  { %9910 = vrsqrt.f32 %v5506_v63  ;;  %v5505_v2 = vmul.f32 0.03125, %v5503_v17 }
0x2f93   :  { %v5507_v3 = vadd.f32 1e-05, %v5505_v2 }
0x2f95   :  { %9912 = vrsqrt.f32 %v5507_v3 }
0x2f9e   :  { %v9911_v4 = vpop.eup %9910 }
0x2f9f   :  { %v5510_v16 = vmul.f32 %v9911_v4, %v5494_v53 }
0x2fa1   :  { %v5518_v5 = vmul.f32 %v8399_v59, %v5510_v16 }
0x2fa2   :  { %v9913_v48 = vpop.eup %9912 }
0x2fa3   :  { %v5511_v6 = vmul.f32 %v9913_v48, %v5495_v56  ;;  %v11348_v8 = vadd.f32 %v8400_v18, %v5518_v5 }
0x2fa5   :  { %v5519_v7 = vmul.f32 %v8399_v59, %v5511_v6 }
0x2fa7   :  { %v11350_v9 = vadd.f32 %v8400_v18, %v5519_v7 }
0x2fa9   :  { %v5550_v11 = vpack.c.bf16 %v11350_v9, %v11348_v8 }
0x2fab   :  { %9375 = vmatmul.mubr.msk.bf16.vlgmr.msra.gmra.mxu0 %vm221_vm0, %v5550_v11 }
0x2fac   :  { %9416 = vmatprep.mubr.msk.bf16.mxu0 %vm10055_vm1, %v10054_v1 }
0x306b   :  { %v5642_v13 = vpop.f32.mrf.mxu0 }
0x306c   :  { %v5643_v19 = vadd.f32 %v8419_v12, %v5642_v13 }
0x306d   :  { %v9376_v31 = vpop.f32.mrf.mxu0 }
0x306e   :  { %v11358_v21 = vpack.c.bf16 %v5643_v19, %v5643_v19 }
0x306f   :  { %v5645_v35 = vpop.f32.mrf.mxu0 }
0x3070   :  { %v5646_v22 = vadd.f32 %v8419_v12, %v5645_v35  ;;  %5651 = vrot.lane.b32.xlu0 %v11358_v21, %s10057_s5 }
0x3071   :  { %v9377_v23 = vpop.f32.mrf.mxu0 }
0x3072   :  { %v11394_v24 = vpack.c.bf16 %v5646_v22, %v5646_v22 }
0x3074   :  { %5763 = vrot.lane.b32.xlu0 %v11358_v21, %s10059_s15 }
0x3078   :  { %5761 = vrot.lane.b32.xlu0 %v11358_v21, %s10060_s16 }
0x30e2   :  { %v5652_v15 = vpop.permute.xlu0 %5651 }
0x30e3   :  { %v5657_v25 = vsel %vm288_vm2, %v5652_v15, 0 }
0x30e4   :  { %9379 = vmatpush3.bf16.xpose.msra.mxu1 %v5657_v25 }
0x30e5   :  { %9384 = vmatprep.subr.bf16.mxu1 %v10054_v1 }
0x30e6   :  { %v5764_v34 = vpop.permute.xlu0 %5763 }
0x30e7   :  { %v5769_v14 = vsel %vm288_vm2, %v5764_v34, 0 }
0x30ea   :  { %v5762_v51 = vpop.permute.xlu0 %5761 }
0x30eb   :  { %9381 = vmatmul.mubr.msk.bf16.vlgmr.msra.gmra.mxu1 %vm288_vm2, %v11358_v21 }
0x30ec   :  { %9386 = vmatprep.mubr.msk.bf16.mxu1 %vm10055_vm1, %v10054_v1 }
0x31ab   :  { %v5693_v27 = vpop.f32.mrf.mxu1 }
0x31ac   :  { %v5699_v28 = vmul.f32 0.35355338, %v5693_v27 }
0x31ad   :  { %v9382_v29 = vpop.f32.mrf.mxu1 }
0x31ae   :  { %v5700_v30 = vsel %vm288_vm2, %v5699_v28, -inf }
0x31af   :  { %5701 = vmax.xlane.f32.xlu1 %v5700_v30  ;;  %v5696_v32 = vpop.f32.mrf.mxu1 }
0x31b1   :  { %v9383_v36 = vpop.f32.mrf.mxu1 }
0x3238   :  { %v5702_v37 = vpop.xlane.xlu1 %5701 }
0x3239   :  { %v5703_v38 = vsub.f32 %v5699_v28, %v5702_v37 }
0x323b   :  { %v5704_v39 = vmul.f32 1.442695, %v5703_v38 }
0x323d   :  { %9914 = vpow2.f32 %v5704_v39 }
0x324a   :  { %v9915_v41 = vpop.eup %9914 }
0x324b   :  { %v5706_v42 = vsel %vm288_vm2, %v9915_v41, 0.0 }
0x324c   :  { %5707 = vadd.xlane.f32.xlu1 %v5706_v42 }
0x325d   :  { %5712 = vrot.lane.b32.xlu1 %v11358_v21, %s10056_s0 }
0x32d5   :  { %v5708_v43 = vpop.xlane.xlu1 %5707 }
0x32d6   :  { %9916 = vrcp.f32 %v5708_v43 }
0x32d9   :  { %v5713_v44 = vpop.permute.xlu1 %5712 }
0x32da   :  { %v5718_v62 = vsel %vm353_vm3, %v5713_v44, 0 }
0x32db   :  { %9385 = vmatpush3.bf16.msra.mxu1 %v5718_v62 }
0x32dc   :  { %9390 = vmatprep.subr.bf16.mxu1 %v10054_v1 }
0x32e3   :  { %v9917_v45 = vpop.eup %9916 }
0x32e4   :  { %v5710_v46 = vmul.f32 %v9917_v45, %v9915_v41 }
0x32e6   :  { %v5711_v47 = vpack.c.bf16 %v5710_v46, %v5710_v46 }
0x32e8   :  { %9387 = vmatmul.mubr.msk.bf16.vlgmr.msra.gmra.mxu1 %vm288_vm2, %v5711_v47 }
0x32e9   :  { %9391 = vmatpush3.bf16.xpose.msra.mxu1 %v5769_v14  ;;  %9392 = vmatprep.mubr.msk.bf16.mxu1 %vm10055_vm1, %v10054_v1 }
0x32ea   :  { %9396 = vmatprep.subr.bf16.mxu1 %v10054_v1 }
0x32f0   :  { %9393 = vmatmul.mubr.msk.bf16.vlgmr.msra.gmra.mxu1 %vm288_vm2, %v5762_v51 }
0x32f1   :  { %9398 = vmatprep.mubr.msk.bf16.mxu1 %vm10055_vm1, %v10054_v1 }
0x33a8   :  { %v5754_v52 = vpop.f32.mrf.mxu1 }
0x33a9   :  { %5760 = vst.msk [vmem:[#allocation2] sm:$0xff] %vm288_vm2, %v5754_v52 }
0x33aa   :  { %v9388_v53 = vpop.f32.mrf.mxu1 }
0x33ac   :  { %v5757_v26 = vpop.f32.mrf.mxu1 }
0x33ae   :  { %v9389_v40 = vpop.f32.mrf.mxu1 }
0x33b0   :  { %v5805_v55 = vpop.f32.mrf.mxu1 }
0x33b1   :  { %v5811_v56 = vmul.f32 0.35355338, %v5805_v55 }
0x33b2   :  { %v9394_v57 = vpop.f32.mrf.mxu1 }
0x33b3   :  { %v5812_v0 = vsel %vm288_vm2, %v5811_v56, -inf }
0x33b4   :  { %5813 = vmax.xlane.f32.xlu1 %v5812_v0  ;;  %v5808_v33 = vpop.f32.mrf.mxu1 }
0x33b6   :  { %v9395_v58 = vpop.f32.mrf.mxu1 }
0x33c5   :  { %5879 = vrot.lane.b32.xlu1 %v11358_v21, %s10062_s22 }
0x33c9   :  { %5877 = vrot.lane.b32.xlu1 %v11358_v21, %s10063_s23 }
0x33cd   :  { %5993 = vrot.lane.b32.xlu1 %v11358_v21, %s10064_s26 }
0x33d1   :  { %6223 = vrot.lane.b32.xlu1 %v11394_v24, %s10059_s15 }
0x33d5   :  { %6339 = vrot.lane.b32.xlu1 %v11394_v24, %s10062_s22 }
0x33d9   :  { %6455 = vrot.lane.b32.xlu1 %v11394_v24, %s10061_s18 }
0x343d   :  { %v5814_v20 = vpop.xlane.xlu1 %5813 }
0x343e   :  { %v5815_v60 = vsub.f32 %v5811_v56, %v5814_v20 }
0x3440   :  { %v5816_v10 = vmul.f32 1.442695, %v5815_v60 }
0x3441   :  { %v5880_v63 = vpop.permute.xlu1 %5879 }
0x3442   :  { %9918 = vpow2.f32 %v5816_v10  ;;  %v5885_v11 = vsel %vm288_vm2, %v5880_v63, 0 }
0x3445   :  { %v5878_v16 = vpop.permute.xlu1 %5877 }
0x3449   :  { %v5994_v6 = vpop.permute.xlu1 %5993 }
0x344d   :  { %v6224_v12 = vpop.permute.xlu1 %6223 }
0x344e   :  { %v6229_v13 = vsel %vm288_vm2, %v6224_v12, 0 }
0x344f   :  { %v9919_v50 = vpop.eup %9918 }
0x3450   :  { %v5818_v49 = vsel %vm288_vm2, %v9919_v50, 0.0 }
0x3451   :  { %5819 = vadd.xlane.f32.xlu0 %v5818_v49  ;;  %v6340_v19 = vpop.permute.xlu1 %6339 }
0x3452   :  { %v6345_v35 = vsel %vm288_vm2, %v6340_v19, 0 }
0x3455   :  { %v6456_v22 = vpop.permute.xlu1 %6455 }
0x3456   :  { %v6461_v15 = vsel %vm288_vm2, %v6456_v22, 0 }
0x3467   :  { %5824 = vrot.lane.b32.xlu0 %v11358_v21, %s10058_s13 }
0x346b   :  { %5995 = vrot.lane.b32.xlu0 %v11358_v21, %s10061_s18 }
0x346f   :  { %6111 = vrot.lane.b32.xlu0 %v11394_v24, %s10057_s5 }
0x3473   :  { %6221 = vrot.lane.b32.xlu0 %v11394_v24, %s10060_s16 }
0x3477   :  { %6337 = vrot.lane.b32.xlu0 %v11394_v24, %s10063_s23 }
0x347b   :  { %6453 = vrot.lane.b32.xlu0 %v11394_v24, %s10064_s26 }
0x34da   :  { %v5820_v61 = vpop.xlane.xlu0 %5819 }
0x34db   :  { %9920 = vrcp.f32 %v5820_v61 }
0x34de   :  { %v5825_v17 = vpop.permute.xlu0 %5824 }
0x34df   :  { %v5830_v2 = vsel %vm353_vm3, %v5825_v17, 0 }
0x34e0   :  { %9397 = vmatpush3.bf16.msra.mxu1 %v5830_v2 }
0x34e1   :  { %9402 = vmatprep.subr.bf16.mxu1 %v10054_v1 }
0x34e2   :  { %v5996_v3 = vpop.permute.xlu0 %5995 }
0x34e3   :  { %v6001_v4 = vsel %vm288_vm2, %v5996_v3, 0 }
0x34e4   :  { %9415 = vmatpush3.bf16.xpose.msra.mxu0 %v6001_v4 }
0x34e5   :  { %9426 = vmatprep.subr.bf16.mxu0 %v10054_v1 }
0x34e6   :  { %v6112_v48 = vpop.permute.xlu0 %6111 }
0x34e7   :  { %v6117_v7 = vsel %vm288_vm2, %v6112_v48, 0 }
0x34e8   :  { %v9921_v59 = vpop.eup %9920 }
0x34e9   :  { %v5822_v5 = vmul.f32 %v9921_v59, %v9919_v50 }
0x34ea   :  { %v6222_v31 = vpop.permute.xlu0 %6221 }
0x34eb   :  { %v5823_v18 = vpack.c.bf16 %v5822_v5, %v5822_v5  ;;  %9417 = vmatmul.mubr.msk.bf16.vlgmr.msra.gmra.mxu0 %vm288_vm2, %v5994_v6 }
0x34ec   :  { %9427 = vmatpush3.bf16.xpose.msra.mxu0 %v6117_v7  ;;  %9428 = vmatprep.mubr.msk.bf16.mxu0 %vm10055_vm1, %v10054_v1 }
0x34ed   :  { %9399 = vmatmul.mubr.msk.bf16.vlgmr.msra.gmra.mxu1 %vm288_vm2, %v5823_v18  ;;  %9438 = vmatprep.subr.bf16.mxu0 %v10054_v1 }
0x34ee   :  { %9403 = vmatpush3.bf16.xpose.msra.mxu1 %v5885_v11  ;;  %9404 = vmatprep.mubr.msk.bf16.mxu1 %vm10055_vm1, %v10054_v1  ;;  %v6338_v23 = vpop.permute.xlu0 %6337 }
0x34ef   :  { %9408 = vmatprep.subr.bf16.mxu1 %v10054_v1 }
0x34f2   :  { %v6454_v25 = vpop.permute.xlu0 %6453 }
0x34f3   :  { %9429 = vmatmul.mubr.msk.bf16.vlgmr.msra.gmra.mxu0 %vm288_vm2, %v11394_v24 }
0x34f4   :  { %9439 = vmatpush3.bf16.xpose.msra.mxu0 %v6229_v13  ;;  %9440 = vmatprep.mubr.msk.bf16.mxu0 %vm10055_vm1, %v10054_v1 }
0x34f5   :  { %9405 = vmatmul.mubr.msk.bf16.vlgmr.msra.gmra.mxu1 %vm288_vm2, %v5878_v16  ;;  %9450 = vmatprep.subr.bf16.mxu0 %v10054_v1 }
0x34f6   :  { %9410 = vmatprep.mubr.msk.bf16.mxu1 %vm10055_vm1, %v10054_v1 }
0x34fb   :  { %9441 = vmatmul.mubr.msk.bf16.vlgmr.msra.gmra.mxu0 %vm288_vm2, %v6222_v31 }
0x34fc   :  { %9451 = vmatpush3.bf16.xpose.msra.mxu0 %v6345_v35  ;;  %9452 = vmatprep.mubr.msk.bf16.mxu0 %vm10055_vm1, %v10054_v1 }
0x34fd   :  { %9462 = vmatprep.subr.bf16.mxu0 %v10054_v1 }
0x3503   :  { %9453 = vmatmul.mubr.msk.bf16.vlgmr.msra.gmra.mxu0 %vm288_vm2, %v6338_v23 }
0x3504   :  { %9463 = vmatpush3.bf16.xpose.msra.mxu0 %v6461_v15  ;;  %9464 = vmatprep.mubr.msk.bf16.mxu0 %vm10055_vm1, %v10054_v1 }
0x3505   :  { %9474 = vmatprep.subr.bf16.mxu0 %v10054_v1 }
0x350b   :  { %9465 = vmatmul.mubr.msk.bf16.vlgmr.msra.gmra.mxu0 %vm288_vm2, %v6454_v25 }
0x350c   :  { %9478 = vmatprep.mubr.msk.bf16.mxu0 %vm10055_vm1, %v10054_v1 }
0x35ab   :  { %v6037_v27 = vpop.f32.mrf.mxu0 }
0x35ac   :  { %v6043_v28 = vmul.f32 0.35355338, %v6037_v27 }
0x35ad   :  { %v11451_v29 = vpop.f32.mrf.mxu1  ;;  %v9418_v30 = vpop.f32.mrf.mxu0 }
0x35ae   :  { %v6044_v32 = vsel %vm288_vm2, %v6043_v28, -inf }
0x35af   :  { %v9400_v36 = vpop.f32.mrf.mxu1  ;;  %6045 = vmax.xlane.f32.xlu0 %v6044_v32  ;;  %v6040_v37 = vpop.f32.mrf.mxu0 }
0x35b1   :  { %v5869_v38 = vpop.f32.mrf.mxu1  ;;  %v9419_v39 = vpop.f32.mrf.mxu0 }
0x35b3   :  { %v9401_v41 = vpop.f32.mrf.mxu1  ;;  %v6153_v42 = vpop.f32.mrf.mxu0 }
0x35b4   :  { %v6159_v43 = vmul.f32 0.35355338, %v6153_v42 }
0x35b5   :  { %v5921_v44 = vpop.f32.mrf.mxu1  ;;  %v9430_v62 = vpop.f32.mrf.mxu0 }
0x35b6   :  { %v5927_v45 = vmul.f32 0.35355338, %v5921_v44  ;;  %v6160_v46 = vsel %vm288_vm2, %v6159_v43, -inf }
0x35b7   :  { %v9406_v34 = vpop.f32.mrf.mxu1  ;;  %6161 = vmax.xlane.f32.xlu0 %v6160_v46  ;;  %v6156_v47 = vpop.f32.mrf.mxu0 }
0x35b8   :  { %v5928_v14 = vsel %vm288_vm2, %v5927_v45, -inf }
0x35b9   :  { %v5924_v51 = vpop.f32.mrf.mxu1  ;;  %5929 = vmax.xlane.f32.xlu1 %v5928_v14  ;;  %v9431_v52 = vpop.f32.mrf.mxu0 }
0x35bb   :  { %v9407_v53 = vpop.f32.mrf.mxu1  ;;  %v6265_v26 = vpop.f32.mrf.mxu0 }
0x35bc   :  { %v6271_v40 = vmul.f32 0.35355338, %v6265_v26 }
0x35bd   :  { %v9442_v55 = vpop.f32.mrf.mxu0 }
0x35be   :  { %v6272_v56 = vsel %vm288_vm2, %v6271_v40, -inf }
0x35bf   :  { %6273 = vmax.xlane.f32.xlu1 %v6272_v56  ;;  %v6268_v57 = vpop.f32.mrf.mxu0 }
0x35c1   :  { %v9443_v0 = vpop.f32.mrf.mxu0 }
0x35c3   :  { %v6381_v33 = vpop.f32.mrf.mxu0 }
0x35c4   :  { %v6387_v58 = vmul.f32 0.35355338, %v6381_v33 }
0x35c5   :  { %v9454_v20 = vpop.f32.mrf.mxu0 }
0x35c6   :  { %v6388_v60 = vsel %vm288_vm2, %v6387_v58, -inf }
0x35c7   :  { %6389 = vmax.xlane.f32.xlu0 %v6388_v60  ;;  %v6384_v10 = vpop.f32.mrf.mxu0 }
0x35c9   :  { %v9455_v50 = vpop.f32.mrf.mxu0 }
0x35cb   :  { %v6497_v49 = vpop.f32.mrf.mxu0 }
0x35cc   :  { %v6503_v61 = vmul.f32 0.35355338, %v6497_v49 }
0x35cd   :  { %v9466_v63 = vpop.f32.mrf.mxu0 }
0x35ce   :  { %v6504_v17 = vsel %vm288_vm2, %v6503_v61, -inf }
0x35cf   :  { %6505 = vmax.xlane.f32.xlu1 %v6504_v17  ;;  %v6500_v2 = vpop.f32.mrf.mxu0 }
0x35d1   :  { %v9467_v3 = vpop.f32.mrf.mxu0 }
0x3638   :  { %v6046_v4 = vpop.xlane.xlu0 %6045 }
0x3639   :  { %v6047_v16 = vsub.f32 %v6043_v28, %v6046_v4 }
0x363b   :  { %v6048_v59 = vmul.f32 1.442695, %v6047_v16 }
0x363d   :  { %9922 = vpow2.f32 %v6048_v59 }
0x3640   :  { %v6162_v48 = vpop.xlane.xlu0 %6161 }
0x3641   :  { %v6163_v5 = vsub.f32 %v6159_v43, %v6162_v48 }
0x3642   :  { %v5930_v6 = vpop.xlane.xlu1 %5929 }
0x3643   :  { %v6164_v18 = vmul.f32 1.442695, %v6163_v5  ;;  %v5931_v7 = vsub.f32 %v5927_v45, %v5930_v6 }
0x3645   :  { %9924 = vpow2.f32 %v6164_v18  ;;  %v5932_v11 = vmul.f32 1.442695, %v5931_v7 }
0x3647   :  { %9926 = vpow2.f32 %v5932_v11 }
0x3648   :  { %v6274_v12 = vpop.xlane.xlu1 %6273 }
0x3649   :  { %v6275_v13 = vsub.f32 %v6271_v40, %v6274_v12 }
0x364a   :  { %v9923_v19 = vpop.eup %9922 }
0x364b   :  { %v6276_v31 = vmul.f32 1.442695, %v6275_v13  ;;  %v6050_v35 = vsel %vm288_vm2, %v9923_v19, 0.0 }
0x364c   :  { %6051 = vadd.xlane.f32.xlu1 %v6050_v35 }
0x364d   :  { %9928 = vpow2.f32 %v6276_v31 }
0x3650   :  { %v6390_v22 = vpop.xlane.xlu0 %6389 }
0x3651   :  { %v6391_v23 = vsub.f32 %v6387_v58, %v6390_v22 }
0x3652   :  { %v9925_v15 = vpop.eup %9924 }
0x3653   :  { %v6392_v25 = vmul.f32 1.442695, %v6391_v23  ;;  %v6166_v27 = vsel %vm288_vm2, %v9925_v15, 0.0 }
0x3654   :  { %v9927_v28 = vpop.eup %9926  ;;  %6167 = vadd.xlane.f32.xlu0 %v6166_v27  ;;  %v9738_v27 = vld [vmem:[%s11880_s8 + $0x18] sm:$0xff]  }
0x3655   :  { %9930 = vpow2.f32 %v6392_v25  ;;  %v5934_v30 = vsel %vm288_vm2, %v9927_v28, 0.0 }
0x3658   :  { %5935 = vadd.xlane.f32.xlu0 %v5934_v30  ;;  %v6506_v39 = vpop.xlane.xlu1 %6505  ;;  %v6595_v30 = vsel %vm221_vm0, %v9738_v27, 0 }
0x3659   :  { %v6507_v41 = vsub.f32 %v6503_v61, %v6506_v39  ;;  %9475 = vmatpush3.bf16.xpose.msra.mxu0 %v6595_v30 }
0x365a   :  { %v11462_v32 = vpop.eup %9928  ;;  %9476 = vmatprep.subr.bf16.mxu0 %v10054_v1 }
0x365b   :  { %v6278_v36 = vsel %vm288_vm2, %v11462_v32, 0.0  ;;  %v6508_v42 = vmul.f32 1.442695, %v6507_v41 }
0x365c   :  { %6279 = vadd.xlane.f32.xlu1 %v6278_v36 }
0x365d   :  { %9932 = vpow2.f32 %v6508_v42 }
0x3662   :  { %v11466_v37 = vpop.eup %9930 }
0x3663   :  { %v6394_v38 = vsel %vm288_vm2, %v11466_v37, 0.0 }
0x3664   :  { %6395 = vadd.xlane.f32.xlu1 %v6394_v38 }
0x366a   :  { %v11482_v43 = vpop.eup %9932 }
0x366e   :  { %5940 = vrot.lane.b32.xlu0 %v11358_v21, %s10065_s28 }
0x3675   :  { %6056 = vrot.lane.b32.xlu1 %v11358_v21, %s11897_s21  ;;  %v6510_v21 = vsel %vm288_vm2, %v11482_v43, 0.0 }
0x3679   :  { %6172 = vrot.lane.b32.xlu1 %v11394_v24, %s10056_s0  ;;  %s11899_s0 = smov 16  }
0x367d   :  { %6284 = vrot.lane.b32.xlu1 %v11394_v24, %s10058_s13  ;;  %s11900_s13 = smov 24  }
0x3681   :  { %6400 = vrot.lane.b32.xlu1 %v11394_v24, %s10065_s28 }
0x3685   :  { %6516 = vrot.lane.b32.xlu1 %v11394_v24, %s11897_s21 }
0x3689   :  { %5873 = vrot.lane.b32.xlu1 %v11451_v29, %s11898_s3 }
0x368d   :  { %6511 = vadd.xlane.f32.xlu0 %v6510_v21  ;;  %v9739_v21 = vld [vmem:[%s11880_s8 + $0x10] sm:$0xff]  }
0x36d5   :  { %v6052_v45 = vpop.xlane.xlu1 %6051 }
0x36dd   :  { %v6168_v44 = vpop.xlane.xlu0 %6167 }
0x36e1   :  { %v5936_v62 = vpop.xlane.xlu0 %5935 }
0x36e2   :  { %9934 = vrcp.f32 %v5936_v62 }
0x36e3   :  { %9936 = vrcp.f32 %v6052_v45 }
0x36e4   :  { %9938 = vrcp.f32 %v6168_v44  ;;  %v6592_v44 = vsel %vm221_vm0, %v9739_v21, 0  ;;  %v8449_v21 = vld [vmem:[%s11885_s6 + $0x1] ss:$0 sm:$0xff] }
0x36e5   :  { %v5941_v46 = vpop.permute.xlu0 %5940  ;;  %v6280_v24 = vpop.xlane.xlu1 %6279  ;;  %9477 = vmatpush3.bf16.xpose.msra.mxu0 %v6592_v44 }
0x36e6   :  { %v5946_v34 = vsel %vm353_vm3, %v5941_v46, 0  ;;  %9940 = vrcp.f32 %v6280_v24  ;;  %9490 = vmatprep.subr.bf16.mxu0 %v10054_v1 }
0x36e7   :  { %9409 = vmatpush3.bf16.msra.mxu1 %v5946_v34 }
0x36e8   :  { %9420 = vmatprep.subr.bf16.mxu1 %v10054_v1 }
0x36ed   :  { %v6396_v47 = vpop.xlane.xlu1 %6395 }
0x36ee   :  { %9942 = vrcp.f32 %v6396_v47 }
0x36ef   :  { %v9935_v14 = vpop.eup %9934 }
0x36f0   :  { %v5938_v29 = vmul.f32 %v9935_v14, %v9927_v28  ;;  %v9937_v26 = vpop.eup %9936 }
0x36f1   :  { %v6057_v51 = vpop.permute.xlu1 %6056  ;;  %v6054_v55 = vmul.f32 %v9937_v26, %v9923_v19  ;;  %v9939_v0 = vpop.eup %9938 }
0x36f2   :  { %v5939_v52 = vpack.c.bf16 %v5938_v29, %v5938_v29  ;;  %v6062_v53 = vsel %vm353_vm3, %v6057_v51, 0  ;;  %v6170_v20 = vmul.f32 %v9939_v0, %v9925_v15  ;;  %v9742_v0 = vld [vmem:[%s11882_s19 + $0x48] sm:$0xff]  }
0x36f3   :  { %v6055_v57 = vpack.c.bf16 %v6054_v55, %v6054_v55  ;;  %v9941_v50 = vpop.eup %9940 }
0x36f4   :  { %9411 = vmatmul.mubr.msk.bf16.vlgmr.msra.gmra.mxu1 %vm288_vm2, %v5939_v52  ;;  %v6171_v10 = vpack.c.bf16 %v6170_v20, %v6170_v20  ;;  %v6282_v63 = vmul.f32 %v9941_v50, %v11462_v32  ;;  %v9740_v52 = vld [vmem:[%s11882_s19 + $0x58] sm:$0xff]  }
0x36f5   :  { %9421 = vmatpush3.bf16.msra.mxu1 %v6062_v53  ;;  %v6173_v40 = vpop.permute.xlu1 %6172  ;;  %9422 = vmatprep.mubr.msk.bf16.mxu1 %vm10055_vm1, %v10054_v1  ;;  %v6808_v55 = vsel %vm221_vm0, %v9740_v52, 0 }
0x36f6   :  { %9432 = vmatprep.subr.bf16.mxu1 %v10054_v1  ;;  %v6178_v33 = vsel %vm353_vm3, %v6173_v40, 0  ;;  %v6283_v17 = vpack.c.bf16 %v6282_v63, %v6282_v63 }
0x36f9   :  { %v6285_v56 = vpop.permute.xlu1 %6284 }
0x36fa   :  { %v6290_v49 = vsel %vm353_vm3, %v6285_v56, 0  ;;  %v9741_v56 = vld [vmem:[%s11882_s19 + $0x50] sm:$0xff]  }
0x36fb   :  { %v9943_v2 = vpop.eup %9942 }
0x36fc   :  { %9423 = vmatmul.mubr.msk.bf16.vlgmr.msra.gmra.mxu1 %vm288_vm2, %v6055_v57  ;;  %v6398_v4 = vmul.f32 %v9943_v2, %v11466_v37  ;;  %v6805_v57 = vsel %vm221_vm0, %v9741_v56, 0 }
0x36fd   :  { %9433 = vmatpush3.bf16.msra.mxu1 %v6178_v33  ;;  %v6401_v58 = vpop.permute.xlu1 %6400  ;;  %9434 = vmatprep.mubr.msk.bf16.mxu1 %vm10055_vm1, %v10054_v1  ;;  %v6802_v33 = vsel %vm221_vm0, %v9742_v0, 0 }
0x36fe   :  { %9444 = vmatprep.subr.bf16.mxu1 %v10054_v1  ;;  %v6406_v3 = vsel %vm353_vm3, %v6401_v58, 0  ;;  %v6399_v16 = vpack.c.bf16 %v6398_v4, %v6398_v4  ;;  %v9743_v58 = vld [vmem:[%s11882_s19 + $0x40] sm:$0xff]  }
0x36ff   :  { %v6799_v20 = vsel %vm221_vm0, %v9743_v58, 0 }
0x3701   :  { %v6517_v60 = vpop.permute.xlu1 %6516 }
0x3702   :  { %v6522_v59 = vsel %vm353_vm3, %v6517_v60, 0  ;;  %v8443_v60 = vld [vmem:[%s11881_s14 + $0x1] ss:$0 sm:$0xff] }
0x3704   :  { %9435 = vmatmul.mubr.msk.bf16.vlgmr.msra.gmra.mxu1 %vm288_vm2, %v6171_v10 }
0x3705   :  { %9445 = vmatpush3.bf16.msra.mxu1 %v6290_v49  ;;  %v5874_v61 = vpop.permute.xlu1 %5873  ;;  %9446 = vmatprep.mubr.msk.bf16.mxu1 %vm10055_vm1, %v10054_v1 }
0x3706   :  { %5876 = vst.msk [vmem:[#allocation2] sm:$0xff] %vm513_vm4, %v5874_v61  ;;  %9456 = vmatprep.subr.bf16.mxu1 %v10054_v1 }
0x370c   :  { %9447 = vmatmul.mubr.msk.bf16.vlgmr.msra.gmra.mxu1 %vm288_vm2, %v6283_v17 }
0x370d   :  { %9457 = vmatpush3.bf16.msra.mxu1 %v6406_v3  ;;  %9458 = vmatprep.mubr.msk.bf16.mxu1 %vm10055_vm1, %v10054_v1 }
0x370e   :  { %9468 = vmatprep.subr.bf16.mxu1 %v10054_v1 }
0x3714   :  { %9459 = vmatmul.mubr.msk.bf16.vlgmr.msra.gmra.mxu1 %vm288_vm2, %v6399_v16 }
0x3715   :  { %9469 = vmatpush3.bf16.msra.mxu1 %v6522_v59  ;;  %9470 = vmatprep.mubr.msk.bf16.mxu1 %vm10055_vm1, %v10054_v1 }
0x3716   :  { %v6512_v48 = vpop.xlane.xlu0 %6511  ;;  %9482 = vmatprep.subr.bf16.mxu1 %v10054_v1 }
0x3717   :  { %9944 = vrcp.f32 %v6512_v48 }
0x3724   :  { %v9945_v5 = vpop.eup %9944 }
0x3725   :  { %v6514_v6 = vmul.f32 %v9945_v5, %v11482_v43 }
0x3727   :  { %v6515_v18 = vpack.c.bf16 %v6514_v6, %v6514_v6 }
0x3729   :  { %9471 = vmatmul.mubr.msk.bf16.vlgmr.msra.gmra.mxu1 %vm288_vm2, %v6515_v18 }
0x372a   :  { %9486 = vmatprep.mubr.msk.bf16.mxu1 %vm10055_vm1, %v10054_v1 }
0x37b4   :  { %v5982_v7 = vpop.f32.mrf.mxu1 }
0x37b5   :  { %5989 = vrot.lane.b32.xlu1 %v5982_v7, %s11899_s0 }
0x37b6   :  { %v9412_v11 = vpop.f32.mrf.mxu1 }
0x37b8   :  { %v5985_v12 = vpop.f32.mrf.mxu1 }
0x37ba   :  { %v9413_v13 = vpop.f32.mrf.mxu1 }
0x37bc   :  { %v6098_v19 = vpop.f32.mrf.mxu1 }
0x37bd   :  { %6105 = vrot.lane.b32.xlu0 %v6098_v19, %s11900_s13 }
0x37be   :  { %v9424_v31 = vpop.f32.mrf.mxu1 }
0x37c0   :  { %v6101_v35 = vpop.f32.mrf.mxu1 }
0x37c1   :  { %v11568_v35 = vld [vmem:[%s11883_s24 + $0x1] ss:$0 sm:$0xff] }
0x37c2   :  { %v9425_v22 = vpop.f32.mrf.mxu1 }
0x37c3   :  { %v9744_v22 = vld [vmem:[%s11882_s19 + $0x38] sm:$0xff]  }
0x37c4   :  { %v6214_v23 = vpop.f32.mrf.mxu1 }
0x37c5   :  { %6220 = vst.msk [vmem:[#allocation2 + $0x8] sm:$0xff] %vm288_vm2, %v6214_v23  ;;  %v6732_v23 = vsel %vm221_vm0, %v9744_v22, 0 }
0x37c6   :  { %v9436_v15 = vpop.f32.mrf.mxu1  ;;  %9483 = vmatpush3.bf16.xpose.msra.mxu1 %v6732_v23 }
0x37c7   :  { %9484 = vmatprep.subr.bf16.mxu1 %v10054_v1  ;;  %v9745_v15 = vld [vmem:[%s11882_s19 + $0x30] sm:$0xff]  }
0x37c8   :  { %v6217_v25 = vpop.f32.mrf.mxu1 }
0x37c9   :  { %v6729_v25 = vsel %vm221_vm0, %v9745_v15, 0 }
0x37ca   :  { %v9437_v28 = vpop.f32.mrf.mxu1 }
0x37cc   :  { %v6326_v32 = vpop.f32.mrf.mxu1 }
0x37cd   :  { %6333 = vrot.lane.b32.xlu1 %v6326_v32, %s11898_s3 }
0x37ce   :  { %v9448_v36 = vpop.f32.mrf.mxu1  ;;  %9485 = vmatpush3.bf16.xpose.msra.mxu1 %v6729_v25 }
0x37cf   :  { %9502 = vmatprep.subr.bf16.mxu1 %v10054_v1 }
0x37d0   :  { %v6329_v37 = vpop.f32.mrf.mxu1 }
0x37d2   :  { %v9449_v38 = vpop.f32.mrf.mxu1 }
0x37d4   :  { %v6442_v39 = vpop.f32.mrf.mxu1 }
0x37d5   :  { %6449 = vrot.lane.b32.xlu1 %v6442_v39, %s11899_s0 }
0x37d6   :  { %v9460_v41 = vpop.f32.mrf.mxu1 }
0x37d8   :  { %v6445_v42 = vpop.f32.mrf.mxu1 }
0x37da   :  { %v9461_v43 = vpop.f32.mrf.mxu1 }
0x37e9   :  { %v6558_v62 = vpop.f32.mrf.mxu1 }
0x37ea   :  { %6565 = vrot.lane.b32.xlu1 %v6558_v62, %s11900_s13 }
0x37eb   :  { %v9472_v45 = vpop.f32.mrf.mxu1 }
0x37ed   :  { %v6561_v46 = vpop.f32.mrf.mxu1 }
0x37ee   :  { %v8450_v46 = vld [vmem:[%s11887_s20 + $0x1] ss:$0 sm:$0xff] }
0x37ef   :  { %v9473_v34 = vpop.f32.mrf.mxu1 }
0x3827   :  { %v5990_v24 = vpop.permute.xlu1 %5989 }
0x3828   :  { %5992 = vst.msk [vmem:[#allocation2] sm:$0xff] %vm630_vm5, %v5990_v24 }
0x382f   :  { %v6106_v47 = vpop.permute.xlu0 %6105 }
0x3830   :  { %6108 = vst.msk [vmem:[#allocation2] sm:$0xff] %vm747_vm6, %v6106_v47 }
0x3837   :  { %v6569_v53 = vld [vmem:[#allocation2] sm:$0xff] }
0x383f   :  { %v6334_v14 = vpop.permute.xlu1 %6333 }
0x3840   :  { %6336 = vst.msk [vmem:[#allocation2 + $0x8] sm:$0xff] %vm513_vm4, %v6334_v14 }
0x3847   :  { %v6450_v29 = vpop.permute.xlu1 %6449 }
0x3848   :  { %6452 = vst.msk [vmem:[#allocation2 + $0x8] sm:$0xff] %vm630_vm5, %v6450_v29 }
0x385c   :  { %v6566_v51 = vpop.permute.xlu1 %6565 }
0x385d   :  { %6568 = vst.msk [vmem:[#allocation2 + $0x8] sm:$0xff] %vm747_vm6, %v6566_v51 }
0x3864   :  { %v6570_v26 = vld [vmem:[#allocation2 + $0x8] sm:$0xff] }
0x3865   :  { %v6571_v40 = vpack.c.bf16 %v6570_v26, %v6569_v53 }
0x3867   :  { %9479 = vmatmul.mubr.msk.bf16.vlgmr.msra.gmra.mxu0 %vm221_vm0, %v6571_v40 }
0x3868   :  { %9491 = vmatpush3.bf16.xpose.msra.mxu0 %v6808_v55  ;;  %9498 = vmatprep.mubr.msk.bf16.mxu0 %vm10055_vm1, %v10054_v1 }
0x3869   :  { %9492 = vmatprep.subr.bf16.mxu0 %v10054_v1 }
0x3870   :  { %9493 = vmatpush3.bf16.xpose.msra.mxu0 %v6805_v57 }
0x3871   :  { %9494 = vmatprep.subr.bf16.mxu0 %v10054_v1 }
0x3878   :  { %9495 = vmatpush3.bf16.xpose.msra.mxu0 %v6802_v33 }
0x3879   :  { %9496 = vmatprep.subr.bf16.mxu0 %v10054_v1 }
0x3880   :  { %9497 = vmatpush3.bf16.xpose.msra.mxu0 %v6799_v20 }
0x3881   :  { %9526 = vmatprep.subr.bf16.mxu0 %v10054_v1 }
0x3887   :  { %9499 = vmatmul.mubr.msk.bf16.vlgmr.msra.gmra.mxu0 %vm221_vm0, %v11076_v54 }
0x3888   :  { %9528 = vmatprep.mubr.msk.bf16.mxu0 %vm10055_vm1, %v10054_v1 }
0x3927   :  { %v6631_v10 = vpop.f32.mrf.mxu0 }
0x3928   :  { %v6632_v50 = vadd.f32 %v8443_v60, %v6631_v10 }
0x3929   :  { %v9480_v49 = vpop.f32.mrf.mxu0 }
0x392a   :  { %v6638_v61 = vadd.f32 %v6632_v50, %v11348_v8 }
0x392b   :  { %v6634_v63 = vpop.f32.mrf.mxu0 }
0x392c   :  { %v6635_v17 = vadd.f32 %v8443_v60, %v6634_v63  ;;  %v6644_v2 = vsel %vm221_vm0, %v6638_v61, 0.0 }
0x392d   :  { %6645 = vadd.xlane.f32.xlu1 %v6644_v2  ;;  %v9481_v3 = vpop.f32.mrf.mxu0 }
0x392e   :  { %v6639_v4 = vadd.f32 %v6635_v17, %v11350_v9 }
0x3930   :  { %v6647_v16 = vsel %vm221_vm0, %v6639_v4, 0.0 }
0x3931   :  { %6648 = vadd.xlane.f32.xlu0 %v6647_v16 }
0x3947   :  { %v6844_v54 = vpop.f32.mrf.mxu0 }
0x3949   :  { %v9500_v59 = vpop.f32.mrf.mxu0 }
0x394b   :  { %v11563_v48 = vpop.f32.mrf.mxu0 }
0x394d   :  { %v9501_v5 = vpop.f32.mrf.mxu0 }
0x39b6   :  { %v6646_v6 = vpop.xlane.xlu1 %6645 }
0x39b7   :  { %v6650_v8 = vmul.f32 0.03125, %v6646_v6 }
0x39b9   :  { %v6652_v18 = vsub.f32 %v6638_v61, %v6650_v8 }
0x39ba   :  { %v6649_v7 = vpop.xlane.xlu0 %6648 }
0x39bb   :  { %v6651_v11 = vmul.f32 0.03125, %v6649_v7  ;;  %v6654_v12 = vmul.f32 %v6652_v18, %v6652_v18 }
0x39bd   :  { %v6653_v13 = vsub.f32 %v6639_v4, %v6651_v11  ;;  %v6656_v9 = vsel %vm221_vm0, %v6654_v12, 0.0 }
0x39be   :  { %6657 = vadd.xlane.f32.xlu1 %v6656_v9 }
0x39bf   :  { %v6655_v19 = vmul.f32 %v6653_v13, %v6653_v13 }
0x39c1   :  { %v6659_v31 = vsel %vm221_vm0, %v6655_v19, 0.0 }
0x39c2   :  { %6660 = vadd.xlane.f32.xlu1 %v6659_v31 }
0x39d3   :  { %6795 = vrot.lane.b32.xlu1 %v11568_v35, %s10057_s5 }
0x3a47   :  { %v6658_v27 = vpop.xlane.xlu1 %6657 }
0x3a48   :  { %v6662_v28 = vmul.f32 0.03125, %v6658_v27 }
0x3a4a   :  { %v6664_v30 = vadd.f32 1e-05, %v6662_v28 }
0x3a4b   :  { %v6661_v32 = vpop.xlane.xlu1 %6660 }
0x3a4c   :  { %9946 = vrsqrt.f32 %v6664_v30  ;;  %v6663_v36 = vmul.f32 0.03125, %v6661_v32 }
0x3a4e   :  { %v6665_v37 = vadd.f32 1e-05, %v6663_v36 }
0x3a4f   :  { %v6796_v38 = vpop.permute.xlu1 %6795 }
0x3a50   :  { %9948 = vrsqrt.f32 %v6665_v37  ;;  %v6845_v39 = vadd.f32 %v6844_v54, %v6796_v38  ;;  %v6848_v56 = vadd.f32 %v11563_v48, %v6796_v38 }
0x3a52   :  { %v11578_v41 = vpack.c.bf16 %v6845_v39, %v6845_v39  ;;  %v11607_v57 = vpack.c.bf16 %v6848_v56, %v6848_v56 }
0x3a54   :  { %6965 = vrot.lane.b32.xlu1 %v11578_v41, %s10060_s16  ;;  %v6857_v29 = vsel %vm288_vm2, %v11578_v41, 0  ;;  %v7317_v22 = vsel %vm288_vm2, %v11607_v57, 0 }
0x3a59   :  { %v9947_v42 = vpop.eup %9946 }
0x3a5a   :  { %v6668_v43 = vmul.f32 %v9947_v42, %v6652_v18 }
0x3a5c   :  { %v6676_v62 = vmul.f32 %v8449_v21, %v6668_v43 }
0x3a5d   :  { %v9949_v44 = vpop.eup %9948 }
0x3a5e   :  { %v6669_v45 = vmul.f32 %v9949_v44, %v6653_v13  ;;  %v11584_v24 = vadd.f32 %v8450_v46, %v6676_v62 }
0x3a60   :  { %v6677_v34 = vmul.f32 %v8449_v21, %v6669_v45 }
0x3a62   :  { %v11586_v47 = vadd.f32 %v8450_v46, %v6677_v34 }
0x3a64   :  { %v6708_v14 = vpack.c.bf16 %v11586_v47, %v11584_v24 }
0x3a66   :  { %9487 = vmatmul.mubr.msk.bf16.vlgmr.msra.gmra.mxu1 %vm221_vm0, %v6708_v14 }
0x3a67   :  { %9503 = vmatpush3.bf16.xpose.msra.mxu1 %v6857_v29  ;;  %9504 = vmatprep.mubr.msk.bf16.mxu1 %vm10055_vm1, %v10054_v1 }
0x3a68   :  { %9508 = vmatprep.subr.bf16.mxu1 %v10054_v1 }
0x3ac6   :  { %v6966_v0 = vpop.permute.xlu1 %6965 }
0x3ac7   :  { %v6971_v30 = vsel %vm288_vm2, %v6966_v0, 0 }
0x3b26   :  { %v6768_v51 = vpop.f32.mrf.mxu1 }
0x3b27   :  { %v6769_v52 = vadd.f32 %v11568_v35, %v6768_v51 }
0x3b28   :  { %v9488_v53 = vpop.f32.mrf.mxu1 }
0x3b29   :  { %v6851_v26 = vpack.c.bf16 %v6769_v52, %v6769_v52 }
0x3b2a   :  { %v6771_v40 = vpop.f32.mrf.mxu1 }
0x3b2b   :  { %6963 = vrot.lane.b32.xlu1 %v6851_v26, %s10060_s16  ;;  %9505 = vmatmul.mubr.msk.bf16.vlgmr.msra.gmra.mxu1 %vm288_vm2, %v6851_v26  ;;  %v6772_v7 = vadd.f32 %v11568_v35, %v6771_v40 }
0x3b2c   :  { %v9489_v55 = vpop.f32.mrf.mxu1  ;;  %9510 = vmatprep.mubr.msk.bf16.mxu1 %vm10055_vm1, %v10054_v1 }
0x3b2d   :  { %v7311_v11 = vpack.c.bf16 %v6772_v7, %v6772_v7 }
0x3b2f   :  { %7081 = vrot.lane.b32.xlu1 %v11578_v41, %s10063_s23 }
0x3b33   :  { %7079 = vrot.lane.b32.xlu1 %v6851_v26, %s10063_s23 }
0x3b37   :  { %7197 = vrot.lane.b32.xlu1 %v11578_v41, %s10064_s26 }
0x3b3b   :  { %7425 = vrot.lane.b32.xlu1 %v11607_v57, %s10060_s16 }
0x3b3f   :  { %7541 = vrot.lane.b32.xlu1 %v11607_v57, %s10063_s23 }
0x3b43   :  { %7657 = vrot.lane.b32.xlu1 %v11607_v57, %s10064_s26 }
0x3b9d   :  { %v11615_v33 = vpop.permute.xlu1 %6963 }
0x3ba1   :  { %v7082_v58 = vpop.permute.xlu1 %7081 }
0x3ba2   :  { %v7087_v20 = vsel %vm288_vm2, %v7082_v58, 0 }
0x3ba3   :  { %9527 = vmatpush3.bf16.xpose.msra.mxu0 %v7087_v20 }
0x3ba4   :  { %9538 = vmatprep.subr.bf16.mxu0 %v10054_v1 }
0x3ba5   :  { %v7080_v60 = vpop.permute.xlu1 %7079 }
0x3ba9   :  { %v7198_v10 = vpop.permute.xlu1 %7197 }
0x3baa   :  { %v7203_v50 = vsel %vm288_vm2, %v7198_v10, 0  ;;  %9529 = vmatmul.mubr.msk.bf16.vlgmr.msra.gmra.mxu0 %vm288_vm2, %v7080_v60 }
0x3bab   :  { %9539 = vmatpush3.bf16.xpose.msra.mxu0 %v7203_v50  ;;  %9540 = vmatprep.mubr.msk.bf16.mxu0 %vm10055_vm1, %v10054_v1 }
0x3bac   :  { %9550 = vmatprep.subr.bf16.mxu0 %v10054_v1 }
0x3bad   :  { %v7426_v15 = vpop.permute.xlu1 %7425 }
0x3bae   :  { %v7431_v27 = vsel %vm288_vm2, %v7426_v15, 0 }
0x3bb1   :  { %v7542_v32 = vpop.permute.xlu1 %7541 }
0x3bb2   :  { %v7547_v37 = vsel %vm288_vm2, %v7542_v32, 0 }
0x3bb5   :  { %v7658_v38 = vpop.permute.xlu1 %7657 }
0x3bb6   :  { %v7663_v42 = vsel %vm288_vm2, %v7658_v38, 0 }
0x3beb   :  { %v6893_v49 = vpop.f32.mrf.mxu1 }
0x3bec   :  { %v6899_v61 = vmul.f32 0.35355338, %v6893_v49 }
0x3bed   :  { %v9506_v63 = vpop.f32.mrf.mxu1 }
0x3bee   :  { %v6900_v17 = vsel %vm288_vm2, %v6899_v61, -inf }
0x3bef   :  { %6901 = vmax.xlane.f32.xlu0 %v6900_v17  ;;  %v6896_v2 = vpop.f32.mrf.mxu1 }
0x3bf1   :  { %v9507_v3 = vpop.f32.mrf.mxu1 }
0x3c6a   :  { %v7123_v4 = vpop.f32.mrf.mxu0 }
0x3c6b   :  { %v11633_v12 = vmul.f32 0.35355338, %v7123_v4 }
0x3c6c   :  { %v9530_v16 = vpop.f32.mrf.mxu0 }
0x3c6d   :  { %v7130_v13 = vsel %vm288_vm2, %v11633_v12, -inf }
0x3c6e   :  { %v7126_v54 = vpop.f32.mrf.mxu0 }
0x3c70   :  { %v9531_v59 = vpop.f32.mrf.mxu0 }
0x3c78   :  { %v6902_v48 = vpop.xlane.xlu0 %6901 }
0x3c79   :  { %v6903_v5 = vsub.f32 %v6899_v61, %v6902_v48 }
0x3c7b   :  { %v6904_v6 = vmul.f32 1.442695, %v6903_v5 }
0x3c7d   :  { %9950 = vpow2.f32 %v6904_v6 }
0x3c8a   :  { %v9951_v8 = vpop.eup %9950 }
0x3c8b   :  { %v6906_v18 = vsel %vm288_vm2, %v9951_v8, 0.0 }
0x3c8c   :  { %6907 = vadd.xlane.f32.xlu0 %v6906_v18 }
0x3ca2   :  { %6913 = vrot.lane.b32.xlu0 %v11578_v41, %s10057_s5 }
0x3ca6   :  { %7195 = vrot.lane.b32.xlu0 %v6851_v26, %s10064_s26 }
0x3caa   :  { %7423 = vrot.lane.b32.xlu0 %v7311_v11, %s10060_s16 }
0x3cae   :  { %7539 = vrot.lane.b32.xlu0 %v7311_v11, %s10063_s23 }
0x3cb2   :  { %7655 = vrot.lane.b32.xlu0 %v7311_v11, %s10064_s26 }
0x3cd1   :  { %7131 = vmax.xlane.f32.xlu0 %v7130_v13 }
0x3d15   :  { %v6908_v9 = vpop.xlane.xlu0 %6907 }
0x3d16   :  { %9952 = vrcp.f32 %v6908_v9 }
0x3d19   :  { %v6914_v19 = vpop.permute.xlu0 %6913 }
0x3d1a   :  { %v6919_v31 = vsel %vm353_vm3, %v6914_v19, 0 }
0x3d1b   :  { %9509 = vmatpush3.bf16.msra.mxu1 %v6919_v31 }
0x3d1c   :  { %9514 = vmatprep.subr.bf16.mxu1 %v10054_v1 }
0x3d1d   :  { %v7196_v35 = vpop.permute.xlu0 %7195 }
0x3d1e   :  { %9541 = vmatmul.mubr.msk.bf16.vlgmr.msra.gmra.mxu0 %vm288_vm2, %v7196_v35 }
0x3d1f   :  { %9551 = vmatpush3.bf16.xpose.msra.mxu0 %v7317_v22  ;;  %9552 = vmatprep.mubr.msk.bf16.mxu0 %vm10055_vm1, %v10054_v1 }
0x3d20   :  { %9562 = vmatprep.subr.bf16.mxu0 %v10054_v1 }
0x3d21   :  { %v7424_v36 = vpop.permute.xlu0 %7423 }
0x3d23   :  { %v9953_v23 = vpop.eup %9952 }
0x3d24   :  { %v6910_v25 = vmul.f32 %v9953_v23, %v9951_v8 }
0x3d25   :  { %v7540_v39 = vpop.permute.xlu0 %7539 }
0x3d26   :  { %v6911_v28 = vpack.c.bf16 %v6910_v25, %v6910_v25  ;;  %9553 = vmatmul.mubr.msk.bf16.vlgmr.msra.gmra.mxu0 %vm288_vm2, %v7311_v11 }
0x3d27   :  { %9563 = vmatpush3.bf16.xpose.msra.mxu0 %v7431_v27  ;;  %9564 = vmatprep.mubr.msk.bf16.mxu0 %vm10055_vm1, %v10054_v1 }
0x3d28   :  { %9511 = vmatmul.mubr.msk.bf16.vlgmr.msra.gmra.mxu1 %vm288_vm2, %v6911_v28  ;;  %9574 = vmatprep.subr.bf16.mxu0 %v10054_v1 }
0x3d29   :  { %9515 = vmatpush3.bf16.xpose.msra.mxu1 %v6971_v30  ;;  %9516 = vmatprep.mubr.msk.bf16.mxu1 %vm10055_vm1, %v10054_v1  ;;  %v7656_v43 = vpop.permute.xlu0 %7655 }
0x3d2a   :  { %9520 = vmatprep.subr.bf16.mxu1 %v10054_v1 }
0x3d2e   :  { %9565 = vmatmul.mubr.msk.bf16.vlgmr.msra.gmra.mxu0 %vm288_vm2, %v7424_v36 }
0x3d2f   :  { %9575 = vmatpush3.bf16.xpose.msra.mxu0 %v7547_v37  ;;  %9576 = vmatprep.mubr.msk.bf16.mxu0 %vm10055_vm1, %v10054_v1 }
0x3d30   :  { %9517 = vmatmul.mubr.msk.bf16.vlgmr.msra.gmra.mxu1 %vm288_vm2, %v11615_v33  ;;  %9586 = vmatprep.subr.bf16.mxu0 %v10054_v1 }
0x3d31   :  { %9522 = vmatprep.mubr.msk.bf16.mxu1 %vm10055_vm1, %v10054_v1 }
0x3d36   :  { %9577 = vmatmul.mubr.msk.bf16.vlgmr.msra.gmra.mxu0 %vm288_vm2, %v7540_v39 }
0x3d37   :  { %9587 = vmatpush3.bf16.xpose.msra.mxu0 %v7663_v42  ;;  %9588 = vmatprep.mubr.msk.bf16.mxu0 %vm10055_vm1, %v10054_v1 }
0x3d38   :  { %9598 = vmatprep.subr.bf16.mxu0 %v10054_v1 }
0x3d3e   :  { %9589 = vmatmul.mubr.msk.bf16.vlgmr.msra.gmra.mxu0 %vm288_vm2, %v7656_v43 }
0x3d3f   :  { %9602 = vmatprep.mubr.msk.bf16.mxu0 %vm10055_vm1, %v10054_v1 }
0x3d5a   :  { %v7132_v53 = vpop.xlane.xlu0 %7131 }
0x3d5b   :  { %v7133_v33 = vsub.f32 %v11633_v12, %v7132_v53 }
0x3d5d   :  { %v7134_v50 = vmul.f32 1.442695, %v7133_v33 }
0x3d5f   :  { %9954 = vpow2.f32 %v7134_v50 }
0x3d6c   :  { %v11680_v9 = vpop.eup %9954 }
0x3d6d   :  { %v7136_v35 = vsel %vm288_vm2, %v11680_v9, 0.0 }
0x3dde   :  { %v7239_v21 = vpop.f32.mrf.mxu0 }
0x3ddf   :  { %v7245_v44 = vmul.f32 0.35355338, %v7239_v21 }
0x3de0   :  { %v9542_v62 = vpop.f32.mrf.mxu0 }
0x3de1   :  { %v7246_v45 = vsel %vm288_vm2, %v7245_v44, -inf }
0x3de2   :  { %7247 = vmax.xlane.f32.xlu0 %v7246_v45  ;;  %v7242_v46 = vpop.f32.mrf.mxu0 }
0x3de4   :  { %v9543_v34 = vpop.f32.mrf.mxu0 }
0x3de6   :  { %v7353_v14 = vpop.f32.mrf.mxu0 }
0x3de7   :  { %v7359_v29 = vmul.f32 0.35355338, %v7353_v14 }
0x3de8   :  { %v6955_v51 = vpop.f32.mrf.mxu1  ;;  %v9554_v52 = vpop.f32.mrf.mxu0 }
0x3de9   :  { %6961 = vst.msk [vmem:[#allocation2] sm:$0xff] %vm288_vm2, %v6955_v51  ;;  %v7360_v26 = vsel %vm288_vm2, %v7359_v29, -inf }
0x3dea   :  { %v9512_v40 = vpop.f32.mrf.mxu1  ;;  %7361 = vmax.xlane.f32.xlu0 %v7360_v26  ;;  %v7356_v55 = vpop.f32.mrf.mxu0 }
0x3dec   :  { %v6958_v56 = vpop.f32.mrf.mxu1  ;;  %v9555_v0 = vpop.f32.mrf.mxu0 }
0x3dee   :  { %v9513_v58 = vpop.f32.mrf.mxu1  ;;  %v7467_v20 = vpop.f32.mrf.mxu0 }
0x3def   :  { %v7473_v17 = vmul.f32 0.35355338, %v7467_v20 }
0x3df0   :  { %v7007_v60 = vpop.f32.mrf.mxu1  ;;  %v9566_v10 = vpop.f32.mrf.mxu0 }
0x3df1   :  { %v7013_v49 = vmul.f32 0.35355338, %v7007_v60  ;;  %v7474_v48 = vsel %vm288_vm2, %v7473_v17, -inf }
0x3df2   :  { %v9518_v61 = vpop.f32.mrf.mxu1  ;;  %v7470_v63 = vpop.f32.mrf.mxu0 }
0x3df3   :  { %v7014_v2 = vsel %vm288_vm2, %v7013_v49, -inf }
0x3df4   :  { %v7010_v3 = vpop.f32.mrf.mxu1  ;;  %7015 = vmax.xlane.f32.xlu1 %v7014_v2  ;;  %v9567_v4 = vpop.f32.mrf.mxu0 }
0x3df6   :  { %v9519_v16 = vpop.f32.mrf.mxu1  ;;  %v7583_v54 = vpop.f32.mrf.mxu0 }
0x3df7   :  { %v7589_v59 = vmul.f32 0.35355338, %v7583_v54 }
0x3df8   :  { %7475 = vmax.xlane.f32.xlu1 %v7474_v48  ;;  %v9578_v5 = vpop.f32.mrf.mxu0 }
0x3df9   :  { %v7590_v6 = vsel %vm288_vm2, %v7589_v59, -inf }
0x3dfa   :  { %7591 = vmax.xlane.f32.xlu0 %v7590_v6  ;;  %v7586_v8 = vpop.f32.mrf.mxu0 }
0x3dfc   :  { %v9579_v18 = vpop.f32.mrf.mxu0 }
0x3dfe   :  { %v7699_v7 = vpop.f32.mrf.mxu0 }
0x3dff   :  { %v7705_v11 = vmul.f32 0.35355338, %v7699_v7 }
0x3e00   :  { %v9590_v12 = vpop.f32.mrf.mxu0 }
0x3e01   :  { %v7706_v13 = vsel %vm288_vm2, %v7705_v11, -inf }
0x3e02   :  { %7707 = vmax.xlane.f32.xlu1 %v7706_v13  ;;  %v7702_v19 = vpop.f32.mrf.mxu0 }
0x3e04   :  { %v9591_v31 = vpop.f32.mrf.mxu0 }
0x3e06   :  { %7137 = vadd.xlane.f32.xlu1 %v7136_v35 }
0x3e6b   :  { %v7248_v22 = vpop.xlane.xlu0 %7247 }
0x3e6c   :  { %v7249_v23 = vsub.f32 %v7245_v44, %v7248_v22 }
0x3e6e   :  { %v7250_v15 = vmul.f32 1.442695, %v7249_v23 }
0x3e70   :  { %9956 = vpow2.f32 %v7250_v15 }
0x3e73   :  { %v7362_v25 = vpop.xlane.xlu0 %7361 }
0x3e74   :  { %v7363_v27 = vsub.f32 %v7359_v29, %v7362_v25 }
0x3e76   :  { %v7364_v28 = vmul.f32 1.442695, %v7363_v27 }
0x3e78   :  { %9958 = vpow2.f32 %v7364_v28 }
0x3e7d   :  { %v11684_v30 = vpop.eup %9956  ;;  %v7016_v32 = vpop.xlane.xlu1 %7015 }
0x3e7e   :  { %v7252_v36 = vsel %vm288_vm2, %v11684_v30, 0.0  ;;  %v7017_v62 = vsub.f32 %v7013_v49, %v7016_v32 }
0x3e7f   :  { %7253 = vadd.xlane.f32.xlu0 %v7252_v36 }
0x3e80   :  { %v7018_v45 = vmul.f32 1.442695, %v7017_v62 }
0x3e81   :  { %v7476_v37 = vpop.xlane.xlu1 %7475 }
0x3e82   :  { %v7477_v38 = vsub.f32 %v7473_v17, %v7476_v37 }
0x3e83   :  { %v7592_v46 = vpop.xlane.xlu0 %7591 }
0x3e84   :  { %v7478_v39 = vmul.f32 1.442695, %v7477_v38  ;;  %v7593_v14 = vsub.f32 %v7589_v59, %v7592_v46 }
0x3e85   :  { %v11688_v42 = vpop.eup %9958 }
0x3e86   :  { %9960 = vpow2.f32 %v7478_v39  ;;  %v7366_v43 = vsel %vm288_vm2, %v11688_v42, 0.0  ;;  %v7594_v51 = vmul.f32 1.442695, %v7593_v14 }
0x3e87   :  { %7367 = vadd.xlane.f32.xlu1 %v7366_v43  ;;  %9962 = vpow2.f32 %v7018_v45 }
0x3e88   :  { %9964 = vpow2.f32 %v7594_v51 }
0x3e8b   :  { %v7708_v26 = vpop.xlane.xlu1 %7707 }
0x3e8c   :  { %v7709_v40 = vsub.f32 %v7705_v11, %v7708_v26 }
0x3e8e   :  { %v7710_v55 = vmul.f32 1.442695, %v7709_v40  ;;  %v9746_v40 = vld [vmem:[%s11888_s11 + $0x18] sm:$0xff]  }
0x3e8f   :  { %v7138_v60 = vpop.xlane.xlu1 %7137 }
0x3e90   :  { %9966 = vpow2.f32 %v7710_v55 }
0x3e93   :  { %v11692_v21 = vpop.eup %9960 }
0x3e94   :  { %v7480_v44 = vsel %vm288_vm2, %v11692_v21, 0.0  ;;  %v9963_v34 = vpop.eup %9962 }
0x3e95   :  { %7026 = vrot.lane.b32.xlu0 %v11578_v41, %s10059_s15  ;;  %7481 = vadd.xlane.f32.xlu1 %v7480_v44  ;;  %v7020_v29 = vsel %vm288_vm2, %v9963_v34, 0.0  ;;  %v11701_v52 = vpop.eup %9964 }
0x3e96   :  { %v7596_v53 = vsel %vm288_vm2, %v11701_v52, 0.0 }
0x3e9d   :  { %v11713_v56 = vpop.eup %9966 }
0x3e9e   :  { %v7712_v0 = vsel %vm288_vm2, %v11713_v56, 0.0 }
0x3ea6   :  { %7142 = vrot.lane.b32.xlu1 %v11578_v41, %s10062_s22 }
0x3eb4   :  { %7021 = vadd.xlane.f32.xlu0 %v7020_v29 }
0x3eca   :  { %7258 = vrot.lane.b32.xlu0 %v11578_v41, %s10061_s18  ;;  %7597 = vadd.xlane.f32.xlu1 %v7596_v53 }
0x3edb   :  { %7486 = vrot.lane.b32.xlu1 %v11607_v57, %s10059_s15 }
0x3edf   :  { %7602 = vrot.lane.b32.xlu1 %v11607_v57, %s10062_s22 }
0x3ee3   :  { %7718 = vrot.lane.b32.xlu1 %v11607_v57, %s10061_s18 }
0x3ee9   :  { %7713 = vadd.xlane.f32.xlu0 %v7712_v0 }
0x3eff   :  { %7373 = vrot.lane.b32.xlu0 %v11607_v57, %s10057_s5 }
0x3f08   :  { %v7254_v41 = vpop.xlane.xlu0 %7253 }
0x3f0c   :  { %v7027_v33 = vpop.permute.xlu0 %7026 }
0x3f0d   :  { %v7032_v58 = vsel %vm353_vm3, %v7027_v33, 0 }
0x3f0e   :  { %9521 = vmatpush3.bf16.msra.mxu1 %v7032_v58  ;;  %v9747_v58 = vld [vmem:[%s11888_s11 + $0x10] sm:$0xff]  }
0x3f0f   :  { %9532 = vmatprep.subr.bf16.mxu1 %v10054_v1 }
0x3f10   :  { %v7368_v10 = vpop.xlane.xlu1 %7367 }
0x3f1e   :  { %v7482_v50 = vpop.xlane.xlu1 %7481 }
0x3f22   :  { %v7143_v63 = vpop.permute.xlu1 %7142 }
0x3f23   :  { %v7148_v57 = vsel %vm353_vm3, %v7143_v63, 0 }
0x3f3d   :  { %v7022_v20 = vpop.xlane.xlu0 %7021 }
0x3f3e   :  { %9968 = vrcp.f32 %v7022_v20 }
0x3f3f   :  { %9970 = vrcp.f32 %v7138_v60  ;;  %v7794_v60 = vsel %vm221_vm0, %v9747_v58, 0  ;;  %v8501_v58 = vld [vmem:[%s11893_s10 + $0x1] ss:$0 sm:$0xff] }
0x3f40   :  { %9972 = vrcp.f32 %v7254_v41 }
0x3f41   :  { %v7259_v4 = vpop.permute.xlu0 %7258  ;;  %9974 = vrcp.f32 %v7368_v10 }
0x3f42   :  { %v7264_v59 = vsel %vm353_vm3, %v7259_v4, 0  ;;  %9976 = vrcp.f32 %v7482_v50 }
0x3f4b   :  { %v9969_v49 = vpop.eup %9968 }
0x3f4c   :  { %v7024_v61 = vmul.f32 %v9969_v49, %v9963_v34  ;;  %v9971_v2 = vpop.eup %9970 }
0x3f4d   :  { %v7140_v3 = vmul.f32 %v9971_v2, %v11680_v9  ;;  %v9973_v54 = vpop.eup %9972 }
0x3f4e   :  { %v7025_v17 = vpack.c.bf16 %v7024_v61, %v7024_v61  ;;  %v7256_v48 = vmul.f32 %v9973_v54, %v11684_v30  ;;  %v9975_v6 = vpop.eup %9974 }
0x3f4f   :  { %v7141_v16 = vpack.c.bf16 %v7140_v3, %v7140_v3  ;;  %v7370_v7 = vmul.f32 %v9975_v6, %v11688_v42  ;;  %v9977_v19 = vpop.eup %9976 }
0x3f50   :  { %9523 = vmatmul.mubr.msk.bf16.vlgmr.msra.gmra.mxu1 %vm288_vm2, %v7025_v17  ;;  %v7257_v5 = vpack.c.bf16 %v7256_v48, %v7256_v48  ;;  %v7484_v35 = vmul.f32 %v9977_v19, %v11692_v21 }
0x3f51   :  { %9533 = vmatpush3.bf16.msra.mxu1 %v7148_v57  ;;  %9534 = vmatprep.mubr.msk.bf16.mxu1 %vm10055_vm1, %v10054_v1  ;;  %v7371_v9 = vpack.c.bf16 %v7370_v7, %v7370_v7 }
0x3f52   :  { %9544 = vmatprep.subr.bf16.mxu1 %v10054_v1  ;;  %v7485_v23 = vpack.c.bf16 %v7484_v35, %v7484_v35 }
0x3f53   :  { %v7598_v8 = vpop.xlane.xlu1 %7597 }
0x3f54   :  { %9978 = vrcp.f32 %v7598_v8 }
0x3f57   :  { %v7487_v13 = vpop.permute.xlu1 %7486 }
0x3f58   :  { %9535 = vmatmul.mubr.msk.bf16.vlgmr.msra.gmra.mxu1 %vm288_vm2, %v7141_v16  ;;  %v7492_v31 = vsel %vm353_vm3, %v7487_v13, 0 }
0x3f59   :  { %9545 = vmatpush3.bf16.msra.mxu1 %v7264_v59  ;;  %9546 = vmatprep.mubr.msk.bf16.mxu1 %vm10055_vm1, %v10054_v1 }
0x3f5a   :  { %9556 = vmatprep.subr.bf16.mxu1 %v10054_v1 }
0x3f5b   :  { %v7603_v22 = vpop.permute.xlu1 %7602 }
0x3f5c   :  { %v7608_v25 = vsel %vm353_vm3, %v7603_v22, 0 }
0x3f5f   :  { %v7719_v28 = vpop.permute.xlu1 %7718 }
0x3f60   :  { %9547 = vmatmul.mubr.msk.bf16.vlgmr.msra.gmra.mxu1 %vm288_vm2, %v7257_v5  ;;  %v7724_v36 = vsel %vm353_vm3, %v7719_v28, 0 }
0x3f61   :  { %9558 = vmatprep.mubr.msk.bf16.mxu1 %vm10055_vm1, %v10054_v1  ;;  %v9979_v15 = vpop.eup %9978 }
0x3f62   :  { %v7600_v27 = vmul.f32 %v9979_v15, %v11701_v52  ;;  %v9748_v15 = vld [vmem:[%s11890_s29 + $0x38] sm:$0xff]  }
0x3f64   :  { %v7601_v30 = vpack.c.bf16 %v7600_v27, %v7600_v27 }
0x3f72   :  { %v7714_v18 = vpop.xlane.xlu0 %7713 }
0x3f73   :  { %9980 = vrcp.f32 %v7714_v18  ;;  %v8494_v18 = vld [vmem:[%s11889_s25 + $0x1] ss:$0 sm:$0xff] }
0x3f76   :  { %v7374_v11 = vpop.permute.xlu0 %7373 }
0x3f77   :  { %v7379_v12 = vsel %vm353_vm3, %v7374_v11, 0 }
0x3f78   :  { %9557 = vmatpush3.bf16.msra.mxu1 %v7379_v12 }
0x3f79   :  { %9568 = vmatprep.subr.bf16.mxu1 %v10054_v1 }
0x3f7b   :  { %9559 = vmatmul.mubr.msk.bf16.vlgmr.msra.gmra.mxu1 %vm288_vm2, %v7371_v9 }
0x3f7c   :  { %9569 = vmatpush3.bf16.msra.mxu1 %v7492_v31  ;;  %9570 = vmatprep.mubr.msk.bf16.mxu1 %vm10055_vm1, %v10054_v1 }
0x3f7d   :  { %9580 = vmatprep.subr.bf16.mxu1 %v10054_v1 }
0x3f80   :  { %v9981_v32 = vpop.eup %9980 }
0x3f81   :  { %v7716_v37 = vmul.f32 %v9981_v32, %v11713_v56  ;;  %v7797_v56 = vsel %vm221_vm0, %v9746_v40, 0 }
0x3f82   :  { %9599 = vmatpush3.bf16.xpose.msra.mxu0 %v7797_v56  ;;  %v8500_v56 = vld [vmem:[%s11892_s12 + $0x1] ss:$0 sm:$0xff] }
0x3f83   :  { %9571 = vmatmul.mubr.msk.bf16.vlgmr.msra.gmra.mxu1 %vm288_vm2, %v7485_v23  ;;  %v7717_v38 = vpack.c.bf16 %v7716_v37, %v7716_v37  ;;  %9600 = vmatprep.subr.bf16.mxu0 %v10054_v1 }
0x3f84   :  { %9581 = vmatpush3.bf16.msra.mxu1 %v7608_v25  ;;  %9582 = vmatprep.mubr.msk.bf16.mxu1 %vm10055_vm1, %v10054_v1  ;;  %v7946_v25 = vsel %vm221_vm0, %v9748_v15, 0 }
0x3f85   :  { %9592 = vmatprep.subr.bf16.mxu1 %v10054_v1 }
0x3f8a   :  { %9601 = vmatpush3.bf16.xpose.msra.mxu0 %v7794_v60 }
0x3f8b   :  { %9583 = vmatmul.mubr.msk.bf16.vlgmr.msra.gmra.mxu1 %vm288_vm2, %v7601_v30  ;;  %9618 = vmatprep.subr.bf16.mxu0 %v10054_v1 }
0x3f8c   :  { %9593 = vmatpush3.bf16.msra.mxu1 %v7724_v36  ;;  %9594 = vmatprep.mubr.msk.bf16.mxu1 %vm10055_vm1, %v10054_v1 }
0x3f8d   :  { %9606 = vmatprep.subr.bf16.mxu1 %v10054_v1 }
0x3f93   :  { %9595 = vmatmul.mubr.msk.bf16.vlgmr.msra.gmra.mxu1 %vm288_vm2, %v7717_v38 }
0x3f94   :  { %9614 = vmatprep.mubr.msk.bf16.mxu1 %vm10055_vm1, %v10054_v1  ;;  %9607 = vmatpush3.bf16.xpose.msra.mxu1 %v7946_v25 }
0x3f95   :  { %9608 = vmatprep.subr.bf16.mxu1 %v10054_v1 }
0x4010   :  { %v7068_v39 = vpop.f32.mrf.mxu1 }
0x4011   :  { %7075 = vrot.lane.b32.xlu0 %v7068_v39, %s11898_s3 }
0x4012   :  { %v9524_v42 = vpop.f32.mrf.mxu1 }
0x4013   :  { %v9749_v42 = vld [vmem:[%s11890_s29 + $0x30] sm:$0xff]  }
0x4014   :  { %v7071_v43 = vpop.f32.mrf.mxu1 }
0x4015   :  { %v7943_v43 = vsel %vm221_vm0, %v9749_v42, 0 }
0x4016   :  { %v9525_v21 = vpop.f32.mrf.mxu1  ;;  %9609 = vmatpush3.bf16.xpose.msra.mxu1 %v7943_v43  ;;  %v8528_v43 = vld [vmem:[%s11896_s1 + $0x1] ss:$0 sm:$0xff] }
0x4017   :  { %9610 = vmatprep.subr.bf16.mxu1 %v10054_v1  ;;  %v9750_v21 = vld [vmem:[%s11890_s29 + $0x28] sm:$0xff]  }
0x4018   :  { %v7184_v44 = vpop.f32.mrf.mxu1 }
0x4019   :  { %7191 = vrot.lane.b32.xlu0 %v7184_v44, %s11899_s0  ;;  %v7940_v44 = vsel %vm221_vm0, %v9750_v21, 0 }
0x401a   :  { %v9536_v62 = vpop.f32.mrf.mxu1 }
0x401b   :  { %v9751_v62 = vld [vmem:[%s11890_s29 + $0x20] sm:$0xff]  }
0x401c   :  { %v7187_v45 = vpop.f32.mrf.mxu1 }
0x401d   :  { %v7937_v45 = vsel %vm221_vm0, %v9751_v62, 0 }
0x401e   :  { %v9537_v46 = vpop.f32.mrf.mxu1  ;;  %9611 = vmatpush3.bf16.xpose.msra.mxu1 %v7940_v44  ;;  %v8529_v44 = vld [vmem:[%s10255_s9 + $0x1] ss:$0 sm:$0xff]  ;;  %s10070_s9 = smov [#allocation3]  }
0x401f   :  { %9612 = vmatprep.subr.bf16.mxu1 %v10054_v1  ;;  %v9752_v46 = vld [vmem:[%s11891_s30 + $0x18] sm:$0xff]   ;;  %s8157_s5 = sshll.u32 %s10070_s9, 4  ;;  %s8158_s5 = int_to_ptr.vmem [resolvable:$true] %s8157_s5 }
0x4020   :  { %v7300_v34 = vpop.f32.mrf.mxu1  ;;  %s9994_s15 = scalar_lea.vmem %s8158_s5, 256  ;;  %p9999_p1 = scmp.lt.s32.totalorder %s8158_s5, %s8158_s5 }
0x4021   :  { %7307 = vrot.lane.b32.xlu0 %v7300_v34, %s11900_s13  ;;  %v8015_v34 = vsel %vm1441_vm7, %v9752_v46, 0  ;;  %p9995_p0 = scmp.ne.s32.totalorder %s8158_s5, %s9994_s15  ;;  %p10000_p2 = scmp.lt.s32.totalorder %s9994_s15, %s9994_s15 }
0x4022   :  { %v9548_v14 = vpop.f32.mrf.mxu1 }
0x4023   :  { %p10001_p3 = por %p10000_p2, %p9999_p1 }
0x4024   :  { %v7303_v29 = vpop.f32.mrf.mxu1 }
0x4025   :  { %p10002_p4 = pnand %p10001_p3, %p9995_p0 }
0x4026   :  { %v9549_v51 = vpop.f32.mrf.mxu1  ;;  %9613 = vmatpush3.bf16.xpose.msra.mxu1 %v7937_v45 }
0x403b   :  { %v7415_v52 = vpop.f32.mrf.mxu1 }
0x403c   :  { %7421 = vst.msk [vmem:[#allocation2 + $0x8] sm:$0xff] %vm288_vm2, %v7415_v52 }
0x403d   :  { %v9560_v53 = vpop.f32.mrf.mxu1 }
0x403f   :  { %v7418_v26 = vpop.f32.mrf.mxu1 }
0x4041   :  { %v9561_v55 = vpop.f32.mrf.mxu1 }
0x4043   :  { %v7528_v0 = vpop.f32.mrf.mxu1 }
0x4044   :  { %7535 = vrot.lane.b32.xlu1 %v7528_v0, %s11898_s3 }
0x4045   :  { %v9572_v41 = vpop.f32.mrf.mxu1 }
0x4047   :  { %v7531_v33 = vpop.f32.mrf.mxu1 }
0x4049   :  { %v9573_v20 = vpop.f32.mrf.mxu1 }
0x404b   :  { %v7644_v10 = vpop.f32.mrf.mxu1 }
0x404c   :  { %7651 = vrot.lane.b32.xlu1 %v7644_v10, %s11899_s0 }
0x404d   :  { %v9584_v50 = vpop.f32.mrf.mxu1 }
0x404e   :  { %v9753_v50 = vld [vmem:[%s11891_s30 + $0x10] sm:$0xff]  }
0x404f   :  { %v7647_v49 = vpop.f32.mrf.mxu1 }
0x4050   :  { %v8012_v49 = vsel %vm1441_vm7, %v9753_v50, 0 }
0x4051   :  { %v9585_v61 = vpop.f32.mrf.mxu1 }
0x4052   :  { %v8516_v61 = vld [vmem:[%s11894_s7 + $0x1] ss:$0 sm:$0xff] }
0x4053   :  { %v7760_v63 = vpop.f32.mrf.mxu1 }
0x4054   :  { %7767 = vrot.lane.b32.xlu1 %v7760_v63, %s11900_s13 }
0x4055   :  { %v9596_v17 = vpop.f32.mrf.mxu1 }
0x4057   :  { %v7763_v2 = vpop.f32.mrf.mxu1 }
0x4059   :  { %v9597_v57 = vpop.f32.mrf.mxu1 }
0x4083   :  { %v7076_v3 = vpop.permute.xlu0 %7075 }
0x4084   :  { %7078 = vst.msk [vmem:[#allocation2] sm:$0xff] %vm513_vm4, %v7076_v3 }
0x408b   :  { %v7192_v4 = vpop.permute.xlu0 %7191 }
0x408c   :  { %7194 = vst.msk [vmem:[#allocation2] sm:$0xff] %vm630_vm5, %v7192_v4 }
0x4093   :  { %v7308_v16 = vpop.permute.xlu0 %7307 }
0x4094   :  { %7310 = vst.msk [vmem:[#allocation2] sm:$0xff] %vm747_vm6, %v7308_v16 }
0x409b   :  { %v7771_v5 = vld [vmem:[#allocation2] sm:$0xff] }
0x40b6   :  { %v7536_v54 = vpop.permute.xlu1 %7535 }
0x40b7   :  { %7538 = vst.msk [vmem:[#allocation2 + $0x8] sm:$0xff] %vm513_vm4, %v7536_v54 }
0x40be   :  { %v7652_v59 = vpop.permute.xlu1 %7651 }
0x40bf   :  { %7654 = vst.msk [vmem:[#allocation2 + $0x8] sm:$0xff] %vm630_vm5, %v7652_v59 }
0x40c6   :  { %v7768_v48 = vpop.permute.xlu1 %7767 }
0x40c7   :  { %7770 = vst.msk [vmem:[#allocation2 + $0x8] sm:$0xff] %vm747_vm6, %v7768_v48  ;;  %v8522_v48 = vld [vmem:[%s11895_s2 + $0x1] ss:$0 sm:$0xff] }
0x40ce   :  { %v7772_v6 = vld [vmem:[#allocation2 + $0x8] sm:$0xff] }
0x40cf   :  { %v7773_v8 = vpack.c.bf16 %v7772_v6, %v7771_v5 }
0x40d1   :  { %9603 = vmatmul.mubr.msk.bf16.vlgmr.msra.gmra.mxu0 %vm221_vm0, %v7773_v8 }
0x40d2   :  { %9622 = vmatprep.mubr.msk.bf16.mxu0 %vm10055_vm1, %v10054_v1  ;;  %9619 = vmatpush3.bf16.xpose.msra.mxu0 %v8015_v34 }
0x40d3   :  { %9620 = vmatprep.subr.bf16.mxu0 %v10054_v1 }
0x40da   :  { %9621 = vmatpush3.bf16.xpose.msra.mxu0 %v8012_v49 }
0x4191   :  { %v7833_v7 = vpop.f32.mrf.mxu0 }
0x4192   :  { %v7834_v11 = vadd.f32 %v8494_v18, %v7833_v7 }
0x4193   :  { %v9604_v12 = vpop.f32.mrf.mxu0 }
0x4194   :  { %v7840_v13 = vadd.f32 %v7834_v11, %v11584_v24 }
0x4195   :  { %v7836_v9 = vpop.f32.mrf.mxu0 }
0x4196   :  { %v7837_v19 = vadd.f32 %v8494_v18, %v7836_v9  ;;  %v7846_v31 = vsel %vm221_vm0, %v7840_v13, 0.0 }
0x4197   :  { %7847 = vadd.xlane.f32.xlu0 %v7846_v31  ;;  %v9605_v35 = vpop.f32.mrf.mxu0 }
0x4198   :  { %v7841_v22 = vadd.f32 %v7837_v19, %v11586_v47 }
0x419a   :  { %v7849_v23 = vsel %vm221_vm0, %v7841_v22, 0.0 }
0x419b   :  { %7850 = vadd.xlane.f32.xlu1 %v7849_v23 }
0x4220   :  { %v7848_v27 = vpop.xlane.xlu0 %7847 }
0x4221   :  { %v7852_v24 = vmul.f32 0.03125, %v7848_v27 }
0x4223   :  { %v7854_v28 = vsub.f32 %v7840_v13, %v7852_v24 }
0x4224   :  { %v7851_v30 = vpop.xlane.xlu1 %7850 }
0x4225   :  { %v7853_v32 = vmul.f32 0.03125, %v7851_v30  ;;  %v7856_v36 = vmul.f32 %v7854_v28, %v7854_v28 }
0x4227   :  { %v7855_v37 = vsub.f32 %v7841_v22, %v7853_v32  ;;  %v7858_v47 = vsel %vm221_vm0, %v7856_v36, 0.0 }
0x4228   :  { %7859 = vadd.xlane.f32.xlu0 %v7858_v47 }
0x4229   :  { %v7857_v38 = vmul.f32 %v7855_v37, %v7855_v37 }
0x422b   :  { %v7861_v39 = vsel %vm221_vm0, %v7857_v38, 0.0 }
0x422c   :  { %7862 = vadd.xlane.f32.xlu0 %v7861_v39 }
0x42b1   :  { %v7860_v14 = vpop.xlane.xlu0 %7859 }
0x42b2   :  { %v7864_v29 = vmul.f32 0.03125, %v7860_v14 }
0x42b4   :  { %v7866_v51 = vadd.f32 1e-05, %v7864_v29 }
0x42b5   :  { %v7863_v52 = vpop.xlane.xlu0 %7862 }
0x42b6   :  { %9982 = vrsqrt.f32 %v7866_v51  ;;  %v7865_v53 = vmul.f32 0.03125, %v7863_v52 }
0x42b8   :  { %v7867_v26 = vadd.f32 1e-05, %v7865_v53 }
0x42ba   :  { %9984 = vrsqrt.f32 %v7867_v26 }
0x42c3   :  { %v9983_v40 = vpop.eup %9982 }
0x42c4   :  { %v7870_v55 = vmul.f32 %v9983_v40, %v7854_v28 }
0x42c6   :  { %v7878_v41 = vmul.f32 %v8500_v56, %v7870_v55 }
0x42c7   :  { %v9985_v0 = vpop.eup %9984 }
0x42c8   :  { %v7871_v33 = vmul.f32 %v9985_v0, %v7855_v37  ;;  %v7886_v60 = vadd.f32 %v8501_v58, %v7878_v41 }
0x42ca   :  { %v7879_v20 = vmul.f32 %v8500_v56, %v7871_v33 }
0x42cc   :  { %v7887_v1 = vadd.f32 %v8501_v58, %v7879_v20 }
0x42ce   :  { %v7906_v10 = vpack.c.bf16 %v7887_v1, %v7886_v60 }
0x42d0   :  { %9615 = vmatmul.mubr.msk.bf16.vlgmr.msra.gmra.mxu1 %vm221_vm0, %v7906_v10 }
0x4390   :  { %v7982_v63 = vpop.f32.mrf.mxu1 }
0x4391   :  { %v7983_v2 = vadd.f32 %v8516_v61, %v7982_v63 }
0x4392   :  { %v9616_v17 = vpop.f32.mrf.mxu1 }
0x4393   :  { %v7989_v16 = vmax.f32 %v7983_v2, 0.0  ;;  %v8530_v17 = vld [vmem:[%s10260_s27] ss:$0 sm:$0xff] }
0x4394   :  { %v7985_v57 = vpop.f32.mrf.mxu1 }
0x4395   :  { %v7986_v3 = vadd.f32 %v8516_v61, %v7985_v57  ;;  %v8531_v57 = vld [vmem:[%s10265_s4] ss:$0 sm:$0xff] }
0x4396   :  { %v9617_v4 = vpop.f32.mrf.mxu1 }
0x4397   :  { %v7990_v54 = vmax.f32 %v7986_v3, 0.0 }
0x4399   :  { %v7991_v59 = vpack.c.bf16 %v7990_v54, %v7989_v16 }
0x439b   :  { %9623 = vmatmul.mubr.msk.bf16.vlgmr.msra.gmra.mxu0 %vm1441_vm7, %v7991_v59 }
0x445b   :  { %v8051_v5 = vpop.f32.mrf.mxu0 }
0x445c   :  { %v8052_v6 = vadd.f32 %v8522_v48, %v8051_v5 }
0x445d   :  { %v9624_v8 = vpop.f32.mrf.mxu0 }
0x445e   :  { %v8058_v18 = vadd.f32 %v8052_v6, %v7886_v60 }
0x445f   :  { %v8054_v7 = vpop.f32.mrf.mxu0 }
0x4460   :  { %v8055_v11 = vadd.f32 %v8522_v48, %v8054_v7  ;;  %v8064_v12 = vsel %vm221_vm0, %v8058_v18, 0.0 }
0x4461   :  { %8065 = vadd.xlane.f32.xlu0 %v8064_v12  ;;  %v9625_v13 = vpop.f32.mrf.mxu0 }
0x4462   :  { %v8059_v9 = vadd.f32 %v8055_v11, %v7887_v1 }
0x4464   :  { %v8067_v19 = vsel %vm221_vm0, %v8059_v9, 0.0 }
0x4465   :  { %8068 = vadd.xlane.f32.xlu1 %v8067_v19 }
0x44ea   :  { %v8066_v31 = vpop.xlane.xlu0 %8065 }
0x44eb   :  { %v8070_v35 = vmul.f32 0.03125, %v8066_v31 }
0x44ed   :  { %v8072_v22 = vsub.f32 %v8058_v18, %v8070_v35 }
0x44ee   :  { %v8069_v23 = vpop.xlane.xlu1 %8068 }
0x44ef   :  { %v8071_v15 = vmul.f32 0.03125, %v8069_v23  ;;  %v8074_v25 = vmul.f32 %v8072_v22, %v8072_v22 }
0x44f1   :  { %v8073_v27 = vsub.f32 %v8059_v9, %v8071_v15  ;;  %v8076_v24 = vsel %vm221_vm0, %v8074_v25, 0.0 }
0x44f2   :  { %8077 = vadd.xlane.f32.xlu0 %v8076_v24 }
0x44f3   :  { %v8075_v28 = vmul.f32 %v8073_v27, %v8073_v27 }
0x44f5   :  { %v8079_v30 = vsel %vm221_vm0, %v8075_v28, 0.0 }
0x44f6   :  { %8080 = vadd.xlane.f32.xlu1 %v8079_v30 }
0x457b   :  { %v8078_v32 = vpop.xlane.xlu0 %8077 }
0x457c   :  { %v8082_v36 = vmul.f32 0.03125, %v8078_v32 }
0x457e   :  { %v8084_v37 = vadd.f32 1e-05, %v8082_v36 }
0x457f   :  { %v8081_v47 = vpop.xlane.xlu1 %8080 }
0x4580   :  { %9986 = vrsqrt.f32 %v8084_v37  ;;  %v8083_v38 = vmul.f32 0.03125, %v8081_v47 }
0x4582   :  { %v8085_v39 = vadd.f32 1e-05, %v8083_v38 }
0x4584   :  { %9988 = vrsqrt.f32 %v8085_v39 }
0x458d   :  { %v9987_v42 = vpop.eup %9986 }
0x458e   :  { %v8088_v21 = vmul.f32 %v9987_v42, %v8072_v22 }
0x4590   :  { %v8096_v62 = vmul.f32 %v8528_v43, %v8088_v21 }
0x4591   :  { %v9989_v45 = vpop.eup %9988 }
0x4592   :  { %v8104_v46 = vadd.f32 %v8529_v44, %v8096_v62  ;;  %v8089_v34 = vmul.f32 %v9989_v45, %v8073_v27 }
0x4594   :  { %v8108_v14 = vsel %vm221_vm0, %v8104_v46, 0.0  ;;  %v8097_v29 = vmul.f32 %v8528_v43, %v8089_v34 }
0x4595   :  { %8109 = vadd.xlane.f32.xlu0 %v8108_v14 }
0x4596   :  { %v8105_v51 = vadd.f32 %v8529_v44, %v8097_v29 }
0x4598   :  { %v8111_v52 = vsel %vm221_vm0, %v8105_v51, 0.0 }
0x4599   :  { %8112 = vadd.xlane.f32.xlu1 %v8111_v52 }
0x461e   :  { %v8110_v53 = vpop.xlane.xlu0 %8109 }
0x461f   :  { %v8114_v26 = vmul.f32 0.03125, %v8110_v53 }
0x4621   :  { %v8116_v40 = vsub.f32 %v8104_v46, %v8114_v26 }
0x4622   :  { %v8113_v55 = vpop.xlane.xlu1 %8112 }
0x4623   :  { %v8115_v56 = vmul.f32 0.03125, %v8113_v55  ;;  %v8118_v0 = vmul.f32 %v8116_v40, %v8116_v40 }
0x4625   :  { %v8117_v41 = vsub.f32 %v8105_v51, %v8115_v56  ;;  %v8120_v33 = vsel %vm221_vm0, %v8118_v0, 0.0 }
0x4626   :  { %8121 = vadd.xlane.f32.xlu0 %v8120_v33 }
0x4627   :  { %v8119_v58 = vmul.f32 %v8117_v41, %v8117_v41 }
0x4629   :  { %v8123_v20 = vsel %vm221_vm0, %v8119_v58, 0.0 }
0x462a   :  { %8124 = vadd.xlane.f32.xlu1 %v8123_v20 }
0x46af   :  { %v8122_v60 = vpop.xlane.xlu0 %8121 }
0x46b0   :  { %v8126_v1 = vmul.f32 0.03125, %v8122_v60 }
0x46b2   :  { %v8128_v10 = vadd.f32 1e-05, %v8126_v1 }
0x46b3   :  { %v8125_v50 = vpop.xlane.xlu1 %8124 }
0x46b4   :  { %9990 = vrsqrt.f32 %v8128_v10  ;;  %v8127_v49 = vmul.f32 0.03125, %v8125_v50 }
0x46b6   :  { %v8129_v61 = vadd.f32 1e-05, %v8127_v49 }
0x46b8   :  { %9992 = vrsqrt.f32 %v8129_v61 }
0x46c1   :  { %v9991_v63 = vpop.eup %9990 }
0x46c2   :  { %v8132_v2 = vmul.f32 %v9991_v63, %v8116_v40 }
0x46c4   :  { %v8140_v3 = vmul.f32 %v8530_v17, %v8132_v2 }
0x46c5   :  { %v9993_v4 = vpop.eup %9992 }
0x46c6   :  { %v8133_v16 = vmul.f32 %v9993_v4, %v8117_v41  ;;  %v8148_v54 = vadd.f32 %v8531_v57, %v8140_v3 }
0x46c8   :  { %v8141_v59 = vmul.f32 %v8530_v17, %v8133_v16  ;;  %8150 = vst.msk [vmem:[#allocation3] sm:$0xff] %vm221_vm0, %v8148_v54 }
0x46ca   :  { %v8149_v48 = vadd.f32 %v8531_v57, %v8141_v59 }
0x46cc   :  { %8151 = vst.msk [vmem:[#allocation3 + $0x8] sm:$0xff] %vm221_vm0, %v8149_v48 }
0x46cd   :  { %10005 = shalt.err (!%p10002_p4)
}
0x46ce   :  { %s10071_s27 = smov 128  }
0x46cf   :  { %8163 = dma.vmem_to_hbm [thread:$0]  %s8158_s5, 256, %s10270_s17, [#allocation4], %s10071_s27, %s10071_s27, %s11898_s3  }
0x46d0   :  { %10014 = dma.done.wait [#allocation4], 256  }
0x46d1   :  { %10015 = vsyncadd [#allocation4], 4294967040 }
0x46d2   :  { %8167 = vsyncpa [#allocation4], 1 }

</bundles_post_ra>
